<compile_context>
chip_gen: v7x
topology: tpu7x:2x2x1
jax: 0.10.0
libtpu: 0.0.40
codegen_flags: <defaults>
</compile_context>

<pallas_src>
import jax
import jax.numpy as jnp
from jax.experimental import pallas as pl
from jax.experimental.pallas import tpu as pltpu


# ----------------------------------------------------------------------------
# Fused conv matmul: (M,K)@(K,N) * scale[N] + bias[N], ReLU.  cdiv grid over M.
# ----------------------------------------------------------------------------
def _conv_mm_kernel(x_ref, w_ref, s_ref, b_ref, o_ref):
    y = jnp.dot(x_ref[...], w_ref[...], preferred_element_type=jnp.float32)
    y = y * s_ref[...] + b_ref[...]
    o_ref[...] = jnp.maximum(y, 0.0).astype(o_ref.dtype)


def conv_matmul(cols, w2d, scale, bias):
    M, K = cols.shape
    N = w2d.shape[1]
    # Large M tile (<=1024) amortizes the ~0.35us/step grid overhead; the
    # conv1/conv2 grids stay >=2 so v7x's two TensorCores both get work.
    tm = min(1024, ((M + 7) // 8) * 8)
    return pl.pallas_call(
        _conv_mm_kernel,
        out_shape=jax.ShapeDtypeStruct((M, N), jnp.float32),
        grid=(pl.cdiv(M, tm),),
        in_specs=[
            pl.BlockSpec((tm, K), lambda i: (i, 0)),
            pl.BlockSpec((K, N), lambda i: (0, 0)),
            pl.BlockSpec((1, N), lambda i: (0, 0)),
            pl.BlockSpec((1, N), lambda i: (0, 0)),
        ],
        out_specs=pl.BlockSpec((tm, N), lambda i: (i, 0)),
        compiler_params=pltpu.CompilerParams(dimension_semantics=("parallel",)),
    )(cols, w2d, scale.reshape(1, N).astype(jnp.float32),
      bias.reshape(1, N).astype(jnp.float32))


# ----------------------------------------------------------------------------
# Fused head kernel: FC1+ReLU, FC2+ReLU, LSTM (PyTorch gate order i,f,g,o),
# and the final h_size -> 1 output linear.  One pallas_call, no grid.
# ----------------------------------------------------------------------------
def _sigmoid(z):
    return 1.0 / (1.0 + jnp.exp(-z))


def _make_head_kernel(n_layers, T, B, H):
    def kernel(*refs):
        (feat_ref, act_ref, w1_ref, b1_ref, w2_ref, b2_ref,
         wih0f_ref, wih0a_ref, whh0_ref, b0_ref) = refs[:10]
        pos = 10
        deep = []
        for _ in range(n_layers - 1):
            deep.append(refs[pos:pos + 3])          # (wih, whh, bias)
            pos += 3
        wout_ref, bout_ref, h0_ref, c0_ref = refs[pos:pos + 4]
        pos += 4
        q_ref, hN_ref, cN_ref = refs[pos:pos + 3]

        # --- FC stack over all T*B rows at once (bias-only + ReLU epilogue).
        f1 = jnp.dot(feat_ref[...], w1_ref[...],
                     preferred_element_type=jnp.float32) + b1_ref[...]
        f1 = jnp.maximum(f1, 0.0)
        f2 = jnp.dot(f1, w2_ref[...],
                     preferred_element_type=jnp.float32) + b2_ref[...]
        f2 = jnp.maximum(f2, 0.0)

        # --- Layer-0 input gates for every timestep in one MXU pass.
        # The [cnn_out, action] concat is folded in by splitting W_ih.
        xw0 = (jnp.dot(f2, wih0f_ref[...], preferred_element_type=jnp.float32)
               + jnp.dot(act_ref[...], wih0a_ref[...],
                         preferred_element_type=jnp.float32)
               + b0_ref[...])                                   # (T*B, 4H)

        wout_row = wout_ref[...]                                # (1, H)
        bout = bout_ref[...]                                    # (1, 1)

        # --- LSTM recurrence, statically unrolled over (layers, time);
        # state stays in vregs, only q / h_n / c_n are stored.
        # TODO(synk): for long sequences switch to lax.fori_loop over VMEM
        # scratch; T here is small so a full unroll is cheapest.
        seq = None
        for l in range(n_layers):
            if l == 0:
                whh = whh0_ref[...]
                wih = None
                bl = None
            else:
                wih_ref, whh_ref, bl_ref = deep[l - 1]
                wih = wih_ref[...]
                whh = whh_ref[...]
                bl = bl_ref[...]
            h = h0_ref[l]
            c = c0_ref[l]
            new_seq = []
            for t in range(T):
                if l == 0:
                    gx = xw0[t * B:(t + 1) * B]                 # (B, 4H)
                else:
                    gx = jnp.dot(seq[t], wih,
                                 preferred_element_type=jnp.float32) + bl
                gates = gx + jnp.dot(h, whh,
                                     preferred_element_type=jnp.float32)
                # Full-width transcendentals (single EUP pass over all 4
                # gates), then cheap static lane slices.
                sig = _sigmoid(gates)
                tnh = jnp.tanh(gates)
                i_g = sig[:, 0 * H:1 * H]
                f_g = sig[:, 1 * H:2 * H]
                g_g = tnh[:, 2 * H:3 * H]
                o_g = sig[:, 3 * H:4 * H]
                c = f_g * c + i_g * g_g
                h = o_g * jnp.tanh(c)
                new_seq.append(h)
                if l == n_layers - 1:
                    # Fused h_size->1 output linear: VPU mul + lane reduce.
                    q_ref[t] = (jnp.sum(h * wout_row, axis=-1, keepdims=True)
                                + bout)
            seq = new_seq
            hN_ref[l] = h
            cN_ref[l] = c

    return kernel


def head_forward(params, feat_tm, act_tm, h0, c0):
    (w1, b1), (w2, b2) = params["fcs"]
    lstm = params["lstm"]
    n_layers = len(lstm)
    H = h0.shape[-1]
    B = h0.shape[1]
    T = feat_tm.shape[0] // B
    feat_dim = w2.shape[1]

    wih0_t, whh0_t, b0 = lstm[0]
    w_out, b_out = params["out"]

    inputs = [feat_tm, act_tm,
              w1, b1.reshape(1, -1), w2, b2.reshape(1, -1),
              wih0_t[:feat_dim], wih0_t[feat_dim:], whh0_t, b0.reshape(1, -1)]
    for l in range(1, n_layers):
        wih_t, whh_t, bl = lstm[l]
        inputs += [wih_t, whh_t, bl.reshape(1, -1)]
    inputs += [w_out.reshape(1, -1), b_out.reshape(1, 1), h0, c0]

    return pl.pallas_call(
        _make_head_kernel(n_layers, T, B, H),
        out_shape=(
            jax.ShapeDtypeStruct((T, B, 1), jnp.float32),
            jax.ShapeDtypeStruct((n_layers, B, H), jnp.float32),
            jax.ShapeDtypeStruct((n_layers, B, H), jnp.float32),
        ),
    )(*inputs)


# ----------------------------------------------------------------------------
# Parameter init (deterministic, PyTorch-style uniform bounds)
# ----------------------------------------------------------------------------
CONV_CFG = [(3, 24, 5, 2), (24, 36, 5, 2), (36, 48, 5, 2), (48, 64, 3, 1)]
FC_CFG = [(1152, 192), (192, 64)]


def _uniform(key, shape, bound):
    return jax.random.uniform(key, shape, jnp.float32, -bound, bound)


def init_params(key, n_actions, h_size, n_layers):
    n_keys = 2 * len(CONV_CFG) + 2 * len(FC_CFG) + 4 * n_layers + 2
    keys = iter(jax.random.split(key, n_keys))

    convs = []
    for cin, cout, k, s in CONV_CFG:
        bound = 1.0 / (cin * k * k) ** 0.5
        w = _uniform(next(keys), (k, k, cin, cout), bound)     # HWIO
        b = _uniform(next(keys), (cout,), bound)
        # TODO(synk): BatchNorm2d folded with freshly-initialized eval-mode
        # running stats (gamma=1, beta=0, mean=0, var=1, eps=1e-5); PyTorch
        # train-mode batch statistics are not reproduced.
        gamma = jnp.ones((cout,), jnp.float32)
        beta = jnp.zeros((cout,), jnp.float32)
        mean = jnp.zeros((cout,), jnp.float32)
        var = jnp.ones((cout,), jnp.float32)
        scale = gamma / jnp.sqrt(var + 1e-5)
        bias_fold = beta + scale * (b - mean)
        convs.append((w, scale, bias_fold))

    fcs = []
    for cin, cout in FC_CFG:
        bound = 1.0 / cin ** 0.5
        fcs.append((_uniform(next(keys), (cin, cout), bound),
                    _uniform(next(keys), (cout,), bound)))

    lstm = []
    for l in range(n_layers):
        isz = 64 + n_actions if l == 0 else h_size
        bound = 1.0 / h_size ** 0.5
        wih_t = _uniform(next(keys), (isz, 4 * h_size), bound)
        whh_t = _uniform(next(keys), (h_size, 4 * h_size), bound)
        bih = _uniform(next(keys), (4 * h_size,), bound)
        bhh = _uniform(next(keys), (4 * h_size,), bound)
        lstm.append((wih_t, whh_t, bih + bhh))

    bound = 1.0 / h_size ** 0.5
    w_out = _uniform(next(keys), (h_size, 1), bound)
    b_out = _uniform(next(keys), (1,), bound)
    return {"convs": convs, "fcs": fcs, "lstm": lstm, "out": (w_out, b_out)}


# ----------------------------------------------------------------------------
# Forward pass
# ----------------------------------------------------------------------------
def _im2col(x, k, stride):
    # x: (N, H, W, C)  ->  (N*Ho*Wo, k*k*C), patch order (kh, kw, C)
    N, H, W, C = x.shape
    Ho = (H - k) // stride + 1
    Wo = (W - k) // stride + 1
    cols = []
    for i in range(k):
        for j in range(k):
            cols.append(x[:, i:i + stride * Ho:stride, j:j + stride * Wo:stride, :])
    p = jnp.stack(cols, axis=3)                       # (N, Ho, Wo, k*k, C)
    return p.reshape(N * Ho * Wo, k * k * C), N, Ho, Wo


def cnn_forward(params, x_nhwc):
    # TODO(synk): the im2col patch extraction still materializes in HBM; a
    # fully fused in-kernel im2col (multi-dim strided VMEM reads) would remove
    # that round trip but is not expressed here for lowering safety.
    h = x_nhwc
    for (w, scale, bias), (_, _, k, s) in zip(params["convs"], CONV_CFG):
        cols, N, Ho, Wo = _im2col(h, k, s)
        y = conv_matmul(cols, w.reshape(-1, w.shape[-1]), scale, bias)
        h = y.reshape(N, Ho, Wo, w.shape[-1])
    # TODO(synk): the reference nn.Sequential has no Flatten between the last
    # conv block and Linear(1152, 192); we flatten in NCHW order (64*3*6=1152)
    # to make the graph well-defined.
    N = h.shape[0]
    return jnp.transpose(h, (0, 3, 1, 2)).reshape(N, -1)        # (N, 1152)


def critic_forward(params, state, action, h_state=None):
    # state: (B, T, 3, H, W) NCHW per frame; action: (B, T, n_actions)
    B, T, C, Hh, Ww = state.shape
    x = jnp.transpose(state.reshape(B * T, C, Hh, Ww), (0, 2, 3, 1))   # NHWC
    feat = cnn_forward(params, x)                                       # (B*T, 1152)

    # Time-major rows for the fused FC+LSTM+out head kernel (tiny transposes).
    feat_tm = jnp.transpose(feat.reshape(B, T, -1), (1, 0, 2)).reshape(T * B, -1)
    act_tm = jnp.transpose(action, (1, 0, 2)).reshape(T * B, -1)

    n_layers = len(params["lstm"])
    h_size = params["lstm"][0][1].shape[0]
    if h_state is None:
        h0 = jnp.zeros((n_layers, B, h_size), jnp.float32)
        c0 = jnp.zeros((n_layers, B, h_size), jnp.float32)
    else:
        h0, c0 = h_state

    q_tb, h_n, c_n = head_forward(params, feat_tm, act_tm, h0, c0)
    return jnp.transpose(q_tb, (1, 0, 2)), (h_n, c_n)           # (B, T, 1)


# ----------------------------------------------------------------------------
if __name__ == "__main__":
    B, T = 2, 4
    H_IMG, W_IMG = 64, 86          # -> conv output 64 x 3 x 6 = 1152 features
    n_actions, h_size, n_layers = 2, 32, 1

    key = jax.random.PRNGKey(0)
    k_param, k_state, k_act = jax.random.split(key, 3)
    params = init_params(k_param, n_actions, h_size, n_layers)

    state = jax.random.normal(k_state, (B, T, 3, H_IMG, W_IMG), jnp.float32)
    action = jax.random.normal(k_act, (B, T, n_actions), jnp.float32)

    critic = jax.jit(critic_forward)
    q_values, (h_n, c_n) = critic(params, state, action)
    jax.block_until_ready(q_values)
    jax.block_until_ready(h_n)
    jax.block_until_ready(c_n)

    assert q_values.shape == (B, T, 1)
    assert h_n.shape == (n_layers, B, h_size)
    assert c_n.shape == (n_layers, B, h_size)
    print("KERNEL_OK")
</pallas_src>

<mosaic_0001>
module attributes {stable_mosaic.version = 11 : i64} {
  func.func @_conv_mm_kernel(%arg0: i32, %arg1: memref<1024x75xf32, #tpu.memory_space<vmem>>, %arg2: memref<75x24xf32, #tpu.memory_space<vmem>>, %arg3: memref<1x24xf32, #tpu.memory_space<vmem>>, %arg4: memref<1x24xf32, #tpu.memory_space<vmem>>, %arg5: memref<1024x24xf32, #tpu.memory_space<vmem>>) attributes {dimension_semantics = [#tpu.dimension_semantics<parallel>], iteration_bounds = array<i64: 10>, scalar_prefetch = 0 : i64, scratch_operands = 0 : i64, tpu.core_type = #tpu.core_type<tc>, window_params = [{transform_indices = @transform_0, window_bounds = array<i64: 1024, 75>}, {pipeline_mode = #tpu.pipeline_mode<synchronous>, transform_indices = @transform_1, window_bounds = array<i64: 75, 24>}, {pipeline_mode = #tpu.pipeline_mode<synchronous>, transform_indices = @transform_2, window_bounds = array<i64: 1, 24>}, {pipeline_mode = #tpu.pipeline_mode<synchronous>, transform_indices = @transform_3, window_bounds = array<i64: 1, 24>}, {transform_indices = @transform_4, window_bounds = array<i64: 1024, 24>}]} {
    %c0 = arith.constant 0 : index
    %c0_0 = arith.constant 0 : index
    %0 = vector.load %arg1[%c0, %c0_0] : memref<1024x75xf32, #tpu.memory_space<vmem>>, vector<1024x75xf32>
    %c0_1 = arith.constant 0 : index
    %c0_2 = arith.constant 0 : index
    %1 = vector.load %arg2[%c0_1, %c0_2] : memref<75x24xf32, #tpu.memory_space<vmem>>, vector<75x24xf32>
    %cst = arith.constant dense<0.000000e+00> : vector<1024x24xf32>
    %2 = tpu.matmul %0, %1, %cst {dimension_numbers = #tpu.dot_dimension_numbers<[1], [0], [0], [1], [0, 0, 1, 1], [], []>} : vector<1024x75xf32>, vector<75x24xf32>, vector<1024x24xf32> -> vector<1024x24xf32>
    %c0_3 = arith.constant 0 : index
    %c0_4 = arith.constant 0 : index
    %3 = vector.load %arg3[%c0_3, %c0_4] : memref<1x24xf32, #tpu.memory_space<vmem>>, vector<1x24xf32>
    %4 = vector.broadcast %3 : vector<1x24xf32> to vector<1024x24xf32>
    %5 = arith.mulf %2, %4 : vector<1024x24xf32>
    %c0_5 = arith.constant 0 : index
    %c0_6 = arith.constant 0 : index
    %6 = vector.load %arg4[%c0_5, %c0_6] : memref<1x24xf32, #tpu.memory_space<vmem>>, vector<1x24xf32>
    %7 = vector.broadcast %6 : vector<1x24xf32> to vector<1024x24xf32>
    %8 = arith.addf %5, %7 : vector<1024x24xf32>
    %cst_7 = arith.constant 0.000000e+00 : f32
    %9 = vector.broadcast %cst_7 : f32 to vector<1024x24xf32>
    %10 = arith.maximumf %8, %9 : vector<1024x24xf32>
    %c0_8 = arith.constant 0 : index
    %c0_9 = arith.constant 0 : index
    %11 = vector.load %arg5[%c0_8, %c0_9] : memref<1024x24xf32, #tpu.memory_space<vmem>>, vector<1024x24xf32>
    tpu.vector_store %arg5[%c0_8, %c0_9], %10 {strides = array<i32>} : memref<1024x24xf32, #tpu.memory_space<vmem>>, vector<1024x24xf32>,
    return
  }
  func.func @transform_0(%arg0: i32) -> (i32, i32) {
    %c0_i32 = arith.constant 0 : i32
    %c0_i32_0 = arith.constant 0 : i32
    return %arg0, %c0_i32 : i32, i32
  }
  func.func @transform_1(%arg0: i32) -> (i32, i32) {
    %c0_i32 = arith.constant 0 : i32
    %c0_i32_0 = arith.constant 0 : i32
    %c0_i32_1 = arith.constant 0 : i32
    return %c0_i32, %c0_i32_0 : i32, i32
  }
  func.func @transform_2(%arg0: i32) -> (i32, i32) {
    %c0_i32 = arith.constant 0 : i32
    %c0_i32_0 = arith.constant 0 : i32
    %c0_i32_1 = arith.constant 0 : i32
    return %c0_i32, %c0_i32_0 : i32, i32
  }
  func.func @transform_3(%arg0: i32) -> (i32, i32) {
    %c0_i32 = arith.constant 0 : i32
    %c0_i32_0 = arith.constant 0 : i32
    %c0_i32_1 = arith.constant 0 : i32
    return %c0_i32, %c0_i32_0 : i32, i32
  }
  func.func @transform_4(%arg0: i32) -> (i32, i32) {
    %c0_i32 = arith.constant 0 : i32
    %c0_i32_0 = arith.constant 0 : i32
    return %arg0, %c0_i32 : i32, i32
  }
}

module attributes {stable_mosaic.version = 11 : i64} {
  func.func @_conv_mm_kernel(%arg0: i32, %arg1: memref<1024x600xf32, #tpu.memory_space<vmem>>, %arg2: memref<600x36xf32, #tpu.memory_space<vmem>>, %arg3: memref<1x36xf32, #tpu.memory_space<vmem>>, %arg4: memref<1x36xf32, #tpu.memory_space<vmem>>, %arg5: memref<1024x36xf32, #tpu.memory_space<vmem>>) attributes {dimension_semantics = [#tpu.dimension_semantics<parallel>], iteration_bounds = array<i64: 2>, scalar_prefetch = 0 : i64, scratch_operands = 0 : i64, tpu.core_type = #tpu.core_type<tc>, window_params = [{transform_indices = @transform_0, window_bounds = array<i64: 1024, 600>}, {pipeline_mode = #tpu.pipeline_mode<synchronous>, transform_indices = @transform_1, window_bounds = array<i64: 600, 36>}, {pipeline_mode = #tpu.pipeline_mode<synchronous>, transform_indices = @transform_2, window_bounds = array<i64: 1, 36>}, {pipeline_mode = #tpu.pipeline_mode<synchronous>, transform_indices = @transform_3, window_bounds = array<i64: 1, 36>}, {transform_indices = @transform_4, window_bounds = array<i64: 1024, 36>}]} {
    %c0 = arith.constant 0 : index
    %c0_0 = arith.constant 0 : index
    %0 = vector.load %arg1[%c0, %c0_0] : memref<1024x600xf32, #tpu.memory_space<vmem>>, vector<1024x600xf32>
    %c0_1 = arith.constant 0 : index
    %c0_2 = arith.constant 0 : index
    %1 = vector.load %arg2[%c0_1, %c0_2] : memref<600x36xf32, #tpu.memory_space<vmem>>, vector<600x36xf32>
    %cst = arith.constant dense<0.000000e+00> : vector<1024x36xf32>
    %2 = tpu.matmul %0, %1, %cst {dimension_numbers = #tpu.dot_dimension_numbers<[1], [0], [0], [1], [0, 0, 1, 1], [], []>} : vector<1024x600xf32>, vector<600x36xf32>, vector<1024x36xf32> -> vector<1024x36xf32>
    %c0_3 = arith.constant 0 : index
    %c0_4 = arith.constant 0 : index
    %3 = vector.load %arg3[%c0_3, %c0_4] : memref<1x36xf32, #tpu.memory_space<vmem>>, vector<1x36xf32>
    %4 = vector.broadcast %3 : vector<1x36xf32> to vector<1024x36xf32>
    %5 = arith.mulf %2, %4 : vector<1024x36xf32>
    %c0_5 = arith.constant 0 : index
    %c0_6 = arith.constant 0 : index
    %6 = vector.load %arg4[%c0_5, %c0_6] : memref<1x36xf32, #tpu.memory_space<vmem>>, vector<1x36xf32>
    %7 = vector.broadcast %6 : vector<1x36xf32> to vector<1024x36xf32>
    %8 = arith.addf %5, %7 : vector<1024x36xf32>
    %cst_7 = arith.constant 0.000000e+00 : f32
    %9 = vector.broadcast %cst_7 : f32 to vector<1024x36xf32>
    %10 = arith.maximumf %8, %9 : vector<1024x36xf32>
    %c0_8 = arith.constant 0 : index
    %c0_9 = arith.constant 0 : index
    %11 = vector.load %arg5[%c0_8, %c0_9] : memref<1024x36xf32, #tpu.memory_space<vmem>>, vector<1024x36xf32>
    tpu.vector_store %arg5[%c0_8, %c0_9], %10 {strides = array<i32>} : memref<1024x36xf32, #tpu.memory_space<vmem>>, vector<1024x36xf32>,
    return
  }
  func.func @transform_0(%arg0: i32) -> (i32, i32) {
    %c0_i32 = arith.constant 0 : i32
    %c0_i32_0 = arith.constant 0 : i32
    return %arg0, %c0_i32 : i32, i32
  }
  func.func @transform_1(%arg0: i32) -> (i32, i32) {
    %c0_i32 = arith.constant 0 : i32
    %c0_i32_0 = arith.constant 0 : i32
    %c0_i32_1 = arith.constant 0 : i32
    return %c0_i32, %c0_i32_0 : i32, i32
  }
  func.func @transform_2(%arg0: i32) -> (i32, i32) {
    %c0_i32 = arith.constant 0 : i32
    %c0_i32_0 = arith.constant 0 : i32
    %c0_i32_1 = arith.constant 0 : i32
    return %c0_i32, %c0_i32_0 : i32, i32
  }
  func.func @transform_3(%arg0: i32) -> (i32, i32) {
    %c0_i32 = arith.constant 0 : i32
    %c0_i32_0 = arith.constant 0 : i32
    %c0_i32_1 = arith.constant 0 : i32
    return %c0_i32, %c0_i32_0 : i32, i32
  }
  func.func @transform_4(%arg0: i32) -> (i32, i32) {
    %c0_i32 = arith.constant 0 : i32
    %c0_i32_0 = arith.constant 0 : i32
    return %arg0, %c0_i32 : i32, i32
  }
}

module attributes {stable_mosaic.version = 11 : i64} {
  func.func @_conv_mm_kernel(%arg0: i32, %arg1: memref<320x900xf32, #tpu.memory_space<vmem>>, %arg2: memref<900x48xf32, #tpu.memory_space<vmem>>, %arg3: memref<1x48xf32, #tpu.memory_space<vmem>>, %arg4: memref<1x48xf32, #tpu.memory_space<vmem>>, %arg5: memref<320x48xf32, #tpu.memory_space<vmem>>) attributes {dimension_semantics = [#tpu.dimension_semantics<parallel>], iteration_bounds = array<i64: 1>, scalar_prefetch = 0 : i64, scratch_operands = 0 : i64, tpu.core_type = #tpu.core_type<tc>, window_params = [{transform_indices = @transform_0, window_bounds = array<i64: 320, 900>}, {pipeline_mode = #tpu.pipeline_mode<synchronous>, transform_indices = @transform_1, window_bounds = array<i64: 900, 48>}, {pipeline_mode = #tpu.pipeline_mode<synchronous>, transform_indices = @transform_2, window_bounds = array<i64: 1, 48>}, {pipeline_mode = #tpu.pipeline_mode<synchronous>, transform_indices = @transform_3, window_bounds = array<i64: 1, 48>}, {transform_indices = @transform_4, window_bounds = array<i64: 320, 48>}]} {
    %c0 = arith.constant 0 : index
    %c0_0 = arith.constant 0 : index
    %0 = vector.load %arg1[%c0, %c0_0] : memref<320x900xf32, #tpu.memory_space<vmem>>, vector<320x900xf32>
    %c0_1 = arith.constant 0 : index
    %c0_2 = arith.constant 0 : index
    %1 = vector.load %arg2[%c0_1, %c0_2] : memref<900x48xf32, #tpu.memory_space<vmem>>, vector<900x48xf32>
    %cst = arith.constant dense<0.000000e+00> : vector<320x48xf32>
    %2 = tpu.matmul %0, %1, %cst {dimension_numbers = #tpu.dot_dimension_numbers<[1], [0], [0], [1], [0, 0, 1, 1], [], []>} : vector<320x900xf32>, vector<900x48xf32>, vector<320x48xf32> -> vector<320x48xf32>
    %c0_3 = arith.constant 0 : index
    %c0_4 = arith.constant 0 : index
    %3 = vector.load %arg3[%c0_3, %c0_4] : memref<1x48xf32, #tpu.memory_space<vmem>>, vector<1x48xf32>
    %4 = vector.broadcast %3 : vector<1x48xf32> to vector<320x48xf32>
    %5 = arith.mulf %2, %4 : vector<320x48xf32>
    %c0_5 = arith.constant 0 : index
    %c0_6 = arith.constant 0 : index
    %6 = vector.load %arg4[%c0_5, %c0_6] : memref<1x48xf32, #tpu.memory_space<vmem>>, vector<1x48xf32>
    %7 = vector.broadcast %6 : vector<1x48xf32> to vector<320x48xf32>
    %8 = arith.addf %5, %7 : vector<320x48xf32>
    %cst_7 = arith.constant 0.000000e+00 : f32
    %9 = vector.broadcast %cst_7 : f32 to vector<320x48xf32>
    %10 = arith.maximumf %8, %9 : vector<320x48xf32>
    %c0_8 = arith.constant 0 : index
    %c0_9 = arith.constant 0 : index
    %11 = vector.load %arg5[%c0_8, %c0_9] : memref<320x48xf32, #tpu.memory_space<vmem>>, vector<320x48xf32>
    tpu.vector_store %arg5[%c0_8, %c0_9], %10 {strides = array<i32>} : memref<320x48xf32, #tpu.memory_space<vmem>>, vector<320x48xf32>,
    return
  }
  func.func @transform_0(%arg0: i32) -> (i32, i32) {
    %c0_i32 = arith.constant 0 : i32
    %c0_i32_0 = arith.constant 0 : i32
    return %arg0, %c0_i32 : i32, i32
  }
  func.func @transform_1(%arg0: i32) -> (i32, i32) {
    %c0_i32 = arith.constant 0 : i32
    %c0_i32_0 = arith.constant 0 : i32
    %c0_i32_1 = arith.constant 0 : i32
    return %c0_i32, %c0_i32_0 : i32, i32
  }
  func.func @transform_2(%arg0: i32) -> (i32, i32) {
    %c0_i32 = arith.constant 0 : i32
    %c0_i32_0 = arith.constant 0 : i32
    %c0_i32_1 = arith.constant 0 : i32
    return %c0_i32, %c0_i32_0 : i32, i32
  }
  func.func @transform_3(%arg0: i32) -> (i32, i32) {
    %c0_i32 = arith.constant 0 : i32
    %c0_i32_0 = arith.constant 0 : i32
    %c0_i32_1 = arith.constant 0 : i32
    return %c0_i32, %c0_i32_0 : i32, i32
  }
  func.func @transform_4(%arg0: i32) -> (i32, i32) {
    %c0_i32 = arith.constant 0 : i32
    %c0_i32_0 = arith.constant 0 : i32
    return %arg0, %c0_i32 : i32, i32
  }
}

module attributes {stable_mosaic.version = 11 : i64} {
  func.func @_conv_mm_kernel(%arg0: i32, %arg1: memref<144x432xf32, #tpu.memory_space<vmem>>, %arg2: memref<432x64xf32, #tpu.memory_space<vmem>>, %arg3: memref<1x64xf32, #tpu.memory_space<vmem>>, %arg4: memref<1x64xf32, #tpu.memory_space<vmem>>, %arg5: memref<144x64xf32, #tpu.memory_space<vmem>>) attributes {dimension_semantics = [#tpu.dimension_semantics<parallel>], iteration_bounds = array<i64: 1>, scalar_prefetch = 0 : i64, scratch_operands = 0 : i64, tpu.core_type = #tpu.core_type<tc>, window_params = [{transform_indices = @transform_0, window_bounds = array<i64: 144, 432>}, {pipeline_mode = #tpu.pipeline_mode<synchronous>, transform_indices = @transform_1, window_bounds = array<i64: 432, 64>}, {pipeline_mode = #tpu.pipeline_mode<synchronous>, transform_indices = @transform_2, window_bounds = array<i64: 1, 64>}, {pipeline_mode = #tpu.pipeline_mode<synchronous>, transform_indices = @transform_3, window_bounds = array<i64: 1, 64>}, {transform_indices = @transform_4, window_bounds = array<i64: 144, 64>}]} {
    %c0 = arith.constant 0 : index
    %c0_0 = arith.constant 0 : index
    %0 = vector.load %arg1[%c0, %c0_0] : memref<144x432xf32, #tpu.memory_space<vmem>>, vector<144x432xf32>
    %c0_1 = arith.constant 0 : index
    %c0_2 = arith.constant 0 : index
    %1 = vector.load %arg2[%c0_1, %c0_2] : memref<432x64xf32, #tpu.memory_space<vmem>>, vector<432x64xf32>
    %cst = arith.constant dense<0.000000e+00> : vector<144x64xf32>
    %2 = tpu.matmul %0, %1, %cst {dimension_numbers = #tpu.dot_dimension_numbers<[1], [0], [0], [1], [0, 0, 1, 1], [], []>} : vector<144x432xf32>, vector<432x64xf32>, vector<144x64xf32> -> vector<144x64xf32>
    %c0_3 = arith.constant 0 : index
    %c0_4 = arith.constant 0 : index
    %3 = vector.load %arg3[%c0_3, %c0_4] : memref<1x64xf32, #tpu.memory_space<vmem>>, vector<1x64xf32>
    %4 = vector.broadcast %3 : vector<1x64xf32> to vector<144x64xf32>
    %5 = arith.mulf %2, %4 : vector<144x64xf32>
    %c0_5 = arith.constant 0 : index
    %c0_6 = arith.constant 0 : index
    %6 = vector.load %arg4[%c0_5, %c0_6] : memref<1x64xf32, #tpu.memory_space<vmem>>, vector<1x64xf32>
    %7 = vector.broadcast %6 : vector<1x64xf32> to vector<144x64xf32>
    %8 = arith.addf %5, %7 : vector<144x64xf32>
    %cst_7 = arith.constant 0.000000e+00 : f32
    %9 = vector.broadcast %cst_7 : f32 to vector<144x64xf32>
    %10 = arith.maximumf %8, %9 : vector<144x64xf32>
    %c0_8 = arith.constant 0 : index
    %c0_9 = arith.constant 0 : index
    %11 = vector.load %arg5[%c0_8, %c0_9] : memref<144x64xf32, #tpu.memory_space<vmem>>, vector<144x64xf32>
    tpu.vector_store %arg5[%c0_8, %c0_9], %10 {strides = array<i32>} : memref<144x64xf32, #tpu.memory_space<vmem>>, vector<144x64xf32>,
    return
  }
  func.func @transform_0(%arg0: i32) -> (i32, i32) {
    %c0_i32 = arith.constant 0 : i32
    %c0_i32_0 = arith.constant 0 : i32
    return %arg0, %c0_i32 : i32, i32
  }
  func.func @transform_1(%arg0: i32) -> (i32, i32) {
    %c0_i32 = arith.constant 0 : i32
    %c0_i32_0 = arith.constant 0 : i32
    %c0_i32_1 = arith.constant 0 : i32
    return %c0_i32, %c0_i32_0 : i32, i32
  }
  func.func @transform_2(%arg0: i32) -> (i32, i32) {
    %c0_i32 = arith.constant 0 : i32
    %c0_i32_0 = arith.constant 0 : i32
    %c0_i32_1 = arith.constant 0 : i32
    return %c0_i32, %c0_i32_0 : i32, i32
  }
  func.func @transform_3(%arg0: i32) -> (i32, i32) {
    %c0_i32 = arith.constant 0 : i32
    %c0_i32_0 = arith.constant 0 : i32
    %c0_i32_1 = arith.constant 0 : i32
    return %c0_i32, %c0_i32_0 : i32, i32
  }
  func.func @transform_4(%arg0: i32) -> (i32, i32) {
    %c0_i32 = arith.constant 0 : i32
    %c0_i32_0 = arith.constant 0 : i32
    return %arg0, %c0_i32 : i32, i32
  }
}

module attributes {stable_mosaic.version = 11 : i64} {
  func.func @kernel(%arg0: memref<8x1152xf32, #tpu.memory_space<vmem>>, %arg1: memref<8x2xf32, #tpu.memory_space<vmem>>, %arg2: memref<1152x192xf32, #tpu.memory_space<vmem>>, %arg3: memref<1x192xf32, #tpu.memory_space<vmem>>, %arg4: memref<192x64xf32, #tpu.memory_space<vmem>>, %arg5: memref<1x64xf32, #tpu.memory_space<vmem>>, %arg6: memref<64x128xf32, #tpu.memory_space<vmem>>, %arg7: memref<2x128xf32, #tpu.memory_space<vmem>>, %arg8: memref<32x128xf32, #tpu.memory_space<vmem>>, %arg9: memref<1x128xf32, #tpu.memory_space<vmem>>, %arg10: memref<1x32xf32, #tpu.memory_space<vmem>>, %arg11: memref<1x1xf32, #tpu.memory_space<vmem>>, %arg12: memref<1x2x32xf32, #tpu.memory_space<vmem>>, %arg13: memref<1x2x32xf32, #tpu.memory_space<vmem>>, %arg14: memref<4x2x1xf32, #tpu.memory_space<vmem>>, %arg15: memref<1x2x32xf32, #tpu.memory_space<vmem>>, %arg16: memref<1x2x32xf32, #tpu.memory_space<vmem>>) attributes {dimension_semantics = [], scalar_prefetch = 0 : i64, scratch_operands = 0 : i64, tpu.core_type = #tpu.core_type<tc>} {
    %c0 = arith.constant 0 : index
    %c0_0 = arith.constant 0 : index
    %0 = vector.load %arg0[%c0, %c0_0] : memref<8x1152xf32, #tpu.memory_space<vmem>>, vector<8x1152xf32>
    %c0_1 = arith.constant 0 : index
    %c0_2 = arith.constant 0 : index
    %1 = vector.load %arg2[%c0_1, %c0_2] : memref<1152x192xf32, #tpu.memory_space<vmem>>, vector<1152x192xf32>
    %cst = arith.constant dense<0.000000e+00> : vector<8x192xf32>
    %2 = tpu.matmul %0, %1, %cst {dimension_numbers = #tpu.dot_dimension_numbers<[1], [0], [0], [1], [0, 0, 1, 1], [], []>} : vector<8x1152xf32>, vector<1152x192xf32>, vector<8x192xf32> -> vector<8x192xf32>
    %c0_3 = arith.constant 0 : index
    %c0_4 = arith.constant 0 : index
    %3 = vector.load %arg3[%c0_3, %c0_4] : memref<1x192xf32, #tpu.memory_space<vmem>>, vector<1x192xf32>
    %4 = vector.broadcast %3 : vector<1x192xf32> to vector<8x192xf32>
    %5 = arith.addf %2, %4 : vector<8x192xf32>
    %cst_5 = arith.constant 0.000000e+00 : f32
    %6 = vector.broadcast %cst_5 : f32 to vector<8x192xf32>
    %7 = arith.maximumf %5, %6 : vector<8x192xf32>
    %c0_6 = arith.constant 0 : index
    %c0_7 = arith.constant 0 : index
    %8 = vector.load %arg4[%c0_6, %c0_7] : memref<192x64xf32, #tpu.memory_space<vmem>>, vector<192x64xf32>
    %cst_8 = arith.constant dense<0.000000e+00> : vector<8x64xf32>
    %9 = tpu.matmul %7, %8, %cst_8 {dimension_numbers = #tpu.dot_dimension_numbers<[1], [0], [0], [1], [0, 0, 1, 1], [], []>} : vector<8x192xf32>, vector<192x64xf32>, vector<8x64xf32> -> vector<8x64xf32>
    %c0_9 = arith.constant 0 : index
    %c0_10 = arith.constant 0 : index
    %10 = vector.load %arg5[%c0_9, %c0_10] : memref<1x64xf32, #tpu.memory_space<vmem>>, vector<1x64xf32>
    %11 = vector.broadcast %10 : vector<1x64xf32> to vector<8x64xf32>
    %12 = arith.addf %9, %11 : vector<8x64xf32>
    %cst_11 = arith.constant 0.000000e+00 : f32
    %13 = vector.broadcast %cst_11 : f32 to vector<8x64xf32>
    %14 = arith.maximumf %12, %13 : vector<8x64xf32>
    %c0_12 = arith.constant 0 : index
    %c0_13 = arith.constant 0 : index
    %15 = vector.load %arg6[%c0_12, %c0_13] : memref<64x128xf32, #tpu.memory_space<vmem>>, vector<64x128xf32>
    %cst_14 = arith.constant dense<0.000000e+00> : vector<8x128xf32>
    %16 = tpu.matmul %14, %15, %cst_14 {dimension_numbers = #tpu.dot_dimension_numbers<[1], [0], [0], [1], [0, 0, 1, 1], [], []>} : vector<8x64xf32>, vector<64x128xf32>, vector<8x128xf32> -> vector<8x128xf32>
    %c0_15 = arith.constant 0 : index
    %c0_16 = arith.constant 0 : index
    %17 = vector.load %arg1[%c0_15, %c0_16] : memref<8x2xf32, #tpu.memory_space<vmem>>, vector<8x2xf32>
    %c0_17 = arith.constant 0 : index
    %c0_18 = arith.constant 0 : index
    %18 = vector.load %arg7[%c0_17, %c0_18] : memref<2x128xf32, #tpu.memory_space<vmem>>, vector<2x128xf32>
    %cst_19 = arith.constant dense<0.000000e+00> : vector<8x128xf32>
    %19 = tpu.matmul %17, %18, %cst_19 {dimension_numbers = #tpu.dot_dimension_numbers<[1], [0], [0], [1], [0, 0, 1, 1], [], []>} : vector<8x2xf32>, vector<2x128xf32>, vector<8x128xf32> -> vector<8x128xf32>
    %20 = arith.addf %16, %19 : vector<8x128xf32>
    %c0_20 = arith.constant 0 : index
    %c0_21 = arith.constant 0 : index
    %21 = vector.load %arg9[%c0_20, %c0_21] : memref<1x128xf32, #tpu.memory_space<vmem>>, vector<1x128xf32>
    %22 = vector.broadcast %21 : vector<1x128xf32> to vector<8x128xf32>
    %23 = arith.addf %20, %22 : vector<8x128xf32>
    %c0_22 = arith.constant 0 : index
    %c0_23 = arith.constant 0 : index
    %24 = vector.load %arg10[%c0_22, %c0_23] : memref<1x32xf32, #tpu.memory_space<vmem>>, vector<1x32xf32>
    %c0_24 = arith.constant 0 : index
    %c0_25 = arith.constant 0 : index
    %25 = vector.load %arg11[%c0_24, %c0_25] : memref<1x1xf32, #tpu.memory_space<vmem>>, vector<1x1xf32>
    %c0_26 = arith.constant 0 : index
    %c0_27 = arith.constant 0 : index
    %26 = vector.load %arg8[%c0_26, %c0_27] : memref<32x128xf32, #tpu.memory_space<vmem>>, vector<32x128xf32>
    %c0_28 = arith.constant 0 : index
    %c0_29 = arith.constant 0 : index
    %c0_30 = arith.constant 0 : index
    %27 = vector.load %arg12[%c0_28, %c0_29, %c0_30] : memref<1x2x32xf32, #tpu.memory_space<vmem>>, vector<1x2x32xf32>
    %28 = vector.shape_cast %27 : vector<1x2x32xf32> to vector<2x32xf32>
    %c0_31 = arith.constant 0 : index
    %c0_32 = arith.constant 0 : index
    %c0_33 = arith.constant 0 : index
    %29 = vector.load %arg13[%c0_31, %c0_32, %c0_33] : memref<1x2x32xf32, #tpu.memory_space<vmem>>, vector<1x2x32xf32>
    %30 = vector.shape_cast %29 : vector<1x2x32xf32> to vector<2x32xf32>
    %31 = vector.extract_strided_slice %23 {offsets = [0, 0], sizes = [2, 128], strides = [1, 1]} : vector<8x128xf32> to vector<2x128xf32>
    %cst_34 = arith.constant dense<0.000000e+00> : vector<2x128xf32>
    %32 = tpu.matmul %28, %26, %cst_34 {dimension_numbers = #tpu.dot_dimension_numbers<[1], [0], [0], [1], [0, 0, 1, 1], [], []>} : vector<2x32xf32>, vector<32x128xf32>, vector<2x128xf32> -> vector<2x128xf32>
    %33 = arith.addf %31, %32 : vector<2x128xf32>
    %cst_35 = arith.constant 0.000000e+00 : f32
    %34 = vector.broadcast %cst_35 : f32 to vector<2x128xf32>
    %35 = arith.subf %34, %33 : vector<2x128xf32>
    %36 = math.exp %35 : vector<2x128xf32>
    %cst_36 = arith.constant 1.000000e+00 : f32
    %37 = vector.broadcast %cst_36 : f32 to vector<2x128xf32>
    %38 = arith.addf %37, %36 : vector<2x128xf32>
    %cst_37 = arith.constant 1.000000e+00 : f32
    %39 = vector.broadcast %cst_37 : f32 to vector<2x128xf32>
    %40 = arith.divf %39, %38 : vector<2x128xf32>
    %41 = math.tanh %33 : vector<2x128xf32>
    %42 = vector.extract_strided_slice %40 {offsets = [0, 0], sizes = [2, 32], strides = [1, 1]} : vector<2x128xf32> to vector<2x32xf32>
    %43 = vector.extract_strided_slice %40 {offsets = [0, 32], sizes = [2, 32], strides = [1, 1]} : vector<2x128xf32> to vector<2x32xf32>
    %44 = vector.extract_strided_slice %41 {offsets = [0, 64], sizes = [2, 32], strides = [1, 1]} : vector<2x128xf32> to vector<2x32xf32>
    %45 = vector.extract_strided_slice %40 {offsets = [0, 96], sizes = [2, 32], strides = [1, 1]} : vector<2x128xf32> to vector<2x32xf32>
    %46 = arith.mulf %43, %30 : vector<2x32xf32>
    %47 = arith.mulf %42, %44 : vector<2x32xf32>
    %48 = arith.addf %46, %47 : vector<2x32xf32>
    %49 = math.tanh %48 : vector<2x32xf32>
    %50 = arith.mulf %45, %49 : vector<2x32xf32>
    %51 = vector.broadcast %24 : vector<1x32xf32> to vector<2x32xf32>
    %52 = arith.mulf %50, %51 : vector<2x32xf32>
    %cst_38 = arith.constant dense<0.000000e+00> : vector<2xf32>
    %53 = vector.multi_reduction <add>, %52, %cst_38 [1] : vector<2x32xf32> to vector<2xf32>
    %54 = vector.shape_cast %53 : vector<2xf32> to vector<2x1xf32>
    %55 = vector.broadcast %25 : vector<1x1xf32> to vector<2x1xf32>
    %56 = arith.addf %54, %55 : vector<2x1xf32>
    %c0_39 = arith.constant 0 : index
    %c0_40 = arith.constant 0 : index
    %c0_41 = arith.constant 0 : index
    %57 = vector.load %arg14[%c0_39, %c0_40, %c0_41] : memref<4x2x1xf32, #tpu.memory_space<vmem>>, vector<1x2x1xf32>
    %58 = vector.shape_cast %57 : vector<1x2x1xf32> to vector<2x1xf32>
    %59 = vector.shape_cast %56 : vector<2x1xf32> to vector<1x2x1xf32>
    tpu.vector_store %arg14[%c0_39, %c0_40, %c0_41], %59 {strides = array<i32>} : memref<4x2x1xf32, #tpu.memory_space<vmem>>, vector<1x2x1xf32>,
    %60 = vector.extract_strided_slice %23 {offsets = [2, 0], sizes = [2, 128], strides = [1, 1]} : vector<8x128xf32> to vector<2x128xf32>
    %cst_42 = arith.constant dense<0.000000e+00> : vector<2x128xf32>
    %61 = tpu.matmul %50, %26, %cst_42 {dimension_numbers = #tpu.dot_dimension_numbers<[1], [0], [0], [1], [0, 0, 1, 1], [], []>} : vector<2x32xf32>, vector<32x128xf32>, vector<2x128xf32> -> vector<2x128xf32>
    %62 = arith.addf %60, %61 : vector<2x128xf32>
    %cst_43 = arith.constant 0.000000e+00 : f32
    %63 = vector.broadcast %cst_43 : f32 to vector<2x128xf32>
    %64 = arith.subf %63, %62 : vector<2x128xf32>
    %65 = math.exp %64 : vector<2x128xf32>
    %cst_44 = arith.constant 1.000000e+00 : f32
    %66 = vector.broadcast %cst_44 : f32 to vector<2x128xf32>
    %67 = arith.addf %66, %65 : vector<2x128xf32>
    %cst_45 = arith.constant 1.000000e+00 : f32
    %68 = vector.broadcast %cst_45 : f32 to vector<2x128xf32>
    %69 = arith.divf %68, %67 : vector<2x128xf32>
    %70 = math.tanh %62 : vector<2x128xf32>
    %71 = vector.extract_strided_slice %69 {offsets = [0, 0], sizes = [2, 32], strides = [1, 1]} : vector<2x128xf32> to vector<2x32xf32>
    %72 = vector.extract_strided_slice %69 {offsets = [0, 32], sizes = [2, 32], strides = [1, 1]} : vector<2x128xf32> to vector<2x32xf32>
    %73 = vector.extract_strided_slice %70 {offsets = [0, 64], sizes = [2, 32], strides = [1, 1]} : vector<2x128xf32> to vector<2x32xf32>
    %74 = vector.extract_strided_slice %69 {offsets = [0, 96], sizes = [2, 32], strides = [1, 1]} : vector<2x128xf32> to vector<2x32xf32>
    %75 = arith.mulf %72, %48 : vector<2x32xf32>
    %76 = arith.mulf %71, %73 : vector<2x32xf32>
    %77 = arith.addf %75, %76 : vector<2x32xf32>
    %78 = math.tanh %77 : vector<2x32xf32>
    %79 = arith.mulf %74, %78 : vector<2x32xf32>
    %80 = vector.broadcast %24 : vector<1x32xf32> to vector<2x32xf32>
    %81 = arith.mulf %79, %80 : vector<2x32xf32>
    %cst_46 = arith.constant dense<0.000000e+00> : vector<2xf32>
    %82 = vector.multi_reduction <add>, %81, %cst_46 [1] : vector<2x32xf32> to vector<2xf32>
    %83 = vector.shape_cast %82 : vector<2xf32> to vector<2x1xf32>
    %84 = vector.broadcast %25 : vector<1x1xf32> to vector<2x1xf32>
    %85 = arith.addf %83, %84 : vector<2x1xf32>
    %c1 = arith.constant 1 : index
    %c0_47 = arith.constant 0 : index
    %c0_48 = arith.constant 0 : index
    %86 = vector.load %arg14[%c1, %c0_47, %c0_48] : memref<4x2x1xf32, #tpu.memory_space<vmem>>, vector<1x2x1xf32>
    %87 = vector.shape_cast %86 : vector<1x2x1xf32> to vector<2x1xf32>
    %88 = vector.shape_cast %85 : vector<2x1xf32> to vector<1x2x1xf32>
    tpu.vector_store %arg14[%c1, %c0_47, %c0_48], %88 {strides = array<i32>} : memref<4x2x1xf32, #tpu.memory_space<vmem>>, vector<1x2x1xf32>,
    %89 = vector.extract_strided_slice %23 {offsets = [4, 0], sizes = [2, 128], strides = [1, 1]} : vector<8x128xf32> to vector<2x128xf32>
    %cst_49 = arith.constant dense<0.000000e+00> : vector<2x128xf32>
    %90 = tpu.matmul %79, %26, %cst_49 {dimension_numbers = #tpu.dot_dimension_numbers<[1], [0], [0], [1], [0, 0, 1, 1], [], []>} : vector<2x32xf32>, vector<32x128xf32>, vector<2x128xf32> -> vector<2x128xf32>
    %91 = arith.addf %89, %90 : vector<2x128xf32>
    %cst_50 = arith.constant 0.000000e+00 : f32
    %92 = vector.broadcast %cst_50 : f32 to vector<2x128xf32>
    %93 = arith.subf %92, %91 : vector<2x128xf32>
    %94 = math.exp %93 : vector<2x128xf32>
    %cst_51 = arith.constant 1.000000e+00 : f32
    %95 = vector.broadcast %cst_51 : f32 to vector<2x128xf32>
    %96 = arith.addf %95, %94 : vector<2x128xf32>
    %cst_52 = arith.constant 1.000000e+00 : f32
    %97 = vector.broadcast %cst_52 : f32 to vector<2x128xf32>
    %98 = arith.divf %97, %96 : vector<2x128xf32>
    %99 = math.tanh %91 : vector<2x128xf32>
    %100 = vector.extract_strided_slice %98 {offsets = [0, 0], sizes = [2, 32], strides = [1, 1]} : vector<2x128xf32> to vector<2x32xf32>
    %101 = vector.extract_strided_slice %98 {offsets = [0, 32], sizes = [2, 32], strides = [1, 1]} : vector<2x128xf32> to vector<2x32xf32>
    %102 = vector.extract_strided_slice %99 {offsets = [0, 64], sizes = [2, 32], strides = [1, 1]} : vector<2x128xf32> to vector<2x32xf32>
    %103 = vector.extract_strided_slice %98 {offsets = [0, 96], sizes = [2, 32], strides = [1, 1]} : vector<2x128xf32> to vector<2x32xf32>
    %104 = arith.mulf %101, %77 : vector<2x32xf32>
    %105 = arith.mulf %100, %102 : vector<2x32xf32>
    %106 = arith.addf %104, %105 : vector<2x32xf32>
    %107 = math.tanh %106 : vector<2x32xf32>
    %108 = arith.mulf %103, %107 : vector<2x32xf32>
    %109 = vector.broadcast %24 : vector<1x32xf32> to vector<2x32xf32>
    %110 = arith.mulf %108, %109 : vector<2x32xf32>
    %cst_53 = arith.constant dense<0.000000e+00> : vector<2xf32>
    %111 = vector.multi_reduction <add>, %110, %cst_53 [1] : vector<2x32xf32> to vector<2xf32>
    %112 = vector.shape_cast %111 : vector<2xf32> to vector<2x1xf32>
    %113 = vector.broadcast %25 : vector<1x1xf32> to vector<2x1xf32>
    %114 = arith.addf %112, %113 : vector<2x1xf32>
    %c2 = arith.constant 2 : index
    %c0_54 = arith.constant 0 : index
    %c0_55 = arith.constant 0 : index
    %115 = vector.load %arg14[%c2, %c0_54, %c0_55] : memref<4x2x1xf32, #tpu.memory_space<vmem>>, vector<1x2x1xf32>
    %116 = vector.shape_cast %115 : vector<1x2x1xf32> to vector<2x1xf32>
    %117 = vector.shape_cast %114 : vector<2x1xf32> to vector<1x2x1xf32>
    tpu.vector_store %arg14[%c2, %c0_54, %c0_55], %117 {strides = array<i32>} : memref<4x2x1xf32, #tpu.memory_space<vmem>>, vector<1x2x1xf32>,
    %118 = vector.extract_strided_slice %23 {offsets = [6, 0], sizes = [2, 128], strides = [1, 1]} : vector<8x128xf32> to vector<2x128xf32>
    %cst_56 = arith.constant dense<0.000000e+00> : vector<2x128xf32>
    %119 = tpu.matmul %108, %26, %cst_56 {dimension_numbers = #tpu.dot_dimension_numbers<[1], [0], [0], [1], [0, 0, 1, 1], [], []>} : vector<2x32xf32>, vector<32x128xf32>, vector<2x128xf32> -> vector<2x128xf32>
    %120 = arith.addf %118, %119 : vector<2x128xf32>
    %cst_57 = arith.constant 0.000000e+00 : f32
    %121 = vector.broadcast %cst_57 : f32 to vector<2x128xf32>
    %122 = arith.subf %121, %120 : vector<2x128xf32>
    %123 = math.exp %122 : vector<2x128xf32>
    %cst_58 = arith.constant 1.000000e+00 : f32
    %124 = vector.broadcast %cst_58 : f32 to vector<2x128xf32>
    %125 = arith.addf %124, %123 : vector<2x128xf32>
    %cst_59 = arith.constant 1.000000e+00 : f32
    %126 = vector.broadcast %cst_59 : f32 to vector<2x128xf32>
    %127 = arith.divf %126, %125 : vector<2x128xf32>
    %128 = math.tanh %120 : vector<2x128xf32>
    %129 = vector.extract_strided_slice %127 {offsets = [0, 0], sizes = [2, 32], strides = [1, 1]} : vector<2x128xf32> to vector<2x32xf32>
    %130 = vector.extract_strided_slice %127 {offsets = [0, 32], sizes = [2, 32], strides = [1, 1]} : vector<2x128xf32> to vector<2x32xf32>
    %131 = vector.extract_strided_slice %128 {offsets = [0, 64], sizes = [2, 32], strides = [1, 1]} : vector<2x128xf32> to vector<2x32xf32>
    %132 = vector.extract_strided_slice %127 {offsets = [0, 96], sizes = [2, 32], strides = [1, 1]} : vector<2x128xf32> to vector<2x32xf32>
    %133 = arith.mulf %130, %106 : vector<2x32xf32>
    %134 = arith.mulf %129, %131 : vector<2x32xf32>
    %135 = arith.addf %133, %134 : vector<2x32xf32>
    %136 = math.tanh %135 : vector<2x32xf32>
    %137 = arith.mulf %132, %136 : vector<2x32xf32>
    %138 = vector.broadcast %24 : vector<1x32xf32> to vector<2x32xf32>
    %139 = arith.mulf %137, %138 : vector<2x32xf32>
    %cst_60 = arith.constant dense<0.000000e+00> : vector<2xf32>
    %140 = vector.multi_reduction <add>, %139, %cst_60 [1] : vector<2x32xf32> to vector<2xf32>
    %141 = vector.shape_cast %140 : vector<2xf32> to vector<2x1xf32>
    %142 = vector.broadcast %25 : vector<1x1xf32> to vector<2x1xf32>
    %143 = arith.addf %141, %142 : vector<2x1xf32>
    %c3 = arith.constant 3 : index
    %c0_61 = arith.constant 0 : index
    %c0_62 = arith.constant 0 : index
    %144 = vector.load %arg14[%c3, %c0_61, %c0_62] : memref<4x2x1xf32, #tpu.memory_space<vmem>>, vector<1x2x1xf32>
    %145 = vector.shape_cast %144 : vector<1x2x1xf32> to vector<2x1xf32>
    %146 = vector.shape_cast %143 : vector<2x1xf32> to vector<1x2x1xf32>
    tpu.vector_store %arg14[%c3, %c0_61, %c0_62], %146 {strides = array<i32>} : memref<4x2x1xf32, #tpu.memory_space<vmem>>, vector<1x2x1xf32>,
    %c0_63 = arith.constant 0 : index
    %c0_64 = arith.constant 0 : index
    %c0_65 = arith.constant 0 : index
    %147 = vector.load %arg15[%c0_63, %c0_64, %c0_65] : memref<1x2x32xf32, #tpu.memory_space<vmem>>, vector<1x2x32xf32>
    %148 = vector.shape_cast %147 : vector<1x2x32xf32> to vector<2x32xf32>
    %149 = vector.shape_cast %137 : vector<2x32xf32> to vector<1x2x32xf32>
    tpu.vector_store %arg15[%c0_63, %c0_64, %c0_65], %149 {strides = array<i32>} : memref<1x2x32xf32, #tpu.memory_space<vmem>>, vector<1x2x32xf32>,
    %c0_66 = arith.constant 0 : index
    %c0_67 = arith.constant 0 : index
    %c0_68 = arith.constant 0 : index
    %150 = vector.load %arg16[%c0_66, %c0_67, %c0_68] : memref<1x2x32xf32, #tpu.memory_space<vmem>>, vector<1x2x32xf32>
    %151 = vector.shape_cast %150 : vector<1x2x32xf32> to vector<2x32xf32>
    %152 = vector.shape_cast %135 : vector<2x32xf32> to vector<1x2x32xf32>
    tpu.vector_store %arg16[%c0_66, %c0_67, %c0_68], %152 {strides = array<i32>} : memref<1x2x32xf32, #tpu.memory_space<vmem>>, vector<1x2x32xf32>,
    return
  }
}

</mosaic_0001>

<bundles_post_ra>
// kernel: critic_forward.5
= control target key start
LH: loop header
LB: loop body
LE: loop exit
PB: predicated region body
PF: predicated region fallthrough
CT: control target
= control target key end

     0   :  { %s3190_s15 = smov 0   ;;  %s3192_s16 = smov 0   ;;  %s4256_s0 = inlined_call_operand.vmem [shape: f32[9840,75], index: 0, kind: input, shape index: {}]   ;;  %s4257_s1 = inlined_call_operand.vmem [shape: f32[75,24], index: 1, kind: input, shape index: {}]   ;;  %s4258_s2 = inlined_call_operand.vmem [shape: f32[1,24], index: 2, kind: input, shape index: {}]   ;;  %s4259_s3 = inlined_call_operand.vmem [shape: f32[1,24], index: 3, kind: input, shape index: {}]   ;;  %s4260_s4 = inlined_call_operand.vmem [shape: f32[9840,24], index: 4, kind: output, shape index: {}]  }
   0x1   :  { %s3194_s17 = smov 0  }
   0x2 LB: > { %s3203_s18 = sadd.s32 4294967295, %s3130_s17   ;;  %s3205_s19 = sadd.s32 1, %s3130_s17   ;;  %s3130_s17 = sphi %s3194_s17, %s4269_s17   ;;  %s3126_s16 = sphi %s3192_s16, %s4268_s16   ;;  %s3122_s15 = sphi %s3190_s15, %s4267_s15  }
   0x3   : > { %s107_s20 = ssub.s32 %s3130_s17, %s3205_s19  ;;  %s110_s21 = sadd.s32 1, %s3126_s16 }
   0x4   : > { %p108_p0 = scmp.eq.s32.totalorder %s107_s20, 0  ;;  %p120_p1 = scmp.ne.s32.totalorder %s3126_s16, %s3122_s15 }
   0x5   : > { %p121_p2 = scmp.eq.s32.totalorder %s3203_s18, 9  ;;  %p2448_p3 = scmp.ge.s32.totalorder %s3130_s17, 1 }
   0x6   : > { %s3213_s22 = scalar_select %p108_p0, %s3126_s16, %s110_s21  }
   0x7   : > { %p3215_p4 = por %p121_p2, %p120_p1  ;;  %p171_p5 = scmp.lt.s32.totalorder %s3130_s17, 11 }
   0x9   : > { %p172_p6 = pnand %p2448_p3, %p171_p5 }
   0xa   : > { %v347_v0 = vld [vmem:[%s4257_s1] sm:$0xff] (!%p172_p6)  ;;  %v348_v1 = vld [vmem:[%s4257_s1 + $0x8] sm:$0xff] (!%p172_p6)  ;;  %v349_v2 = vld [vmem:[%s4257_s1 + $0x10] sm:$0xff] (!%p172_p6)  ;;  %s3229_s30 = sshll.u32 (!%p172_p6), %s3203_s18, 7  ;;  %vm357_vm0 = vcmask (!%p172_p6), 613376   ;;  %vm742_vm1 = vcmask (!%p172_p6), 1042432  }
   0xb   : > { %175 = sbr.rel (%p172_p6) target bundleno = 449 (0x1c1), region = 36  ;;  %v2953_v3 = vpack.c.bf16 (!%p172_p6), %v348_v1, %v347_v0  ;;  %v350_v4 = vld [vmem:[%s4257_s1 + $0x18] sm:$0xff] (!%p172_p6)  ;;  %p205_p7 = scmp.lt.s32.totalorder (!%p172_p6), %s3229_s30, 1229  ;;  %v351_v6 = vld [vmem:[%s4257_s1 + $0x20] sm:$0xff] (!%p172_p6)  ;;  %v352_v7 = vld [vmem:[%s4257_s1 + $0x28] sm:$0xff] (!%p172_p6)  ;;  %vm3164_vm2 = vmmov (!%p172_p6), 1  }
   0xc   : > { %v2957_v5 = vpack.c.bf16 (!%p172_p6), %v350_v4, %v349_v2  ;;  %v2961_v8 = vpack.c.bf16 (!%p172_p6), %v352_v7, %v351_v6  ;;  %v353_v9 = vld [vmem:[%s4257_s1 + $0x30] sm:$0xff] (!%p172_p6)  ;;  %v354_v10 = vld [vmem:[%s4257_s1 + $0x38] sm:$0xff] (!%p172_p6)  ;;  %v355_v14 = vld [vmem:[%s4257_s1 + $0x40] sm:$0xff] (!%p172_p6)  ;;  %s197_s5 = sand.u32 (!%p172_p6), 1, %s3122_s15   ;;  %vm1849_vm4 = vcmask (!%p172_p6), 195584  }
   0xd   : > { %2954 = vmatprep.subr.bf16.mxu0 (!%p172_p6), %v2953_v3  ;;  %2975 = vmatprep.subr.bf16.mxu1 (!%p172_p6), %v2953_v3  ;;  %v2965_v13 = vpack.c.bf16 (!%p172_p6), %v354_v10, %v353_v9  ;;  %v356_v15 = vld [vmem:[%s4257_s1 + $0x48] sm:$0x7] (!%p172_p6)  ;;  %vm2970_vm3 = vmpackc.low (!%p172_p6), %vm742_vm1, %vm3164_vm2  ;;  %s2449_s10 = sshll.u32 (!%p172_p6), %s197_s5, 10 }
   0xe   : > { %2956 = vmatpush3.bf16.msra.mxu0 (!%p172_p6), %v2953_v3  ;;  %2980 = vmatpush3.bf16.msra.mxu1 (!%p172_p6), %v2953_v3  ;;  %v2969_v16 = vpack.c.bf16 (!%p172_p6), %v356_v15, %v355_v14  ;;  %s3538_s15 = scalar_lea.vmem (!%p172_p6), [#allocation2], %s2449_s10  }
   0xf   : > { %2958 = vmatprep.subr.bf16.mxu0 (!%p172_p6), %v2957_v5  ;;  %2976 = vmatprep.subr.bf16.mxu1 (!%p172_p6), %v2957_v5 }
  0x12   : > { %s206_s11 = scalar_select %p205_p7, %s3229_s30, 1229  ;;  %2960 = vmatpush3.bf16.msra.mxu0 %v2957_v5  ;;  %2981 = vmatpush3.bf16.msra.mxu1 %v2957_v5 }
  0x13   : > { %2962 = vmatprep.subr.bf16.mxu0 %v2961_v8  ;;  %2977 = vmatprep.subr.bf16.mxu1 %v2961_v8  ;;  %s1986_s17 = ssub.s32 (%p3215_p4), 1230, %s3229_s30  ;;  %s2600_s20 = sshll.u32 (%p3215_p4), %s3203_s18, 10 }
  0x14   : > { %s2451_s12 = sshll.u32 %s206_s11, 3  ;;  %p1987_p8 = scmp.lt.s32.totalorder (%p3215_p4), %s1986_s17, 128 }
  0x15   : > { %s3251_s25 = scalar_lea.vmem %s4256_s0, %s2451_s12 }
  0x16   : > { %v219_v11 = vld [vmem:[%s3251_s25] sm:$0xff]  ;;  %2964 = vmatpush3.bf16.msra.mxu0 %v2961_v8  ;;  %2982 = vmatpush3.bf16.msra.mxu1 %v2961_v8  ;;  %v220_v17 = vld [vmem:[%s3251_s25 + $0x8] sm:$0xff]  ;;  %v221_v19 = vld [vmem:[%s3251_s25 + $0x10] sm:$0xff] }
  0x17   : > { %v283_v12 = vld [vmem:[%s3251_s25 + $0x200] sm:$0xff]  ;;  %2761 = vmatprep.mubr.msk.f32.mxu0 %vm357_vm0, %v219_v11  ;;  %2966 = vmatprep.subr.bf16.mxu0 %v2965_v13  ;;  %v284_v18 = vld [vmem:[%s3251_s25 + $0x208] sm:$0xff]  ;;  %v285_v20 = vld [vmem:[%s3251_s25 + $0x210] sm:$0xff] }
  0x18   : > { %2857 = vmatprep.mubr.msk.f32.mxu1 %vm357_vm0, %v283_v12  ;;  %2978 = vmatprep.subr.bf16.mxu1 %v2965_v13  ;;  %v222_v21 = vld [vmem:[%s3251_s25 + $0x18] sm:$0xff]  ;;  %v223_v23 = vld [vmem:[%s3251_s25 + $0x20] sm:$0xff]  ;;  %v224_v25 = vld [vmem:[%s3251_s25 + $0x28] sm:$0xff] }
  0x19   : > { %v286_v22 = vld [vmem:[%s3251_s25 + $0x218] sm:$0xff]  ;;  %v287_v24 = vld [vmem:[%s3251_s25 + $0x220] sm:$0xff]  ;;  %v288_v26 = vld [vmem:[%s3251_s25 + $0x228] sm:$0xff] }
  0x1a   : > { %2968 = vmatpush3.bf16.msra.mxu0 %v2965_v13  ;;  %2983 = vmatpush3.bf16.msra.mxu1 %v2965_v13  ;;  %v225_v27 = vld [vmem:[%s3251_s25 + $0x30] sm:$0xff]  ;;  %v226_v29 = vld [vmem:[%s3251_s25 + $0x38] sm:$0xff]  ;;  %v227_v31 = vld [vmem:[%s3251_s25 + $0x40] sm:$0xff] }
  0x1b   : > { %2971 = vmatprep.subr.msk.bf16.mxu0 %vm2970_vm3, %v2969_v16  ;;  %2979 = vmatprep.subr.msk.bf16.mxu1 %vm2970_vm3, %v2969_v16  ;;  %v289_v28 = vld [vmem:[%s3251_s25 + $0x230] sm:$0xff]  ;;  %v290_v30 = vld [vmem:[%s3251_s25 + $0x238] sm:$0xff]  ;;  %v291_v32 = vld [vmem:[%s3251_s25 + $0x240] sm:$0xff] }
  0x1c   : > { %v228_v33 = vld [vmem:[%s3251_s25 + $0x48] sm:$0xff]  ;;  %v229_v35 = vld [vmem:[%s3251_s25 + $0x50] sm:$0xff]  ;;  %v230_v37 = vld [vmem:[%s3251_s25 + $0x58] sm:$0xff] }
  0x1d   : > { %v292_v34 = vld [vmem:[%s3251_s25 + $0x248] sm:$0xff]  ;;  %v293_v36 = vld [vmem:[%s3251_s25 + $0x250] sm:$0xff]  ;;  %v294_v38 = vld [vmem:[%s3251_s25 + $0x258] sm:$0xff] }
  0x1e   : > { %2974 = vmatpush3.bf16.msk.msra.mxu0 %vm2970_vm3, %v2969_v16  ;;  %2984 = vmatpush3.bf16.msk.msra.mxu1 %vm2970_vm3, %v2969_v16  ;;  %v231_v39 = vld [vmem:[%s3251_s25 + $0x60] sm:$0xff]  ;;  %v232_v41 = vld [vmem:[%s3251_s25 + $0x68] sm:$0xff]  ;;  %v233_v43 = vld [vmem:[%s3251_s25 + $0x70] sm:$0xff] }
  0x1f   : > { %v295_v40 = vld [vmem:[%s3251_s25 + $0x260] sm:$0xff]  ;;  %v296_v42 = vld [vmem:[%s3251_s25 + $0x268] sm:$0xff]  ;;  %v297_v44 = vld [vmem:[%s3251_s25 + $0x270] sm:$0xff] }
  0x20   : > { %v234_v45 = vld [vmem:[%s3251_s25 + $0x78] sm:$0xff]  ;;  %v235_v47 = vld [vmem:[%s3251_s25 + $0x80] sm:$0xff]  ;;  %v236_v49 = vld [vmem:[%s3251_s25 + $0x88] sm:$0xff] }
  0x21   : > { %2762 = vmatmul.mubr.msk.f32.vlgmr.msra.gmra.mrb[0].mxu0 %vm357_vm0, %v220_v17  ;;  %2858 = vmatmul.mubr.msk.f32.vlgmr.msra.gmra.mrb[0].mxu1 %vm357_vm0, %v284_v18  ;;  %v298_v46 = vld [vmem:[%s3251_s25 + $0x278] sm:$0xff]  ;;  %v299_v48 = vld [vmem:[%s3251_s25 + $0x280] sm:$0xff]  ;;  %v300_v50 = vld [vmem:[%s3251_s25 + $0x288] sm:$0xff] }
  0x22   : > { %2764 = vmatprep.mubr.msk.f32.mxu0 %vm357_vm0, %v221_v19  ;;  %2860 = vmatprep.mubr.msk.f32.mxu1 %vm357_vm0, %v285_v20  ;;  %v237_v51 = vld [vmem:[%s3251_s25 + $0x90] sm:$0xff]  ;;  %v238_v53 = vld [vmem:[%s3251_s25 + $0x98] sm:$0xff]  ;;  %v239_v55 = vld [vmem:[%s3251_s25 + $0xa0] sm:$0xff] }
  0x23   : > { %v301_v52 = vld [vmem:[%s3251_s25 + $0x290] sm:$0xff]  ;;  %v302_v54 = vld [vmem:[%s3251_s25 + $0x298] sm:$0xff]  ;;  %v303_v56 = vld [vmem:[%s3251_s25 + $0x2a0] sm:$0xff] }
  0x24   : > { %v240_v57 = vld [vmem:[%s3251_s25 + $0xa8] sm:$0xff]  ;;  %v241_v59 = vld [vmem:[%s3251_s25 + $0xb0] sm:$0xff]  ;;  %v242_v61 = vld [vmem:[%s3251_s25 + $0xb8] sm:$0xff] }
  0x25   : > { %2765 = vmatmul.mubr.msk.f32.gmra.mrb[2].mxu0 %vm357_vm0, %v222_v21  ;;  %2861 = vmatmul.mubr.msk.f32.gmra.mrb[2].mxu1 %vm357_vm0, %v286_v22  ;;  %v304_v58 = vld [vmem:[%s3251_s25 + $0x2a8] sm:$0xff]  ;;  %v305_v60 = vld [vmem:[%s3251_s25 + $0x2b0] sm:$0xff]  ;;  %v306_v62 = vld [vmem:[%s3251_s25 + $0x2b8] sm:$0xff] }
  0x26   : > { %2767 = vmatprep.mubr.msk.f32.mxu0 %vm357_vm0, %v223_v23  ;;  %2863 = vmatprep.mubr.msk.f32.mxu1 %vm357_vm0, %v287_v24  ;;  %v243_v63 = vld [vmem:[%s3251_s25 + $0xc0] sm:$0xff]  ;;  %v244_v1 = vld [vmem:[%s3251_s25 + $0xc8] sm:$0xff]  ;;  %v245_v3 = vld [vmem:[%s3251_s25 + $0xd0] sm:$0xff] }
  0x27   : > { %v307_v0 = vld [vmem:[%s3251_s25 + $0x2c0] sm:$0xff]  ;;  %v308_v2 = vld [vmem:[%s3251_s25 + $0x2c8] sm:$0xff]  ;;  %v309_v4 = vld [vmem:[%s3251_s25 + $0x2d0] sm:$0xff] }
  0x28   : > { %v246_v5 = vld [vmem:[%s3251_s25 + $0xd8] sm:$0xff]  ;;  %v247_v7 = vld [vmem:[%s3251_s25 + $0xe0] sm:$0xff]  ;;  %v248_v9 = vld [vmem:[%s3251_s25 + $0xe8] sm:$0xff] }
  0x29   : > { %2768 = vmatmul.mubr.msk.f32.gmra.mrb[4].mxu0 %vm357_vm0, %v224_v25  ;;  %2864 = vmatmul.mubr.msk.f32.gmra.mrb[4].mxu1 %vm357_vm0, %v288_v26  ;;  %v310_v6 = vld [vmem:[%s3251_s25 + $0x2d8] sm:$0xff]  ;;  %v311_v8 = vld [vmem:[%s3251_s25 + $0x2e0] sm:$0xff]  ;;  %v312_v10 = vld [vmem:[%s3251_s25 + $0x2e8] sm:$0xff] }
  0x2a   : > { %2770 = vmatprep.mubr.msk.f32.mxu0 %vm357_vm0, %v225_v27  ;;  %2866 = vmatprep.mubr.msk.f32.mxu1 %vm357_vm0, %v289_v28  ;;  %v249_v11 = vld [vmem:[%s3251_s25 + $0xf0] sm:$0xff]  ;;  %v250_v13 = vld [vmem:[%s3251_s25 + $0xf8] sm:$0xff]  ;;  %v251_v15 = vld [vmem:[%s3251_s25 + $0x100] sm:$0xff] }
  0x2b   : > { %v313_v12 = vld [vmem:[%s3251_s25 + $0x2f0] sm:$0xff]  ;;  %v314_v14 = vld [vmem:[%s3251_s25 + $0x2f8] sm:$0xff]  ;;  %v315_v16 = vld [vmem:[%s3251_s25 + $0x300] sm:$0xff] }
  0x2c   : > { %v252_v17 = vld [vmem:[%s3251_s25 + $0x108] sm:$0xff]  ;;  %v253_v19 = vld [vmem:[%s3251_s25 + $0x110] sm:$0xff]  ;;  %v254_v21 = vld [vmem:[%s3251_s25 + $0x118] sm:$0xff] }
  0x2d   : > { %2771 = vmatmul.mubr.msk.f32.gmra.mrb[6].mxu0 %vm357_vm0, %v226_v29  ;;  %2867 = vmatmul.mubr.msk.f32.gmra.mrb[6].mxu1 %vm357_vm0, %v290_v30  ;;  %v316_v18 = vld [vmem:[%s3251_s25 + $0x308] sm:$0xff]  ;;  %v317_v20 = vld [vmem:[%s3251_s25 + $0x310] sm:$0xff]  ;;  %v318_v22 = vld [vmem:[%s3251_s25 + $0x318] sm:$0xff] }
  0x2e   : > { %2773 = vmatprep.mubr.msk.f32.mxu0 %vm357_vm0, %v227_v31  ;;  %2869 = vmatprep.mubr.msk.f32.mxu1 %vm357_vm0, %v291_v32  ;;  %v255_v23 = vld [vmem:[%s3251_s25 + $0x120] sm:$0xff]  ;;  %v256_v25 = vld [vmem:[%s3251_s25 + $0x128] sm:$0xff]  ;;  %v257_v27 = vld [vmem:[%s3251_s25 + $0x130] sm:$0xff] }
  0x2f   : > { %v319_v24 = vld [vmem:[%s3251_s25 + $0x320] sm:$0xff]  ;;  %v320_v26 = vld [vmem:[%s3251_s25 + $0x328] sm:$0xff]  ;;  %v321_v28 = vld [vmem:[%s3251_s25 + $0x330] sm:$0xff] }
  0x30   : > { %v258_v29 = vld [vmem:[%s3251_s25 + $0x138] sm:$0xff]  ;;  %v259_v31 = vld [vmem:[%s3251_s25 + $0x140] sm:$0xff] }
  0x31   : > { %2774 = vmatmul.mubr.msk.f32.gmra.mrb[8].mxu0 %vm357_vm0, %v228_v33  ;;  %2870 = vmatmul.mubr.msk.f32.gmra.mrb[8].mxu1 %vm357_vm0, %v292_v34  ;;  %v322_v30 = vld [vmem:[%s3251_s25 + $0x338] sm:$0xff]  ;;  %v323_v32 = vld [vmem:[%s3251_s25 + $0x340] sm:$0xff]  ;;  %v260_v33 = vld [vmem:[%s3251_s25 + $0x148] sm:$0xff] }
  0x32   : > { %2776 = vmatprep.mubr.msk.f32.mxu0 %vm357_vm0, %v229_v35  ;;  %2872 = vmatprep.mubr.msk.f32.mxu1 %vm357_vm0, %v293_v36  ;;  %v324_v34 = vld [vmem:[%s3251_s25 + $0x348] sm:$0xff]  ;;  %v261_v35 = vld [vmem:[%s3251_s25 + $0x150] sm:$0xff] }
  0x33   : > { %v325_v36 = vld [vmem:[%s3251_s25 + $0x350] sm:$0xff] }
  0x35   : > { %2777 = vmatmul.mubr.msk.f32.gmra.mrb[10].mxu0 %vm357_vm0, %v230_v37  ;;  %2873 = vmatmul.mubr.msk.f32.gmra.mrb[10].mxu1 %vm357_vm0, %v294_v38  ;;  %v262_v37 = vld [vmem:[%s3251_s25 + $0x158] sm:$0xff] }
  0x36   : > { %2779 = vmatprep.mubr.msk.f32.mxu0 %vm357_vm0, %v231_v39  ;;  %2875 = vmatprep.mubr.msk.f32.mxu1 %vm357_vm0, %v295_v40  ;;  %v326_v38 = vld [vmem:[%s3251_s25 + $0x358] sm:$0xff]  ;;  %v263_v39 = vld [vmem:[%s3251_s25 + $0x160] sm:$0xff] }
  0x37   : > { %v327_v40 = vld [vmem:[%s3251_s25 + $0x360] sm:$0xff] }
  0x39   : > { %2780 = vmatmul.mubr.msk.f32.gmra.mrb[12].mxu0 %vm357_vm0, %v232_v41  ;;  %2876 = vmatmul.mubr.msk.f32.gmra.mrb[12].mxu1 %vm357_vm0, %v296_v42  ;;  %v264_v41 = vld [vmem:[%s3251_s25 + $0x168] sm:$0xff] }
  0x3a   : > { %2782 = vmatprep.mubr.msk.f32.mxu0 %vm357_vm0, %v233_v43  ;;  %2878 = vmatprep.mubr.msk.f32.mxu1 %vm357_vm0, %v297_v44  ;;  %v328_v42 = vld [vmem:[%s3251_s25 + $0x368] sm:$0xff]  ;;  %v265_v43 = vld [vmem:[%s3251_s25 + $0x170] sm:$0xff] }
  0x3b   : > { %v329_v44 = vld [vmem:[%s3251_s25 + $0x370] sm:$0xff] }
  0x3d   : > { %2783 = vmatmul.mubr.msk.f32.gmra.mrb[14].mxu0 %vm357_vm0, %v234_v45  ;;  %2879 = vmatmul.mubr.msk.f32.gmra.mrb[14].mxu1 %vm357_vm0, %v298_v46  ;;  %v266_v45 = vld [vmem:[%s3251_s25 + $0x178] sm:$0xff] }
  0x3e   : > { %2785 = vmatprep.mubr.msk.f32.mxu0 %vm357_vm0, %v235_v47  ;;  %2881 = vmatprep.mubr.msk.f32.mxu1 %vm357_vm0, %v299_v48  ;;  %v330_v46 = vld [vmem:[%s3251_s25 + $0x378] sm:$0xff]  ;;  %v267_v47 = vld [vmem:[%s3251_s25 + $0x180] sm:$0xff] }
  0x3f   : > { %v331_v48 = vld [vmem:[%s3251_s25 + $0x380] sm:$0xff] }
  0x41   : > { %2786 = vmatmul.mubr.msk.f32.gmra.mrb[16].mxu0 %vm357_vm0, %v236_v49  ;;  %2882 = vmatmul.mubr.msk.f32.gmra.mrb[16].mxu1 %vm357_vm0, %v300_v50  ;;  %v268_v49 = vld [vmem:[%s3251_s25 + $0x188] sm:$0xff] }
  0x42   : > { %2788 = vmatprep.mubr.msk.f32.mxu0 %vm357_vm0, %v237_v51  ;;  %2884 = vmatprep.mubr.msk.f32.mxu1 %vm357_vm0, %v301_v52  ;;  %v332_v50 = vld [vmem:[%s3251_s25 + $0x388] sm:$0xff]  ;;  %v269_v51 = vld [vmem:[%s3251_s25 + $0x190] sm:$0xff] }
  0x43   : > { %v333_v52 = vld [vmem:[%s3251_s25 + $0x390] sm:$0xff] }
  0x45   : > { %2789 = vmatmul.mubr.msk.f32.gmra.mrb[18].mxu0 %vm357_vm0, %v238_v53  ;;  %2885 = vmatmul.mubr.msk.f32.gmra.mrb[18].mxu1 %vm357_vm0, %v302_v54  ;;  %v270_v53 = vld [vmem:[%s3251_s25 + $0x198] sm:$0xff] }
  0x46   : > { %2791 = vmatprep.mubr.msk.f32.mxu0 %vm357_vm0, %v239_v55  ;;  %2887 = vmatprep.mubr.msk.f32.mxu1 %vm357_vm0, %v303_v56  ;;  %v334_v54 = vld [vmem:[%s3251_s25 + $0x398] sm:$0xff]  ;;  %v271_v55 = vld [vmem:[%s3251_s25 + $0x1a0] sm:$0xff] }
  0x47   : > { %v335_v56 = vld [vmem:[%s3251_s25 + $0x3a0] sm:$0xff] }
  0x49   : > { %2792 = vmatmul.mubr.msk.f32.gmra.mrb[20].mxu0 %vm357_vm0, %v240_v57  ;;  %2888 = vmatmul.mubr.msk.f32.gmra.mrb[20].mxu1 %vm357_vm0, %v304_v58  ;;  %v272_v57 = vld [vmem:[%s3251_s25 + $0x1a8] sm:$0xff] }
  0x4a   : > { %2794 = vmatprep.mubr.msk.f32.mxu0 %vm357_vm0, %v241_v59  ;;  %2890 = vmatprep.mubr.msk.f32.mxu1 %vm357_vm0, %v305_v60  ;;  %v336_v58 = vld [vmem:[%s3251_s25 + $0x3a8] sm:$0xff]  ;;  %v273_v59 = vld [vmem:[%s3251_s25 + $0x1b0] sm:$0xff] }
  0x4b   : > { %v337_v60 = vld [vmem:[%s3251_s25 + $0x3b0] sm:$0xff] }
  0x4d   : > { %2795 = vmatmul.mubr.msk.f32.gmra.mrb[22].mxu0 %vm357_vm0, %v242_v61  ;;  %2891 = vmatmul.mubr.msk.f32.gmra.mrb[22].mxu1 %vm357_vm0, %v306_v62  ;;  %v274_v61 = vld [vmem:[%s3251_s25 + $0x1b8] sm:$0xff] }
  0x4e   : > { %2797 = vmatprep.mubr.msk.f32.mxu0 %vm357_vm0, %v243_v63  ;;  %2893 = vmatprep.mubr.msk.f32.mxu1 %vm357_vm0, %v307_v0  ;;  %v338_v62 = vld [vmem:[%s3251_s25 + $0x3b8] sm:$0xff]  ;;  %v275_v63 = vld [vmem:[%s3251_s25 + $0x1c0] sm:$0xff] }
  0x4f   : > { %v339_v0 = vld [vmem:[%s3251_s25 + $0x3c0] sm:$0xff] }
  0x51   : > { %2798 = vmatmul.mubr.msk.f32.gmra.mrb[24].mxu0 %vm357_vm0, %v244_v1  ;;  %2894 = vmatmul.mubr.msk.f32.gmra.mrb[24].mxu1 %vm357_vm0, %v308_v2  ;;  %v276_v1 = vld [vmem:[%s3251_s25 + $0x1c8] sm:$0xff] }
  0x52   : > { %2800 = vmatprep.mubr.msk.f32.mxu0 %vm357_vm0, %v245_v3  ;;  %2896 = vmatprep.mubr.msk.f32.mxu1 %vm357_vm0, %v309_v4  ;;  %v340_v2 = vld [vmem:[%s3251_s25 + $0x3c8] sm:$0xff]  ;;  %v277_v3 = vld [vmem:[%s3251_s25 + $0x1d0] sm:$0xff] }
  0x53   : > { %v341_v4 = vld [vmem:[%s3251_s25 + $0x3d0] sm:$0xff] }
  0x55   : > { %2801 = vmatmul.mubr.msk.f32.gmra.mrb[26].mxu0 %vm357_vm0, %v246_v5  ;;  %2897 = vmatmul.mubr.msk.f32.gmra.mrb[26].mxu1 %vm357_vm0, %v310_v6  ;;  %v278_v5 = vld [vmem:[%s3251_s25 + $0x1d8] sm:$0xff] }
  0x56   : > { %2803 = vmatprep.mubr.msk.f32.mxu0 %vm357_vm0, %v247_v7  ;;  %2899 = vmatprep.mubr.msk.f32.mxu1 %vm357_vm0, %v311_v8  ;;  %v342_v6 = vld [vmem:[%s3251_s25 + $0x3d8] sm:$0xff]  ;;  %v279_v7 = vld [vmem:[%s3251_s25 + $0x1e0] sm:$0xff] }
  0x57   : > { %v343_v8 = vld [vmem:[%s3251_s25 + $0x3e0] sm:$0xff] }
  0x59   : > { %2804 = vmatmul.mubr.msk.f32.gmra.mrb[28].mxu0 %vm357_vm0, %v248_v9  ;;  %2900 = vmatmul.mubr.msk.f32.gmra.mrb[28].mxu1 %vm357_vm0, %v312_v10  ;;  %v280_v9 = vld [vmem:[%s3251_s25 + $0x1e8] sm:$0xff] }
  0x5a   : > { %2806 = vmatprep.mubr.msk.f32.mxu0 %vm357_vm0, %v249_v11  ;;  %2902 = vmatprep.mubr.msk.f32.mxu1 %vm357_vm0, %v313_v12  ;;  %v344_v10 = vld [vmem:[%s3251_s25 + $0x3e8] sm:$0xff]  ;;  %v281_v11 = vld [vmem:[%s3251_s25 + $0x1f0] sm:$0xff] }
  0x5b   : > { %v345_v12 = vld [vmem:[%s3251_s25 + $0x3f0] sm:$0xff] }
  0x5d   : > { %2807 = vmatmul.mubr.msk.f32.gmra.mrb[30].mxu0 %vm357_vm0, %v250_v13  ;;  %2903 = vmatmul.mubr.msk.f32.gmra.mrb[30].mxu1 %vm357_vm0, %v314_v14  ;;  %v282_v13 = vld [vmem:[%s3251_s25 + $0x1f8] sm:$0xff] }
  0x5e   : > { %2809 = vmatprep.mubr.msk.f32.mxu0 %vm357_vm0, %v251_v15  ;;  %2905 = vmatprep.mubr.msk.f32.mxu1 %vm357_vm0, %v315_v16  ;;  %v346_v14 = vld [vmem:[%s3251_s25 + $0x3f8] sm:$0xff]  ;;  %v3519_v15 = vld [vmem:[%s4258_s2] ss:$0 sm:$0xff]  ;;  %s4057_s25 = scalar_lea.vmem (%p3215_p4), %s4260_s4, %s2600_s20  }
  0x61   : > { %2810 = vmatmul.mubr.msk.f32.gmra.mrb[32].mxu0 %vm357_vm0, %v252_v17  ;;  %2906 = vmatmul.mubr.msk.f32.gmra.mrb[32].mxu1 %vm357_vm0, %v316_v18  ;;  %v3524_v17 = vld [vmem:[%s4259_s3] ss:$0 sm:$0xff] }
  0x62   : > { %2812 = vmatprep.mubr.msk.f32.mxu0 %vm357_vm0, %v253_v19  ;;  %2908 = vmatprep.mubr.msk.f32.mxu1 %vm357_vm0, %v317_v20 }
  0x65   : > { %2813 = vmatmul.mubr.msk.f32.gmra.mrb[34].mxu0 %vm357_vm0, %v254_v21  ;;  %2909 = vmatmul.mubr.msk.f32.gmra.mrb[34].mxu1 %vm357_vm0, %v318_v22 }
  0x66   : > { %2815 = vmatprep.mubr.msk.f32.mxu0 %vm357_vm0, %v255_v23  ;;  %2911 = vmatprep.mubr.msk.f32.mxu1 %vm357_vm0, %v319_v24 }
  0x69   : > { %2816 = vmatmul.mubr.msk.f32.gmra.mrb[36].mxu0 %vm357_vm0, %v256_v25  ;;  %2912 = vmatmul.mubr.msk.f32.gmra.mrb[36].mxu1 %vm357_vm0, %v320_v26 }
  0x6a   : > { %2818 = vmatprep.mubr.msk.f32.mxu0 %vm357_vm0, %v257_v27  ;;  %2914 = vmatprep.mubr.msk.f32.mxu1 %vm357_vm0, %v321_v28 }
  0x6d   : > { %2819 = vmatmul.mubr.msk.f32.gmra.mrb[38].mxu0 %vm357_vm0, %v258_v29  ;;  %2915 = vmatmul.mubr.msk.f32.gmra.mrb[38].mxu1 %vm357_vm0, %v322_v30 }
  0x6e   : > { %2821 = vmatprep.mubr.msk.f32.mxu0 %vm357_vm0, %v259_v31  ;;  %2917 = vmatprep.mubr.msk.f32.mxu1 %vm357_vm0, %v323_v32 }
  0x71   : > { %2822 = vmatmul.mubr.msk.f32.gmra.mrb[40].mxu0 %vm357_vm0, %v260_v33  ;;  %2918 = vmatmul.mubr.msk.f32.gmra.mrb[40].mxu1 %vm357_vm0, %v324_v34 }
  0x72   : > { %2824 = vmatprep.mubr.msk.f32.mxu0 %vm357_vm0, %v261_v35  ;;  %2920 = vmatprep.mubr.msk.f32.mxu1 %vm357_vm0, %v325_v36 }
  0x75   : > { %2825 = vmatmul.mubr.msk.f32.gmra.mrb[42].mxu0 %vm357_vm0, %v262_v37  ;;  %2921 = vmatmul.mubr.msk.f32.gmra.mrb[42].mxu1 %vm357_vm0, %v326_v38 }
  0x76   : > { %2827 = vmatprep.mubr.msk.f32.mxu0 %vm357_vm0, %v263_v39  ;;  %2923 = vmatprep.mubr.msk.f32.mxu1 %vm357_vm0, %v327_v40 }
  0x79   : > { %2828 = vmatmul.mubr.msk.f32.gmra.mrb[44].mxu0 %vm357_vm0, %v264_v41  ;;  %2924 = vmatmul.mubr.msk.f32.gmra.mrb[44].mxu1 %vm357_vm0, %v328_v42 }
  0x7a   : > { %2830 = vmatprep.mubr.msk.f32.mxu0 %vm357_vm0, %v265_v43  ;;  %2926 = vmatprep.mubr.msk.f32.mxu1 %vm357_vm0, %v329_v44 }
  0x7d   : > { %2831 = vmatmul.mubr.msk.f32.gmra.mrb[46].mxu0 %vm357_vm0, %v266_v45  ;;  %2927 = vmatmul.mubr.msk.f32.gmra.mrb[46].mxu1 %vm357_vm0, %v330_v46 }
  0x7e   : > { %2833 = vmatprep.mubr.msk.f32.mxu0 %vm357_vm0, %v267_v47  ;;  %2929 = vmatprep.mubr.msk.f32.mxu1 %vm357_vm0, %v331_v48 }
  0x81   : > { %2834 = vmatmul.mubr.msk.f32.gmra.mrb[48].mxu0 %vm357_vm0, %v268_v49  ;;  %2930 = vmatmul.mubr.msk.f32.gmra.mrb[48].mxu1 %vm357_vm0, %v332_v50 }
  0x82   : > { %2836 = vmatprep.mubr.msk.f32.mxu0 %vm357_vm0, %v269_v51  ;;  %2932 = vmatprep.mubr.msk.f32.mxu1 %vm357_vm0, %v333_v52 }
  0x85   : > { %2837 = vmatmul.mubr.msk.f32.gmra.mrb[50].mxu0 %vm357_vm0, %v270_v53  ;;  %2933 = vmatmul.mubr.msk.f32.gmra.mrb[50].mxu1 %vm357_vm0, %v334_v54 }
  0x86   : > { %2839 = vmatprep.mubr.msk.f32.mxu0 %vm357_vm0, %v271_v55  ;;  %2935 = vmatprep.mubr.msk.f32.mxu1 %vm357_vm0, %v335_v56 }
  0x89   : > { %2840 = vmatmul.mubr.msk.f32.gmra.mrb[52].mxu0 %vm357_vm0, %v272_v57  ;;  %2936 = vmatmul.mubr.msk.f32.gmra.mrb[52].mxu1 %vm357_vm0, %v336_v58 }
  0x8a   : > { %2842 = vmatprep.mubr.msk.f32.mxu0 %vm357_vm0, %v273_v59  ;;  %2938 = vmatprep.mubr.msk.f32.mxu1 %vm357_vm0, %v337_v60 }
  0x8d   : > { %2843 = vmatmul.mubr.msk.f32.gmra.mrb[54].mxu0 %vm357_vm0, %v274_v61  ;;  %2939 = vmatmul.mubr.msk.f32.gmra.mrb[54].mxu1 %vm357_vm0, %v338_v62 }
  0x8e   : > { %2845 = vmatprep.mubr.msk.f32.mxu0 %vm357_vm0, %v275_v63  ;;  %2941 = vmatprep.mubr.msk.f32.mxu1 %vm357_vm0, %v339_v0 }
  0x91   : > { %2846 = vmatmul.mubr.msk.f32.gmra.mrb[56].mxu0 %vm357_vm0, %v276_v1  ;;  %2942 = vmatmul.mubr.msk.f32.gmra.mrb[56].mxu1 %vm357_vm0, %v340_v2 }
  0x92   : > { %2848 = vmatprep.mubr.msk.f32.mxu0 %vm357_vm0, %v277_v3  ;;  %2944 = vmatprep.mubr.msk.f32.mxu1 %vm357_vm0, %v341_v4 }
  0x95   : > { %2849 = vmatmul.mubr.msk.f32.gmra.mrb[58].mxu0 %vm357_vm0, %v278_v5  ;;  %2945 = vmatmul.mubr.msk.f32.gmra.mrb[58].mxu1 %vm357_vm0, %v342_v6 }
  0x96   : > { %2851 = vmatprep.mubr.msk.f32.mxu0 %vm357_vm0, %v279_v7  ;;  %2947 = vmatprep.mubr.msk.f32.mxu1 %vm357_vm0, %v343_v8 }
  0x99   : > { %2852 = vmatmul.mubr.msk.f32.gmra.mrb[60].mxu0 %vm357_vm0, %v280_v9  ;;  %2948 = vmatmul.mubr.msk.f32.gmra.mrb[60].mxu1 %vm357_vm0, %v344_v10 }
  0x9a   : > { %2854 = vmatprep.mubr.msk.f32.mxu0 %vm357_vm0, %v281_v11  ;;  %2950 = vmatprep.mubr.msk.f32.mxu1 %vm357_vm0, %v345_v12 }
  0x9d   : > { %2855 = vmatmul.mubr.msk.f32.gmra.mrb[62].mxu0 %vm357_vm0, %v282_v13  ;;  %2951 = vmatmul.mubr.msk.f32.gmra.mrb[62].mxu1 %vm357_vm0, %v346_v14 }
  0xf4   : > { %v2763_v16 = vpop.f32.mrb[0].mxu0  ;;  %v2859_v18 = vpop.f32.mrb[0].mxu1 }
  0xf5   : > { %v1459_v19 = vmul.f32 %v2763_v16, %v3519_v15  ;;  %v1523_v20 = vmul.f32 %v2859_v18, %v3519_v15  ;;  %v812_v21 = vpop.f32.mrb[1].mxu0  ;;  %v1132_v22 = vpop.f32.mrb[1].mxu1 }
  0xf6   : > { %v1458_v23 = vmul.f32 %v3519_v15, %v812_v21  ;;  %v1522_v24 = vmul.f32 %v3519_v15, %v1132_v22 }
  0xf7   : > { %v1594_v25 = vadd.f32 %v3524_v17, %v1459_v19  ;;  %v1658_v26 = vadd.f32 %v3524_v17, %v1523_v20 }
  0xf8   : > { %v1593_v27 = vadd.f32 %v3524_v17, %v1458_v23  ;;  %v1657_v28 = vadd.f32 %v3524_v17, %v1522_v24  ;;  %v2766_v29 = vpop.f32.mrb[2].mxu0  ;;  %v2862_v30 = vpop.f32.mrb[2].mxu1 }
  0xf9   : > { %v1722_v31 = vmax.f32 %v1594_v25, 0.0  ;;  %v1786_v32 = vmax.f32 %v1658_v26, 0.0  ;;  %v1461_v33 = vmul.f32 %v2766_v29, %v3519_v15  ;;  %v1525_v34 = vmul.f32 %v2862_v30, %v3519_v15  ;;  %v822_v35 = vpop.f32.mrb[3].mxu0  ;;  %v1142_v36 = vpop.f32.mrb[3].mxu1 }
  0xfa   : > { %v1721_v37 = vmax.f32 %v1593_v27, 0.0  ;;  %v1785_v38 = vmax.f32 %v1657_v28, 0.0  ;;  %v1460_v39 = vmul.f32 %v3519_v15, %v822_v35  ;;  %v1524_v40 = vmul.f32 %v3519_v15, %v1142_v36 }
  0xfb   : > { %1851 = vst.msk [vmem:[%s3538_s15 + $0x8] sm:$0xff] %vm1849_vm4, %v1722_v31  ;;  %1915 = vst.msk [vmem:[%s3538_s15 + $0x208] sm:$0xff] %vm1849_vm4, %v1786_v32  ;;  %v1596_v41 = vadd.f32 %v3524_v17, %v1461_v33  ;;  %v1660_v42 = vadd.f32 %v3524_v17, %v1525_v34 }
  0xfc   : > { %1850 = vst.msk [vmem:[%s3538_s15] sm:$0xff] %vm1849_vm4, %v1721_v37  ;;  %1914 = vst.msk [vmem:[%s3538_s15 + $0x200] sm:$0xff] %vm1849_vm4, %v1785_v38  ;;  %v1595_v43 = vadd.f32 %v3524_v17, %v1460_v39  ;;  %v1659_v44 = vadd.f32 %v3524_v17, %v1524_v40  ;;  %v2769_v45 = vpop.f32.mrb[4].mxu0  ;;  %v2865_v46 = vpop.f32.mrb[4].mxu1 }
  0xfd   : > { %v1724_v47 = vmax.f32 %v1596_v41, 0.0  ;;  %v1788_v48 = vmax.f32 %v1660_v42, 0.0  ;;  %v1463_v49 = vmul.f32 %v2769_v45, %v3519_v15  ;;  %v1527_v50 = vmul.f32 %v2865_v46, %v3519_v15  ;;  %v832_v51 = vpop.f32.mrb[5].mxu0  ;;  %v1152_v52 = vpop.f32.mrb[5].mxu1 }
  0xfe   : > { %v1723_v53 = vmax.f32 %v1595_v43, 0.0  ;;  %v1787_v54 = vmax.f32 %v1659_v44, 0.0  ;;  %v1462_v55 = vmul.f32 %v3519_v15, %v832_v51  ;;  %v1526_v56 = vmul.f32 %v3519_v15, %v1152_v52 }
  0xff   : > { %1853 = vst.msk [vmem:[%s3538_s15 + $0x18] sm:$0xff] %vm1849_vm4, %v1724_v47  ;;  %1917 = vst.msk [vmem:[%s3538_s15 + $0x218] sm:$0xff] %vm1849_vm4, %v1788_v48  ;;  %v1598_v57 = vadd.f32 %v3524_v17, %v1463_v49  ;;  %v1662_v58 = vadd.f32 %v3524_v17, %v1527_v50 }
 0x100   : > { %1852 = vst.msk [vmem:[%s3538_s15 + $0x10] sm:$0xff] %vm1849_vm4, %v1723_v53  ;;  %1916 = vst.msk [vmem:[%s3538_s15 + $0x210] sm:$0xff] %vm1849_vm4, %v1787_v54  ;;  %v1597_v59 = vadd.f32 %v3524_v17, %v1462_v55  ;;  %v1661_v60 = vadd.f32 %v3524_v17, %v1526_v56  ;;  %v2772_v61 = vpop.f32.mrb[6].mxu0  ;;  %v2868_v62 = vpop.f32.mrb[6].mxu1 }
 0x101   : > { %v1726_v63 = vmax.f32 %v1598_v57, 0.0  ;;  %v1790_v0 = vmax.f32 %v1662_v58, 0.0  ;;  %v1465_v1 = vmul.f32 %v2772_v61, %v3519_v15  ;;  %v1529_v2 = vmul.f32 %v2868_v62, %v3519_v15  ;;  %v842_v3 = vpop.f32.mrb[7].mxu0  ;;  %v1162_v4 = vpop.f32.mrb[7].mxu1 }
 0x102   : > { %v1725_v5 = vmax.f32 %v1597_v59, 0.0  ;;  %v1789_v6 = vmax.f32 %v1661_v60, 0.0  ;;  %v1464_v7 = vmul.f32 %v3519_v15, %v842_v3  ;;  %v1528_v8 = vmul.f32 %v3519_v15, %v1162_v4 }
 0x103   : > { %1855 = vst.msk [vmem:[%s3538_s15 + $0x28] sm:$0xff] %vm1849_vm4, %v1726_v63  ;;  %1919 = vst.msk [vmem:[%s3538_s15 + $0x228] sm:$0xff] %vm1849_vm4, %v1790_v0  ;;  %v1600_v9 = vadd.f32 %v3524_v17, %v1465_v1  ;;  %v1664_v10 = vadd.f32 %v3524_v17, %v1529_v2 }
 0x104   : > { %1854 = vst.msk [vmem:[%s3538_s15 + $0x20] sm:$0xff] %vm1849_vm4, %v1725_v5  ;;  %1918 = vst.msk [vmem:[%s3538_s15 + $0x220] sm:$0xff] %vm1849_vm4, %v1789_v6  ;;  %v1599_v11 = vadd.f32 %v3524_v17, %v1464_v7  ;;  %v1663_v12 = vadd.f32 %v3524_v17, %v1528_v8  ;;  %v2775_v13 = vpop.f32.mrb[8].mxu0  ;;  %v2871_v14 = vpop.f32.mrb[8].mxu1 }
 0x105   : > { %v1728_v16 = vmax.f32 %v1600_v9, 0.0  ;;  %v1792_v18 = vmax.f32 %v1664_v10, 0.0  ;;  %v1467_v19 = vmul.f32 %v2775_v13, %v3519_v15  ;;  %v1531_v20 = vmul.f32 %v2871_v14, %v3519_v15  ;;  %v852_v21 = vpop.f32.mrb[9].mxu0  ;;  %v1172_v22 = vpop.f32.mrb[9].mxu1 }
 0x106   : > { %v1727_v23 = vmax.f32 %v1599_v11, 0.0  ;;  %v1791_v24 = vmax.f32 %v1663_v12, 0.0  ;;  %v1466_v25 = vmul.f32 %v3519_v15, %v852_v21  ;;  %v1530_v26 = vmul.f32 %v3519_v15, %v1172_v22 }
 0x107   : > { %1857 = vst.msk [vmem:[%s3538_s15 + $0x38] sm:$0xff] %vm1849_vm4, %v1728_v16  ;;  %1921 = vst.msk [vmem:[%s3538_s15 + $0x238] sm:$0xff] %vm1849_vm4, %v1792_v18  ;;  %v1602_v27 = vadd.f32 %v3524_v17, %v1467_v19  ;;  %v1666_v28 = vadd.f32 %v3524_v17, %v1531_v20 }
 0x108   : > { %1856 = vst.msk [vmem:[%s3538_s15 + $0x30] sm:$0xff] %vm1849_vm4, %v1727_v23  ;;  %1920 = vst.msk [vmem:[%s3538_s15 + $0x230] sm:$0xff] %vm1849_vm4, %v1791_v24  ;;  %v1601_v29 = vadd.f32 %v3524_v17, %v1466_v25  ;;  %v1665_v30 = vadd.f32 %v3524_v17, %v1530_v26  ;;  %v2778_v31 = vpop.f32.mrb[10].mxu0  ;;  %v2874_v32 = vpop.f32.mrb[10].mxu1 }
 0x109   : > { %v1730_v33 = vmax.f32 %v1602_v27, 0.0  ;;  %v1794_v34 = vmax.f32 %v1666_v28, 0.0  ;;  %v1469_v35 = vmul.f32 %v2778_v31, %v3519_v15  ;;  %v1533_v36 = vmul.f32 %v2874_v32, %v3519_v15  ;;  %v862_v37 = vpop.f32.mrb[11].mxu0  ;;  %v1182_v38 = vpop.f32.mrb[11].mxu1 }
 0x10a   : > { %v1729_v39 = vmax.f32 %v1601_v29, 0.0  ;;  %v1793_v40 = vmax.f32 %v1665_v30, 0.0  ;;  %v1468_v41 = vmul.f32 %v3519_v15, %v862_v37  ;;  %v1532_v42 = vmul.f32 %v3519_v15, %v1182_v38 }
 0x10b   : > { %1859 = vst.msk [vmem:[%s3538_s15 + $0x48] sm:$0xff] %vm1849_vm4, %v1730_v33  ;;  %1923 = vst.msk [vmem:[%s3538_s15 + $0x248] sm:$0xff] %vm1849_vm4, %v1794_v34  ;;  %v1604_v43 = vadd.f32 %v3524_v17, %v1469_v35  ;;  %v1668_v44 = vadd.f32 %v3524_v17, %v1533_v36 }
 0x10c   : > { %1858 = vst.msk [vmem:[%s3538_s15 + $0x40] sm:$0xff] %vm1849_vm4, %v1729_v39  ;;  %1922 = vst.msk [vmem:[%s3538_s15 + $0x240] sm:$0xff] %vm1849_vm4, %v1793_v40  ;;  %v1603_v45 = vadd.f32 %v3524_v17, %v1468_v41  ;;  %v1667_v46 = vadd.f32 %v3524_v17, %v1532_v42  ;;  %v2781_v47 = vpop.f32.mrb[12].mxu0  ;;  %v2877_v48 = vpop.f32.mrb[12].mxu1 }
 0x10d   : > { %v1732_v49 = vmax.f32 %v1604_v43, 0.0  ;;  %v1796_v50 = vmax.f32 %v1668_v44, 0.0  ;;  %v1471_v51 = vmul.f32 %v2781_v47, %v3519_v15  ;;  %v1535_v52 = vmul.f32 %v2877_v48, %v3519_v15  ;;  %v872_v53 = vpop.f32.mrb[13].mxu0  ;;  %v1192_v54 = vpop.f32.mrb[13].mxu1 }
 0x10e   : > { %v1731_v55 = vmax.f32 %v1603_v45, 0.0  ;;  %v1795_v56 = vmax.f32 %v1667_v46, 0.0  ;;  %v1470_v57 = vmul.f32 %v3519_v15, %v872_v53  ;;  %v1534_v58 = vmul.f32 %v3519_v15, %v1192_v54 }
 0x10f   : > { %1861 = vst.msk [vmem:[%s3538_s15 + $0x58] sm:$0xff] %vm1849_vm4, %v1732_v49  ;;  %1925 = vst.msk [vmem:[%s3538_s15 + $0x258] sm:$0xff] %vm1849_vm4, %v1796_v50  ;;  %v1606_v59 = vadd.f32 %v3524_v17, %v1471_v51  ;;  %v1670_v60 = vadd.f32 %v3524_v17, %v1535_v52 }
 0x110   : > { %1860 = vst.msk [vmem:[%s3538_s15 + $0x50] sm:$0xff] %vm1849_vm4, %v1731_v55  ;;  %1924 = vst.msk [vmem:[%s3538_s15 + $0x250] sm:$0xff] %vm1849_vm4, %v1795_v56  ;;  %v1605_v61 = vadd.f32 %v3524_v17, %v1470_v57  ;;  %v1669_v62 = vadd.f32 %v3524_v17, %v1534_v58  ;;  %v2784_v63 = vpop.f32.mrb[14].mxu0  ;;  %v2880_v0 = vpop.f32.mrb[14].mxu1 }
 0x111   : > { %v1734_v1 = vmax.f32 %v1606_v59, 0.0  ;;  %v1798_v2 = vmax.f32 %v1670_v60, 0.0  ;;  %v1473_v3 = vmul.f32 %v2784_v63, %v3519_v15  ;;  %v1537_v4 = vmul.f32 %v2880_v0, %v3519_v15  ;;  %v882_v5 = vpop.f32.mrb[15].mxu0  ;;  %v1202_v6 = vpop.f32.mrb[15].mxu1 }
 0x112   : > { %v1733_v7 = vmax.f32 %v1605_v61, 0.0  ;;  %v1797_v8 = vmax.f32 %v1669_v62, 0.0  ;;  %v1472_v9 = vmul.f32 %v3519_v15, %v882_v5  ;;  %v1536_v10 = vmul.f32 %v3519_v15, %v1202_v6 }
 0x113   : > { %1863 = vst.msk [vmem:[%s3538_s15 + $0x68] sm:$0xff] %vm1849_vm4, %v1734_v1  ;;  %1927 = vst.msk [vmem:[%s3538_s15 + $0x268] sm:$0xff] %vm1849_vm4, %v1798_v2  ;;  %v1608_v11 = vadd.f32 %v3524_v17, %v1473_v3  ;;  %v1672_v12 = vadd.f32 %v3524_v17, %v1537_v4 }
 0x114   : > { %1862 = vst.msk [vmem:[%s3538_s15 + $0x60] sm:$0xff] %vm1849_vm4, %v1733_v7  ;;  %1926 = vst.msk [vmem:[%s3538_s15 + $0x260] sm:$0xff] %vm1849_vm4, %v1797_v8  ;;  %v1607_v13 = vadd.f32 %v3524_v17, %v1472_v9  ;;  %v1671_v14 = vadd.f32 %v3524_v17, %v1536_v10  ;;  %v2787_v16 = vpop.f32.mrb[16].mxu0  ;;  %v2883_v18 = vpop.f32.mrb[16].mxu1 }
 0x115   : > { %v1736_v19 = vmax.f32 %v1608_v11, 0.0  ;;  %v1800_v20 = vmax.f32 %v1672_v12, 0.0  ;;  %v1475_v21 = vmul.f32 %v2787_v16, %v3519_v15  ;;  %v1539_v22 = vmul.f32 %v2883_v18, %v3519_v15  ;;  %v892_v23 = vpop.f32.mrb[17].mxu0  ;;  %v1212_v24 = vpop.f32.mrb[17].mxu1 }
 0x116   : > { %v1735_v25 = vmax.f32 %v1607_v13, 0.0  ;;  %v1799_v26 = vmax.f32 %v1671_v14, 0.0  ;;  %v1474_v27 = vmul.f32 %v3519_v15, %v892_v23  ;;  %v1538_v28 = vmul.f32 %v3519_v15, %v1212_v24 }
 0x117   : > { %1865 = vst.msk [vmem:[%s3538_s15 + $0x78] sm:$0xff] %vm1849_vm4, %v1736_v19  ;;  %1929 = vst.msk [vmem:[%s3538_s15 + $0x278] sm:$0xff] %vm1849_vm4, %v1800_v20  ;;  %v1610_v29 = vadd.f32 %v3524_v17, %v1475_v21  ;;  %v1674_v30 = vadd.f32 %v3524_v17, %v1539_v22 }
 0x118   : > { %1864 = vst.msk [vmem:[%s3538_s15 + $0x70] sm:$0xff] %vm1849_vm4, %v1735_v25  ;;  %1928 = vst.msk [vmem:[%s3538_s15 + $0x270] sm:$0xff] %vm1849_vm4, %v1799_v26  ;;  %v1609_v31 = vadd.f32 %v3524_v17, %v1474_v27  ;;  %v1673_v32 = vadd.f32 %v3524_v17, %v1538_v28  ;;  %v2790_v33 = vpop.f32.mrb[18].mxu0  ;;  %v2886_v34 = vpop.f32.mrb[18].mxu1 }
 0x119   : > { %v1738_v35 = vmax.f32 %v1610_v29, 0.0  ;;  %v1802_v36 = vmax.f32 %v1674_v30, 0.0  ;;  %v1477_v37 = vmul.f32 %v2790_v33, %v3519_v15  ;;  %v1541_v38 = vmul.f32 %v2886_v34, %v3519_v15  ;;  %v902_v39 = vpop.f32.mrb[19].mxu0  ;;  %v1222_v40 = vpop.f32.mrb[19].mxu1 }
 0x11a   : > { %v1737_v41 = vmax.f32 %v1609_v31, 0.0  ;;  %v1801_v42 = vmax.f32 %v1673_v32, 0.0  ;;  %v1476_v43 = vmul.f32 %v3519_v15, %v902_v39  ;;  %v1540_v44 = vmul.f32 %v3519_v15, %v1222_v40 }
 0x11b   : > { %1867 = vst.msk [vmem:[%s3538_s15 + $0x88] sm:$0xff] %vm1849_vm4, %v1738_v35  ;;  %1931 = vst.msk [vmem:[%s3538_s15 + $0x288] sm:$0xff] %vm1849_vm4, %v1802_v36  ;;  %v1612_v45 = vadd.f32 %v3524_v17, %v1477_v37  ;;  %v1676_v46 = vadd.f32 %v3524_v17, %v1541_v38 }
 0x11c   : > { %1866 = vst.msk [vmem:[%s3538_s15 + $0x80] sm:$0xff] %vm1849_vm4, %v1737_v41  ;;  %1930 = vst.msk [vmem:[%s3538_s15 + $0x280] sm:$0xff] %vm1849_vm4, %v1801_v42  ;;  %v1611_v47 = vadd.f32 %v3524_v17, %v1476_v43  ;;  %v1675_v48 = vadd.f32 %v3524_v17, %v1540_v44  ;;  %v2793_v49 = vpop.f32.mrb[20].mxu0  ;;  %v2889_v50 = vpop.f32.mrb[20].mxu1 }
 0x11d   : > { %v1740_v51 = vmax.f32 %v1612_v45, 0.0  ;;  %v1804_v52 = vmax.f32 %v1676_v46, 0.0  ;;  %v1479_v53 = vmul.f32 %v2793_v49, %v3519_v15  ;;  %v1543_v54 = vmul.f32 %v2889_v50, %v3519_v15  ;;  %v912_v55 = vpop.f32.mrb[21].mxu0  ;;  %v1232_v56 = vpop.f32.mrb[21].mxu1 }
 0x11e   : > { %v1739_v57 = vmax.f32 %v1611_v47, 0.0  ;;  %v1803_v58 = vmax.f32 %v1675_v48, 0.0  ;;  %v1478_v59 = vmul.f32 %v3519_v15, %v912_v55  ;;  %v1542_v60 = vmul.f32 %v3519_v15, %v1232_v56 }
 0x11f   : > { %1869 = vst.msk [vmem:[%s3538_s15 + $0x98] sm:$0xff] %vm1849_vm4, %v1740_v51  ;;  %1933 = vst.msk [vmem:[%s3538_s15 + $0x298] sm:$0xff] %vm1849_vm4, %v1804_v52  ;;  %v1614_v61 = vadd.f32 %v3524_v17, %v1479_v53  ;;  %v1678_v62 = vadd.f32 %v3524_v17, %v1543_v54 }
 0x120   : > { %1868 = vst.msk [vmem:[%s3538_s15 + $0x90] sm:$0xff] %vm1849_vm4, %v1739_v57  ;;  %1932 = vst.msk [vmem:[%s3538_s15 + $0x290] sm:$0xff] %vm1849_vm4, %v1803_v58  ;;  %v1613_v63 = vadd.f32 %v3524_v17, %v1478_v59  ;;  %v1677_v0 = vadd.f32 %v3524_v17, %v1542_v60  ;;  %v2796_v1 = vpop.f32.mrb[22].mxu0  ;;  %v2892_v2 = vpop.f32.mrb[22].mxu1 }
 0x121   : > { %v1742_v3 = vmax.f32 %v1614_v61, 0.0  ;;  %v1806_v4 = vmax.f32 %v1678_v62, 0.0  ;;  %v1481_v5 = vmul.f32 %v2796_v1, %v3519_v15  ;;  %v1545_v6 = vmul.f32 %v2892_v2, %v3519_v15  ;;  %v922_v7 = vpop.f32.mrb[23].mxu0  ;;  %v1242_v8 = vpop.f32.mrb[23].mxu1 }
 0x122   : > { %v1741_v9 = vmax.f32 %v1613_v63, 0.0  ;;  %v1805_v10 = vmax.f32 %v1677_v0, 0.0  ;;  %v1480_v11 = vmul.f32 %v3519_v15, %v922_v7  ;;  %v1544_v12 = vmul.f32 %v3519_v15, %v1242_v8 }
 0x123   : > { %1871 = vst.msk [vmem:[%s3538_s15 + $0xa8] sm:$0xff] %vm1849_vm4, %v1742_v3  ;;  %1935 = vst.msk [vmem:[%s3538_s15 + $0x2a8] sm:$0xff] %vm1849_vm4, %v1806_v4  ;;  %v1616_v13 = vadd.f32 %v3524_v17, %v1481_v5  ;;  %v1680_v14 = vadd.f32 %v3524_v17, %v1545_v6 }
 0x124   : > { %1870 = vst.msk [vmem:[%s3538_s15 + $0xa0] sm:$0xff] %vm1849_vm4, %v1741_v9  ;;  %1934 = vst.msk [vmem:[%s3538_s15 + $0x2a0] sm:$0xff] %vm1849_vm4, %v1805_v10  ;;  %v1615_v16 = vadd.f32 %v3524_v17, %v1480_v11  ;;  %v1679_v18 = vadd.f32 %v3524_v17, %v1544_v12  ;;  %v2799_v19 = vpop.f32.mrb[24].mxu0  ;;  %v2895_v20 = vpop.f32.mrb[24].mxu1 }
 0x125   : > { %v1744_v21 = vmax.f32 %v1616_v13, 0.0  ;;  %v1808_v22 = vmax.f32 %v1680_v14, 0.0  ;;  %v1483_v23 = vmul.f32 %v2799_v19, %v3519_v15  ;;  %v1547_v24 = vmul.f32 %v2895_v20, %v3519_v15  ;;  %v932_v25 = vpop.f32.mrb[25].mxu0  ;;  %v1252_v26 = vpop.f32.mrb[25].mxu1 }
 0x126   : > { %v1743_v27 = vmax.f32 %v1615_v16, 0.0  ;;  %v1807_v28 = vmax.f32 %v1679_v18, 0.0  ;;  %v1482_v29 = vmul.f32 %v3519_v15, %v932_v25  ;;  %v1546_v30 = vmul.f32 %v3519_v15, %v1252_v26 }
 0x127   : > { %1873 = vst.msk [vmem:[%s3538_s15 + $0xb8] sm:$0xff] %vm1849_vm4, %v1744_v21  ;;  %1937 = vst.msk [vmem:[%s3538_s15 + $0x2b8] sm:$0xff] %vm1849_vm4, %v1808_v22  ;;  %v1618_v31 = vadd.f32 %v3524_v17, %v1483_v23  ;;  %v1682_v32 = vadd.f32 %v3524_v17, %v1547_v24 }
 0x128   : > { %1872 = vst.msk [vmem:[%s3538_s15 + $0xb0] sm:$0xff] %vm1849_vm4, %v1743_v27  ;;  %1936 = vst.msk [vmem:[%s3538_s15 + $0x2b0] sm:$0xff] %vm1849_vm4, %v1807_v28  ;;  %v1617_v33 = vadd.f32 %v3524_v17, %v1482_v29  ;;  %v1681_v34 = vadd.f32 %v3524_v17, %v1546_v30  ;;  %v2802_v35 = vpop.f32.mrb[26].mxu0  ;;  %v2898_v36 = vpop.f32.mrb[26].mxu1 }
 0x129   : > { %v1746_v37 = vmax.f32 %v1618_v31, 0.0  ;;  %v1810_v38 = vmax.f32 %v1682_v32, 0.0  ;;  %v1485_v39 = vmul.f32 %v2802_v35, %v3519_v15  ;;  %v1549_v40 = vmul.f32 %v2898_v36, %v3519_v15  ;;  %v942_v41 = vpop.f32.mrb[27].mxu0  ;;  %v1262_v42 = vpop.f32.mrb[27].mxu1 }
 0x12a   : > { %v1745_v43 = vmax.f32 %v1617_v33, 0.0  ;;  %v1809_v44 = vmax.f32 %v1681_v34, 0.0  ;;  %v1484_v45 = vmul.f32 %v3519_v15, %v942_v41  ;;  %v1548_v46 = vmul.f32 %v3519_v15, %v1262_v42 }
 0x12b   : > { %1875 = vst.msk [vmem:[%s3538_s15 + $0xc8] sm:$0xff] %vm1849_vm4, %v1746_v37  ;;  %1939 = vst.msk [vmem:[%s3538_s15 + $0x2c8] sm:$0xff] %vm1849_vm4, %v1810_v38  ;;  %v1620_v47 = vadd.f32 %v3524_v17, %v1485_v39  ;;  %v1684_v48 = vadd.f32 %v3524_v17, %v1549_v40 }
 0x12c   : > { %1874 = vst.msk [vmem:[%s3538_s15 + $0xc0] sm:$0xff] %vm1849_vm4, %v1745_v43  ;;  %1938 = vst.msk [vmem:[%s3538_s15 + $0x2c0] sm:$0xff] %vm1849_vm4, %v1809_v44  ;;  %v1619_v49 = vadd.f32 %v3524_v17, %v1484_v45  ;;  %v1683_v50 = vadd.f32 %v3524_v17, %v1548_v46  ;;  %v2805_v51 = vpop.f32.mrb[28].mxu0  ;;  %v2901_v52 = vpop.f32.mrb[28].mxu1 }
 0x12d   : > { %v1748_v53 = vmax.f32 %v1620_v47, 0.0  ;;  %v1812_v54 = vmax.f32 %v1684_v48, 0.0  ;;  %v1487_v55 = vmul.f32 %v2805_v51, %v3519_v15  ;;  %v1551_v56 = vmul.f32 %v2901_v52, %v3519_v15  ;;  %v952_v57 = vpop.f32.mrb[29].mxu0  ;;  %v1272_v58 = vpop.f32.mrb[29].mxu1 }
 0x12e   : > { %v1747_v59 = vmax.f32 %v1619_v49, 0.0  ;;  %v1811_v60 = vmax.f32 %v1683_v50, 0.0  ;;  %v1486_v61 = vmul.f32 %v3519_v15, %v952_v57  ;;  %v1550_v62 = vmul.f32 %v3519_v15, %v1272_v58 }
 0x12f   : > { %1877 = vst.msk [vmem:[%s3538_s15 + $0xd8] sm:$0xff] %vm1849_vm4, %v1748_v53  ;;  %1941 = vst.msk [vmem:[%s3538_s15 + $0x2d8] sm:$0xff] %vm1849_vm4, %v1812_v54  ;;  %v1622_v63 = vadd.f32 %v3524_v17, %v1487_v55  ;;  %v1686_v0 = vadd.f32 %v3524_v17, %v1551_v56 }
 0x130   : > { %1876 = vst.msk [vmem:[%s3538_s15 + $0xd0] sm:$0xff] %vm1849_vm4, %v1747_v59  ;;  %1940 = vst.msk [vmem:[%s3538_s15 + $0x2d0] sm:$0xff] %vm1849_vm4, %v1811_v60  ;;  %v1621_v1 = vadd.f32 %v3524_v17, %v1486_v61  ;;  %v1685_v2 = vadd.f32 %v3524_v17, %v1550_v62  ;;  %v2808_v3 = vpop.f32.mrb[30].mxu0  ;;  %v2904_v4 = vpop.f32.mrb[30].mxu1 }
 0x131   : > { %v1750_v5 = vmax.f32 %v1622_v63, 0.0  ;;  %v1814_v6 = vmax.f32 %v1686_v0, 0.0  ;;  %v1489_v7 = vmul.f32 %v2808_v3, %v3519_v15  ;;  %v1553_v8 = vmul.f32 %v2904_v4, %v3519_v15  ;;  %v962_v9 = vpop.f32.mrb[31].mxu0  ;;  %v1282_v10 = vpop.f32.mrb[31].mxu1 }
 0x132   : > { %v1749_v11 = vmax.f32 %v1621_v1, 0.0  ;;  %v1813_v12 = vmax.f32 %v1685_v2, 0.0  ;;  %v1488_v13 = vmul.f32 %v3519_v15, %v962_v9  ;;  %v1552_v14 = vmul.f32 %v3519_v15, %v1282_v10 }
 0x133   : > { %1879 = vst.msk [vmem:[%s3538_s15 + $0xe8] sm:$0xff] %vm1849_vm4, %v1750_v5  ;;  %1943 = vst.msk [vmem:[%s3538_s15 + $0x2e8] sm:$0xff] %vm1849_vm4, %v1814_v6  ;;  %v1624_v16 = vadd.f32 %v3524_v17, %v1489_v7  ;;  %v1688_v18 = vadd.f32 %v3524_v17, %v1553_v8 }
 0x134   : > { %1878 = vst.msk [vmem:[%s3538_s15 + $0xe0] sm:$0xff] %vm1849_vm4, %v1749_v11  ;;  %1942 = vst.msk [vmem:[%s3538_s15 + $0x2e0] sm:$0xff] %vm1849_vm4, %v1813_v12  ;;  %v1623_v19 = vadd.f32 %v3524_v17, %v1488_v13  ;;  %v1687_v20 = vadd.f32 %v3524_v17, %v1552_v14  ;;  %v2811_v21 = vpop.f32.mrb[32].mxu0  ;;  %v2907_v22 = vpop.f32.mrb[32].mxu1 }
 0x135   : > { %v1752_v23 = vmax.f32 %v1624_v16, 0.0  ;;  %v1816_v24 = vmax.f32 %v1688_v18, 0.0  ;;  %v1491_v25 = vmul.f32 %v2811_v21, %v3519_v15  ;;  %v1555_v26 = vmul.f32 %v2907_v22, %v3519_v15  ;;  %v972_v27 = vpop.f32.mrb[33].mxu0  ;;  %v1292_v28 = vpop.f32.mrb[33].mxu1 }
 0x136   : > { %v1751_v29 = vmax.f32 %v1623_v19, 0.0  ;;  %v1815_v30 = vmax.f32 %v1687_v20, 0.0  ;;  %v1490_v31 = vmul.f32 %v3519_v15, %v972_v27  ;;  %v1554_v32 = vmul.f32 %v3519_v15, %v1292_v28 }
 0x137   : > { %1881 = vst.msk [vmem:[%s3538_s15 + $0xf8] sm:$0xff] %vm1849_vm4, %v1752_v23  ;;  %1945 = vst.msk [vmem:[%s3538_s15 + $0x2f8] sm:$0xff] %vm1849_vm4, %v1816_v24  ;;  %v1626_v33 = vadd.f32 %v3524_v17, %v1491_v25  ;;  %v1690_v34 = vadd.f32 %v3524_v17, %v1555_v26 }
 0x138   : > { %1880 = vst.msk [vmem:[%s3538_s15 + $0xf0] sm:$0xff] %vm1849_vm4, %v1751_v29  ;;  %1944 = vst.msk [vmem:[%s3538_s15 + $0x2f0] sm:$0xff] %vm1849_vm4, %v1815_v30  ;;  %v1625_v35 = vadd.f32 %v3524_v17, %v1490_v31  ;;  %v1689_v36 = vadd.f32 %v3524_v17, %v1554_v32  ;;  %v2814_v37 = vpop.f32.mrb[34].mxu0  ;;  %v2910_v38 = vpop.f32.mrb[34].mxu1 }
 0x139   : > { %v1754_v39 = vmax.f32 %v1626_v33, 0.0  ;;  %v1818_v40 = vmax.f32 %v1690_v34, 0.0  ;;  %v1493_v41 = vmul.f32 %v2814_v37, %v3519_v15  ;;  %v1557_v42 = vmul.f32 %v2910_v38, %v3519_v15  ;;  %v982_v43 = vpop.f32.mrb[35].mxu0  ;;  %v1302_v44 = vpop.f32.mrb[35].mxu1 }
 0x13a   : > { %v1753_v45 = vmax.f32 %v1625_v35, 0.0  ;;  %v1817_v46 = vmax.f32 %v1689_v36, 0.0  ;;  %v1492_v47 = vmul.f32 %v3519_v15, %v982_v43  ;;  %v1556_v48 = vmul.f32 %v3519_v15, %v1302_v44 }
 0x13b   : > { %1883 = vst.msk [vmem:[%s3538_s15 + $0x108] sm:$0xff] %vm1849_vm4, %v1754_v39  ;;  %1947 = vst.msk [vmem:[%s3538_s15 + $0x308] sm:$0xff] %vm1849_vm4, %v1818_v40  ;;  %v1628_v49 = vadd.f32 %v3524_v17, %v1493_v41  ;;  %v1692_v50 = vadd.f32 %v3524_v17, %v1557_v42 }
 0x13c   : > { %1882 = vst.msk [vmem:[%s3538_s15 + $0x100] sm:$0xff] %vm1849_vm4, %v1753_v45  ;;  %1946 = vst.msk [vmem:[%s3538_s15 + $0x300] sm:$0xff] %vm1849_vm4, %v1817_v46  ;;  %v1627_v51 = vadd.f32 %v3524_v17, %v1492_v47  ;;  %v1691_v52 = vadd.f32 %v3524_v17, %v1556_v48  ;;  %v2817_v53 = vpop.f32.mrb[36].mxu0  ;;  %v2913_v54 = vpop.f32.mrb[36].mxu1 }
 0x13d   : > { %v1756_v55 = vmax.f32 %v1628_v49, 0.0  ;;  %v1820_v56 = vmax.f32 %v1692_v50, 0.0  ;;  %v1495_v57 = vmul.f32 %v2817_v53, %v3519_v15  ;;  %v1559_v58 = vmul.f32 %v2913_v54, %v3519_v15  ;;  %v992_v59 = vpop.f32.mrb[37].mxu0  ;;  %v1312_v60 = vpop.f32.mrb[37].mxu1 }
 0x13e   : > { %v1755_v61 = vmax.f32 %v1627_v51, 0.0  ;;  %v1819_v62 = vmax.f32 %v1691_v52, 0.0  ;;  %v1494_v63 = vmul.f32 %v3519_v15, %v992_v59  ;;  %v1558_v0 = vmul.f32 %v3519_v15, %v1312_v60 }
 0x13f   : > { %1885 = vst.msk [vmem:[%s3538_s15 + $0x118] sm:$0xff] %vm1849_vm4, %v1756_v55  ;;  %1949 = vst.msk [vmem:[%s3538_s15 + $0x318] sm:$0xff] %vm1849_vm4, %v1820_v56  ;;  %v1630_v1 = vadd.f32 %v3524_v17, %v1495_v57  ;;  %v1694_v2 = vadd.f32 %v3524_v17, %v1559_v58 }
 0x140   : > { %1884 = vst.msk [vmem:[%s3538_s15 + $0x110] sm:$0xff] %vm1849_vm4, %v1755_v61  ;;  %1948 = vst.msk [vmem:[%s3538_s15 + $0x310] sm:$0xff] %vm1849_vm4, %v1819_v62  ;;  %v1629_v3 = vadd.f32 %v3524_v17, %v1494_v63  ;;  %v1693_v4 = vadd.f32 %v3524_v17, %v1558_v0  ;;  %v2820_v5 = vpop.f32.mrb[38].mxu0  ;;  %v2916_v6 = vpop.f32.mrb[38].mxu1 }
 0x141   : > { %v1758_v7 = vmax.f32 %v1630_v1, 0.0  ;;  %v1822_v8 = vmax.f32 %v1694_v2, 0.0  ;;  %v1497_v9 = vmul.f32 %v2820_v5, %v3519_v15  ;;  %v1561_v10 = vmul.f32 %v2916_v6, %v3519_v15  ;;  %v1002_v11 = vpop.f32.mrb[39].mxu0  ;;  %v1322_v12 = vpop.f32.mrb[39].mxu1 }
 0x142   : > { %v1757_v13 = vmax.f32 %v1629_v3, 0.0  ;;  %v1821_v14 = vmax.f32 %v1693_v4, 0.0  ;;  %v1496_v16 = vmul.f32 %v3519_v15, %v1002_v11  ;;  %v1560_v18 = vmul.f32 %v3519_v15, %v1322_v12 }
 0x143   : > { %1887 = vst.msk [vmem:[%s3538_s15 + $0x128] sm:$0xff] %vm1849_vm4, %v1758_v7  ;;  %1951 = vst.msk [vmem:[%s3538_s15 + $0x328] sm:$0xff] %vm1849_vm4, %v1822_v8  ;;  %v1632_v19 = vadd.f32 %v3524_v17, %v1497_v9  ;;  %v1696_v20 = vadd.f32 %v3524_v17, %v1561_v10 }
 0x144   : > { %1886 = vst.msk [vmem:[%s3538_s15 + $0x120] sm:$0xff] %vm1849_vm4, %v1757_v13  ;;  %1950 = vst.msk [vmem:[%s3538_s15 + $0x320] sm:$0xff] %vm1849_vm4, %v1821_v14  ;;  %v1631_v21 = vadd.f32 %v3524_v17, %v1496_v16  ;;  %v1695_v22 = vadd.f32 %v3524_v17, %v1560_v18  ;;  %v2823_v23 = vpop.f32.mrb[40].mxu0  ;;  %v2919_v24 = vpop.f32.mrb[40].mxu1 }
 0x145   : > { %v1760_v25 = vmax.f32 %v1632_v19, 0.0  ;;  %v1824_v26 = vmax.f32 %v1696_v20, 0.0  ;;  %v1499_v27 = vmul.f32 %v2823_v23, %v3519_v15  ;;  %v1563_v28 = vmul.f32 %v2919_v24, %v3519_v15  ;;  %v1012_v29 = vpop.f32.mrb[41].mxu0  ;;  %v1332_v30 = vpop.f32.mrb[41].mxu1 }
 0x146   : > { %v1759_v31 = vmax.f32 %v1631_v21, 0.0  ;;  %v1823_v32 = vmax.f32 %v1695_v22, 0.0  ;;  %v1498_v33 = vmul.f32 %v3519_v15, %v1012_v29  ;;  %v1562_v34 = vmul.f32 %v3519_v15, %v1332_v30 }
 0x147   : > { %1889 = vst.msk [vmem:[%s3538_s15 + $0x138] sm:$0xff] %vm1849_vm4, %v1760_v25  ;;  %1953 = vst.msk [vmem:[%s3538_s15 + $0x338] sm:$0xff] %vm1849_vm4, %v1824_v26  ;;  %v1634_v35 = vadd.f32 %v3524_v17, %v1499_v27  ;;  %v1698_v36 = vadd.f32 %v3524_v17, %v1563_v28 }
 0x148   : > { %1888 = vst.msk [vmem:[%s3538_s15 + $0x130] sm:$0xff] %vm1849_vm4, %v1759_v31  ;;  %1952 = vst.msk [vmem:[%s3538_s15 + $0x330] sm:$0xff] %vm1849_vm4, %v1823_v32  ;;  %v1633_v37 = vadd.f32 %v3524_v17, %v1498_v33  ;;  %v1697_v38 = vadd.f32 %v3524_v17, %v1562_v34  ;;  %v2826_v39 = vpop.f32.mrb[42].mxu0  ;;  %v2922_v40 = vpop.f32.mrb[42].mxu1 }
 0x149   : > { %v1762_v41 = vmax.f32 %v1634_v35, 0.0  ;;  %v1826_v42 = vmax.f32 %v1698_v36, 0.0  ;;  %v1501_v43 = vmul.f32 %v2826_v39, %v3519_v15  ;;  %v1565_v44 = vmul.f32 %v2922_v40, %v3519_v15  ;;  %v1022_v45 = vpop.f32.mrb[43].mxu0  ;;  %v1342_v46 = vpop.f32.mrb[43].mxu1 }
 0x14a   : > { %v1761_v47 = vmax.f32 %v1633_v37, 0.0  ;;  %v1825_v48 = vmax.f32 %v1697_v38, 0.0  ;;  %v1500_v49 = vmul.f32 %v3519_v15, %v1022_v45  ;;  %v1564_v50 = vmul.f32 %v3519_v15, %v1342_v46 }
 0x14b   : > { %1891 = vst.msk [vmem:[%s3538_s15 + $0x148] sm:$0xff] %vm1849_vm4, %v1762_v41  ;;  %1955 = vst.msk [vmem:[%s3538_s15 + $0x348] sm:$0xff] %vm1849_vm4, %v1826_v42  ;;  %v1636_v51 = vadd.f32 %v3524_v17, %v1501_v43  ;;  %v1700_v52 = vadd.f32 %v3524_v17, %v1565_v44 }
 0x14c   : > { %1890 = vst.msk [vmem:[%s3538_s15 + $0x140] sm:$0xff] %vm1849_vm4, %v1761_v47  ;;  %1954 = vst.msk [vmem:[%s3538_s15 + $0x340] sm:$0xff] %vm1849_vm4, %v1825_v48  ;;  %v1635_v53 = vadd.f32 %v3524_v17, %v1500_v49  ;;  %v1699_v54 = vadd.f32 %v3524_v17, %v1564_v50  ;;  %v2829_v55 = vpop.f32.mrb[44].mxu0  ;;  %v2925_v56 = vpop.f32.mrb[44].mxu1 }
 0x14d   : > { %v1764_v57 = vmax.f32 %v1636_v51, 0.0  ;;  %v1828_v58 = vmax.f32 %v1700_v52, 0.0  ;;  %v1503_v59 = vmul.f32 %v2829_v55, %v3519_v15  ;;  %v1567_v60 = vmul.f32 %v2925_v56, %v3519_v15  ;;  %v1032_v61 = vpop.f32.mrb[45].mxu0  ;;  %v1352_v62 = vpop.f32.mrb[45].mxu1  ;;  %v3937_v55 = vld [vmem:[%s4259_s3] ss:$0 sm:$0xff] }
 0x14e   : > { %v1763_v63 = vmax.f32 %v1635_v53, 0.0  ;;  %v1827_v0 = vmax.f32 %v1699_v54, 0.0  ;;  %v1502_v1 = vmul.f32 %v3519_v15, %v1032_v61  ;;  %v1566_v2 = vmul.f32 %v3519_v15, %v1352_v62 }
 0x14f   : > { %1893 = vst.msk [vmem:[%s3538_s15 + $0x158] sm:$0xff] %vm1849_vm4, %v1764_v57  ;;  %1957 = vst.msk [vmem:[%s3538_s15 + $0x358] sm:$0xff] %vm1849_vm4, %v1828_v58  ;;  %v1638_v3 = vadd.f32 %v3524_v17, %v1503_v59  ;;  %v1702_v4 = vadd.f32 %v3524_v17, %v1567_v60  ;;  %v3944_v60 = vld [vmem:[%s4258_s2] ss:$0 sm:$0xff] }
 0x150   : > { %1892 = vst.msk [vmem:[%s3538_s15 + $0x150] sm:$0xff] %vm1849_vm4, %v1763_v63  ;;  %1956 = vst.msk [vmem:[%s3538_s15 + $0x350] sm:$0xff] %vm1849_vm4, %v1827_v0  ;;  %v1637_v5 = vadd.f32 %v3524_v17, %v1502_v1  ;;  %v1701_v6 = vadd.f32 %v3524_v17, %v1566_v2  ;;  %v2832_v7 = vpop.f32.mrb[46].mxu0  ;;  %v2928_v8 = vpop.f32.mrb[46].mxu1 }
 0x151   : > { %v1766_v9 = vmax.f32 %v1638_v3, 0.0  ;;  %v1830_v10 = vmax.f32 %v1702_v4, 0.0  ;;  %v1505_v11 = vmul.f32 %v2832_v7, %v3519_v15  ;;  %v1569_v12 = vmul.f32 %v2928_v8, %v3519_v15  ;;  %v1042_v13 = vpop.f32.mrb[47].mxu0  ;;  %v1362_v14 = vpop.f32.mrb[47].mxu1 }
 0x152   : > { %v1765_v16 = vmax.f32 %v1637_v5, 0.0  ;;  %v1829_v18 = vmax.f32 %v1701_v6, 0.0  ;;  %v1504_v19 = vmul.f32 %v3519_v15, %v1042_v13  ;;  %v1568_v20 = vmul.f32 %v3519_v15, %v1362_v14 }
 0x153   : > { %1895 = vst.msk [vmem:[%s3538_s15 + $0x168] sm:$0xff] %vm1849_vm4, %v1766_v9  ;;  %1959 = vst.msk [vmem:[%s3538_s15 + $0x368] sm:$0xff] %vm1849_vm4, %v1830_v10  ;;  %v1640_v21 = vadd.f32 %v3524_v17, %v1505_v11  ;;  %v1704_v22 = vadd.f32 %v3524_v17, %v1569_v12 }
 0x154   : > { %1894 = vst.msk [vmem:[%s3538_s15 + $0x160] sm:$0xff] %vm1849_vm4, %v1765_v16  ;;  %1958 = vst.msk [vmem:[%s3538_s15 + $0x360] sm:$0xff] %vm1849_vm4, %v1829_v18  ;;  %v1639_v23 = vadd.f32 %v3524_v17, %v1504_v19  ;;  %v1703_v24 = vadd.f32 %v3524_v17, %v1568_v20  ;;  %v2835_v25 = vpop.f32.mrb[48].mxu0  ;;  %v2931_v26 = vpop.f32.mrb[48].mxu1 }
 0x155   : > { %v1768_v27 = vmax.f32 %v1640_v21, 0.0  ;;  %v1832_v28 = vmax.f32 %v1704_v22, 0.0  ;;  %v1507_v29 = vmul.f32 %v2835_v25, %v3519_v15  ;;  %v1571_v30 = vmul.f32 %v2931_v26, %v3519_v15  ;;  %v1052_v31 = vpop.f32.mrb[49].mxu0  ;;  %v1372_v32 = vpop.f32.mrb[49].mxu1 }
 0x156   : > { %v1767_v33 = vmax.f32 %v1639_v23, 0.0  ;;  %v1831_v34 = vmax.f32 %v1703_v24, 0.0  ;;  %v1506_v35 = vmul.f32 %v3519_v15, %v1052_v31  ;;  %v1570_v36 = vmul.f32 %v3519_v15, %v1372_v32 }
 0x157   : > { %1897 = vst.msk [vmem:[%s3538_s15 + $0x178] sm:$0xff] %vm1849_vm4, %v1768_v27  ;;  %1961 = vst.msk [vmem:[%s3538_s15 + $0x378] sm:$0xff] %vm1849_vm4, %v1832_v28  ;;  %v1642_v37 = vadd.f32 %v3524_v17, %v1507_v29  ;;  %v1706_v38 = vadd.f32 %v3524_v17, %v1571_v30 }
 0x158   : > { %1896 = vst.msk [vmem:[%s3538_s15 + $0x170] sm:$0xff] %vm1849_vm4, %v1767_v33  ;;  %1960 = vst.msk [vmem:[%s3538_s15 + $0x370] sm:$0xff] %vm1849_vm4, %v1831_v34  ;;  %v1641_v39 = vadd.f32 %v3524_v17, %v1506_v35  ;;  %v1705_v40 = vadd.f32 %v3524_v17, %v1570_v36  ;;  %v2838_v41 = vpop.f32.mrb[50].mxu0  ;;  %v2934_v42 = vpop.f32.mrb[50].mxu1 }
 0x159   : > { %v1770_v43 = vmax.f32 %v1642_v37, 0.0  ;;  %v1834_v44 = vmax.f32 %v1706_v38, 0.0  ;;  %v1509_v45 = vmul.f32 %v2838_v41, %v3519_v15  ;;  %v1573_v46 = vmul.f32 %v2934_v42, %v3519_v15  ;;  %v1062_v47 = vpop.f32.mrb[51].mxu0  ;;  %v1382_v48 = vpop.f32.mrb[51].mxu1 }
 0x15a   : > { %v1769_v49 = vmax.f32 %v1641_v39, 0.0  ;;  %v1833_v50 = vmax.f32 %v1705_v40, 0.0  ;;  %v1508_v51 = vmul.f32 %v3519_v15, %v1062_v47  ;;  %v1572_v52 = vmul.f32 %v3519_v15, %v1382_v48 }
 0x15b   : > { %1899 = vst.msk [vmem:[%s3538_s15 + $0x188] sm:$0xff] %vm1849_vm4, %v1770_v43  ;;  %1963 = vst.msk [vmem:[%s3538_s15 + $0x388] sm:$0xff] %vm1849_vm4, %v1834_v44  ;;  %v1644_v53 = vadd.f32 %v3524_v17, %v1509_v45  ;;  %v1708_v54 = vadd.f32 %v3524_v17, %v1573_v46 }
 0x15c   : > { %1898 = vst.msk [vmem:[%s3538_s15 + $0x180] sm:$0xff] %vm1849_vm4, %v1769_v49  ;;  %1962 = vst.msk [vmem:[%s3538_s15 + $0x380] sm:$0xff] %vm1849_vm4, %v1833_v50  ;;  %v1643_v15 = vadd.f32 %v3937_v55, %v1508_v51  ;;  %v1707_v56 = vadd.f32 %v3937_v55, %v1572_v52  ;;  %v2841_v57 = vpop.f32.mrb[52].mxu0  ;;  %v2937_v58 = vpop.f32.mrb[52].mxu1 }
 0x15d   : > { %v1772_v59 = vmax.f32 %v1644_v53, 0.0  ;;  %v1836_v17 = vmax.f32 %v1708_v54, 0.0  ;;  %v1511_v61 = vmul.f32 %v3944_v60, %v2841_v57  ;;  %v1575_v62 = vmul.f32 %v3944_v60, %v2937_v58  ;;  %v1072_v63 = vpop.f32.mrb[53].mxu0  ;;  %v1392_v0 = vpop.f32.mrb[53].mxu1 }
 0x15e   : > { %v1771_v1 = vmax.f32 %v1643_v15, 0.0  ;;  %v1835_v2 = vmax.f32 %v1707_v56, 0.0  ;;  %v1510_v3 = vmul.f32 %v3944_v60, %v1072_v63  ;;  %v1574_v4 = vmul.f32 %v3944_v60, %v1392_v0 }
 0x15f   : > { %1901 = vst.msk [vmem:[%s3538_s15 + $0x198] sm:$0xff] %vm1849_vm4, %v1772_v59  ;;  %1965 = vst.msk [vmem:[%s3538_s15 + $0x398] sm:$0xff] %vm1849_vm4, %v1836_v17  ;;  %v1646_v5 = vadd.f32 %v3937_v55, %v1511_v61  ;;  %v1710_v6 = vadd.f32 %v3937_v55, %v1575_v62 }
 0x160   : > { %1900 = vst.msk [vmem:[%s3538_s15 + $0x190] sm:$0xff] %vm1849_vm4, %v1771_v1  ;;  %1964 = vst.msk [vmem:[%s3538_s15 + $0x390] sm:$0xff] %vm1849_vm4, %v1835_v2  ;;  %v1645_v7 = vadd.f32 %v3937_v55, %v1510_v3  ;;  %v1709_v8 = vadd.f32 %v3937_v55, %v1574_v4  ;;  %v2844_v9 = vpop.f32.mrb[54].mxu0  ;;  %v2940_v10 = vpop.f32.mrb[54].mxu1 }
 0x161   : > { %v1774_v11 = vmax.f32 %v1646_v5, 0.0  ;;  %v1838_v12 = vmax.f32 %v1710_v6, 0.0  ;;  %v1513_v13 = vmul.f32 %v3944_v60, %v2844_v9  ;;  %v1577_v14 = vmul.f32 %v3944_v60, %v2940_v10  ;;  %v1082_v16 = vpop.f32.mrb[55].mxu0  ;;  %v1402_v18 = vpop.f32.mrb[55].mxu1 }
 0x162   : > { %v1773_v19 = vmax.f32 %v1645_v7, 0.0  ;;  %v1837_v20 = vmax.f32 %v1709_v8, 0.0  ;;  %v1512_v21 = vmul.f32 %v3944_v60, %v1082_v16  ;;  %v1576_v22 = vmul.f32 %v3944_v60, %v1402_v18 }
 0x163   : > { %1903 = vst.msk [vmem:[%s3538_s15 + $0x1a8] sm:$0xff] %vm1849_vm4, %v1774_v11  ;;  %1967 = vst.msk [vmem:[%s3538_s15 + $0x3a8] sm:$0xff] %vm1849_vm4, %v1838_v12  ;;  %v1648_v23 = vadd.f32 %v3937_v55, %v1513_v13  ;;  %v1712_v24 = vadd.f32 %v3937_v55, %v1577_v14 }
 0x164   : > { %1902 = vst.msk [vmem:[%s3538_s15 + $0x1a0] sm:$0xff] %vm1849_vm4, %v1773_v19  ;;  %1966 = vst.msk [vmem:[%s3538_s15 + $0x3a0] sm:$0xff] %vm1849_vm4, %v1837_v20  ;;  %v1647_v25 = vadd.f32 %v3937_v55, %v1512_v21  ;;  %v1711_v26 = vadd.f32 %v3937_v55, %v1576_v22  ;;  %v2847_v27 = vpop.f32.mrb[56].mxu0  ;;  %v2943_v28 = vpop.f32.mrb[56].mxu1 }
 0x165   : > { %v1776_v29 = vmax.f32 %v1648_v23, 0.0  ;;  %v1840_v30 = vmax.f32 %v1712_v24, 0.0  ;;  %v1515_v31 = vmul.f32 %v3944_v60, %v2847_v27  ;;  %v1579_v32 = vmul.f32 %v3944_v60, %v2943_v28  ;;  %v1092_v33 = vpop.f32.mrb[57].mxu0  ;;  %v1412_v34 = vpop.f32.mrb[57].mxu1 }
 0x166   : > { %v1775_v35 = vmax.f32 %v1647_v25, 0.0  ;;  %v1839_v36 = vmax.f32 %v1711_v26, 0.0  ;;  %v1514_v37 = vmul.f32 %v3944_v60, %v1092_v33  ;;  %v1578_v38 = vmul.f32 %v3944_v60, %v1412_v34 }
 0x167   : > { %1905 = vst.msk [vmem:[%s3538_s15 + $0x1b8] sm:$0xff] %vm1849_vm4, %v1776_v29  ;;  %1969 = vst.msk [vmem:[%s3538_s15 + $0x3b8] sm:$0xff] %vm1849_vm4, %v1840_v30  ;;  %v1650_v39 = vadd.f32 %v3937_v55, %v1515_v31  ;;  %v1714_v40 = vadd.f32 %v3937_v55, %v1579_v32 }
 0x168   : > { %1904 = vst.msk [vmem:[%s3538_s15 + $0x1b0] sm:$0xff] %vm1849_vm4, %v1775_v35  ;;  %1968 = vst.msk [vmem:[%s3538_s15 + $0x3b0] sm:$0xff] %vm1849_vm4, %v1839_v36  ;;  %v1649_v41 = vadd.f32 %v3937_v55, %v1514_v37  ;;  %v1713_v42 = vadd.f32 %v3937_v55, %v1578_v38  ;;  %v2850_v43 = vpop.f32.mrb[58].mxu0  ;;  %v2946_v44 = vpop.f32.mrb[58].mxu1 }
 0x169   : > { %v1778_v45 = vmax.f32 %v1650_v39, 0.0  ;;  %v1842_v46 = vmax.f32 %v1714_v40, 0.0  ;;  %v1517_v47 = vmul.f32 %v3944_v60, %v2850_v43  ;;  %v1581_v48 = vmul.f32 %v3944_v60, %v2946_v44  ;;  %v1102_v49 = vpop.f32.mrb[59].mxu0  ;;  %v1422_v50 = vpop.f32.mrb[59].mxu1 }
 0x16a   : > { %v1777_v51 = vmax.f32 %v1649_v41, 0.0  ;;  %v1841_v52 = vmax.f32 %v1713_v42, 0.0  ;;  %v1516_v53 = vmul.f32 %v3944_v60, %v1102_v49  ;;  %v1580_v54 = vmul.f32 %v3944_v60, %v1422_v50 }
 0x16b   : > { %1907 = vst.msk [vmem:[%s3538_s15 + $0x1c8] sm:$0xff] %vm1849_vm4, %v1778_v45  ;;  %1971 = vst.msk [vmem:[%s3538_s15 + $0x3c8] sm:$0xff] %vm1849_vm4, %v1842_v46  ;;  %v1652_v15 = vadd.f32 %v3937_v55, %v1517_v47  ;;  %v1716_v56 = vadd.f32 %v3937_v55, %v1581_v48 }
 0x16c   : > { %1906 = vst.msk [vmem:[%s3538_s15 + $0x1c0] sm:$0xff] %vm1849_vm4, %v1777_v51  ;;  %1970 = vst.msk [vmem:[%s3538_s15 + $0x3c0] sm:$0xff] %vm1849_vm4, %v1841_v52  ;;  %v1651_v57 = vadd.f32 %v3937_v55, %v1516_v53  ;;  %v1715_v58 = vadd.f32 %v3937_v55, %v1580_v54  ;;  %v2853_v59 = vpop.f32.mrb[60].mxu0  ;;  %v2949_v17 = vpop.f32.mrb[60].mxu1 }
 0x16d   : > { %v1780_v61 = vmax.f32 %v1652_v15, 0.0  ;;  %v1844_v62 = vmax.f32 %v1716_v56, 0.0  ;;  %v1519_v63 = vmul.f32 %v3944_v60, %v2853_v59  ;;  %v1583_v0 = vmul.f32 %v3944_v60, %v2949_v17  ;;  %v1112_v1 = vpop.f32.mrb[61].mxu0  ;;  %v1432_v2 = vpop.f32.mrb[61].mxu1 }
 0x16e   : > { %v1779_v3 = vmax.f32 %v1651_v57, 0.0  ;;  %v1843_v4 = vmax.f32 %v1715_v58, 0.0  ;;  %v1518_v5 = vmul.f32 %v3944_v60, %v1112_v1  ;;  %v1582_v6 = vmul.f32 %v3944_v60, %v1432_v2 }
 0x16f   : > { %1909 = vst.msk [vmem:[%s3538_s15 + $0x1d8] sm:$0xff] %vm1849_vm4, %v1780_v61  ;;  %1973 = vst.msk [vmem:[%s3538_s15 + $0x3d8] sm:$0xff] %vm1849_vm4, %v1844_v62  ;;  %v1654_v7 = vadd.f32 %v3937_v55, %v1519_v63  ;;  %v1718_v8 = vadd.f32 %v3937_v55, %v1583_v0 }
 0x170   : > { %1908 = vst.msk [vmem:[%s3538_s15 + $0x1d0] sm:$0xff] %vm1849_vm4, %v1779_v3  ;;  %1972 = vst.msk [vmem:[%s3538_s15 + $0x3d0] sm:$0xff] %vm1849_vm4, %v1843_v4  ;;  %v1653_v9 = vadd.f32 %v3937_v55, %v1518_v5  ;;  %v1717_v10 = vadd.f32 %v3937_v55, %v1582_v6  ;;  %v2856_v11 = vpop.f32.mrb[62].mxu0  ;;  %v2952_v12 = vpop.f32.mrb[62].mxu1 }
 0x171   : > { %v1782_v13 = vmax.f32 %v1654_v7, 0.0  ;;  %v1846_v14 = vmax.f32 %v1718_v8, 0.0  ;;  %v1521_v16 = vmul.f32 %v3944_v60, %v2856_v11  ;;  %v1585_v18 = vmul.f32 %v3944_v60, %v2952_v12  ;;  %v1122_v19 = vpop.f32.mrb[63].mxu0  ;;  %v1442_v20 = vpop.f32.mrb[63].mxu1 }
 0x172   : > { %v1781_v21 = vmax.f32 %v1653_v9, 0.0  ;;  %v1845_v22 = vmax.f32 %v1717_v10, 0.0  ;;  %v1520_v23 = vmul.f32 %v3944_v60, %v1122_v19  ;;  %v1584_v24 = vmul.f32 %v3944_v60, %v1442_v20  ;;  %1984 = sbr.rel (!%p3215_p4) target bundleno = 449 (0x1c1), region = 40 }
 0x173   : > { %1911 = vst.msk [vmem:[%s3538_s15 + $0x1e8] sm:$0xff] %vm1849_vm4, %v1782_v13  ;;  %1975 = vst.msk [vmem:[%s3538_s15 + $0x3e8] sm:$0xff] %vm1849_vm4, %v1846_v14  ;;  %v1656_v25 = vadd.f32 %v3937_v55, %v1521_v16  ;;  %v1720_v26 = vadd.f32 %v3937_v55, %v1585_v18 }
 0x174   : > { %1910 = vst.msk [vmem:[%s3538_s15 + $0x1e0] sm:$0xff] %vm1849_vm4, %v1781_v21  ;;  %1974 = vst.msk [vmem:[%s3538_s15 + $0x3e0] sm:$0xff] %vm1849_vm4, %v1845_v22  ;;  %v1655_v27 = vadd.f32 %v3937_v55, %v1520_v23  ;;  %v1719_v28 = vadd.f32 %v3937_v55, %v1584_v24 }
 0x175   : > { %v1784_v29 = vmax.f32 %v1656_v25, 0.0  ;;  %v1848_v30 = vmax.f32 %v1720_v26, 0.0 }
 0x176   : > { %v1783_v60 = vmax.f32 %v1655_v27, 0.0  ;;  %v1847_v31 = vmax.f32 %v1719_v28, 0.0 }
 0x177   : > { %1913 = vst.msk [vmem:[%s3538_s15 + $0x1f8] sm:$0xff] %vm1849_vm4, %v1784_v29  ;;  %1977 = vst.msk [vmem:[%s3538_s15 + $0x3f8] sm:$0xff] %vm1849_vm4, %v1848_v30 }
 0x178   : > { %1912 = vst.msk [vmem:[%s3538_s15 + $0x1f0] sm:$0xff] %vm1849_vm4, %v1783_v60  ;;  %1976 = vst.msk [vmem:[%s3538_s15 + $0x3f0] sm:$0xff] %vm1849_vm4, %v1847_v31 }
 0x179   : > { %s4271_s17 = smov (!%p1987_p8, %s1986_s17), 128 }
 0x17a   : > { %s2585_s26 = sshll.u32 %s4271_s17, 7 }
 0x17b   : > { %p2588_p9 = scmp.eq.s32.totalorder %s2585_s26, 0 }
 0x17c   : > { %s4063_s27 = sshrl.u32 (!%p2588_p9), %s4271_s17, 6 }
 0x17d   : > { %1995 = sbr.rel (%p2588_p9) target bundleno = 449 (0x1c1), region = 44  ;;  %p2589_p10 = scmp.le.s32.totalorder (!%p2588_p9), %s4063_s27, 0 }
 0x184   : > { %2401 = sbr.rel (%p2589_p10) target bundleno = 428 (0x1ac), region = 120  ;;  %s4262_s18 = smov (!%p2589_p10), %s4057_s25 }
 0x185   : > { %s4263_s23 = smov (!%p2589_p10), %s3538_s15  ;;  %s4072_s30 = smov (!%p2589_p10), 0  }
 0x186   : > { %s4074_s28 = smov (!%p2589_p10), 0  }
 0x18b LB: >> { %v2183_v55 = vld [vmem:[%s3138_s23] sm:$0xff]  ;;  %v2185_v32 = vld [vmem:[%s3138_s23 + $0x8] sm:$0xff]  ;;  %v2187_v33 = vld [vmem:[%s3138_s23 + $0x10] sm:$0xff]  ;;  %s2311_s29 = sadd.s32 1, %s3142_s30  ;;  %s2177_s28 = sadd.s32 1, %s3146_s28   ;;  %s3146_s28 = sphi %s4074_s28, %s2177_s28   ;;  %s3142_s30 = sphi %s4072_s30, %s4266_s30   ;;  %s3138_s23 = sphi %s4263_s23, %s4265_s23   ;;  %s3134_s18 = sphi %s4262_s18, %s4264_s18  }
 0x18c   : >> { %2184 = vst [vmem:[%s3134_s18] sm:$0xff] %v2183_v55  ;;  %2186 = vst [vmem:[%s3134_s18 + $0x8] sm:$0xff] %v2185_v32  ;;  %v2189_v34 = vld [vmem:[%s3138_s23 + $0x18] sm:$0xff]  ;;  %v2191_v35 = vld [vmem:[%s3138_s23 + $0x20] sm:$0xff]  ;;  %p2312_p11 = scmp.ge.s32.totalorder %s2311_s29, %s4063_s27  ;;  %p2176_p12 = scmp.ge.s32.totalorder %s2177_s28, %s4063_s27 }
 0x18d   : >> { %2188 = vst [vmem:[%s3134_s18 + $0x10] sm:$0xff] %v2187_v33  ;;  %v2193_v36 = vld [vmem:[%s3138_s23 + $0x28] sm:$0xff]  ;;  %2190 = vst [vmem:[%s3134_s18 + $0x18] sm:$0xff] %v2189_v34  ;;  %v2195_v37 = vld [vmem:[%s3138_s23 + $0x30] sm:$0xff] }
 0x18e   : >> { %2192 = vst [vmem:[%s3134_s18 + $0x20] sm:$0xff] %v2191_v35  ;;  %2194 = vst [vmem:[%s3134_s18 + $0x28] sm:$0xff] %v2193_v36  ;;  %v2197_v38 = vld [vmem:[%s3138_s23 + $0x38] sm:$0xff]  ;;  %v2199_v39 = vld [vmem:[%s3138_s23 + $0x40] sm:$0xff]  ;;  %s4273_s29 = smov (%p2312_p11, %s2311_s29), 0 }
 0x18f   : >> { %2196 = vst [vmem:[%s3134_s18 + $0x30] sm:$0xff] %v2195_v37  ;;  %2198 = vst [vmem:[%s3134_s18 + $0x38] sm:$0xff] %v2197_v38  ;;  %v2201_v40 = vld [vmem:[%s3138_s23 + $0x48] sm:$0xff]  ;;  %v2203_v41 = vld [vmem:[%s3138_s23 + $0x50] sm:$0xff]  ;;  %s2590_s5 = sshll.u32 %s4273_s29, 9  ;;  %s4266_s30 = smov %s4273_s29 }
 0x190   : >> { %2200 = vst [vmem:[%s3134_s18 + $0x40] sm:$0xff] %v2199_v39  ;;  %v2205_v42 = vld [vmem:[%s3138_s23 + $0x58] sm:$0xff]  ;;  %2202 = vst [vmem:[%s3134_s18 + $0x48] sm:$0xff] %v2201_v40  ;;  %v2207_v43 = vld [vmem:[%s3138_s23 + $0x60] sm:$0xff]  ;;  %s4130_s6 = scalar_lea.vmem %s3538_s15, %s2590_s5 [#allocation2]   ;;  %s4133_s7 = scalar_lea.vmem %s4057_s25, %s2590_s5  }
 0x191   : >> { %2204 = vst [vmem:[%s3134_s18 + $0x50] sm:$0xff] %v2203_v41  ;;  %2206 = vst [vmem:[%s3134_s18 + $0x58] sm:$0xff] %v2205_v42  ;;  %v2209_v44 = vld [vmem:[%s3138_s23 + $0x68] sm:$0xff]  ;;  %v2211_v45 = vld [vmem:[%s3138_s23 + $0x70] sm:$0xff] }
 0x192   : >> { %2208 = vst [vmem:[%s3134_s18 + $0x60] sm:$0xff] %v2207_v43  ;;  %2210 = vst [vmem:[%s3134_s18 + $0x68] sm:$0xff] %v2209_v44  ;;  %v2213_v46 = vld [vmem:[%s3138_s23 + $0x78] sm:$0xff]  ;;  %v2215_v47 = vld [vmem:[%s3138_s23 + $0x80] sm:$0xff] }
 0x193   : >> { %2212 = vst [vmem:[%s3134_s18 + $0x70] sm:$0xff] %v2211_v45  ;;  %v2217_v48 = vld [vmem:[%s3138_s23 + $0x88] sm:$0xff]  ;;  %2214 = vst [vmem:[%s3134_s18 + $0x78] sm:$0xff] %v2213_v46  ;;  %v2219_v49 = vld [vmem:[%s3138_s23 + $0x90] sm:$0xff] }
 0x194   : >> { %2216 = vst [vmem:[%s3134_s18 + $0x80] sm:$0xff] %v2215_v47  ;;  %2218 = vst [vmem:[%s3134_s18 + $0x88] sm:$0xff] %v2217_v48  ;;  %v2221_v50 = vld [vmem:[%s3138_s23 + $0x98] sm:$0xff]  ;;  %v2223_v51 = vld [vmem:[%s3138_s23 + $0xa0] sm:$0xff] }
 0x195   : >> { %2220 = vst [vmem:[%s3134_s18 + $0x90] sm:$0xff] %v2219_v49  ;;  %2222 = vst [vmem:[%s3134_s18 + $0x98] sm:$0xff] %v2221_v50  ;;  %v2225_v52 = vld [vmem:[%s3138_s23 + $0xa8] sm:$0xff]  ;;  %v2227_v53 = vld [vmem:[%s3138_s23 + $0xb0] sm:$0xff] }
 0x196   : >> { %2224 = vst [vmem:[%s3134_s18 + $0xa0] sm:$0xff] %v2223_v51  ;;  %v2229_v54 = vld [vmem:[%s3138_s23 + $0xb8] sm:$0xff]  ;;  %2226 = vst [vmem:[%s3134_s18 + $0xa8] sm:$0xff] %v2225_v52  ;;  %v2231_v15 = vld [vmem:[%s3138_s23 + $0xc0] sm:$0xff] }
 0x197   : >> { %2228 = vst [vmem:[%s3134_s18 + $0xb0] sm:$0xff] %v2227_v53  ;;  %2230 = vst [vmem:[%s3134_s18 + $0xb8] sm:$0xff] %v2229_v54  ;;  %v2233_v56 = vld [vmem:[%s3138_s23 + $0xc8] sm:$0xff]  ;;  %v2235_v57 = vld [vmem:[%s3138_s23 + $0xd0] sm:$0xff] }
 0x198   : >> { %2232 = vst [vmem:[%s3134_s18 + $0xc0] sm:$0xff] %v2231_v15  ;;  %2234 = vst [vmem:[%s3134_s18 + $0xc8] sm:$0xff] %v2233_v56  ;;  %v2237_v58 = vld [vmem:[%s3138_s23 + $0xd8] sm:$0xff]  ;;  %v2239_v59 = vld [vmem:[%s3138_s23 + $0xe0] sm:$0xff] }
 0x199   : >> { %2236 = vst [vmem:[%s3134_s18 + $0xd0] sm:$0xff] %v2235_v57  ;;  %v2241_v17 = vld [vmem:[%s3138_s23 + $0xe8] sm:$0xff]  ;;  %2238 = vst [vmem:[%s3134_s18 + $0xd8] sm:$0xff] %v2237_v58  ;;  %v2243_v61 = vld [vmem:[%s3138_s23 + $0xf0] sm:$0xff] }
 0x19a   : >> { %2240 = vst [vmem:[%s3134_s18 + $0xe0] sm:$0xff] %v2239_v59  ;;  %2242 = vst [vmem:[%s3134_s18 + $0xe8] sm:$0xff] %v2241_v17  ;;  %v2245_v62 = vld [vmem:[%s3138_s23 + $0xf8] sm:$0xff]  ;;  %v2247_v63 = vld [vmem:[%s3138_s23 + $0x100] sm:$0xff] }
 0x19b   : >> { %2244 = vst [vmem:[%s3134_s18 + $0xf0] sm:$0xff] %v2243_v61  ;;  %2246 = vst [vmem:[%s3134_s18 + $0xf8] sm:$0xff] %v2245_v62  ;;  %v2249_v0 = vld [vmem:[%s3138_s23 + $0x108] sm:$0xff]  ;;  %v2251_v1 = vld [vmem:[%s3138_s23 + $0x110] sm:$0xff] }
 0x19c   : >> { %2248 = vst [vmem:[%s3134_s18 + $0x100] sm:$0xff] %v2247_v63  ;;  %v2253_v2 = vld [vmem:[%s3138_s23 + $0x118] sm:$0xff]  ;;  %2250 = vst [vmem:[%s3134_s18 + $0x108] sm:$0xff] %v2249_v0  ;;  %v2255_v3 = vld [vmem:[%s3138_s23 + $0x120] sm:$0xff] }
 0x19d   : >> { %2252 = vst [vmem:[%s3134_s18 + $0x110] sm:$0xff] %v2251_v1  ;;  %2254 = vst [vmem:[%s3134_s18 + $0x118] sm:$0xff] %v2253_v2  ;;  %v2257_v4 = vld [vmem:[%s3138_s23 + $0x128] sm:$0xff]  ;;  %v2259_v5 = vld [vmem:[%s3138_s23 + $0x130] sm:$0xff] }
 0x19e   : >> { %2256 = vst [vmem:[%s3134_s18 + $0x120] sm:$0xff] %v2255_v3  ;;  %2258 = vst [vmem:[%s3134_s18 + $0x128] sm:$0xff] %v2257_v4  ;;  %v2261_v6 = vld [vmem:[%s3138_s23 + $0x138] sm:$0xff]  ;;  %v2263_v7 = vld [vmem:[%s3138_s23 + $0x140] sm:$0xff] }
 0x19f   : >> { %2260 = vst [vmem:[%s3134_s18 + $0x130] sm:$0xff] %v2259_v5  ;;  %v2265_v8 = vld [vmem:[%s3138_s23 + $0x148] sm:$0xff]  ;;  %2262 = vst [vmem:[%s3134_s18 + $0x138] sm:$0xff] %v2261_v6  ;;  %v2267_v9 = vld [vmem:[%s3138_s23 + $0x150] sm:$0xff] }
 0x1a0   : >> { %2264 = vst [vmem:[%s3134_s18 + $0x140] sm:$0xff] %v2263_v7  ;;  %2266 = vst [vmem:[%s3134_s18 + $0x148] sm:$0xff] %v2265_v8  ;;  %v2269_v10 = vld [vmem:[%s3138_s23 + $0x158] sm:$0xff]  ;;  %v2271_v11 = vld [vmem:[%s3138_s23 + $0x160] sm:$0xff] }
 0x1a1   : >> { %2268 = vst [vmem:[%s3134_s18 + $0x150] sm:$0xff] %v2267_v9  ;;  %2270 = vst [vmem:[%s3134_s18 + $0x158] sm:$0xff] %v2269_v10  ;;  %v2273_v12 = vld [vmem:[%s3138_s23 + $0x168] sm:$0xff]  ;;  %v2275_v13 = vld [vmem:[%s3138_s23 + $0x170] sm:$0xff] }
 0x1a2   : >> { %2272 = vst [vmem:[%s3134_s18 + $0x160] sm:$0xff] %v2271_v11  ;;  %v2277_v14 = vld [vmem:[%s3138_s23 + $0x178] sm:$0xff]  ;;  %2274 = vst [vmem:[%s3134_s18 + $0x168] sm:$0xff] %v2273_v12  ;;  %v2279_v16 = vld [vmem:[%s3138_s23 + $0x180] sm:$0xff] }
 0x1a3   : >> { %2276 = vst [vmem:[%s3134_s18 + $0x170] sm:$0xff] %v2275_v13  ;;  %2278 = vst [vmem:[%s3134_s18 + $0x178] sm:$0xff] %v2277_v14  ;;  %v2281_v18 = vld [vmem:[%s3138_s23 + $0x188] sm:$0xff]  ;;  %v2283_v19 = vld [vmem:[%s3138_s23 + $0x190] sm:$0xff] }
 0x1a4   : >> { %2280 = vst [vmem:[%s3134_s18 + $0x180] sm:$0xff] %v2279_v16  ;;  %2282 = vst [vmem:[%s3134_s18 + $0x188] sm:$0xff] %v2281_v18  ;;  %v2285_v20 = vld [vmem:[%s3138_s23 + $0x198] sm:$0xff]  ;;  %v2287_v21 = vld [vmem:[%s3138_s23 + $0x1a0] sm:$0xff] }
 0x1a5   : >> { %2284 = vst [vmem:[%s3134_s18 + $0x190] sm:$0xff] %v2283_v19  ;;  %v2289_v22 = vld [vmem:[%s3138_s23 + $0x1a8] sm:$0xff]  ;;  %2286 = vst [vmem:[%s3134_s18 + $0x198] sm:$0xff] %v2285_v20  ;;  %v2291_v23 = vld [vmem:[%s3138_s23 + $0x1b0] sm:$0xff]  ;;  %2179 = sbr.rel (!%p2176_p12) target bundleno = 395 (0x18b), region = 126 }
 0x1a6   : >> { %2288 = vst [vmem:[%s3134_s18 + $0x1a0] sm:$0xff] %v2287_v21  ;;  %2290 = vst [vmem:[%s3134_s18 + $0x1a8] sm:$0xff] %v2289_v22  ;;  %v2293_v24 = vld [vmem:[%s3138_s23 + $0x1b8] sm:$0xff]  ;;  %v2295_v25 = vld [vmem:[%s3138_s23 + $0x1c0] sm:$0xff] }
 0x1a7   : >> { %2292 = vst [vmem:[%s3134_s18 + $0x1b0] sm:$0xff] %v2291_v23  ;;  %2294 = vst [vmem:[%s3134_s18 + $0x1b8] sm:$0xff] %v2293_v24  ;;  %v2297_v26 = vld [vmem:[%s3138_s23 + $0x1c8] sm:$0xff]  ;;  %v2299_v27 = vld [vmem:[%s3138_s23 + $0x1d0] sm:$0xff] }
 0x1a8   : >> { %2296 = vst [vmem:[%s3134_s18 + $0x1c0] sm:$0xff] %v2295_v25  ;;  %v2301_v28 = vld [vmem:[%s3138_s23 + $0x1d8] sm:$0xff]  ;;  %2298 = vst [vmem:[%s3134_s18 + $0x1c8] sm:$0xff] %v2297_v26  ;;  %v2303_v29 = vld [vmem:[%s3138_s23 + $0x1e0] sm:$0xff] }
 0x1a9   : >> { %2300 = vst [vmem:[%s3134_s18 + $0x1d0] sm:$0xff] %v2299_v27  ;;  %2302 = vst [vmem:[%s3134_s18 + $0x1d8] sm:$0xff] %v2301_v28  ;;  %v2305_v30 = vld [vmem:[%s3138_s23 + $0x1e8] sm:$0xff]  ;;  %v2307_v60 = vld [vmem:[%s3138_s23 + $0x1f0] sm:$0xff] }
 0x1aa   : >> { %2304 = vst [vmem:[%s3134_s18 + $0x1e0] sm:$0xff] %v2303_v29  ;;  %2306 = vst [vmem:[%s3134_s18 + $0x1e8] sm:$0xff] %v2305_v30  ;;  %v2309_v31 = vld [vmem:[%s3138_s23 + $0x1f8] sm:$0xff]  ;;  %s4265_s23 = smov %s4130_s6 }
 0x1ab   : >> { %2308 = vst [vmem:[%s3134_s18 + $0x1f0] sm:$0xff] %v2307_v60  ;;  %2310 = vst [vmem:[%s3134_s18 + $0x1f8] sm:$0xff] %v2309_v31  ;;  %s4264_s18 = smov %s4133_s7 }
 0x1ac PF: > { %s4238_s8 = sand.u32 63, %s4271_s17   ;;  %s2601_s9 = sshll.u32 %s4063_s27, 9 }
 0x1ad   : > { %s2322_s10 = scalar_lea.vmem %s3538_s15, %s2601_s9 [#allocation2]   ;;  %s2324_s11 = scalar_lea.vmem %s4057_s25, %s2601_s9  }
 0x1ae   : > { %p2595_p13 = scmp.le.s32.totalorder %s4238_s8, 0 }
 0x1af   : > { %s3148_s12 = smov (!%p2595_p13), %s2324_s11   ;;  %s3152_s13 = smov (!%p2595_p13), %s2322_s10  }
 0x1b0   : > { %2415 = sbr.rel (%p2595_p13) target bundleno = 449 (0x1c1), region = 131  ;;  %s3156_s14 = smov (!%p2595_p13), 0  }
 0x1b1   : > { %s3160_s20 = smov (!%p2595_p13), 0  }
 0x1b7 LB: >> { %v2334_v55 = vld [vmem:[%s3154_s13] sm:$0xff]  ;;  %s2336_s17 = sadd.s32 1, %s3158_s14  ;;  %s2328_s20 = sadd.s32 1, %s3162_s20   ;;  %s3162_s20 = sphi %s3160_s20, %s2328_s20   ;;  %s3158_s14 = sphi %s3156_s14, %s3157_s14   ;;  %s3154_s13 = sphi %s3152_s13, %s2341_s13   ;;  %s3150_s12 = sphi %s3148_s12, %s2342_s12  }
 0x1b8   : >> { %2335 = vst [vmem:[%s3150_s12] sm:$0xff] %v2334_v55  ;;  %p2337_p0 = scmp.ge.s32.totalorder %s2336_s17, %s4238_s8  ;;  %p2327_p1 = scmp.ge.s32.totalorder %s2328_s20, %s4238_s8 }
 0x1ba   : >> { %s4275_s17 = smov (%p2337_p0, %s2336_s17), 0  ;;  %2330 = sbr.rel (!%p2327_p1) target bundleno = 439 (0x1b7), region = 137 }
 0x1bb   : >> { %s2596_s15 = sshll.u32 %s4275_s17, 3  ;;  %s3157_s14 = smov %s4275_s17  }
 0x1bc   : >> { %s2341_s13 = scalar_lea.vmem %s2322_s10, %s2596_s15 [#allocation2]   ;;  %s2342_s12 = scalar_lea.vmem %s2324_s11, %s2596_s15  }
 0x1c1 PF: > { %p11_p2 = scmp.ge.s32.totalorder %s3205_s19, 12   ;;  %s4267_s15 = smov %s3126_s16 }
 0x1c2   : > { %s4268_s16 = smov %s3213_s22  ;;  %s4269_s17 = smov %s3205_s19 }
 0x1c3   :  { %13 = sbr.rel (!%p11_p2) target bundleno = 2 (0x2), region = 148 }

// kernel: critic_forward.6
= control target key start
LH: loop header
LB: loop body
LE: loop exit
PB: predicated region body
PF: predicated region fallthrough
CT: control target
= control target key end

     0   :  { %s5462_s15 = smov 0   ;;  %s5464_s16 = smov 0   ;;  %s7934_s0 = inlined_call_operand.vmem [shape: f32[1976,600], index: 0, kind: input, shape index: {}]   ;;  %s7935_s1 = inlined_call_operand.vmem [shape: f32[600,36], index: 1, kind: input, shape index: {}]   ;;  %s7936_s2 = inlined_call_operand.vmem [shape: f32[1,36], index: 2, kind: input, shape index: {}]   ;;  %s7937_s3 = inlined_call_operand.vmem [shape: f32[1,36], index: 3, kind: input, shape index: {}]   ;;  %s7938_s4 = inlined_call_operand.vmem [shape: f32[1976,36], index: 4, kind: output, shape index: {}]  }
   0x1   :  { %s5466_s17 = smov 0  }
   0x2 LB: > { %s5475_s18 = sadd.s32 4294967295, %s5402_s17   ;;  %s5477_s19 = sadd.s32 1, %s5402_s17   ;;  %s5402_s17 = sphi %s5466_s17, %s8111_s17   ;;  %s5398_s16 = sphi %s5464_s16, %s8110_s16   ;;  %s5394_s15 = sphi %s5462_s15, %s8109_s15  }
   0x3   : > { %s107_s20 = ssub.s32 %s5402_s17, %s5477_s19  ;;  %s110_s21 = sadd.s32 1, %s5398_s16 }
   0x4   : > { %p108_p0 = scmp.eq.s32.totalorder %s107_s20, 0  ;;  %p120_p1 = scmp.ne.s32.totalorder %s5398_s16, %s5394_s15 }
   0x5   : > { %p121_p2 = scmp.eq.s32.totalorder %s5475_s18, 1  ;;  %p4439_p3 = scmp.ge.s32.totalorder %s5402_s17, 1 }
   0x6   : > { %s5485_s22 = scalar_select %p108_p0, %s5398_s16, %s110_s21  }
   0x7   : > { %p5487_p4 = por %p121_p2, %p120_p1  ;;  %p174_p5 = scmp.lt.s32.totalorder %s5402_s17, 3 }
   0x9   : > { %p175_p6 = pnand %p4439_p3, %p174_p5 }
   0xb   : > { %178 = sbr.rel (%p175_p6) target bundleno = 1015 (0x3f7), region = 36 }
  0x12   : > { %v867_v0 = vld [vmem:[%s7935_s1] sm:$0xff]  ;;  %v868_v1 = vld [vmem:[%s7935_s1 + $0x8] sm:$0xff]  ;;  %v869_v2 = vld [vmem:[%s7935_s1 + $0x10] sm:$0xff]  ;;  %s5501_s30 = sshll.u32 %s5475_s18, 7  ;;  %v5436_v3 = vmov 0.0|0.0   ;;  %vm942_vm0 = vcmask 719872  }
  0x13   : > { %4946 = vmatprep.subr.bf16.mxu0 %v5436_v3  ;;  %5062 = vmatprep.subr.bf16.mxu1 %v5436_v3  ;;  %v4947_v4 = vpack.c.bf16 %v868_v1, %v867_v0  ;;  %v870_v5 = vld [vmem:[%s7935_s1 + $0x18] sm:$0xff]  ;;  %p211_p7 = scmp.lt.s32.totalorder %s5501_s30, 246  ;;  %v871_v7 = vld [vmem:[%s7935_s1 + $0x20] sm:$0xff]  ;;  %v872_v8 = vld [vmem:[%s7935_s1 + $0x28] sm:$0xff]  ;;  %s202_s9 = sand.u32 1, %s5394_s15   ;;  %vm3840_vm1 = vcmask 293888  }
  0x14   : > { %v4950_v6 = vpack.c.bf16 %v870_v5, %v869_v2  ;;  %v4953_v9 = vpack.c.bf16 %v872_v8, %v871_v7  ;;  %v873_v10 = vld [vmem:[%s7935_s1 + $0x30] sm:$0xff]  ;;  %v874_v11 = vld [vmem:[%s7935_s1 + $0x38] sm:$0xff]  ;;  %v875_v15 = vld [vmem:[%s7935_s1 + $0x40] sm:$0xff]  ;;  %s4440_s13 = sshll.u32 %s202_s9, 10  ;;  %s3977_s29 = ssub.s32 (%p5487_p4), 247, %s5501_s30 }
  0x15   : > { %4948 = vmatpush1.bf16.msra.mxu0 %v4947_v4  ;;  %5078 = vmatpush1.bf16.msra.mxu1 %v4947_v4  ;;  %s212_s7 = scalar_select %p211_p7, %s5501_s30, 246  ;;  %v4956_v13 = vpack.c.bf16 %v874_v11, %v873_v10  ;;  %v876_v16 = vld [vmem:[%s7935_s1 + $0x48] sm:$0xff]  ;;  %v877_v18 = vld [vmem:[%s7935_s1 + $0x50] sm:$0xff]  ;;  %v878_v19 = vld [vmem:[%s7935_s1 + $0x58] sm:$0xff] }
  0x16   : > { %4949 = vmatprep.subr.bf16.mxu0 %v5436_v3  ;;  %5063 = vmatprep.subr.bf16.mxu1 %v5436_v3  ;;  %v4959_v17 = vpack.c.bf16 %v876_v16, %v875_v15  ;;  %v4962_v20 = vpack.c.bf16 %v878_v19, %v877_v18  ;;  %v879_v21 = vld [vmem:[%s7935_s1 + $0x60] sm:$0xff]  ;;  %v880_v22 = vld [vmem:[%s7935_s1 + $0x68] sm:$0xff]  ;;  %v881_v24 = vld [vmem:[%s7935_s1 + $0x70] sm:$0xff]  ;;  %s6874_s14 = scalar_lea.vmem [#allocation2], %s4440_s13   ;;  %s4590_s5 = sshll.u32 (%p5487_p4), %s5475_s18, 10 }
  0x17   : > { %s5254_s12 = smul.u32 40, %s212_s7  ;;  %v4965_v23 = vpack.c.bf16 %v880_v22, %v879_v21  ;;  %v882_v25 = vld [vmem:[%s7935_s1 + $0x78] sm:$0xff]  ;;  %v883_v27 = vld [vmem:[%s7935_s1 + $0x80] sm:$0xff]  ;;  %v884_v28 = vld [vmem:[%s7935_s1 + $0x88] sm:$0xff]  ;;  %p3978_p8 = scmp.lt.s32.totalorder (%p5487_p4), %s3977_s29, 128 }
  0x18   : > { %v4968_v26 = vpack.c.bf16 %v882_v25, %v881_v24  ;;  %v4971_v29 = vpack.c.bf16 %v884_v28, %v883_v27  ;;  %v885_v30 = vld [vmem:[%s7935_s1 + $0x90] sm:$0xff]  ;;  %v886_v31 = vld [vmem:[%s7935_s1 + $0x98] sm:$0xff]  ;;  %v887_v33 = vld [vmem:[%s7935_s1 + $0xa0] sm:$0xff]  ;;  %s7735_s8 = scalar_lea.vmem (%p5487_p4), %s7938_s4, %s4590_s5  }
  0x19   : > { %4951 = vmatpush1.bf16.msra.mxu0 %v4950_v6  ;;  %5079 = vmatpush1.bf16.msra.mxu1 %v4950_v6  ;;  %s5521_s17 = scalar_lea.vmem %s7934_s0, %s5254_s12  ;;  %v4974_v32 = vpack.c.bf16 %v886_v31, %v885_v30  ;;  %v888_v34 = vld [vmem:[%s7935_s1 + $0xa8] sm:$0xff]  ;;  %v889_v36 = vld [vmem:[%s7935_s1 + $0xb0] sm:$0xff]  ;;  %v890_v37 = vld [vmem:[%s7935_s1 + $0xb8] sm:$0xff] }
  0x1a   : > { %4952 = vmatprep.subr.bf16.mxu0 %v5436_v3  ;;  %5064 = vmatprep.subr.bf16.mxu1 %v5436_v3  ;;  %v228_v12 = vld [vmem:[%s5521_s17 + $0x8] sm:$0xff]  ;;  %v4977_v35 = vpack.c.bf16 %v888_v34, %v887_v33  ;;  %v4980_v38 = vpack.c.bf16 %v890_v37, %v889_v36  ;;  %v891_v39 = vld [vmem:[%s7935_s1 + $0xc0] sm:$0xff]  ;;  %v893_v42 = vld [vmem:[%s7935_s1 + $0xd0] sm:$0xff] }
  0x1b   : > { %v388_v14 = vld [vmem:[%s5521_s17 + $0x508] sm:$0xff]  ;;  %1391 = vmatprep.mubr.f32.mxu0 %v228_v12  ;;  %v894_v43 = vld [vmem:[%s7935_s1 + $0xd8] sm:$0xff]  ;;  %v895_v45 = vld [vmem:[%s7935_s1 + $0xe0] sm:$0xff] }
  0x1c   : > { %1551 = vmatprep.mubr.f32.mxu1 %v388_v14  ;;  %v892_v40 = vld [vmem:[%s7935_s1 + $0xc8] sm:$0xff]  ;;  %v4986_v44 = vpack.c.bf16 %v894_v43, %v893_v42  ;;  %v897_v48 = vld [vmem:[%s7935_s1 + $0xf0] sm:$0xff]  ;;  %v898_v49 = vld [vmem:[%s7935_s1 + $0xf8] sm:$0xff] }
  0x1d   : > { %4954 = vmatpush1.bf16.msra.mxu0 %v4953_v9  ;;  %5080 = vmatpush1.bf16.msra.mxu1 %v4953_v9  ;;  %v4983_v41 = vpack.c.bf16 %v892_v40, %v891_v39  ;;  %v896_v46 = vld [vmem:[%s7935_s1 + $0xe8] sm:$0xff]  ;;  %v931_v50 = vld [vmem:[%s7935_s1 + $0x200] sm:$0xff]  ;;  %v4992_v52 = vpack.c.bf16 %v898_v49, %v897_v48  ;;  %v933_v56 = vld [vmem:[%s7935_s1 + $0x210] sm:$0xff] }
  0x1e   : > { %4955 = vmatprep.subr.bf16.mxu0 %v5436_v3  ;;  %5065 = vmatprep.subr.bf16.mxu1 %v5436_v3  ;;  %v4989_v47 = vpack.c.bf16 %v896_v46, %v895_v45  ;;  %v932_v51 = vld [vmem:[%s7935_s1 + $0x208] sm:$0xff]  ;;  %v899_v53 = vld [vmem:[%s7935_s1 + $0x100] sm:$0xff]  ;;  %v934_v57 = vld [vmem:[%s7935_s1 + $0x218] sm:$0xff] }
  0x1f   : > { %v900_v54 = vld [vmem:[%s7935_s1 + $0x108] sm:$0xff]  ;;  %v5042_v55 = vpack.c.bf16 %v932_v51, %v931_v50  ;;  %v227_v58 = vld [vmem:[%s5521_s17] sm:$0xff]  ;;  %v233_v61 = vld [vmem:[%s5521_s17 + $0x30] sm:$0xff]  ;;  %v5046_v1 = vpack.c.bf16 %v934_v57, %v933_v56 }
  0x20   : > { %v387_v59 = vld [vmem:[%s5521_s17 + $0x500] sm:$0xff]  ;;  %v4995_v60 = vpack.c.bf16 %v900_v54, %v899_v53  ;;  %v393_v62 = vld [vmem:[%s5521_s17 + $0x530] sm:$0xff]  ;;  %v902_v0 = vld [vmem:[%s7935_s1 + $0x118] sm:$0xff] }
  0x21   : > { %4957 = vmatpush1.bf16.msra.mxu0 %v4956_v13  ;;  %5081 = vmatpush1.bf16.msra.mxu1 %v4956_v13  ;;  %v901_v63 = vld [vmem:[%s7935_s1 + $0x110] sm:$0xff]  ;;  %v935_v2 = vld [vmem:[%s7935_s1 + $0x220] sm:$0xff]  ;;  %v232_v4 = vld [vmem:[%s5521_s17 + $0x28] sm:$0xff] }
  0x22   : > { %4958 = vmatprep.subr.bf16.mxu0 %v5436_v3  ;;  %5066 = vmatprep.subr.bf16.mxu1 %v5436_v3  ;;  %v392_v5 = vld [vmem:[%s5521_s17 + $0x528] sm:$0xff]  ;;  %v238_v7 = vld [vmem:[%s5521_s17 + $0x58] sm:$0xff]  ;;  %v4998_v9 = vpack.c.bf16 %v902_v0, %v901_v63  ;;  %v903_v10 = vld [vmem:[%s7935_s1 + $0x120] sm:$0xff] }
  0x23   : > { %v936_v6 = vld [vmem:[%s7935_s1 + $0x228] sm:$0xff]  ;;  %v398_v8 = vld [vmem:[%s5521_s17 + $0x558] sm:$0xff]  ;;  %v237_v13 = vld [vmem:[%s5521_s17 + $0x50] sm:$0xff] }
  0x24   : > { %v904_v11 = vld [vmem:[%s7935_s1 + $0x128] sm:$0xff]  ;;  %v5050_v12 = vpack.c.bf16 %v936_v6, %v935_v2  ;;  %v397_v14 = vld [vmem:[%s5521_s17 + $0x550] sm:$0xff]  ;;  %v243_v15 = vld [vmem:[%s5521_s17 + $0x80] sm:$0xff] }
  0x25   : > { %4960 = vmatpush1.bf16.msra.mxu0 %v4959_v17  ;;  %5082 = vmatpush1.bf16.msra.mxu1 %v4959_v17  ;;  %v403_v16 = vld [vmem:[%s5521_s17 + $0x580] sm:$0xff]  ;;  %v5001_v17 = vpack.c.bf16 %v904_v11, %v903_v10  ;;  %v905_v18 = vld [vmem:[%s7935_s1 + $0x130] sm:$0xff]  ;;  %v906_v19 = vld [vmem:[%s7935_s1 + $0x138] sm:$0xff] }
  0x26   : > { %4961 = vmatprep.subr.bf16.mxu0 %v5436_v3  ;;  %5067 = vmatprep.subr.bf16.mxu1 %v5436_v3  ;;  %v402_v21 = vld [vmem:[%s5521_s17 + $0x578] sm:$0xff]  ;;  %v248_v22 = vld [vmem:[%s5521_s17 + $0xa8] sm:$0xff]  ;;  %v5004_v24 = vpack.c.bf16 %v906_v19, %v905_v18  ;;  %v907_v25 = vld [vmem:[%s7935_s1 + $0x140] sm:$0xff] }
  0x27   : > { %v247_v27 = vld [vmem:[%s5521_s17 + $0xa0] sm:$0xff]  ;;  %v413_v30 = vld [vmem:[%s5521_s17 + $0x5d0] sm:$0xff]  ;;  %v910_v33 = vld [vmem:[%s7935_s1 + $0x158] sm:$0xff] }
  0x28   : > { %v407_v28 = vld [vmem:[%s5521_s17 + $0x5a0] sm:$0xff]  ;;  %v252_v34 = vld [vmem:[%s5521_s17 + $0xc8] sm:$0xff]  ;;  %v258_v36 = vld [vmem:[%s5521_s17 + $0xf8] sm:$0xff] }
  0x29   : > { %4963 = vmatpush1.bf16.msra.mxu0 %v4962_v20  ;;  %5083 = vmatpush1.bf16.msra.mxu1 %v4962_v20  ;;  %v242_v20 = vld [vmem:[%s5521_s17 + $0x78] sm:$0xff]  ;;  %v911_v39 = vld [vmem:[%s7935_s1 + $0x160] sm:$0xff]  ;;  %v912_v40 = vld [vmem:[%s7935_s1 + $0x168] sm:$0xff] }
  0x2a   : > { %4964 = vmatprep.subr.bf16.mxu0 %v5436_v3  ;;  %5068 = vmatprep.subr.bf16.mxu1 %v5436_v3  ;;  %v418_v37 = vld [vmem:[%s5521_s17 + $0x5f8] sm:$0xff]  ;;  %v417_v42 = vld [vmem:[%s5521_s17 + $0x5f0] sm:$0xff]  ;;  %v263_v43 = vld [vmem:[%s5521_s17 + $0x120] sm:$0xff]  ;;  %v5013_v45 = vpack.c.bf16 %v912_v40, %v911_v39 }
  0x2b   : > { %v913_v46 = vld [vmem:[%s7935_s1 + $0x170] sm:$0xff]  ;;  %v262_v48 = vld [vmem:[%s5521_s17 + $0x118] sm:$0xff]  ;;  %v268_v50 = vld [vmem:[%s5521_s17 + $0x148] sm:$0xff] }
  0x2c   : > { %v422_v49 = vld [vmem:[%s5521_s17 + $0x618] sm:$0xff]  ;;  %v428_v51 = vld [vmem:[%s5521_s17 + $0x648] sm:$0xff]  ;;  %v915_v53 = vld [vmem:[%s7935_s1 + $0x180] sm:$0xff] }
  0x2d   : > { %4966 = vmatpush1.bf16.msra.mxu0 %v4965_v23  ;;  %5084 = vmatpush1.bf16.msra.mxu1 %v4965_v23  ;;  %v408_v23 = vld [vmem:[%s5521_s17 + $0x5a8] sm:$0xff]  ;;  %v427_v56 = vld [vmem:[%s5521_s17 + $0x640] sm:$0xff]  ;;  %v273_v57 = vld [vmem:[%s5521_s17 + $0x170] sm:$0xff] }
  0x2e   : > { %4967 = vmatprep.subr.bf16.mxu0 %v5436_v3  ;;  %5069 = vmatprep.subr.bf16.mxu1 %v5436_v3  ;;  %v916_v54 = vld [vmem:[%s7935_s1 + $0x188] sm:$0xff]  ;;  %v278_v0 = vld [vmem:[%s5521_s17 + $0x198] sm:$0xff]  ;;  %v277_v6 = vld [vmem:[%s5521_s17 + $0x190] sm:$0xff] }
  0x2f   : > { %v432_v63 = vld [vmem:[%s5521_s17 + $0x668] sm:$0xff]  ;;  %v921_v11 = vld [vmem:[%s7935_s1 + $0x1b0] sm:$0xff]  ;;  %v923_v18 = vld [vmem:[%s7935_s1 + $0x1c0] sm:$0xff] }
  0x30   : > { %v924_v19 = vld [vmem:[%s7935_s1 + $0x1c8] sm:$0xff]  ;;  %v929_v39 = vld [vmem:[%s7935_s1 + $0x1f0] sm:$0xff]  ;;  %v930_v40 = vld [vmem:[%s7935_s1 + $0x1f8] sm:$0xff] }
  0x31   : > { %4969 = vmatpush1.bf16.msra.mxu0 %v4968_v26  ;;  %5085 = vmatpush1.bf16.msra.mxu1 %v4968_v26  ;;  %v908_v26 = vld [vmem:[%s7935_s1 + $0x148] sm:$0xff] }
  0x32   : > { %4970 = vmatprep.subr.bf16.mxu0 %v5436_v3  ;;  %5070 = vmatprep.subr.bf16.mxu1 %v5436_v3  ;;  %v5007_v31 = vpack.c.bf16 %v908_v26, %v907_v25  ;;  %v925_v25 = vld [vmem:[%s7935_s1 + $0x1d0] sm:$0xff]  ;;  %v926_v26 = vld [vmem:[%s7935_s1 + $0x1d8] sm:$0xff] }
  0x35   : > { %4972 = vmatpush1.bf16.msra.mxu0 %v4971_v29  ;;  %5086 = vmatpush1.bf16.msra.mxu1 %v4971_v29  ;;  %v253_v29 = vld [vmem:[%s5521_s17 + $0xd0] sm:$0xff] }
  0x36   : > { %4973 = vmatprep.subr.bf16.mxu0 %v5436_v3  ;;  %5071 = vmatprep.subr.bf16.mxu1 %v5436_v3 }
  0x39   : > { %4975 = vmatpush1.bf16.msra.mxu0 %v4974_v32  ;;  %5087 = vmatpush1.bf16.msra.mxu1 %v4974_v32  ;;  %v909_v32 = vld [vmem:[%s7935_s1 + $0x150] sm:$0xff] }
  0x3a   : > { %4976 = vmatprep.subr.bf16.mxu0 %v5436_v3  ;;  %5072 = vmatprep.subr.bf16.mxu1 %v5436_v3 }
  0x3d   : > { %4978 = vmatpush1.bf16.msra.mxu0 %v4977_v35  ;;  %5088 = vmatpush1.bf16.msra.mxu1 %v4977_v35  ;;  %v412_v35 = vld [vmem:[%s5521_s17 + $0x5c8] sm:$0xff] }
  0x3e   : > { %4979 = vmatprep.subr.bf16.mxu0 %v5436_v3  ;;  %5073 = vmatprep.subr.bf16.mxu1 %v5436_v3 }
  0x41   : > { %4981 = vmatpush1.bf16.msra.mxu0 %v4980_v38  ;;  %5089 = vmatpush1.bf16.msra.mxu1 %v4980_v38  ;;  %v5010_v38 = vpack.c.bf16 %v910_v33, %v909_v32  ;;  %v927_v32 = vld [vmem:[%s7935_s1 + $0x1e0] sm:$0xff]  ;;  %v928_v33 = vld [vmem:[%s7935_s1 + $0x1e8] sm:$0xff] }
  0x42   : > { %4982 = vmatprep.subr.bf16.mxu0 %v5436_v3  ;;  %5074 = vmatprep.subr.bf16.mxu1 %v5436_v3 }
  0x45   : > { %4984 = vmatpush1.bf16.msra.mxu0 %v4983_v41  ;;  %5090 = vmatpush1.bf16.msra.mxu1 %v4983_v41  ;;  %v257_v41 = vld [vmem:[%s5521_s17 + $0xf0] sm:$0xff] }
  0x46   : > { %4985 = vmatprep.subr.bf16.mxu0 %v5436_v3  ;;  %5075 = vmatprep.subr.bf16.mxu1 %v5436_v3 }
  0x49   : > { %4987 = vmatpush1.bf16.msra.mxu0 %v4986_v44  ;;  %5091 = vmatpush1.bf16.msra.mxu1 %v4986_v44  ;;  %v423_v44 = vld [vmem:[%s5521_s17 + $0x620] sm:$0xff] }
  0x4a   : > { %4988 = vmatprep.subr.bf16.mxu0 %v5436_v3  ;;  %5076 = vmatprep.subr.bf16.mxu1 %v5436_v3 }
  0x4d   : > { %4990 = vmatpush1.bf16.msra.mxu0 %v4989_v47  ;;  %5092 = vmatpush1.bf16.msra.mxu1 %v4989_v47  ;;  %v914_v47 = vld [vmem:[%s7935_s1 + $0x178] sm:$0xff] }
  0x4e   : > { %4991 = vmatprep.subr.bf16.mxu0 %v5436_v3  ;;  %5077 = vmatprep.subr.bf16.mxu1 %v5436_v3 }
  0x51   : > { %4993 = vmatpush1.bf16.msra.mxu0 %v4992_v52  ;;  %5093 = vmatpush1.bf16.msra.mxu1 %v4992_v52  ;;  %v5016_v52 = vpack.c.bf16 %v914_v47, %v913_v46  ;;  %v307_v46 = vld [vmem:[%s5521_s17 + $0x280] sm:$0xff] }
  0x52   : > { %4994 = vmatprep.subr.bf16.mxu0 %v5436_v3  ;;  %5043 = vmatprep.subr.bf16.mxu1 %v5042_v55  ;;  %v467_v47 = vld [vmem:[%s5521_s17 + $0x780] sm:$0xff] }
  0x54   : > { %1392 = vmatmul.mubr.f32.vlgmr.msra.gmra.mrb[0].mxu0 %v227_v58  ;;  %1552 = vmatmul.mubr.f32.vlgmr.msra.gmra.mrb[0].mxu1 %v387_v59  ;;  %v433_v58 = vld [vmem:[%s5521_s17 + $0x670] sm:$0xff]  ;;  %v5019_v59 = vpack.c.bf16 %v916_v54, %v915_v53  ;;  %v318_v54 = vld [vmem:[%s5521_s17 + $0x2d8] sm:$0xff] }
  0x55   : > { %4996 = vmatpush1.bf16.msra.mxu0 %v4995_v60  ;;  %5045 = vmatpush3.bf16.msra.mxu1 %v5042_v55  ;;  %v267_v55 = vld [vmem:[%s5521_s17 + $0x140] sm:$0xff]  ;;  %v917_v60 = vld [vmem:[%s7935_s1 + $0x190] sm:$0xff] }
  0x56   : > { %1396 = vmatprep.mubr.f32.mxu0 %v233_v61  ;;  %1556 = vmatprep.mubr.f32.mxu1 %v393_v62  ;;  %v918_v61 = vld [vmem:[%s7935_s1 + $0x198] sm:$0xff]  ;;  %v272_v62 = vld [vmem:[%s5521_s17 + $0x168] sm:$0xff] }
  0x57   : > { %4997 = vmatprep.subr.bf16.mxu0 %v5436_v3  ;;  %5047 = vmatprep.subr.bf16.mxu1 %v5046_v1  ;;  %v5022_v2 = vpack.c.bf16 %v918_v61, %v917_v60  ;;  %v322_v60 = vld [vmem:[%s5521_s17 + $0x2f8] sm:$0xff] }
  0x58   : > { %1397 = vmatmul.mubr.f32.gmra.mrb[2].mxu0 %v232_v4  ;;  %1557 = vmatmul.mubr.f32.gmra.mrb[2].mxu1 %v392_v5  ;;  %v919_v4 = vld [vmem:[%s7935_s1 + $0x1a0] sm:$0xff]  ;;  %v920_v5 = vld [vmem:[%s7935_s1 + $0x1a8] sm:$0xff]  ;;  %v482_v61 = vld [vmem:[%s5521_s17 + $0x7f8] sm:$0xff] }
  0x59   : > { %1401 = vmatprep.mubr.f32.mxu0 %v238_v7  ;;  %1561 = vmatprep.mubr.f32.mxu1 %v398_v8  ;;  %v437_v7 = vld [vmem:[%s5521_s17 + $0x690] sm:$0xff]  ;;  %v283_v8 = vld [vmem:[%s5521_s17 + $0x1c0] sm:$0xff]  ;;  %v5025_v10 = vpack.c.bf16 %v920_v5, %v919_v4  ;;  %v332_v5 = vld [vmem:[%s5521_s17 + $0x348] sm:$0xff] }
  0x5a   : > { %4999 = vmatpush1.bf16.msra.mxu0 %v4998_v9  ;;  %5049 = vmatpush3.bf16.msra.mxu1 %v5046_v1  ;;  %v438_v1 = vld [vmem:[%s5521_s17 + $0x698] sm:$0xff]  ;;  %v443_v9 = vld [vmem:[%s5521_s17 + $0x6c0] sm:$0xff]  ;;  %v493_v4 = vld [vmem:[%s5521_s17 + $0x850] sm:$0xff] }
  0x5b   : > { %5000 = vmatprep.subr.bf16.mxu0 %v5436_v3  ;;  %5051 = vmatprep.subr.bf16.mxu1 %v5050_v12 }
  0x5c   : > { %1402 = vmatmul.mubr.f32.gmra.mrb[4].mxu0 %v237_v13  ;;  %1562 = vmatmul.mubr.f32.gmra.mrb[4].mxu1 %v397_v14  ;;  %v282_v13 = vld [vmem:[%s5521_s17 + $0x1b8] sm:$0xff] }
  0x5d   : > { %1406 = vmatprep.mubr.f32.mxu0 %v243_v15  ;;  %1566 = vmatprep.mubr.f32.mxu1 %v403_v16  ;;  %v442_v14 = vld [vmem:[%s5521_s17 + $0x6b8] sm:$0xff]  ;;  %v288_v15 = vld [vmem:[%s5521_s17 + $0x1e8] sm:$0xff] }
  0x5e   : > { %5002 = vmatpush1.bf16.msra.mxu0 %v5001_v17  ;;  %5053 = vmatpush3.bf16.msra.mxu1 %v5050_v12  ;;  %v922_v12 = vld [vmem:[%s7935_s1 + $0x1b8] sm:$0xff]  ;;  %v448_v16 = vld [vmem:[%s5521_s17 + $0x6e8] sm:$0xff] }
  0x5f   : > { %5003 = vmatprep.subr.bf16.mxu0 %v5436_v3  ;;  %v5028_v17 = vpack.c.bf16 %v922_v12, %v921_v11  ;;  %v343_v11 = vld [vmem:[%s5521_s17 + $0x3a0] sm:$0xff] }
  0x60   : > { %1407 = vmatmul.mubr.f32.gmra.mrb[6].mxu0 %v242_v20  ;;  %1567 = vmatmul.mubr.f32.gmra.mrb[6].mxu1 %v402_v21  ;;  %v287_v20 = vld [vmem:[%s5521_s17 + $0x1e0] sm:$0xff] }
  0x61   : > { %1411 = vmatprep.mubr.f32.mxu0 %v248_v22  ;;  %1571 = vmatprep.mubr.f32.mxu1 %v408_v23  ;;  %v447_v21 = vld [vmem:[%s5521_s17 + $0x6e0] sm:$0xff]  ;;  %v293_v22 = vld [vmem:[%s5521_s17 + $0x210] sm:$0xff] }
  0x62   : > { %5005 = vmatpush1.bf16.msra.mxu0 %v5004_v24  ;;  %v453_v23 = vld [vmem:[%s5521_s17 + $0x710] sm:$0xff]  ;;  %v5031_v24 = vpack.c.bf16 %v924_v19, %v923_v18  ;;  %v503_v12 = vld [vmem:[%s5521_s17 + $0x8a0] sm:$0xff] }
  0x63   : > { %5006 = vmatprep.subr.bf16.mxu0 %v5436_v3  ;;  %v507_v18 = vld [vmem:[%s5521_s17 + $0x8c0] sm:$0xff]  ;;  %v353_v19 = vld [vmem:[%s5521_s17 + $0x3f0] sm:$0xff] }
  0x64   : > { %1412 = vmatmul.mubr.f32.gmra.mrb[8].mxu0 %v247_v27  ;;  %1572 = vmatmul.mubr.f32.gmra.mrb[8].mxu1 %v407_v28  ;;  %v292_v27 = vld [vmem:[%s5521_s17 + $0x208] sm:$0xff] }
  0x65   : > { %1416 = vmatprep.mubr.f32.mxu0 %v253_v29  ;;  %1576 = vmatprep.mubr.f32.mxu1 %v413_v30  ;;  %v452_v28 = vld [vmem:[%s5521_s17 + $0x708] sm:$0xff]  ;;  %v298_v29 = vld [vmem:[%s5521_s17 + $0x238] sm:$0xff] }
  0x66   : > { %5008 = vmatpush1.bf16.msra.mxu0 %v5007_v31  ;;  %v458_v30 = vld [vmem:[%s5521_s17 + $0x738] sm:$0xff]  ;;  %v5034_v31 = vpack.c.bf16 %v926_v26, %v925_v25  ;;  %v357_v25 = vld [vmem:[%s5521_s17 + $0x410] sm:$0xff] }
  0x67   : > { %5009 = vmatprep.subr.bf16.mxu0 %v5436_v3  ;;  %v517_v26 = vld [vmem:[%s5521_s17 + $0x910] sm:$0xff] }
  0x68   : > { %1417 = vmatmul.mubr.f32.gmra.mrb[10].mxu0 %v252_v34  ;;  %1577 = vmatmul.mubr.f32.gmra.mrb[10].mxu1 %v412_v35  ;;  %v297_v34 = vld [vmem:[%s5521_s17 + $0x230] sm:$0xff] }
  0x69   : > { %1421 = vmatprep.mubr.f32.mxu0 %v258_v36  ;;  %1581 = vmatprep.mubr.f32.mxu1 %v418_v37  ;;  %v457_v35 = vld [vmem:[%s5521_s17 + $0x730] sm:$0xff]  ;;  %v303_v36 = vld [vmem:[%s5521_s17 + $0x260] sm:$0xff] }
  0x6a   : > { %5011 = vmatpush1.bf16.msra.mxu0 %v5010_v38  ;;  %v463_v37 = vld [vmem:[%s5521_s17 + $0x760] sm:$0xff]  ;;  %v5037_v38 = vpack.c.bf16 %v928_v33, %v927_v32  ;;  %v528_v32 = vld [vmem:[%s5521_s17 + $0x968] sm:$0xff] }
  0x6b   : > { %5012 = vmatprep.subr.bf16.mxu0 %v5436_v3  ;;  %v367_v33 = vld [vmem:[%s5521_s17 + $0x460] sm:$0xff] }
  0x6c   : > { %1422 = vmatmul.mubr.f32.gmra.mrb[12].mxu0 %v257_v41  ;;  %1582 = vmatmul.mubr.f32.gmra.mrb[12].mxu1 %v417_v42  ;;  %v302_v41 = vld [vmem:[%s5521_s17 + $0x258] sm:$0xff] }
  0x6d   : > { %1426 = vmatprep.mubr.f32.mxu0 %v263_v43  ;;  %1586 = vmatprep.mubr.f32.mxu1 %v423_v44  ;;  %v462_v42 = vld [vmem:[%s5521_s17 + $0x758] sm:$0xff]  ;;  %v308_v43 = vld [vmem:[%s5521_s17 + $0x288] sm:$0xff] }
  0x6e   : > { %5014 = vmatpush1.bf16.msra.mxu0 %v5013_v45  ;;  %v468_v44 = vld [vmem:[%s5521_s17 + $0x788] sm:$0xff]  ;;  %v5040_v45 = vpack.c.bf16 %v930_v40, %v929_v39  ;;  %v378_v39 = vld [vmem:[%s5521_s17 + $0x4b8] sm:$0xff] }
  0x6f   : > { %5015 = vmatprep.subr.bf16.mxu0 %v5436_v3  ;;  %v538_v40 = vld [vmem:[%s5521_s17 + $0x9b8] sm:$0xff] }
  0x70   : > { %1427 = vmatmul.mubr.f32.gmra.mrb[14].mxu0 %v262_v48  ;;  %1587 = vmatmul.mubr.f32.gmra.mrb[14].mxu1 %v422_v49  ;;  %v313_v48 = vld [vmem:[%s5521_s17 + $0x2b0] sm:$0xff] }
  0x71   : > { %1431 = vmatprep.mubr.f32.mxu0 %v268_v50  ;;  %1591 = vmatprep.mubr.f32.mxu1 %v428_v51  ;;  %v473_v49 = vld [vmem:[%s5521_s17 + $0x7b0] sm:$0xff]  ;;  %v938_v50 = vld [vmem:[%s7935_s1 + $0x238] sm:$0xff]  ;;  %v312_v51 = vld [vmem:[%s5521_s17 + $0x2a8] sm:$0xff] }
  0x72   : > { %5017 = vmatpush1.bf16.msra.mxu0 %v5016_v52  ;;  %v472_v52 = vld [vmem:[%s5521_s17 + $0x7a8] sm:$0xff] }
  0x73   : > { %5018 = vmatprep.subr.bf16.mxu0 %v5436_v3 }
  0x74   : > { %1432 = vmatmul.mubr.f32.gmra.mrb[16].mxu0 %v267_v55  ;;  %1592 = vmatmul.mubr.f32.gmra.mrb[16].mxu1 %v427_v56  ;;  %v478_v55 = vld [vmem:[%s5521_s17 + $0x7d8] sm:$0xff]  ;;  %v317_v56 = vld [vmem:[%s5521_s17 + $0x2d0] sm:$0xff] }
  0x75   : > { %1436 = vmatprep.mubr.f32.mxu0 %v273_v57  ;;  %1596 = vmatprep.mubr.f32.mxu1 %v433_v58  ;;  %v477_v57 = vld [vmem:[%s5521_s17 + $0x7d0] sm:$0xff]  ;;  %v323_v58 = vld [vmem:[%s5521_s17 + $0x300] sm:$0xff] }
  0x76   : > { %5020 = vmatpush1.bf16.msra.mxu0 %v5019_v59  ;;  %v483_v59 = vld [vmem:[%s5521_s17 + $0x800] sm:$0xff] }
  0x77   : > { %5021 = vmatprep.subr.bf16.mxu0 %v5436_v3 }
  0x78   : > { %1437 = vmatmul.mubr.f32.gmra.mrb[18].mxu0 %v272_v62  ;;  %1597 = vmatmul.mubr.f32.gmra.mrb[18].mxu1 %v432_v63  ;;  %v328_v62 = vld [vmem:[%s5521_s17 + $0x328] sm:$0xff] }
  0x79   : > { %1441 = vmatprep.mubr.f32.mxu0 %v278_v0  ;;  %1601 = vmatprep.mubr.f32.mxu1 %v438_v1  ;;  %v488_v63 = vld [vmem:[%s5521_s17 + $0x828] sm:$0xff]  ;;  %v327_v0 = vld [vmem:[%s5521_s17 + $0x320] sm:$0xff] }
  0x7a   : > { %5023 = vmatpush1.bf16.msra.mxu0 %v5022_v2  ;;  %v487_v1 = vld [vmem:[%s5521_s17 + $0x820] sm:$0xff]  ;;  %v333_v2 = vld [vmem:[%s5521_s17 + $0x350] sm:$0xff] }
  0x7b   : > { %5024 = vmatprep.subr.bf16.mxu0 %v5436_v3 }
  0x7c   : > { %1442 = vmatmul.mubr.f32.gmra.mrb[20].mxu0 %v277_v6  ;;  %1602 = vmatmul.mubr.f32.gmra.mrb[20].mxu1 %v437_v7  ;;  %v492_v6 = vld [vmem:[%s5521_s17 + $0x848] sm:$0xff]  ;;  %v338_v7 = vld [vmem:[%s5521_s17 + $0x378] sm:$0xff] }
  0x7d   : > { %1446 = vmatprep.mubr.f32.mxu0 %v283_v8  ;;  %1606 = vmatprep.mubr.f32.mxu1 %v443_v9  ;;  %v498_v8 = vld [vmem:[%s5521_s17 + $0x878] sm:$0xff]  ;;  %v337_v9 = vld [vmem:[%s5521_s17 + $0x370] sm:$0xff] }
  0x7e   : > { %5026 = vmatpush1.bf16.msra.mxu0 %v5025_v10  ;;  %v497_v10 = vld [vmem:[%s5521_s17 + $0x870] sm:$0xff] }
  0x7f   : > { %5027 = vmatprep.subr.bf16.mxu0 %v5436_v3 }
  0x80   : > { %1447 = vmatmul.mubr.f32.gmra.mrb[22].mxu0 %v282_v13  ;;  %1607 = vmatmul.mubr.f32.gmra.mrb[22].mxu1 %v442_v14  ;;  %v342_v13 = vld [vmem:[%s5521_s17 + $0x398] sm:$0xff] }
  0x81   : > { %1451 = vmatprep.mubr.f32.mxu0 %v288_v15  ;;  %1611 = vmatprep.mubr.f32.mxu1 %v448_v16  ;;  %v502_v14 = vld [vmem:[%s5521_s17 + $0x898] sm:$0xff]  ;;  %v348_v15 = vld [vmem:[%s5521_s17 + $0x3c8] sm:$0xff] }
  0x82   : > { %5029 = vmatpush1.bf16.msra.mxu0 %v5028_v17  ;;  %v508_v16 = vld [vmem:[%s5521_s17 + $0x8c8] sm:$0xff]  ;;  %v347_v17 = vld [vmem:[%s5521_s17 + $0x3c0] sm:$0xff] }
  0x83   : > { %5030 = vmatprep.subr.bf16.mxu0 %v5436_v3 }
  0x84   : > { %1452 = vmatmul.mubr.f32.gmra.mrb[24].mxu0 %v287_v20  ;;  %1612 = vmatmul.mubr.f32.gmra.mrb[24].mxu1 %v447_v21  ;;  %v513_v20 = vld [vmem:[%s5521_s17 + $0x8f0] sm:$0xff]  ;;  %v352_v21 = vld [vmem:[%s5521_s17 + $0x3e8] sm:$0xff] }
  0x85   : > { %1456 = vmatprep.mubr.f32.mxu0 %v293_v22  ;;  %1616 = vmatprep.mubr.f32.mxu1 %v453_v23  ;;  %v512_v22 = vld [vmem:[%s5521_s17 + $0x8e8] sm:$0xff]  ;;  %v358_v23 = vld [vmem:[%s5521_s17 + $0x418] sm:$0xff] }
  0x86   : > { %5032 = vmatpush1.bf16.msra.mxu0 %v5031_v24  ;;  %v518_v24 = vld [vmem:[%s5521_s17 + $0x918] sm:$0xff] }
  0x87   : > { %5033 = vmatprep.subr.bf16.mxu0 %v5436_v3 }
  0x88   : > { %1457 = vmatmul.mubr.f32.gmra.mrb[26].mxu0 %v292_v27  ;;  %1617 = vmatmul.mubr.f32.gmra.mrb[26].mxu1 %v452_v28  ;;  %v363_v27 = vld [vmem:[%s5521_s17 + $0x440] sm:$0xff] }
  0x89   : > { %1461 = vmatprep.mubr.f32.mxu0 %v298_v29  ;;  %1621 = vmatprep.mubr.f32.mxu1 %v458_v30  ;;  %v523_v28 = vld [vmem:[%s5521_s17 + $0x940] sm:$0xff]  ;;  %v362_v29 = vld [vmem:[%s5521_s17 + $0x438] sm:$0xff] }
  0x8a   : > { %5035 = vmatpush1.bf16.msra.mxu0 %v5034_v31  ;;  %v522_v30 = vld [vmem:[%s5521_s17 + $0x938] sm:$0xff]  ;;  %v368_v31 = vld [vmem:[%s5521_s17 + $0x468] sm:$0xff] }
  0x8b   : > { %5036 = vmatprep.subr.bf16.mxu0 %v5436_v3 }
  0x8c   : > { %1462 = vmatmul.mubr.f32.gmra.mrb[28].mxu0 %v297_v34  ;;  %1622 = vmatmul.mubr.f32.gmra.mrb[28].mxu1 %v457_v35  ;;  %v527_v34 = vld [vmem:[%s5521_s17 + $0x960] sm:$0xff]  ;;  %v373_v35 = vld [vmem:[%s5521_s17 + $0x490] sm:$0xff] }
  0x8d   : > { %1466 = vmatprep.mubr.f32.mxu0 %v303_v36  ;;  %1626 = vmatprep.mubr.f32.mxu1 %v463_v37  ;;  %v533_v36 = vld [vmem:[%s5521_s17 + $0x990] sm:$0xff]  ;;  %v372_v37 = vld [vmem:[%s5521_s17 + $0x488] sm:$0xff] }
  0x8e   : > { %5038 = vmatpush1.bf16.msra.mxu0 %v5037_v38  ;;  %v532_v38 = vld [vmem:[%s5521_s17 + $0x988] sm:$0xff] }
  0x8f   : > { %5039 = vmatprep.subr.bf16.mxu0 %v5436_v3  ;;  %v937_v3 = vld [vmem:[%s7935_s1 + $0x230] sm:$0xff] }
  0x90   : > { %1467 = vmatmul.mubr.f32.gmra.mrb[30].mxu0 %v302_v41  ;;  %1627 = vmatmul.mubr.f32.gmra.mrb[30].mxu1 %v462_v42  ;;  %v5054_v53 = vpack.c.bf16 %v938_v50, %v937_v3  ;;  %v377_v41 = vld [vmem:[%s5521_s17 + $0x4b0] sm:$0xff] }
  0x91   : > { %1471 = vmatprep.mubr.f32.mxu0 %v308_v43  ;;  %1631 = vmatprep.mubr.f32.mxu1 %v468_v44  ;;  %v537_v42 = vld [vmem:[%s5521_s17 + $0x9b0] sm:$0xff]  ;;  %v383_v43 = vld [vmem:[%s5521_s17 + $0x4e0] sm:$0xff] }
  0x92   : > { %5041 = vmatpush1.bf16.msra.mxu0 %v5040_v45  ;;  %5055 = vmatprep.subr.bf16.mxu1 %v5054_v53  ;;  %v543_v44 = vld [vmem:[%s5521_s17 + $0x9e0] sm:$0xff]  ;;  %v382_v45 = vld [vmem:[%s5521_s17 + $0x4d8] sm:$0xff]  ;;  %v229_v3 = vld [vmem:[%s5521_s17 + $0x10] sm:$0xff] }
  0x93   : > { %5057 = vmatpush3.bf16.msra.mxu1 %v5054_v53  ;;  %v553_v50 = vld [vmem:[%s5521_s17 + $0xa30] sm:$0xff]  ;;  %v940_v53 = vld [vmem:[%s7935_s1 + $0x248] sm:$0xff] }
  0x94   : > { %1472 = vmatmul.mubr.f32.gmra.mrb[32].mxu0 %v307_v46  ;;  %1632 = vmatmul.mubr.f32.gmra.mrb[32].mxu1 %v467_v47  ;;  %v542_v46 = vld [vmem:[%s5521_s17 + $0x9d8] sm:$0xff]  ;;  %v548_v47 = vld [vmem:[%s5521_s17 + $0xa08] sm:$0xff] }
  0x95   : > { %1476 = vmatprep.mubr.f32.mxu0 %v313_v48  ;;  %1636 = vmatprep.mubr.f32.mxu1 %v473_v49  ;;  %v230_v48 = vld [vmem:[%s5521_s17 + $0x18] sm:$0xff]  ;;  %v547_v49 = vld [vmem:[%s5521_s17 + $0xa00] sm:$0xff] }
  0x98   : > { %1477 = vmatmul.mubr.f32.gmra.mrb[34].mxu0 %v312_v51  ;;  %1637 = vmatmul.mubr.f32.gmra.mrb[34].mxu1 %v472_v52  ;;  %v235_v51 = vld [vmem:[%s5521_s17 + $0x40] sm:$0xff] }
  0x99   : > { %1481 = vmatprep.mubr.f32.mxu0 %v318_v54  ;;  %1641 = vmatprep.mubr.f32.mxu1 %v478_v55  ;;  %v939_v52 = vld [vmem:[%s7935_s1 + $0x240] sm:$0xff]  ;;  %v552_v54 = vld [vmem:[%s5521_s17 + $0xa28] sm:$0xff]  ;;  %v234_v55 = vld [vmem:[%s5521_s17 + $0x38] sm:$0xff] }
  0x9c   : > { %1482 = vmatmul.mubr.f32.gmra.mrb[36].mxu0 %v317_v56  ;;  %1642 = vmatmul.mubr.f32.gmra.mrb[36].mxu1 %v477_v57  ;;  %v5058_v56 = vpack.c.bf16 %v940_v53, %v939_v52  ;;  %v558_v57 = vld [vmem:[%s5521_s17 + $0xa58] sm:$0xff]  ;;  %v309_v52 = vld [vmem:[%s5521_s17 + $0x290] sm:$0xff] }
  0x9d   : > { %1486 = vmatprep.mubr.f32.mxu0 %v323_v58  ;;  %1646 = vmatprep.mubr.f32.mxu1 %v483_v59  ;;  %v240_v58 = vld [vmem:[%s5521_s17 + $0x68] sm:$0xff]  ;;  %v557_v59 = vld [vmem:[%s5521_s17 + $0xa50] sm:$0xff] }
  0x9e   : > { %5059 = vmatprep.subr.bf16.mxu1 %v5058_v56  ;;  %v633_v53 = vld [vmem:[%s5521_s17 + $0xcb0] sm:$0xff] }
  0x9f   : > { %5061 = vmatpush3.bf16.msra.mxu1 %v5058_v56  ;;  %v632_v56 = vld [vmem:[%s5521_s17 + $0xca8] sm:$0xff] }
  0xa0   : > { %1487 = vmatmul.mubr.f32.gmra.mrb[38].mxu0 %v322_v60  ;;  %1647 = vmatmul.mubr.f32.gmra.mrb[38].mxu1 %v482_v61  ;;  %v239_v60 = vld [vmem:[%s5521_s17 + $0x60] sm:$0xff] }
  0xa1   : > { %1491 = vmatprep.mubr.f32.mxu0 %v328_v62  ;;  %1651 = vmatprep.mubr.f32.mxu1 %v488_v63  ;;  %v563_v61 = vld [vmem:[%s5521_s17 + $0xa80] sm:$0xff]  ;;  %v245_v62 = vld [vmem:[%s5521_s17 + $0x90] sm:$0xff]  ;;  %v562_v63 = vld [vmem:[%s5521_s17 + $0xa78] sm:$0xff] }
  0xa4   : > { %1492 = vmatmul.mubr.f32.gmra.mrb[40].mxu0 %v327_v0  ;;  %1652 = vmatmul.mubr.f32.gmra.mrb[40].mxu1 %v487_v1  ;;  %v244_v0 = vld [vmem:[%s5521_s17 + $0x88] sm:$0xff] }
  0xa5   : > { %1496 = vmatprep.mubr.f32.mxu0 %v333_v2  ;;  %1656 = vmatprep.mubr.f32.mxu1 %v493_v4  ;;  %v568_v1 = vld [vmem:[%s5521_s17 + $0xaa8] sm:$0xff]  ;;  %v250_v2 = vld [vmem:[%s5521_s17 + $0xb8] sm:$0xff]  ;;  %v567_v4 = vld [vmem:[%s5521_s17 + $0xaa0] sm:$0xff] }
  0xa8   : > { %1497 = vmatmul.mubr.f32.gmra.mrb[42].mxu0 %v332_v5  ;;  %1657 = vmatmul.mubr.f32.gmra.mrb[42].mxu1 %v492_v6  ;;  %v249_v5 = vld [vmem:[%s5521_s17 + $0xb0] sm:$0xff] }
  0xa9   : > { %1501 = vmatprep.mubr.f32.mxu0 %v338_v7  ;;  %1661 = vmatprep.mubr.f32.mxu1 %v498_v8  ;;  %v573_v6 = vld [vmem:[%s5521_s17 + $0xad0] sm:$0xff]  ;;  %v255_v7 = vld [vmem:[%s5521_s17 + $0xe0] sm:$0xff]  ;;  %v572_v8 = vld [vmem:[%s5521_s17 + $0xac8] sm:$0xff] }
  0xac   : > { %1502 = vmatmul.mubr.f32.gmra.mrb[44].mxu0 %v337_v9  ;;  %1662 = vmatmul.mubr.f32.gmra.mrb[44].mxu1 %v497_v10  ;;  %v254_v9 = vld [vmem:[%s5521_s17 + $0xd8] sm:$0xff] }
  0xad   : > { %1506 = vmatprep.mubr.f32.mxu0 %v343_v11  ;;  %1666 = vmatprep.mubr.f32.mxu1 %v503_v12  ;;  %v578_v10 = vld [vmem:[%s5521_s17 + $0xaf8] sm:$0xff]  ;;  %v260_v11 = vld [vmem:[%s5521_s17 + $0x108] sm:$0xff]  ;;  %v577_v12 = vld [vmem:[%s5521_s17 + $0xaf0] sm:$0xff] }
  0xb0   : > { %1507 = vmatmul.mubr.f32.gmra.mrb[46].mxu0 %v342_v13  ;;  %1667 = vmatmul.mubr.f32.gmra.mrb[46].mxu1 %v502_v14  ;;  %v259_v13 = vld [vmem:[%s5521_s17 + $0x100] sm:$0xff] }
  0xb1   : > { %1511 = vmatprep.mubr.f32.mxu0 %v348_v15  ;;  %1671 = vmatprep.mubr.f32.mxu1 %v508_v16  ;;  %v583_v14 = vld [vmem:[%s5521_s17 + $0xb20] sm:$0xff]  ;;  %v265_v15 = vld [vmem:[%s5521_s17 + $0x130] sm:$0xff]  ;;  %v582_v16 = vld [vmem:[%s5521_s17 + $0xb18] sm:$0xff] }
  0xb4   : > { %1512 = vmatmul.mubr.f32.gmra.mrb[48].mxu0 %v347_v17  ;;  %1672 = vmatmul.mubr.f32.gmra.mrb[48].mxu1 %v507_v18  ;;  %v264_v17 = vld [vmem:[%s5521_s17 + $0x128] sm:$0xff] }
  0xb5   : > { %1516 = vmatprep.mubr.f32.mxu0 %v353_v19  ;;  %1676 = vmatprep.mubr.f32.mxu1 %v513_v20  ;;  %v588_v18 = vld [vmem:[%s5521_s17 + $0xb48] sm:$0xff]  ;;  %v270_v19 = vld [vmem:[%s5521_s17 + $0x158] sm:$0xff]  ;;  %v587_v20 = vld [vmem:[%s5521_s17 + $0xb40] sm:$0xff] }
  0xb8   : > { %1517 = vmatmul.mubr.f32.gmra.mrb[50].mxu0 %v352_v21  ;;  %1677 = vmatmul.mubr.f32.gmra.mrb[50].mxu1 %v512_v22  ;;  %v269_v21 = vld [vmem:[%s5521_s17 + $0x150] sm:$0xff] }
  0xb9   : > { %1521 = vmatprep.mubr.f32.mxu0 %v358_v23  ;;  %1681 = vmatprep.mubr.f32.mxu1 %v518_v24  ;;  %v593_v22 = vld [vmem:[%s5521_s17 + $0xb70] sm:$0xff]  ;;  %v275_v23 = vld [vmem:[%s5521_s17 + $0x180] sm:$0xff]  ;;  %v592_v24 = vld [vmem:[%s5521_s17 + $0xb68] sm:$0xff] }
  0xbc   : > { %1522 = vmatmul.mubr.f32.gmra.mrb[52].mxu0 %v357_v25  ;;  %1682 = vmatmul.mubr.f32.gmra.mrb[52].mxu1 %v517_v26  ;;  %v274_v25 = vld [vmem:[%s5521_s17 + $0x178] sm:$0xff] }
  0xbd   : > { %1526 = vmatprep.mubr.f32.mxu0 %v363_v27  ;;  %1686 = vmatprep.mubr.f32.mxu1 %v523_v28  ;;  %v598_v26 = vld [vmem:[%s5521_s17 + $0xb98] sm:$0xff]  ;;  %v280_v27 = vld [vmem:[%s5521_s17 + $0x1a8] sm:$0xff]  ;;  %v597_v28 = vld [vmem:[%s5521_s17 + $0xb90] sm:$0xff] }
  0xc0   : > { %1527 = vmatmul.mubr.f32.gmra.mrb[54].mxu0 %v362_v29  ;;  %1687 = vmatmul.mubr.f32.gmra.mrb[54].mxu1 %v522_v30  ;;  %v279_v29 = vld [vmem:[%s5521_s17 + $0x1a0] sm:$0xff] }
  0xc1   : > { %1531 = vmatprep.mubr.f32.mxu0 %v368_v31  ;;  %1691 = vmatprep.mubr.f32.mxu1 %v528_v32  ;;  %v603_v30 = vld [vmem:[%s5521_s17 + $0xbc0] sm:$0xff]  ;;  %v285_v31 = vld [vmem:[%s5521_s17 + $0x1d0] sm:$0xff]  ;;  %v602_v32 = vld [vmem:[%s5521_s17 + $0xbb8] sm:$0xff] }
  0xc4   : > { %1532 = vmatmul.mubr.f32.gmra.mrb[56].mxu0 %v367_v33  ;;  %1692 = vmatmul.mubr.f32.gmra.mrb[56].mxu1 %v527_v34  ;;  %v284_v33 = vld [vmem:[%s5521_s17 + $0x1c8] sm:$0xff] }
  0xc5   : > { %1536 = vmatprep.mubr.f32.mxu0 %v373_v35  ;;  %1696 = vmatprep.mubr.f32.mxu1 %v533_v36  ;;  %v608_v34 = vld [vmem:[%s5521_s17 + $0xbe8] sm:$0xff]  ;;  %v290_v35 = vld [vmem:[%s5521_s17 + $0x1f8] sm:$0xff]  ;;  %v607_v36 = vld [vmem:[%s5521_s17 + $0xbe0] sm:$0xff] }
  0xc8   : > { %1537 = vmatmul.mubr.f32.gmra.mrb[58].mxu0 %v372_v37  ;;  %1697 = vmatmul.mubr.f32.gmra.mrb[58].mxu1 %v532_v38  ;;  %v289_v37 = vld [vmem:[%s5521_s17 + $0x1f0] sm:$0xff] }
  0xc9   : > { %1541 = vmatprep.mubr.f32.mxu0 %v378_v39  ;;  %1701 = vmatprep.mubr.f32.mxu1 %v538_v40  ;;  %v613_v38 = vld [vmem:[%s5521_s17 + $0xc10] sm:$0xff]  ;;  %v295_v39 = vld [vmem:[%s5521_s17 + $0x220] sm:$0xff]  ;;  %v612_v40 = vld [vmem:[%s5521_s17 + $0xc08] sm:$0xff] }
  0xcc   : > { %1542 = vmatmul.mubr.f32.gmra.mrb[60].mxu0 %v377_v41  ;;  %1702 = vmatmul.mubr.f32.gmra.mrb[60].mxu1 %v537_v42  ;;  %v294_v41 = vld [vmem:[%s5521_s17 + $0x218] sm:$0xff] }
  0xcd   : > { %1546 = vmatprep.mubr.f32.mxu0 %v383_v43  ;;  %1706 = vmatprep.mubr.f32.mxu1 %v543_v44  ;;  %v618_v42 = vld [vmem:[%s5521_s17 + $0xc38] sm:$0xff]  ;;  %v300_v43 = vld [vmem:[%s5521_s17 + $0x248] sm:$0xff]  ;;  %v617_v44 = vld [vmem:[%s5521_s17 + $0xc30] sm:$0xff] }
  0xd0   : > { %1547 = vmatmul.mubr.f32.gmra.mrb[62].mxu0 %v382_v45  ;;  %1707 = vmatmul.mubr.f32.gmra.mrb[62].mxu1 %v542_v46  ;;  %v299_v45 = vld [vmem:[%s5521_s17 + $0x240] sm:$0xff] }
  0xd1   : > { %1711 = vmatprep.mubr.f32.mxu1 %v548_v47  ;;  %2096 = vmatprep.mubr.f32.mxu0 %v230_v48  ;;  %v623_v46 = vld [vmem:[%s5521_s17 + $0xc60] sm:$0xff]  ;;  %v305_v47 = vld [vmem:[%s5521_s17 + $0x270] sm:$0xff]  ;;  %v622_v48 = vld [vmem:[%s5521_s17 + $0xc58] sm:$0xff] }
  0xd4   : > { %1712 = vmatmul.mubr.f32.gmra.mrb[64].mxu1 %v547_v49  ;;  %2097 = vmatmul.mubr.f32.vlgmr.msra.gmra.mrb[0].mxu0 %v229_v3  ;;  %v304_v49 = vld [vmem:[%s5521_s17 + $0x268] sm:$0xff] }
  0xd5   : > { %1716 = vmatprep.mubr.f32.mxu1 %v553_v50  ;;  %2101 = vmatprep.mubr.f32.mxu0 %v235_v51  ;;  %v628_v3 = vld [vmem:[%s5521_s17 + $0xc88] sm:$0xff]  ;;  %v310_v50 = vld [vmem:[%s5521_s17 + $0x298] sm:$0xff]  ;;  %v627_v51 = vld [vmem:[%s5521_s17 + $0xc80] sm:$0xff] }
  0xd8   : > { %1717 = vmatmul.mubr.f32.gmra.mrb[66].mxu1 %v552_v54  ;;  %2102 = vmatmul.mubr.f32.gmra.mrb[2].mxu0 %v234_v55  ;;  %v315_v54 = vld [vmem:[%s5521_s17 + $0x2c0] sm:$0xff]  ;;  %v941_v55 = vld [vmem:[%s7935_s1 + $0x250] sm:$0xff] }
  0xd9   : > { %1721 = vmatprep.mubr.f32.mxu1 %v558_v57  ;;  %2106 = vmatprep.mubr.f32.mxu0 %v240_v58  ;;  %v314_v57 = vld [vmem:[%s5521_s17 + $0x2b8] sm:$0xff] }
  0xda   : > { %v638_v58 = vld [vmem:[%s5521_s17 + $0xcd8] sm:$0xff]  ;;  %4752 = vmatprep.subr.mxu1 %v941_v55 }
  0xdb   : > { %4753 = vmatpush3.msra.mxu1 %v941_v55 }
  0xdc   : > { %1722 = vmatmul.mubr.f32.gmra.mrb[68].mxu1 %v557_v59  ;;  %2107 = vmatmul.mubr.f32.gmra.mrb[4].mxu0 %v239_v60  ;;  %v320_v59 = vld [vmem:[%s5521_s17 + $0x2e8] sm:$0xff]  ;;  %v637_v60 = vld [vmem:[%s5521_s17 + $0xcd0] sm:$0xff] }
  0xdd   : > { %1726 = vmatprep.mubr.f32.mxu1 %v563_v61  ;;  %2111 = vmatprep.mubr.f32.mxu0 %v245_v62  ;;  %v319_v61 = vld [vmem:[%s5521_s17 + $0x2e0] sm:$0xff] }
  0xde   : > { %v643_v62 = vld [vmem:[%s5521_s17 + $0xd00] sm:$0xff] }
  0xe0   : > { %1727 = vmatmul.mubr.f32.gmra.mrb[70].mxu1 %v562_v63  ;;  %2112 = vmatmul.mubr.f32.gmra.mrb[6].mxu0 %v244_v0  ;;  %v325_v63 = vld [vmem:[%s5521_s17 + $0x310] sm:$0xff]  ;;  %v642_v0 = vld [vmem:[%s5521_s17 + $0xcf8] sm:$0xff] }
  0xe1   : > { %1731 = vmatprep.mubr.f32.mxu1 %v568_v1  ;;  %2116 = vmatprep.mubr.f32.mxu0 %v250_v2  ;;  %v324_v1 = vld [vmem:[%s5521_s17 + $0x308] sm:$0xff] }
  0xe2   : > { %v648_v2 = vld [vmem:[%s5521_s17 + $0xd28] sm:$0xff] }
  0xe4   : > { %1732 = vmatmul.mubr.f32.gmra.mrb[72].mxu1 %v567_v4  ;;  %2117 = vmatmul.mubr.f32.gmra.mrb[8].mxu0 %v249_v5  ;;  %v330_v4 = vld [vmem:[%s5521_s17 + $0x338] sm:$0xff]  ;;  %v647_v5 = vld [vmem:[%s5521_s17 + $0xd20] sm:$0xff] }
  0xe5   : > { %1736 = vmatprep.mubr.f32.mxu1 %v573_v6  ;;  %2121 = vmatprep.mubr.f32.mxu0 %v255_v7  ;;  %v329_v6 = vld [vmem:[%s5521_s17 + $0x330] sm:$0xff] }
  0xe6   : > { %v653_v7 = vld [vmem:[%s5521_s17 + $0xd50] sm:$0xff] }
  0xe8   : > { %1737 = vmatmul.mubr.f32.gmra.mrb[74].mxu1 %v572_v8  ;;  %2122 = vmatmul.mubr.f32.gmra.mrb[10].mxu0 %v254_v9  ;;  %v335_v8 = vld [vmem:[%s5521_s17 + $0x360] sm:$0xff]  ;;  %v652_v9 = vld [vmem:[%s5521_s17 + $0xd48] sm:$0xff] }
  0xe9   : > { %1741 = vmatprep.mubr.f32.mxu1 %v578_v10  ;;  %2126 = vmatprep.mubr.f32.mxu0 %v260_v11  ;;  %v334_v10 = vld [vmem:[%s5521_s17 + $0x358] sm:$0xff] }
  0xea   : > { %v658_v11 = vld [vmem:[%s5521_s17 + $0xd78] sm:$0xff] }
  0xec   : > { %1742 = vmatmul.mubr.f32.gmra.mrb[76].mxu1 %v577_v12  ;;  %2127 = vmatmul.mubr.f32.gmra.mrb[12].mxu0 %v259_v13  ;;  %v340_v12 = vld [vmem:[%s5521_s17 + $0x388] sm:$0xff] }
  0xed   : > { %1746 = vmatprep.mubr.f32.mxu1 %v583_v14  ;;  %2131 = vmatprep.mubr.f32.mxu0 %v265_v15  ;;  %v657_v15 = vld [vmem:[%s5521_s17 + $0xd70] sm:$0xff] }
  0xf0   : > { %1747 = vmatmul.mubr.f32.gmra.mrb[78].mxu1 %v582_v16  ;;  %2132 = vmatmul.mubr.f32.gmra.mrb[14].mxu0 %v264_v17  ;;  %v339_v16 = vld [vmem:[%s5521_s17 + $0x380] sm:$0xff] }
  0xf1   : > { %1751 = vmatprep.mubr.f32.mxu1 %v588_v18  ;;  %2136 = vmatprep.mubr.f32.mxu0 %v270_v19  ;;  %v663_v17 = vld [vmem:[%s5521_s17 + $0xda0] sm:$0xff]  ;;  %v345_v18 = vld [vmem:[%s5521_s17 + $0x3b0] sm:$0xff] }
  0xf4   : > { %1752 = vmatmul.mubr.f32.gmra.mrb[80].mxu1 %v587_v20  ;;  %2137 = vmatmul.mubr.f32.gmra.mrb[16].mxu0 %v269_v21  ;;  %v662_v21 = vld [vmem:[%s5521_s17 + $0xd98] sm:$0xff] }
  0xf5   : > { %1756 = vmatprep.mubr.f32.mxu1 %v593_v22  ;;  %2141 = vmatprep.mubr.f32.mxu0 %v275_v23  ;;  %v344_v22 = vld [vmem:[%s5521_s17 + $0x3a8] sm:$0xff] }
  0xf6   : > { %v668_v23 = vld [vmem:[%s5521_s17 + $0xdc8] sm:$0xff] }
  0xf8   : > { %1757 = vmatmul.mubr.f32.gmra.mrb[82].mxu1 %v592_v24  ;;  %2142 = vmatmul.mubr.f32.gmra.mrb[18].mxu0 %v274_v25  ;;  %v350_v24 = vld [vmem:[%s5521_s17 + $0x3d8] sm:$0xff] }
  0xf9   : > { %1761 = vmatprep.mubr.f32.mxu1 %v598_v26  ;;  %2146 = vmatprep.mubr.f32.mxu0 %v280_v27  ;;  %v667_v27 = vld [vmem:[%s5521_s17 + $0xdc0] sm:$0xff] }
  0xfc   : > { %1762 = vmatmul.mubr.f32.gmra.mrb[84].mxu1 %v597_v28  ;;  %2147 = vmatmul.mubr.f32.gmra.mrb[20].mxu0 %v279_v29  ;;  %v349_v28 = vld [vmem:[%s5521_s17 + $0x3d0] sm:$0xff] }
  0xfd   : > { %1766 = vmatprep.mubr.f32.mxu1 %v603_v30  ;;  %2151 = vmatprep.mubr.f32.mxu0 %v285_v31  ;;  %v673_v29 = vld [vmem:[%s5521_s17 + $0xdf0] sm:$0xff]  ;;  %v355_v30 = vld [vmem:[%s5521_s17 + $0x400] sm:$0xff] }
 0x100   : > { %1767 = vmatmul.mubr.f32.gmra.mrb[86].mxu1 %v602_v32  ;;  %2152 = vmatmul.mubr.f32.gmra.mrb[22].mxu0 %v284_v33  ;;  %v672_v33 = vld [vmem:[%s5521_s17 + $0xde8] sm:$0xff] }
 0x101   : > { %1771 = vmatprep.mubr.f32.mxu1 %v608_v34  ;;  %2156 = vmatprep.mubr.f32.mxu0 %v290_v35  ;;  %v354_v34 = vld [vmem:[%s5521_s17 + $0x3f8] sm:$0xff] }
 0x102   : > { %v678_v35 = vld [vmem:[%s5521_s17 + $0xe18] sm:$0xff] }
 0x104   : > { %1772 = vmatmul.mubr.f32.gmra.mrb[88].mxu1 %v607_v36  ;;  %2157 = vmatmul.mubr.f32.gmra.mrb[24].mxu0 %v289_v37  ;;  %v360_v36 = vld [vmem:[%s5521_s17 + $0x428] sm:$0xff] }
 0x105   : > { %1776 = vmatprep.mubr.f32.mxu1 %v613_v38  ;;  %2161 = vmatprep.mubr.f32.mxu0 %v295_v39  ;;  %v677_v39 = vld [vmem:[%s5521_s17 + $0xe10] sm:$0xff] }
 0x108   : > { %1777 = vmatmul.mubr.f32.gmra.mrb[90].mxu1 %v612_v40  ;;  %2162 = vmatmul.mubr.f32.gmra.mrb[26].mxu0 %v294_v41  ;;  %v359_v40 = vld [vmem:[%s5521_s17 + $0x420] sm:$0xff] }
 0x109   : > { %1781 = vmatprep.mubr.f32.mxu1 %v618_v42  ;;  %2166 = vmatprep.mubr.f32.mxu0 %v300_v43  ;;  %v683_v41 = vld [vmem:[%s5521_s17 + $0xe40] sm:$0xff]  ;;  %v365_v42 = vld [vmem:[%s5521_s17 + $0x450] sm:$0xff] }
 0x10c   : > { %1782 = vmatmul.mubr.f32.gmra.mrb[92].mxu1 %v617_v44  ;;  %2167 = vmatmul.mubr.f32.gmra.mrb[28].mxu0 %v299_v45  ;;  %v682_v45 = vld [vmem:[%s5521_s17 + $0xe38] sm:$0xff] }
 0x10d   : > { %1786 = vmatprep.mubr.f32.mxu1 %v623_v46  ;;  %2171 = vmatprep.mubr.f32.mxu0 %v305_v47  ;;  %v364_v46 = vld [vmem:[%s5521_s17 + $0x448] sm:$0xff] }
 0x10e   : > { %v688_v47 = vld [vmem:[%s5521_s17 + $0xe68] sm:$0xff] }
 0x110   : > { %1787 = vmatmul.mubr.f32.gmra.mrb[94].mxu1 %v622_v48  ;;  %2172 = vmatmul.mubr.f32.gmra.mrb[30].mxu0 %v304_v49  ;;  %v370_v48 = vld [vmem:[%s5521_s17 + $0x478] sm:$0xff] }
 0x111   : > { %1791 = vmatprep.mubr.f32.mxu1 %v628_v3  ;;  %2176 = vmatprep.mubr.f32.mxu0 %v310_v50  ;;  %v687_v50 = vld [vmem:[%s5521_s17 + $0xe60] sm:$0xff] }
 0x114   : > { %1792 = vmatmul.mubr.f32.gmra.mrb[96].mxu1 %v627_v51  ;;  %2177 = vmatmul.mubr.f32.gmra.mrb[32].mxu0 %v309_v52  ;;  %v369_v51 = vld [vmem:[%s5521_s17 + $0x470] sm:$0xff] }
 0x115   : > { %1796 = vmatprep.mubr.f32.mxu1 %v633_v53  ;;  %2181 = vmatprep.mubr.f32.mxu0 %v315_v54  ;;  %v693_v52 = vld [vmem:[%s5521_s17 + $0xe90] sm:$0xff]  ;;  %v375_v53 = vld [vmem:[%s5521_s17 + $0x4a0] sm:$0xff] }
 0x118   : > { %1797 = vmatmul.mubr.f32.gmra.mrb[98].mxu1 %v632_v56  ;;  %2182 = vmatmul.mubr.f32.gmra.mrb[34].mxu0 %v314_v57  ;;  %v692_v56 = vld [vmem:[%s5521_s17 + $0xe88] sm:$0xff]  ;;  %v374_v57 = vld [vmem:[%s5521_s17 + $0x498] sm:$0xff] }
 0x119   : > { %1801 = vmatprep.mubr.f32.mxu1 %v638_v58  ;;  %2186 = vmatprep.mubr.f32.mxu0 %v320_v59  ;;  %v698_v58 = vld [vmem:[%s5521_s17 + $0xeb8] sm:$0xff]  ;;  %v380_v59 = vld [vmem:[%s5521_s17 + $0x4c8] sm:$0xff] }
 0x11c   : > { %1802 = vmatmul.mubr.f32.gmra.mrb[100].mxu1 %v637_v60  ;;  %2187 = vmatmul.mubr.f32.gmra.mrb[36].mxu0 %v319_v61 }
 0x11d   : > { %1806 = vmatprep.mubr.f32.mxu1 %v643_v62  ;;  %2191 = vmatprep.mubr.f32.mxu0 %v325_v63  ;;  %v697_v62 = vld [vmem:[%s5521_s17 + $0xeb0] sm:$0xff]  ;;  %v379_v63 = vld [vmem:[%s5521_s17 + $0x4c0] sm:$0xff] }
 0x120   : > { %1807 = vmatmul.mubr.f32.gmra.mrb[102].mxu1 %v642_v0  ;;  %2192 = vmatmul.mubr.f32.gmra.mrb[38].mxu0 %v324_v1  ;;  %v703_v0 = vld [vmem:[%s5521_s17 + $0xee0] sm:$0xff]  ;;  %v385_v1 = vld [vmem:[%s5521_s17 + $0x4f0] sm:$0xff] }
 0x121   : > { %1811 = vmatprep.mubr.f32.mxu1 %v648_v2  ;;  %2196 = vmatprep.mubr.f32.mxu0 %v330_v4 }
 0x124   : > { %1812 = vmatmul.mubr.f32.gmra.mrb[104].mxu1 %v647_v5  ;;  %2197 = vmatmul.mubr.f32.gmra.mrb[40].mxu0 %v329_v6  ;;  %v702_v5 = vld [vmem:[%s5521_s17 + $0xed8] sm:$0xff]  ;;  %v384_v6 = vld [vmem:[%s5521_s17 + $0x4e8] sm:$0xff] }
 0x125   : > { %1816 = vmatprep.mubr.f32.mxu1 %v653_v7  ;;  %2201 = vmatprep.mubr.f32.mxu0 %v335_v8  ;;  %v708_v7 = vld [vmem:[%s5521_s17 + $0xf08] sm:$0xff]  ;;  %v390_v8 = vld [vmem:[%s5521_s17 + $0x518] sm:$0xff] }
 0x127   : > { %v5992_v13 = vpop.f32.mrb[0].mxu1 }
 0x128   : > { %1817 = vmatmul.mubr.f32.gmra.mrb[106].mxu1 %v652_v9  ;;  %2202 = vmatmul.mubr.f32.gmra.mrb[42].mxu0 %v334_v10  ;;  %v1555_v14 = vpop.f32.mrb[1].mxu1 }
 0x129   : > { %1821 = vmatprep.mubr.f32.mxu1 %v658_v11  ;;  %2206 = vmatprep.mubr.f32.mxu0 %v340_v12  ;;  %v707_v11 = vld [vmem:[%s5521_s17 + $0xf00] sm:$0xff]  ;;  %v389_v12 = vld [vmem:[%s5521_s17 + $0x510] sm:$0xff] }
 0x12a   : > { %v713_v14 = vld [vmem:[%s5521_s17 + $0xf30] sm:$0xff] }
 0x12b   : > { %v5998_v19 = vpop.f32.mrb[2].mxu1 }
 0x12c   : > { %1822 = vmatmul.mubr.f32.gmra.mrb[108].mxu1 %v657_v15  ;;  %2207 = vmatmul.mubr.f32.gmra.mrb[44].mxu0 %v339_v16  ;;  %v1560_v20 = vpop.f32.mrb[3].mxu1  ;;  %v395_v15 = vld [vmem:[%s5521_s17 + $0x540] sm:$0xff] }
 0x12d   : > { %1826 = vmatprep.mubr.f32.mxu1 %v663_v17  ;;  %2211 = vmatprep.mubr.f32.mxu0 %v345_v18  ;;  %v712_v18 = vld [vmem:[%s5521_s17 + $0xf28] sm:$0xff]  ;;  %v394_v20 = vld [vmem:[%s5521_s17 + $0x538] sm:$0xff] }
 0x12f   : > { %v6004_v25 = vpop.f32.mrb[4].mxu1 }
 0x130   : > { %1827 = vmatmul.mubr.f32.gmra.mrb[110].mxu1 %v662_v21  ;;  %2212 = vmatmul.mubr.f32.gmra.mrb[46].mxu0 %v344_v22  ;;  %v1565_v26 = vpop.f32.mrb[5].mxu1  ;;  %v718_v21 = vld [vmem:[%s5521_s17 + $0xf58] sm:$0xff]  ;;  %v400_v22 = vld [vmem:[%s5521_s17 + $0x568] sm:$0xff] }
 0x131   : > { %1831 = vmatprep.mubr.f32.mxu1 %v668_v23  ;;  %2216 = vmatprep.mubr.f32.mxu0 %v350_v24  ;;  %v717_v26 = vld [vmem:[%s5521_s17 + $0xf50] sm:$0xff] }
 0x133   : > { %v6010_v31 = vpop.f32.mrb[6].mxu1 }
 0x134   : > { %1832 = vmatmul.mubr.f32.gmra.mrb[112].mxu1 %v667_v27  ;;  %2217 = vmatmul.mubr.f32.gmra.mrb[48].mxu0 %v349_v28  ;;  %v1570_v32 = vpop.f32.mrb[7].mxu1  ;;  %v399_v27 = vld [vmem:[%s5521_s17 + $0x560] sm:$0xff] }
 0x135   : > { %1836 = vmatprep.mubr.f32.mxu1 %v673_v29  ;;  %2221 = vmatprep.mubr.f32.mxu0 %v355_v30  ;;  %v723_v28 = vld [vmem:[%s5521_s17 + $0xf80] sm:$0xff]  ;;  %v405_v29 = vld [vmem:[%s5521_s17 + $0x590] sm:$0xff] }
 0x137   : > { %v6016_v37 = vpop.f32.mrb[8].mxu1 }
 0x138   : > { %1837 = vmatmul.mubr.f32.gmra.mrb[114].mxu1 %v672_v33  ;;  %2222 = vmatmul.mubr.f32.gmra.mrb[50].mxu0 %v354_v34  ;;  %v1575_v38 = vpop.f32.mrb[9].mxu1  ;;  %v722_v33 = vld [vmem:[%s5521_s17 + $0xf78] sm:$0xff]  ;;  %v404_v34 = vld [vmem:[%s5521_s17 + $0x588] sm:$0xff] }
 0x139   : > { %1841 = vmatprep.mubr.f32.mxu1 %v678_v35  ;;  %2226 = vmatprep.mubr.f32.mxu0 %v360_v36  ;;  %v728_v35 = vld [vmem:[%s5521_s17 + $0xfa8] sm:$0xff]  ;;  %v410_v36 = vld [vmem:[%s5521_s17 + $0x5b8] sm:$0xff] }
 0x13b   : > { %v6022_v43 = vpop.f32.mrb[10].mxu1 }
 0x13c   : > { %1842 = vmatmul.mubr.f32.gmra.mrb[116].mxu1 %v677_v39  ;;  %2227 = vmatmul.mubr.f32.gmra.mrb[52].mxu0 %v359_v40  ;;  %v1580_v44 = vpop.f32.mrb[11].mxu1  ;;  %v727_v40 = vld [vmem:[%s5521_s17 + $0xfa0] sm:$0xff] }
 0x13d   : > { %1846 = vmatprep.mubr.f32.mxu1 %v683_v41  ;;  %2231 = vmatprep.mubr.f32.mxu0 %v365_v42  ;;  %v409_v41 = vld [vmem:[%s5521_s17 + $0x5b0] sm:$0xff]  ;;  %v415_v44 = vld [vmem:[%s5521_s17 + $0x5e0] sm:$0xff] }
 0x13e   : > { %v733_v42 = vld [vmem:[%s5521_s17 + $0xfd0] sm:$0xff] }
 0x13f   : > { %v6028_v49 = vpop.f32.mrb[12].mxu1 }
 0x140   : > { %1847 = vmatmul.mubr.f32.gmra.mrb[118].mxu1 %v682_v45  ;;  %2232 = vmatmul.mubr.f32.gmra.mrb[54].mxu0 %v364_v46  ;;  %v1585_v3 = vpop.f32.mrb[13].mxu1 }
 0x141   : > { %1851 = vmatprep.mubr.f32.mxu1 %v688_v47  ;;  %2236 = vmatprep.mubr.f32.mxu0 %v370_v48  ;;  %v732_v47 = vld [vmem:[%s5521_s17 + $0xfc8] sm:$0xff]  ;;  %v414_v48 = vld [vmem:[%s5521_s17 + $0x5d8] sm:$0xff] }
 0x142   : > { %v738_v3 = vld [vmem:[%s5521_s17 + $0xff8] sm:$0xff] }
 0x143   : > { %v6034_v54 = vpop.f32.mrb[14].mxu1 }
 0x144   : > { %1852 = vmatmul.mubr.f32.gmra.mrb[120].mxu1 %v687_v50  ;;  %2237 = vmatmul.mubr.f32.gmra.mrb[56].mxu0 %v369_v51  ;;  %v1590_v55 = vpop.f32.mrb[15].mxu1  ;;  %v420_v50 = vld [vmem:[%s5521_s17 + $0x608] sm:$0xff] }
 0x145   : > { %1856 = vmatprep.mubr.f32.mxu1 %v693_v52  ;;  %2241 = vmatprep.mubr.f32.mxu0 %v375_v53  ;;  %v737_v53 = vld [vmem:[%s5521_s17 + $0xff0] sm:$0xff]  ;;  %v419_v55 = vld [vmem:[%s5521_s17 + $0x600] sm:$0xff] }
 0x147   : > { %v6040_v60 = vpop.f32.mrb[16].mxu1 }
 0x148   : > { %1857 = vmatmul.mubr.f32.gmra.mrb[122].mxu1 %v692_v56  ;;  %2242 = vmatmul.mubr.f32.gmra.mrb[58].mxu0 %v374_v57  ;;  %v1595_v61 = vpop.f32.mrb[17].mxu1  ;;  %v743_v56 = vld [vmem:[%s5521_s17 + $0x1020] sm:$0xff]  ;;  %v425_v57 = vld [vmem:[%s5521_s17 + $0x630] sm:$0xff] }
 0x149   : > { %1861 = vmatprep.mubr.f32.mxu1 %v698_v58  ;;  %2246 = vmatprep.mubr.f32.mxu0 %v380_v59  ;;  %v742_v61 = vld [vmem:[%s5521_s17 + $0x1018] sm:$0xff] }
 0x14b   : > { %v6046_v2 = vpop.f32.mrb[18].mxu1 }
 0x14c   : > { %1862 = vmatmul.mubr.f32.gmra.mrb[124].mxu1 %v697_v62  ;;  %2247 = vmatmul.mubr.f32.gmra.mrb[60].mxu0 %v379_v63  ;;  %v1600_v4 = vpop.f32.mrb[19].mxu1  ;;  %v424_v62 = vld [vmem:[%s5521_s17 + $0x628] sm:$0xff] }
 0x14d   : > { %1866 = vmatprep.mubr.f32.mxu1 %v703_v0  ;;  %2251 = vmatprep.mubr.f32.mxu0 %v385_v1  ;;  %v748_v63 = vld [vmem:[%s5521_s17 + $0x1048] sm:$0xff]  ;;  %v430_v0 = vld [vmem:[%s5521_s17 + $0x658] sm:$0xff] }
 0x14f   : > { %v6052_v9 = vpop.f32.mrb[20].mxu1 }
 0x150   : > { %1867 = vmatmul.mubr.f32.gmra.mrb[126].mxu1 %v702_v5  ;;  %2252 = vmatmul.mubr.f32.gmra.mrb[62].mxu0 %v384_v6  ;;  %v1605_v10 = vpop.f32.mrb[21].mxu1  ;;  %v747_v5 = vld [vmem:[%s5521_s17 + $0x1040] sm:$0xff]  ;;  %v429_v6 = vld [vmem:[%s5521_s17 + $0x650] sm:$0xff] }
 0x151   : > { %1871 = vmatprep.mubr.f32.mxu1 %v708_v7  ;;  %2256 = vmatprep.mubr.f32.mxu0 %v390_v8  ;;  %v753_v7 = vld [vmem:[%s5521_s17 + $0x1070] sm:$0xff]  ;;  %v435_v8 = vld [vmem:[%s5521_s17 + $0x680] sm:$0xff] }
 0x153   : > { %v6058_v16 = vpop.f32.mrb[22].mxu1 }
 0x154   : > { %1872 = vmatmul.mubr.f32.gmra.mrb[128].mxu1 %v707_v11  ;;  %2257 = vmatmul.mubr.f32.gmra.mrb[64].mxu0 %v389_v12  ;;  %v1610_v17 = vpop.f32.mrb[23].mxu1  ;;  %v752_v12 = vld [vmem:[%s5521_s17 + $0x1068] sm:$0xff] }
 0x155   : > { %1876 = vmatprep.mubr.f32.mxu1 %v713_v14  ;;  %2261 = vmatprep.mubr.f32.mxu0 %v395_v15  ;;  %v434_v14 = vld [vmem:[%s5521_s17 + $0x678] sm:$0xff]  ;;  %v440_v17 = vld [vmem:[%s5521_s17 + $0x6a8] sm:$0xff] }
 0x156   : > { %v758_v15 = vld [vmem:[%s5521_s17 + $0x1098] sm:$0xff] }
 0x157   : > { %v6064_v23 = vpop.f32.mrb[24].mxu1 }
 0x158   : > { %1877 = vmatmul.mubr.f32.gmra.mrb[130].mxu1 %v712_v18  ;;  %2262 = vmatmul.mubr.f32.gmra.mrb[66].mxu0 %v394_v20  ;;  %v1615_v24 = vpop.f32.mrb[25].mxu1 }
 0x159   : > { %1881 = vmatprep.mubr.f32.mxu1 %v718_v21  ;;  %2266 = vmatprep.mubr.f32.mxu0 %v400_v22  ;;  %v757_v21 = vld [vmem:[%s5521_s17 + $0x1090] sm:$0xff]  ;;  %v439_v22 = vld [vmem:[%s5521_s17 + $0x6a0] sm:$0xff] }
 0x15a   : > { %v763_v24 = vld [vmem:[%s5521_s17 + $0x10c0] sm:$0xff] }
 0x15b   : > { %v6070_v30 = vpop.f32.mrb[26].mxu1 }
 0x15c   : > { %1882 = vmatmul.mubr.f32.gmra.mrb[132].mxu1 %v717_v26  ;;  %2267 = vmatmul.mubr.f32.gmra.mrb[68].mxu0 %v399_v27  ;;  %v1620_v32 = vpop.f32.mrb[27].mxu1  ;;  %v445_v26 = vld [vmem:[%s5521_s17 + $0x6d0] sm:$0xff] }
 0x15d   : > { %1886 = vmatprep.mubr.f32.mxu1 %v723_v28  ;;  %2271 = vmatprep.mubr.f32.mxu0 %v405_v29  ;;  %v762_v29 = vld [vmem:[%s5521_s17 + $0x10b8] sm:$0xff]  ;;  %v444_v32 = vld [vmem:[%s5521_s17 + $0x6c8] sm:$0xff] }
 0x15f   : > { %v6076_v38 = vpop.f32.mrb[28].mxu1 }
 0x160   : > { %1887 = vmatmul.mubr.f32.gmra.mrb[134].mxu1 %v722_v33  ;;  %2272 = vmatmul.mubr.f32.gmra.mrb[70].mxu0 %v404_v34  ;;  %v1625_v39 = vpop.f32.mrb[29].mxu1  ;;  %v768_v33 = vld [vmem:[%s5521_s17 + $0x10e8] sm:$0xff]  ;;  %v450_v34 = vld [vmem:[%s5521_s17 + $0x6f8] sm:$0xff] }
 0x161   : > { %1891 = vmatprep.mubr.f32.mxu1 %v728_v35  ;;  %2276 = vmatprep.mubr.f32.mxu0 %v410_v36  ;;  %v767_v39 = vld [vmem:[%s5521_s17 + $0x10e0] sm:$0xff] }
 0x163   : > { %v6082_v45 = vpop.f32.mrb[30].mxu1 }
 0x164   : > { %1892 = vmatmul.mubr.f32.gmra.mrb[136].mxu1 %v727_v40  ;;  %2277 = vmatmul.mubr.f32.gmra.mrb[72].mxu0 %v409_v41  ;;  %v1630_v46 = vpop.f32.mrb[31].mxu1  ;;  %v449_v40 = vld [vmem:[%s5521_s17 + $0x6f0] sm:$0xff] }
 0x165   : > { %1896 = vmatprep.mubr.f32.mxu1 %v733_v42  ;;  %2281 = vmatprep.mubr.f32.mxu0 %v415_v44  ;;  %v773_v41 = vld [vmem:[%s5521_s17 + $0x1110] sm:$0xff]  ;;  %v455_v42 = vld [vmem:[%s5521_s17 + $0x720] sm:$0xff] }
 0x167   : > { %v6088_v51 = vpop.f32.mrb[32].mxu1 }
 0x168   : > { %1897 = vmatmul.mubr.f32.gmra.mrb[138].mxu1 %v732_v47  ;;  %2282 = vmatmul.mubr.f32.gmra.mrb[74].mxu0 %v414_v48  ;;  %v1635_v52 = vpop.f32.mrb[33].mxu1  ;;  %v772_v47 = vld [vmem:[%s5521_s17 + $0x1108] sm:$0xff]  ;;  %v454_v48 = vld [vmem:[%s5521_s17 + $0x718] sm:$0xff] }
 0x169   : > { %1901 = vmatprep.mubr.f32.mxu1 %v738_v3  ;;  %2286 = vmatprep.mubr.f32.mxu0 %v420_v50  ;;  %v778_v3 = vld [vmem:[%s5521_s17 + $0x1138] sm:$0xff]  ;;  %v460_v50 = vld [vmem:[%s5521_s17 + $0x748] sm:$0xff] }
 0x16b   : > { %v6094_v58 = vpop.f32.mrb[34].mxu1 }
 0x16c   : > { %1902 = vmatmul.mubr.f32.gmra.mrb[140].mxu1 %v737_v53  ;;  %2287 = vmatmul.mubr.f32.gmra.mrb[76].mxu0 %v419_v55  ;;  %v1640_v59 = vpop.f32.mrb[35].mxu1  ;;  %v777_v55 = vld [vmem:[%s5521_s17 + $0x1130] sm:$0xff] }
 0x16d   : > { %1906 = vmatprep.mubr.f32.mxu1 %v743_v56  ;;  %2291 = vmatprep.mubr.f32.mxu0 %v425_v57  ;;  %v459_v56 = vld [vmem:[%s5521_s17 + $0x740] sm:$0xff]  ;;  %v465_v59 = vld [vmem:[%s5521_s17 + $0x770] sm:$0xff] }
 0x16e   : > { %v783_v57 = vld [vmem:[%s5521_s17 + $0x1160] sm:$0xff] }
 0x16f   : > { %v6100_v1 = vpop.f32.mrb[36].mxu1 }
 0x170   : > { %1907 = vmatmul.mubr.f32.gmra.mrb[142].mxu1 %v742_v61  ;;  %2292 = vmatmul.mubr.f32.gmra.mrb[78].mxu0 %v424_v62  ;;  %v1645_v4 = vpop.f32.mrb[37].mxu1 }
 0x171   : > { %1911 = vmatprep.mubr.f32.mxu1 %v748_v63  ;;  %2296 = vmatprep.mubr.f32.mxu0 %v430_v0  ;;  %v782_v63 = vld [vmem:[%s5521_s17 + $0x1158] sm:$0xff]  ;;  %v464_v0 = vld [vmem:[%s5521_s17 + $0x768] sm:$0xff] }
 0x172   : > { %v788_v4 = vld [vmem:[%s5521_s17 + $0x1188] sm:$0xff] }
 0x173   : > { %v6106_v10 = vpop.f32.mrb[38].mxu1 }
 0x174   : > { %1912 = vmatmul.mubr.f32.gmra.mrb[144].mxu1 %v747_v5  ;;  %2297 = vmatmul.mubr.f32.gmra.mrb[80].mxu0 %v429_v6  ;;  %v1650_v11 = vpop.f32.mrb[39].mxu1  ;;  %v470_v5 = vld [vmem:[%s5521_s17 + $0x798] sm:$0xff] }
 0x175   : > { %1916 = vmatprep.mubr.f32.mxu1 %v753_v7  ;;  %2301 = vmatprep.mubr.f32.mxu0 %v435_v8  ;;  %v787_v8 = vld [vmem:[%s5521_s17 + $0x1180] sm:$0xff]  ;;  %v469_v11 = vld [vmem:[%s5521_s17 + $0x790] sm:$0xff] }
 0x177   : > { %v6112_v18 = vpop.f32.mrb[40].mxu1 }
 0x178   : > { %1917 = vmatmul.mubr.f32.gmra.mrb[146].mxu1 %v752_v12  ;;  %2302 = vmatmul.mubr.f32.gmra.mrb[82].mxu0 %v434_v14  ;;  %v1655_v20 = vpop.f32.mrb[41].mxu1  ;;  %v793_v12 = vld [vmem:[%s5521_s17 + $0x11b0] sm:$0xff]  ;;  %v475_v14 = vld [vmem:[%s5521_s17 + $0x7c0] sm:$0xff] }
 0x179   : > { %1921 = vmatprep.mubr.f32.mxu1 %v758_v15  ;;  %2306 = vmatprep.mubr.f32.mxu0 %v440_v17  ;;  %v792_v20 = vld [vmem:[%s5521_s17 + $0x11a8] sm:$0xff] }
 0x17b   : > { %v6118_v27 = vpop.f32.mrb[42].mxu1 }
 0x17c   : > { %1922 = vmatmul.mubr.f32.gmra.mrb[148].mxu1 %v757_v21  ;;  %2307 = vmatmul.mubr.f32.gmra.mrb[84].mxu0 %v439_v22  ;;  %v1660_v28 = vpop.f32.mrb[43].mxu1  ;;  %v474_v21 = vld [vmem:[%s5521_s17 + $0x7b8] sm:$0xff] }
 0x17d   : > { %1926 = vmatprep.mubr.f32.mxu1 %v763_v24  ;;  %2311 = vmatprep.mubr.f32.mxu0 %v445_v26  ;;  %v798_v22 = vld [vmem:[%s5521_s17 + $0x11d8] sm:$0xff]  ;;  %v480_v24 = vld [vmem:[%s5521_s17 + $0x7e8] sm:$0xff] }
 0x17f   : > { %v6124_v35 = vpop.f32.mrb[44].mxu1 }
 0x180   : > { %1927 = vmatmul.mubr.f32.gmra.mrb[150].mxu1 %v762_v29  ;;  %2312 = vmatmul.mubr.f32.gmra.mrb[86].mxu0 %v444_v32  ;;  %v1665_v36 = vpop.f32.mrb[45].mxu1  ;;  %v797_v29 = vld [vmem:[%s5521_s17 + $0x11d0] sm:$0xff]  ;;  %v479_v32 = vld [vmem:[%s5521_s17 + $0x7e0] sm:$0xff] }
 0x181   : > { %1931 = vmatprep.mubr.f32.mxu1 %v768_v33  ;;  %2316 = vmatprep.mubr.f32.mxu0 %v450_v34  ;;  %v803_v33 = vld [vmem:[%s5521_s17 + $0x1200] sm:$0xff]  ;;  %v485_v34 = vld [vmem:[%s5521_s17 + $0x810] sm:$0xff] }
 0x183   : > { %v6130_v44 = vpop.f32.mrb[46].mxu1 }
 0x184   : > { %1932 = vmatmul.mubr.f32.gmra.mrb[152].mxu1 %v767_v39  ;;  %2317 = vmatmul.mubr.f32.gmra.mrb[88].mxu0 %v449_v40  ;;  %v1670_v46 = vpop.f32.mrb[47].mxu1  ;;  %v802_v40 = vld [vmem:[%s5521_s17 + $0x11f8] sm:$0xff] }
 0x185   : > { %1936 = vmatprep.mubr.f32.mxu1 %v773_v41  ;;  %2321 = vmatprep.mubr.f32.mxu0 %v455_v42  ;;  %v484_v41 = vld [vmem:[%s5521_s17 + $0x808] sm:$0xff]  ;;  %v490_v46 = vld [vmem:[%s5521_s17 + $0x838] sm:$0xff] }
 0x186   : > { %v808_v42 = vld [vmem:[%s5521_s17 + $0x1228] sm:$0xff] }
 0x187   : > { %v6136_v52 = vpop.f32.mrb[48].mxu1 }
 0x188   : > { %1937 = vmatmul.mubr.f32.gmra.mrb[154].mxu1 %v772_v47  ;;  %2322 = vmatmul.mubr.f32.gmra.mrb[90].mxu0 %v454_v48  ;;  %v1675_v53 = vpop.f32.mrb[49].mxu1 }
 0x189   : > { %1941 = vmatprep.mubr.f32.mxu1 %v778_v3  ;;  %2326 = vmatprep.mubr.f32.mxu0 %v460_v50  ;;  %v807_v3 = vld [vmem:[%s5521_s17 + $0x1220] sm:$0xff]  ;;  %v489_v50 = vld [vmem:[%s5521_s17 + $0x830] sm:$0xff] }
 0x18a   : > { %v813_v53 = vld [vmem:[%s5521_s17 + $0x1250] sm:$0xff] }
 0x18b   : > { %v6142_v61 = vpop.f32.mrb[50].mxu1 }
 0x18c   : > { %1942 = vmatmul.mubr.f32.gmra.mrb[156].mxu1 %v777_v55  ;;  %2327 = vmatmul.mubr.f32.gmra.mrb[92].mxu0 %v459_v56  ;;  %v1680_v62 = vpop.f32.mrb[51].mxu1  ;;  %v495_v55 = vld [vmem:[%s5521_s17 + $0x860] sm:$0xff] }
 0x18d   : > { %1946 = vmatprep.mubr.f32.mxu1 %v783_v57  ;;  %2331 = vmatprep.mubr.f32.mxu0 %v465_v59  ;;  %v812_v59 = vld [vmem:[%s5521_s17 + $0x1248] sm:$0xff]  ;;  %v494_v62 = vld [vmem:[%s5521_s17 + $0x858] sm:$0xff] }
 0x18f   : > { %v6148_v6 = vpop.f32.mrb[52].mxu1 }
 0x190   : > { %1947 = vmatmul.mubr.f32.gmra.mrb[158].mxu1 %v782_v63  ;;  %2332 = vmatmul.mubr.f32.gmra.mrb[94].mxu0 %v464_v0  ;;  %v1685_v7 = vpop.f32.mrb[53].mxu1  ;;  %v818_v63 = vld [vmem:[%s5521_s17 + $0x1278] sm:$0xff]  ;;  %v500_v0 = vld [vmem:[%s5521_s17 + $0x888] sm:$0xff] }
 0x191   : > { %1951 = vmatprep.mubr.f32.mxu1 %v788_v4  ;;  %2336 = vmatprep.mubr.f32.mxu0 %v470_v5 }
 0x193   : > { %v6154_v15 = vpop.f32.mrb[54].mxu1 }
 0x194   : > { %1952 = vmatmul.mubr.f32.gmra.mrb[160].mxu1 %v787_v8  ;;  %2337 = vmatmul.mubr.f32.gmra.mrb[96].mxu0 %v469_v11  ;;  %v1690_v17 = vpop.f32.mrb[55].mxu1  ;;  %v817_v11 = vld [vmem:[%s5521_s17 + $0x1270] sm:$0xff] }
 0x195   : > { %1956 = vmatprep.mubr.f32.mxu1 %v793_v12  ;;  %2341 = vmatprep.mubr.f32.mxu0 %v475_v14  ;;  %v499_v12 = vld [vmem:[%s5521_s17 + $0x880] sm:$0xff]  ;;  %v505_v17 = vld [vmem:[%s5521_s17 + $0x8b0] sm:$0xff] }
 0x196   : > { %v823_v14 = vld [vmem:[%s5521_s17 + $0x12a0] sm:$0xff] }
 0x197   : > { %v6160_v26 = vpop.f32.mrb[56].mxu1 }
 0x198   : > { %1957 = vmatmul.mubr.f32.gmra.mrb[162].mxu1 %v792_v20  ;;  %2342 = vmatmul.mubr.f32.gmra.mrb[98].mxu0 %v474_v21  ;;  %v1695_v28 = vpop.f32.mrb[57].mxu1 }
 0x199   : > { %1961 = vmatprep.mubr.f32.mxu1 %v798_v22  ;;  %2346 = vmatprep.mubr.f32.mxu0 %v480_v24  ;;  %v822_v28 = vld [vmem:[%s5521_s17 + $0x1298] sm:$0xff] }
 0x19b   : > { %v6166_v36 = vpop.f32.mrb[58].mxu1 }
 0x19c   : > { %1962 = vmatmul.mubr.f32.gmra.mrb[164].mxu1 %v797_v29  ;;  %2347 = vmatmul.mubr.f32.gmra.mrb[100].mxu0 %v479_v32  ;;  %v1700_v39 = vpop.f32.mrb[59].mxu1  ;;  %v504_v29 = vld [vmem:[%s5521_s17 + $0x8a8] sm:$0xff] }
 0x19d   : > { %1966 = vmatprep.mubr.f32.mxu1 %v803_v33  ;;  %2351 = vmatprep.mubr.f32.mxu0 %v485_v34  ;;  %v828_v32 = vld [vmem:[%s5521_s17 + $0x12c8] sm:$0xff]  ;;  %v510_v33 = vld [vmem:[%s5521_s17 + $0x8d8] sm:$0xff] }
 0x19f   : > { %v6172_v47 = vpop.f32.mrb[60].mxu1 }
 0x1a0   : > { %1967 = vmatmul.mubr.f32.gmra.mrb[166].mxu1 %v802_v40  ;;  %2352 = vmatmul.mubr.f32.gmra.mrb[102].mxu0 %v484_v41  ;;  %v1705_v48 = vpop.f32.mrb[61].mxu1 }
 0x1a1   : > { %1971 = vmatprep.mubr.f32.mxu1 %v808_v42  ;;  %2356 = vmatprep.mubr.f32.mxu0 %v490_v46  ;;  %v827_v42 = vld [vmem:[%s5521_s17 + $0x12c0] sm:$0xff]  ;;  %v509_v46 = vld [vmem:[%s5521_s17 + $0x8d0] sm:$0xff] }
 0x1a2   : > { %v833_v48 = vld [vmem:[%s5521_s17 + $0x12f0] sm:$0xff] }
 0x1a3   : > { %v6178_v56 = vpop.f32.mrb[62].mxu1 }
 0x1a4   : > { %1972 = vmatmul.mubr.f32.gmra.mrb[168].mxu1 %v807_v3  ;;  %2357 = vmatmul.mubr.f32.gmra.mrb[104].mxu0 %v489_v50  ;;  %v1710_v57 = vpop.f32.mrb[63].mxu1  ;;  %v515_v3 = vld [vmem:[%s5521_s17 + $0x900] sm:$0xff] }
 0x1a5   : > { %1976 = vmatprep.mubr.f32.mxu1 %v813_v53  ;;  %2361 = vmatprep.mubr.f32.mxu0 %v495_v55 }
 0x1a7   : > { %v6184_v4 = vpop.f32.mrb[0].mxu0  ;;  %v6186_v5 = vpop.f32.mrb[64].mxu1 }
 0x1a8   : > { %1977 = vmatmul.mubr.f32.gmra.mrb[170].mxu1 %v812_v59  ;;  %v2100_v7 = vpop.f32.mrb[1].mxu0  ;;  %2362 = vmatmul.mubr.f32.gmra.mrb[106].mxu0 %v494_v62  ;;  %v1715_v8 = vpop.f32.mrb[65].mxu1  ;;  %v832_v59 = vld [vmem:[%s5521_s17 + $0x12e8] sm:$0xff]  ;;  %v514_v62 = vld [vmem:[%s5521_s17 + $0x8f8] sm:$0xff] }
 0x1a9   : > { %1981 = vmatprep.mubr.f32.mxu1 %v818_v63  ;;  %2366 = vmatprep.mubr.f32.mxu0 %v500_v0  ;;  %v838_v63 = vld [vmem:[%s5521_s17 + $0x1318] sm:$0xff]  ;;  %v520_v0 = vld [vmem:[%s5521_s17 + $0x928] sm:$0xff] }
 0x1ab   : > { %v6192_v20 = vpop.f32.mrb[2].mxu0  ;;  %v6194_v21 = vpop.f32.mrb[66].mxu1 }
 0x1ac   : > { %1982 = vmatmul.mubr.f32.gmra.mrb[172].mxu1 %v817_v11  ;;  %v2105_v22 = vpop.f32.mrb[3].mxu0  ;;  %2367 = vmatmul.mubr.f32.gmra.mrb[108].mxu0 %v499_v12  ;;  %v1720_v24 = vpop.f32.mrb[67].mxu1 }
 0x1ad   : > { %1986 = vmatprep.mubr.f32.mxu1 %v823_v14  ;;  %2371 = vmatprep.mubr.f32.mxu0 %v505_v17  ;;  %v837_v14 = vld [vmem:[%s5521_s17 + $0x1310] sm:$0xff]  ;;  %v519_v17 = vld [vmem:[%s5521_s17 + $0x920] sm:$0xff] }
 0x1ae   : > { %v843_v22 = vld [vmem:[%s5521_s17 + $0x1340] sm:$0xff]  ;;  %v525_v24 = vld [vmem:[%s5521_s17 + $0x950] sm:$0xff] }
 0x1af   : > { %v6200_v34 = vpop.f32.mrb[4].mxu0  ;;  %v6202_v39 = vpop.f32.mrb[68].mxu1 }
 0x1b0   : > { %1987 = vmatmul.mubr.f32.gmra.mrb[174].mxu1 %v822_v28  ;;  %v2110_v40 = vpop.f32.mrb[5].mxu0  ;;  %2372 = vmatmul.mubr.f32.gmra.mrb[110].mxu0 %v504_v29  ;;  %v1725_v41 = vpop.f32.mrb[69].mxu1 }
 0x1b1   : > { %1991 = vmatprep.mubr.f32.mxu1 %v828_v32  ;;  %2376 = vmatprep.mubr.f32.mxu0 %v510_v33  ;;  %v842_v40 = vld [vmem:[%s5521_s17 + $0x1338] sm:$0xff]  ;;  %v524_v41 = vld [vmem:[%s5521_s17 + $0x948] sm:$0xff] }
 0x1b3   : > { %v6208_v50 = vpop.f32.mrb[6].mxu0  ;;  %v6210_v53 = vpop.f32.mrb[70].mxu1 }
 0x1b4   : > { %1992 = vmatmul.mubr.f32.gmra.mrb[176].mxu1 %v827_v42  ;;  %v2115_v55 = vpop.f32.mrb[7].mxu0  ;;  %2377 = vmatmul.mubr.f32.gmra.mrb[112].mxu0 %v509_v46  ;;  %v1730_v57 = vpop.f32.mrb[71].mxu1  ;;  %v848_v42 = vld [vmem:[%s5521_s17 + $0x1368] sm:$0xff]  ;;  %v530_v46 = vld [vmem:[%s5521_s17 + $0x978] sm:$0xff] }
 0x1b5   : > { %1996 = vmatprep.mubr.f32.mxu1 %v833_v48  ;;  %2381 = vmatprep.mubr.f32.mxu0 %v515_v3 }
 0x1b7   : > { %v6216_v7 = vpop.f32.mrb[8].mxu0  ;;  %v6218_v8 = vpop.f32.mrb[72].mxu1 }
 0x1b8   : > { %1997 = vmatmul.mubr.f32.gmra.mrb[178].mxu1 %v832_v59  ;;  %v2120_v11 = vpop.f32.mrb[9].mxu0  ;;  %2382 = vmatmul.mubr.f32.gmra.mrb[114].mxu0 %v514_v62  ;;  %v1735_v12 = vpop.f32.mrb[73].mxu1  ;;  %v847_v59 = vld [vmem:[%s5521_s17 + $0x1360] sm:$0xff]  ;;  %v529_v62 = vld [vmem:[%s5521_s17 + $0x970] sm:$0xff] }
 0x1b9   : > { %2001 = vmatprep.mubr.f32.mxu1 %v838_v63  ;;  %2386 = vmatprep.mubr.f32.mxu0 %v520_v0  ;;  %v853_v63 = vld [vmem:[%s5521_s17 + $0x1390] sm:$0xff]  ;;  %v535_v0 = vld [vmem:[%s5521_s17 + $0x9a0] sm:$0xff] }
 0x1bb   : > { %v6224_v28 = vpop.f32.mrb[10].mxu0  ;;  %v6226_v29 = vpop.f32.mrb[74].mxu1 }
 0x1bc   : > { %2002 = vmatmul.mubr.f32.gmra.mrb[180].mxu1 %v837_v14  ;;  %v2125_v32 = vpop.f32.mrb[11].mxu0  ;;  %2387 = vmatmul.mubr.f32.gmra.mrb[116].mxu0 %v519_v17  ;;  %v1740_v33 = vpop.f32.mrb[75].mxu1 }
 0x1bd   : > { %2006 = vmatprep.mubr.f32.mxu1 %v843_v22  ;;  %2391 = vmatprep.mubr.f32.mxu0 %v525_v24  ;;  %v852_v22 = vld [vmem:[%s5521_s17 + $0x1388] sm:$0xff]  ;;  %v534_v24 = vld [vmem:[%s5521_s17 + $0x998] sm:$0xff] }
 0x1be   : > { %v858_v32 = vld [vmem:[%s5521_s17 + $0x13b8] sm:$0xff]  ;;  %v540_v33 = vld [vmem:[%s5521_s17 + $0x9c8] sm:$0xff] }
 0x1bf   : > { %v6232_v48 = vpop.f32.mrb[12].mxu0  ;;  %v6234_v3 = vpop.f32.mrb[76].mxu1 }
 0x1c0   : > { %7940 = vst [vmem:[#allocation3_spill] sm:$0xff] %v6234_v3  ;;  %2007 = vmatmul.mubr.f32.gmra.mrb[182].mxu1 %v842_v40  ;;  %v2130_v55 = vpop.f32.mrb[13].mxu0  ;;  %2392 = vmatmul.mubr.f32.gmra.mrb[118].mxu0 %v524_v41  ;;  %v1745_v57 = vpop.f32.mrb[77].mxu1 }
 0x1c1   : > { %2011 = vmatprep.mubr.f32.mxu1 %v848_v42  ;;  %2396 = vmatprep.mubr.f32.mxu0 %v530_v46  ;;  %v857_v55 = vld [vmem:[%s5521_s17 + $0x13b0] sm:$0xff]  ;;  %v539_v57 = vld [vmem:[%s5521_s17 + $0x9c0] sm:$0xff] }
 0x1c3   : > { %v6240_v11 = vpop.f32.mrb[14].mxu0  ;;  %v6242_v12 = vpop.f32.mrb[78].mxu1 }
 0x1c4   : > { %7941 = vst [vmem:[#allocation4_spill] sm:$0xff] %v6242_v12  ;;  %2012 = vmatmul.mubr.f32.gmra.mrb[184].mxu1 %v847_v59  ;;  %v2135_v14 = vpop.f32.mrb[15].mxu0  ;;  %2397 = vmatmul.mubr.f32.gmra.mrb[120].mxu0 %v529_v62  ;;  %v1750_v17 = vpop.f32.mrb[79].mxu1  ;;  %v863_v59 = vld [vmem:[%s5521_s17 + $0x13e0] sm:$0xff]  ;;  %v545_v62 = vld [vmem:[%s5521_s17 + $0x9f0] sm:$0xff] }
 0x1c5   : > { %2016 = vmatprep.mubr.f32.mxu1 %v853_v63  ;;  %2401 = vmatprep.mubr.f32.mxu0 %v535_v0 }
 0x1c7   : > { %v6248_v40 = vpop.f32.mrb[16].mxu0  ;;  %v6250_v41 = vpop.f32.mrb[80].mxu1 }
 0x1c8   : > { %7942 = vst [vmem:[#allocation5_spill] sm:$0xff] %v6250_v41  ;;  %2017 = vmatmul.mubr.f32.gmra.mrb[186].mxu1 %v852_v22  ;;  %v2140_v42 = vpop.f32.mrb[17].mxu0  ;;  %2402 = vmatmul.mubr.f32.gmra.mrb[122].mxu0 %v534_v24  ;;  %v1755_v46 = vpop.f32.mrb[81].mxu1  ;;  %v862_v22 = vld [vmem:[%s5521_s17 + $0x13d8] sm:$0xff]  ;;  %v544_v24 = vld [vmem:[%s5521_s17 + $0x9e8] sm:$0xff] }
 0x1c9   : > { %2021 = vmatprep.mubr.f32.mxu1 %v858_v32  ;;  %2406 = vmatprep.mubr.f32.mxu0 %v540_v33  ;;  %v550_v32 = vld [vmem:[%s5521_s17 + $0xa18] sm:$0xff]  ;;  %v231_v33 = vld [vmem:[%s5521_s17 + $0x20] sm:$0xff] }
 0x1cb   : > { %v6256_v63 = vpop.f32.mrb[18].mxu0  ;;  %v6258_v0 = vpop.f32.mrb[82].mxu1 }
 0x1cc   : > { %7943 = vst [vmem:[#allocation6_spill] sm:$0xff] %v6258_v0  ;;  %2022 = vmatmul.mubr.f32.gmra.mrb[188].mxu1 %v857_v55  ;;  %v2145_v14 = vpop.f32.mrb[19].mxu0  ;;  %2407 = vmatmul.mubr.f32.gmra.mrb[124].mxu0 %v539_v57  ;;  %v1760_v17 = vpop.f32.mrb[83].mxu1 }
 0x1cd   : > { %2026 = vmatprep.mubr.f32.mxu1 %v863_v59  ;;  %2411 = vmatprep.mubr.f32.mxu0 %v545_v62  ;;  %v549_v59 = vld [vmem:[%s5521_s17 + $0xa10] sm:$0xff]  ;;  %v236_v62 = vld [vmem:[%s5521_s17 + $0x48] sm:$0xff]  ;;  %v555_v14 = vld [vmem:[%s5521_s17 + $0xa40] sm:$0xff] }
 0x1ce   : > { %v241_v17 = vld [vmem:[%s5521_s17 + $0x70] sm:$0xff] }
 0x1cf   : > { %v6264_v42 = vpop.f32.mrb[20].mxu0  ;;  %v6266_v46 = vpop.f32.mrb[84].mxu1 }
 0x1d0   : > { %7944 = vst [vmem:[#allocation7_spill] sm:$0xff] %v6266_v46  ;;  %2027 = vmatmul.mubr.f32.gmra.mrb[190].mxu1 %v862_v22  ;;  %v2150_v55 = vpop.f32.mrb[21].mxu0  ;;  %2412 = vmatmul.mubr.f32.gmra.mrb[126].mxu0 %v544_v24  ;;  %v1765_v57 = vpop.f32.mrb[85].mxu1  ;;  %v554_v24 = vld [vmem:[%s5521_s17 + $0xa38] sm:$0xff] }
 0x1d1   : > { %2416 = vmatprep.mubr.f32.mxu0 %v550_v32  ;;  %4754 = vmatprep.mubr.msk.f32.mxu1 %vm942_vm0, %v231_v33  ;;  %v246_v32 = vld [vmem:[%s5521_s17 + $0x98] sm:$0xff]  ;;  %v560_v33 = vld [vmem:[%s5521_s17 + $0xa68] sm:$0xff]  ;;  %v251_v55 = vld [vmem:[%s5521_s17 + $0xc0] sm:$0xff] }
 0x1d3   : > { %v6273_v0 = vpop.f32.mrb[22].mxu0  ;;  %v6275_v41 = vpop.f32.mrb[86].mxu1 }
 0x1d4   : > { %7945 = vst [vmem:[#allocation8_spill] sm:$0xff] %v6275_v41  ;;  %v2155_v46 = vpop.f32.mrb[23].mxu0  ;;  %2417 = vmatmul.mubr.f32.gmra.mrb[128].mxu0 %v549_v59  ;;  %4755 = vmatmul.mubr.msk.f32.vlgmr.msra.gmra.mrb[192].mxu1 %vm942_vm0, %v236_v62  ;;  %v1770_v22 = vpop.f32.mrb[87].mxu1  ;;  %v559_v62 = vld [vmem:[%s5521_s17 + $0xa60] sm:$0xff] }
 0x1d5   : > { %2421 = vmatprep.mubr.f32.mxu0 %v555_v14  ;;  %4757 = vmatprep.mubr.msk.f32.mxu1 %vm942_vm0, %v241_v17  ;;  %v256_v14 = vld [vmem:[%s5521_s17 + $0xe8] sm:$0xff]  ;;  %v565_v17 = vld [vmem:[%s5521_s17 + $0xa90] sm:$0xff] }
 0x1d6   : > { %v261_v22 = vld [vmem:[%s5521_s17 + $0x110] sm:$0xff] }
 0x1d7   : > { %v6283_v57 = vpop.f32.mrb[24].mxu0  ;;  %v6285_v12 = vpop.f32.mrb[88].mxu1 }
 0x1d8   : > { %7946 = vst [vmem:[#allocation9_spill] sm:$0xff] %v6283_v57  ;;  %7947 = vst [vmem:[#allocation10_spill] sm:$0xff] %v6285_v12  ;;  %v2160_v46 = vpop.f32.mrb[25].mxu0  ;;  %2422 = vmatmul.mubr.f32.gmra.mrb[130].mxu0 %v554_v24  ;;  %4758 = vmatmul.mubr.msk.f32.gmra.mrb[194].mxu1 %vm942_vm0, %v246_v32  ;;  %v1775_v59 = vpop.f32.mrb[89].mxu1  ;;  %v564_v32 = vld [vmem:[%s5521_s17 + $0xa88] sm:$0xff] }
 0x1d9   : > { %2426 = vmatprep.mubr.f32.mxu0 %v560_v33  ;;  %4760 = vmatprep.mubr.msk.f32.mxu1 %vm942_vm0, %v251_v55  ;;  %v266_v33 = vld [vmem:[%s5521_s17 + $0x138] sm:$0xff]  ;;  %v271_v59 = vld [vmem:[%s5521_s17 + $0x160] sm:$0xff] }
 0x1da   : > { %v570_v55 = vld [vmem:[%s5521_s17 + $0xab8] sm:$0xff] }
 0x1db   : > { %v6293_v41 = vpop.f32.mrb[26].mxu0  ;;  %v6295_v57 = vpop.f32.mrb[90].mxu1 }
 0x1dc   : > { %7948 = vst [vmem:[#allocation11_spill] sm:$0xff] %v6293_v41  ;;  %7949 = vst [vmem:[#allocation12_spill] sm:$0xff] %v6295_v57  ;;  %v2165_v46 = vpop.f32.mrb[27].mxu0  ;;  %2427 = vmatmul.mubr.f32.gmra.mrb[132].mxu0 %v559_v62  ;;  %4761 = vmatmul.mubr.msk.f32.gmra.mrb[196].mxu1 %vm942_vm0, %v256_v14  ;;  %v1780_v24 = vpop.f32.mrb[91].mxu1  ;;  %v569_v14 = vld [vmem:[%s5521_s17 + $0xab0] sm:$0xff] }
 0x1dd   : > { %2431 = vmatprep.mubr.f32.mxu0 %v565_v17  ;;  %4763 = vmatprep.mubr.msk.f32.mxu1 %vm942_vm0, %v261_v22  ;;  %v276_v17 = vld [vmem:[%s5521_s17 + $0x188] sm:$0xff]  ;;  %v575_v22 = vld [vmem:[%s5521_s17 + $0xae0] sm:$0xff]  ;;  %v281_v24 = vld [vmem:[%s5521_s17 + $0x1b0] sm:$0xff] }
 0x1df   : > { %v6303_v12 = vpop.f32.mrb[28].mxu0  ;;  %v6305_v41 = vpop.f32.mrb[92].mxu1 }
 0x1e0   : > { %7950 = vst [vmem:[#allocation13_spill] sm:$0xff] %v6303_v12  ;;  %7951 = vst [vmem:[#allocation14_spill] sm:$0xff] %v6305_v41  ;;  %v2170_v46 = vpop.f32.mrb[29].mxu0  ;;  %2432 = vmatmul.mubr.f32.gmra.mrb[134].mxu0 %v564_v32  ;;  %4764 = vmatmul.mubr.msk.f32.gmra.mrb[198].mxu1 %vm942_vm0, %v266_v33  ;;  %v1785_v62 = vpop.f32.mrb[93].mxu1  ;;  %v574_v33 = vld [vmem:[%s5521_s17 + $0xad8] sm:$0xff] }
 0x1e1   : > { %2436 = vmatprep.mubr.f32.mxu0 %v570_v55  ;;  %4766 = vmatprep.mubr.msk.f32.mxu1 %vm942_vm0, %v271_v59  ;;  %v286_v55 = vld [vmem:[%s5521_s17 + $0x1d8] sm:$0xff]  ;;  %v580_v59 = vld [vmem:[%s5521_s17 + $0xb08] sm:$0xff]  ;;  %v291_v62 = vld [vmem:[%s5521_s17 + $0x200] sm:$0xff] }
 0x1e3   : > { %v6313_v57 = vpop.f32.mrb[30].mxu0  ;;  %v6315_v12 = vpop.f32.mrb[94].mxu1 }
 0x1e4   : > { %7952 = vst [vmem:[#allocation15_spill] sm:$0xff] %v6313_v57  ;;  %7953 = vst [vmem:[#allocation16_spill] sm:$0xff] %v6315_v12  ;;  %v2175_v46 = vpop.f32.mrb[31].mxu0  ;;  %2437 = vmatmul.mubr.f32.gmra.mrb[136].mxu0 %v569_v14  ;;  %4767 = vmatmul.mubr.msk.f32.gmra.mrb[200].mxu1 %vm942_vm0, %v276_v17  ;;  %v1790_v32 = vpop.f32.mrb[95].mxu1  ;;  %v579_v17 = vld [vmem:[%s5521_s17 + $0xb00] sm:$0xff] }
 0x1e5   : > { %2441 = vmatprep.mubr.f32.mxu0 %v575_v22  ;;  %4769 = vmatprep.mubr.msk.f32.mxu1 %vm942_vm0, %v281_v24  ;;  %v296_v22 = vld [vmem:[%s5521_s17 + $0x228] sm:$0xff]  ;;  %v585_v24 = vld [vmem:[%s5521_s17 + $0xb30] sm:$0xff] }
 0x1e6   : > { %v301_v32 = vld [vmem:[%s5521_s17 + $0x250] sm:$0xff] }
 0x1e7   : > { %v6323_v41 = vpop.f32.mrb[32].mxu0  ;;  %v6325_v57 = vpop.f32.mrb[96].mxu1 }
 0x1e8   : > { %7954 = vst [vmem:[#allocation17_spill] sm:$0xff] %v6323_v41  ;;  %7955 = vst [vmem:[#allocation18_spill] sm:$0xff] %v6325_v57  ;;  %v2180_v46 = vpop.f32.mrb[33].mxu0  ;;  %2442 = vmatmul.mubr.f32.gmra.mrb[138].mxu0 %v574_v33  ;;  %4770 = vmatmul.mubr.msk.f32.gmra.mrb[202].mxu1 %vm942_vm0, %v286_v55  ;;  %v1795_v14 = vpop.f32.mrb[97].mxu1  ;;  %v584_v55 = vld [vmem:[%s5521_s17 + $0xb28] sm:$0xff] }
 0x1e9   : > { %2446 = vmatprep.mubr.f32.mxu0 %v580_v59  ;;  %4772 = vmatprep.mubr.msk.f32.mxu1 %vm942_vm0, %v291_v62  ;;  %v306_v59 = vld [vmem:[%s5521_s17 + $0x278] sm:$0xff]  ;;  %v311_v14 = vld [vmem:[%s5521_s17 + $0x2a0] sm:$0xff] }
 0x1ea   : > { %v590_v62 = vld [vmem:[%s5521_s17 + $0xb58] sm:$0xff] }
 0x1eb   : > { %v6333_v12 = vpop.f32.mrb[34].mxu0  ;;  %v6335_v41 = vpop.f32.mrb[98].mxu1 }
 0x1ec   : > { %7956 = vst [vmem:[#allocation19_spill] sm:$0xff] %v6333_v12  ;;  %7957 = vst [vmem:[#allocation20_spill] sm:$0xff] %v6335_v41  ;;  %v2185_v46 = vpop.f32.mrb[35].mxu0  ;;  %2447 = vmatmul.mubr.f32.gmra.mrb[140].mxu0 %v579_v17  ;;  %4773 = vmatmul.mubr.msk.f32.gmra.mrb[204].mxu1 %vm942_vm0, %v296_v22  ;;  %v1800_v33 = vpop.f32.mrb[99].mxu1  ;;  %v589_v22 = vld [vmem:[%s5521_s17 + $0xb50] sm:$0xff] }
 0x1ed   : > { %2451 = vmatprep.mubr.f32.mxu0 %v585_v24  ;;  %4775 = vmatprep.mubr.msk.f32.mxu1 %vm942_vm0, %v301_v32  ;;  %v316_v24 = vld [vmem:[%s5521_s17 + $0x2c8] sm:$0xff]  ;;  %v595_v32 = vld [vmem:[%s5521_s17 + $0xb80] sm:$0xff]  ;;  %v321_v33 = vld [vmem:[%s5521_s17 + $0x2f0] sm:$0xff] }
 0x1ef   : > { %v6343_v57 = vpop.f32.mrb[36].mxu0  ;;  %v6345_v12 = vpop.f32.mrb[100].mxu1 }
 0x1f0   : > { %7958 = vst [vmem:[#allocation21_spill] sm:$0xff] %v6343_v57  ;;  %7959 = vst [vmem:[#allocation22_spill] sm:$0xff] %v6345_v12  ;;  %v2190_v46 = vpop.f32.mrb[37].mxu0  ;;  %2452 = vmatmul.mubr.f32.gmra.mrb[142].mxu0 %v584_v55  ;;  %4776 = vmatmul.mubr.msk.f32.gmra.mrb[206].mxu1 %vm942_vm0, %v306_v59  ;;  %v1805_v17 = vpop.f32.mrb[101].mxu1  ;;  %v594_v59 = vld [vmem:[%s5521_s17 + $0xb78] sm:$0xff] }
 0x1f1   : > { %2456 = vmatprep.mubr.f32.mxu0 %v590_v62  ;;  %4778 = vmatprep.mubr.msk.f32.mxu1 %vm942_vm0, %v311_v14  ;;  %v326_v62 = vld [vmem:[%s5521_s17 + $0x318] sm:$0xff]  ;;  %v600_v14 = vld [vmem:[%s5521_s17 + $0xba8] sm:$0xff]  ;;  %v331_v17 = vld [vmem:[%s5521_s17 + $0x340] sm:$0xff] }
 0x1f3   : > { %v6353_v41 = vpop.f32.mrb[38].mxu0  ;;  %v6355_v57 = vpop.f32.mrb[102].mxu1 }
 0x1f4   : > { %7960 = vst [vmem:[#allocation23_spill] sm:$0xff] %v6353_v41  ;;  %7961 = vst [vmem:[#allocation24_spill] sm:$0xff] %v6355_v57  ;;  %v2195_v46 = vpop.f32.mrb[39].mxu0  ;;  %2457 = vmatmul.mubr.f32.gmra.mrb[144].mxu0 %v589_v22  ;;  %4779 = vmatmul.mubr.msk.f32.gmra.mrb[208].mxu1 %vm942_vm0, %v316_v24  ;;  %v1810_v55 = vpop.f32.mrb[103].mxu1  ;;  %v599_v24 = vld [vmem:[%s5521_s17 + $0xba0] sm:$0xff] }
 0x1f5   : > { %2461 = vmatprep.mubr.f32.mxu0 %v595_v32  ;;  %4781 = vmatprep.mubr.msk.f32.mxu1 %vm942_vm0, %v321_v33  ;;  %v336_v32 = vld [vmem:[%s5521_s17 + $0x368] sm:$0xff]  ;;  %v605_v33 = vld [vmem:[%s5521_s17 + $0xbd0] sm:$0xff] }
 0x1f6   : > { %v341_v55 = vld [vmem:[%s5521_s17 + $0x390] sm:$0xff] }
 0x1f7   : > { %v6363_v12 = vpop.f32.mrb[40].mxu0  ;;  %v6365_v41 = vpop.f32.mrb[104].mxu1 }
 0x1f8   : > { %7962 = vst [vmem:[#allocation25_spill] sm:$0xff] %v6363_v12  ;;  %7963 = vst [vmem:[#allocation26_spill] sm:$0xff] %v6365_v41  ;;  %v2200_v46 = vpop.f32.mrb[41].mxu0  ;;  %2462 = vmatmul.mubr.f32.gmra.mrb[146].mxu0 %v594_v59  ;;  %4782 = vmatmul.mubr.msk.f32.gmra.mrb[210].mxu1 %vm942_vm0, %v326_v62  ;;  %v1815_v22 = vpop.f32.mrb[105].mxu1  ;;  %v604_v62 = vld [vmem:[%s5521_s17 + $0xbc8] sm:$0xff] }
 0x1f9   : > { %2466 = vmatprep.mubr.f32.mxu0 %v600_v14  ;;  %4784 = vmatprep.mubr.msk.f32.mxu1 %vm942_vm0, %v331_v17  ;;  %v346_v14 = vld [vmem:[%s5521_s17 + $0x3b8] sm:$0xff]  ;;  %v351_v22 = vld [vmem:[%s5521_s17 + $0x3e0] sm:$0xff] }
 0x1fa   : > { %v610_v17 = vld [vmem:[%s5521_s17 + $0xbf8] sm:$0xff] }
 0x1fb   : > { %v6373_v57 = vpop.f32.mrb[42].mxu0  ;;  %v6375_v12 = vpop.f32.mrb[106].mxu1 }
 0x1fc   : > { %7964 = vst [vmem:[#allocation27_spill] sm:$0xff] %v6373_v57  ;;  %7965 = vst [vmem:[#allocation28_spill] sm:$0xff] %v6375_v12  ;;  %v2205_v46 = vpop.f32.mrb[43].mxu0  ;;  %2467 = vmatmul.mubr.f32.gmra.mrb[148].mxu0 %v599_v24  ;;  %4785 = vmatmul.mubr.msk.f32.gmra.mrb[212].mxu1 %vm942_vm0, %v336_v32  ;;  %v1820_v59 = vpop.f32.mrb[107].mxu1  ;;  %v609_v32 = vld [vmem:[%s5521_s17 + $0xbf0] sm:$0xff] }
 0x1fd   : > { %2471 = vmatprep.mubr.f32.mxu0 %v605_v33  ;;  %4787 = vmatprep.mubr.msk.f32.mxu1 %vm942_vm0, %v341_v55  ;;  %v356_v33 = vld [vmem:[%s5521_s17 + $0x408] sm:$0xff]  ;;  %v615_v55 = vld [vmem:[%s5521_s17 + $0xc20] sm:$0xff]  ;;  %v361_v59 = vld [vmem:[%s5521_s17 + $0x430] sm:$0xff] }
 0x1ff   : > { %v6383_v41 = vpop.f32.mrb[44].mxu0  ;;  %v6385_v57 = vpop.f32.mrb[108].mxu1 }
 0x200   : > { %7966 = vst [vmem:[#allocation29_spill] sm:$0xff] %v6383_v41  ;;  %7967 = vst [vmem:[#allocation30_spill] sm:$0xff] %v6385_v57  ;;  %v2210_v46 = vpop.f32.mrb[45].mxu0  ;;  %2472 = vmatmul.mubr.f32.gmra.mrb[150].mxu0 %v604_v62  ;;  %4788 = vmatmul.mubr.msk.f32.gmra.mrb[214].mxu1 %vm942_vm0, %v346_v14  ;;  %v1825_v24 = vpop.f32.mrb[109].mxu1  ;;  %v614_v14 = vld [vmem:[%s5521_s17 + $0xc18] sm:$0xff] }
 0x201   : > { %2476 = vmatprep.mubr.f32.mxu0 %v610_v17  ;;  %4790 = vmatprep.mubr.msk.f32.mxu1 %vm942_vm0, %v351_v22  ;;  %v366_v17 = vld [vmem:[%s5521_s17 + $0x458] sm:$0xff]  ;;  %v620_v22 = vld [vmem:[%s5521_s17 + $0xc48] sm:$0xff]  ;;  %v371_v24 = vld [vmem:[%s5521_s17 + $0x480] sm:$0xff] }
 0x203   : > { %v6393_v12 = vpop.f32.mrb[46].mxu0  ;;  %v6395_v41 = vpop.f32.mrb[110].mxu1 }
 0x204   : > { %7968 = vst [vmem:[#allocation31_spill] sm:$0xff] %v6393_v12  ;;  %7969 = vst [vmem:[#allocation32_spill] sm:$0xff] %v6395_v41  ;;  %v2215_v46 = vpop.f32.mrb[47].mxu0  ;;  %2477 = vmatmul.mubr.f32.gmra.mrb[152].mxu0 %v609_v32  ;;  %4791 = vmatmul.mubr.msk.f32.gmra.mrb[216].mxu1 %vm942_vm0, %v356_v33  ;;  %v1830_v62 = vpop.f32.mrb[111].mxu1  ;;  %v619_v33 = vld [vmem:[%s5521_s17 + $0xc40] sm:$0xff] }
 0x205   : > { %2481 = vmatprep.mubr.f32.mxu0 %v615_v55  ;;  %4793 = vmatprep.mubr.msk.f32.mxu1 %vm942_vm0, %v361_v59  ;;  %v376_v55 = vld [vmem:[%s5521_s17 + $0x4a8] sm:$0xff]  ;;  %v625_v59 = vld [vmem:[%s5521_s17 + $0xc70] sm:$0xff] }
 0x206   : > { %v381_v62 = vld [vmem:[%s5521_s17 + $0x4d0] sm:$0xff] }
 0x207   : > { %v6403_v57 = vpop.f32.mrb[48].mxu0  ;;  %v6405_v12 = vpop.f32.mrb[112].mxu1 }
 0x208   : > { %7970 = vst [vmem:[#allocation33_spill] sm:$0xff] %v6403_v57  ;;  %7971 = vst [vmem:[#allocation34_spill] sm:$0xff] %v6405_v12  ;;  %v2220_v46 = vpop.f32.mrb[49].mxu0  ;;  %2482 = vmatmul.mubr.f32.gmra.mrb[154].mxu0 %v614_v14  ;;  %4794 = vmatmul.mubr.msk.f32.gmra.mrb[218].mxu1 %vm942_vm0, %v366_v17  ;;  %v1835_v32 = vpop.f32.mrb[113].mxu1  ;;  %v624_v17 = vld [vmem:[%s5521_s17 + $0xc68] sm:$0xff] }
 0x209   : > { %2486 = vmatprep.mubr.f32.mxu0 %v620_v22  ;;  %4796 = vmatprep.mubr.msk.f32.mxu1 %vm942_vm0, %v371_v24  ;;  %v386_v22 = vld [vmem:[%s5521_s17 + $0x4f8] sm:$0xff]  ;;  %v391_v32 = vld [vmem:[%s5521_s17 + $0x520] sm:$0xff] }
 0x20a   : > { %v630_v24 = vld [vmem:[%s5521_s17 + $0xc98] sm:$0xff] }
 0x20b   : > { %v6413_v41 = vpop.f32.mrb[50].mxu0  ;;  %v6415_v57 = vpop.f32.mrb[114].mxu1 }
 0x20c   : > { %7972 = vst [vmem:[#allocation35_spill] sm:$0xff] %v6413_v41  ;;  %7973 = vst [vmem:[#allocation36_spill] sm:$0xff] %v6415_v57  ;;  %v2225_v46 = vpop.f32.mrb[51].mxu0  ;;  %2487 = vmatmul.mubr.f32.gmra.mrb[156].mxu0 %v619_v33  ;;  %4797 = vmatmul.mubr.msk.f32.gmra.mrb[220].mxu1 %vm942_vm0, %v376_v55  ;;  %v1840_v14 = vpop.f32.mrb[115].mxu1  ;;  %v629_v55 = vld [vmem:[%s5521_s17 + $0xc90] sm:$0xff] }
 0x20d   : > { %2491 = vmatprep.mubr.f32.mxu0 %v625_v59  ;;  %4799 = vmatprep.mubr.msk.f32.mxu1 %vm942_vm0, %v381_v62  ;;  %v396_v59 = vld [vmem:[%s5521_s17 + $0x548] sm:$0xff]  ;;  %v635_v62 = vld [vmem:[%s5521_s17 + $0xcc0] sm:$0xff]  ;;  %v401_v14 = vld [vmem:[%s5521_s17 + $0x570] sm:$0xff] }
 0x20f   : > { %v6423_v12 = vpop.f32.mrb[52].mxu0  ;;  %v6425_v41 = vpop.f32.mrb[116].mxu1 }
 0x210   : > { %7974 = vst [vmem:[#allocation37_spill] sm:$0xff] %v6423_v12  ;;  %7975 = vst [vmem:[#allocation38_spill] sm:$0xff] %v6425_v41  ;;  %v2230_v46 = vpop.f32.mrb[53].mxu0  ;;  %2492 = vmatmul.mubr.f32.gmra.mrb[158].mxu0 %v624_v17  ;;  %4800 = vmatmul.mubr.msk.f32.gmra.mrb[222].mxu1 %vm942_vm0, %v386_v22  ;;  %v1845_v33 = vpop.f32.mrb[117].mxu1  ;;  %v634_v22 = vld [vmem:[%s5521_s17 + $0xcb8] sm:$0xff] }
 0x211   : > { %2496 = vmatprep.mubr.f32.mxu0 %v630_v24  ;;  %4802 = vmatprep.mubr.msk.f32.mxu1 %vm942_vm0, %v391_v32  ;;  %v406_v24 = vld [vmem:[%s5521_s17 + $0x598] sm:$0xff]  ;;  %v640_v32 = vld [vmem:[%s5521_s17 + $0xce8] sm:$0xff]  ;;  %v411_v33 = vld [vmem:[%s5521_s17 + $0x5c0] sm:$0xff] }
 0x213   : > { %v6433_v57 = vpop.f32.mrb[54].mxu0  ;;  %v6435_v12 = vpop.f32.mrb[118].mxu1 }
 0x214   : > { %7976 = vst [vmem:[#allocation39_spill] sm:$0xff] %v6433_v57  ;;  %7977 = vst [vmem:[#allocation40_spill] sm:$0xff] %v6435_v12  ;;  %v2235_v46 = vpop.f32.mrb[55].mxu0  ;;  %2497 = vmatmul.mubr.f32.gmra.mrb[160].mxu0 %v629_v55  ;;  %4803 = vmatmul.mubr.msk.f32.gmra.mrb[224].mxu1 %vm942_vm0, %v396_v59  ;;  %v1850_v17 = vpop.f32.mrb[119].mxu1  ;;  %v639_v59 = vld [vmem:[%s5521_s17 + $0xce0] sm:$0xff] }
 0x215   : > { %2501 = vmatprep.mubr.f32.mxu0 %v635_v62  ;;  %4805 = vmatprep.mubr.msk.f32.mxu1 %vm942_vm0, %v401_v14  ;;  %v416_v62 = vld [vmem:[%s5521_s17 + $0x5e8] sm:$0xff]  ;;  %v645_v14 = vld [vmem:[%s5521_s17 + $0xd10] sm:$0xff] }
 0x216   : > { %v421_v17 = vld [vmem:[%s5521_s17 + $0x610] sm:$0xff] }
 0x217   : > { %v6443_v41 = vpop.f32.mrb[56].mxu0  ;;  %v6445_v57 = vpop.f32.mrb[120].mxu1 }
 0x218   : > { %7978 = vst [vmem:[#allocation41_spill] sm:$0xff] %v6443_v41  ;;  %7979 = vst [vmem:[#allocation42_spill] sm:$0xff] %v6445_v57  ;;  %v2240_v46 = vpop.f32.mrb[57].mxu0  ;;  %2502 = vmatmul.mubr.f32.gmra.mrb[162].mxu0 %v634_v22  ;;  %4806 = vmatmul.mubr.msk.f32.gmra.mrb[226].mxu1 %vm942_vm0, %v406_v24  ;;  %v1855_v55 = vpop.f32.mrb[121].mxu1  ;;  %v644_v24 = vld [vmem:[%s5521_s17 + $0xd08] sm:$0xff] }
 0x219   : > { %2506 = vmatprep.mubr.f32.mxu0 %v640_v32  ;;  %4808 = vmatprep.mubr.msk.f32.mxu1 %vm942_vm0, %v411_v33  ;;  %v426_v32 = vld [vmem:[%s5521_s17 + $0x638] sm:$0xff]  ;;  %v431_v55 = vld [vmem:[%s5521_s17 + $0x660] sm:$0xff] }
 0x21a   : > { %v650_v33 = vld [vmem:[%s5521_s17 + $0xd38] sm:$0xff] }
 0x21b   : > { %v6453_v12 = vpop.f32.mrb[58].mxu0  ;;  %v6455_v41 = vpop.f32.mrb[122].mxu1 }
 0x21c   : > { %7980 = vst [vmem:[#allocation43_spill] sm:$0xff] %v6453_v12  ;;  %7981 = vst [vmem:[#allocation44_spill] sm:$0xff] %v6455_v41  ;;  %v2245_v46 = vpop.f32.mrb[59].mxu0  ;;  %2507 = vmatmul.mubr.f32.gmra.mrb[164].mxu0 %v639_v59  ;;  %4809 = vmatmul.mubr.msk.f32.gmra.mrb[228].mxu1 %vm942_vm0, %v416_v62  ;;  %v1860_v22 = vpop.f32.mrb[123].mxu1  ;;  %v649_v62 = vld [vmem:[%s5521_s17 + $0xd30] sm:$0xff] }
 0x21d   : > { %2511 = vmatprep.mubr.f32.mxu0 %v645_v14  ;;  %4811 = vmatprep.mubr.msk.f32.mxu1 %vm942_vm0, %v421_v17  ;;  %v436_v14 = vld [vmem:[%s5521_s17 + $0x688] sm:$0xff]  ;;  %v655_v17 = vld [vmem:[%s5521_s17 + $0xd60] sm:$0xff]  ;;  %v441_v22 = vld [vmem:[%s5521_s17 + $0x6b0] sm:$0xff] }
 0x21f   : > { %v6463_v57 = vpop.f32.mrb[60].mxu0  ;;  %v6465_v12 = vpop.f32.mrb[124].mxu1 }
 0x220   : > { %7982 = vst [vmem:[#allocation45_spill] sm:$0xff] %v6463_v57  ;;  %7983 = vst [vmem:[#allocation46_spill] sm:$0xff] %v6465_v12  ;;  %v2250_v46 = vpop.f32.mrb[61].mxu0  ;;  %2512 = vmatmul.mubr.f32.gmra.mrb[166].mxu0 %v644_v24  ;;  %4812 = vmatmul.mubr.msk.f32.gmra.mrb[230].mxu1 %vm942_vm0, %v426_v32  ;;  %v1865_v59 = vpop.f32.mrb[125].mxu1  ;;  %v654_v32 = vld [vmem:[%s5521_s17 + $0xd58] sm:$0xff] }
 0x221   : > { %2516 = vmatprep.mubr.f32.mxu0 %v650_v33  ;;  %4814 = vmatprep.mubr.msk.f32.mxu1 %vm942_vm0, %v431_v55  ;;  %v446_v33 = vld [vmem:[%s5521_s17 + $0x6d8] sm:$0xff]  ;;  %v660_v55 = vld [vmem:[%s5521_s17 + $0xd88] sm:$0xff]  ;;  %v451_v59 = vld [vmem:[%s5521_s17 + $0x700] sm:$0xff] }
 0x223   : > { %v6473_v41 = vpop.f32.mrb[62].mxu0  ;;  %v6475_v57 = vpop.f32.mrb[126].mxu1 }
 0x224   : > { %7984 = vst [vmem:[#allocation47_spill] sm:$0xff] %v6473_v41  ;;  %7985 = vst [vmem:[#allocation48_spill] sm:$0xff] %v6475_v57  ;;  %v2255_v46 = vpop.f32.mrb[63].mxu0  ;;  %2517 = vmatmul.mubr.f32.gmra.mrb[168].mxu0 %v649_v62  ;;  %4815 = vmatmul.mubr.msk.f32.gmra.mrb[232].mxu1 %vm942_vm0, %v436_v14  ;;  %v1870_v24 = vpop.f32.mrb[127].mxu1  ;;  %v461_v57 = vld [vmem:[%s5521_s17 + $0x750] sm:$0xff] }
 0x225   : > { %2521 = vmatprep.mubr.f32.mxu0 %v655_v17  ;;  %4817 = vmatprep.mubr.msk.f32.mxu1 %vm942_vm0, %v441_v22  ;;  %v659_v17 = vld [vmem:[%s5521_s17 + $0xd80] sm:$0xff]  ;;  %v456_v22 = vld [vmem:[%s5521_s17 + $0x728] sm:$0xff]  ;;  %v665_v24 = vld [vmem:[%s5521_s17 + $0xdb0] sm:$0xff] }
 0x227   : > { %v2258_v12 = vpop.f32.mrb[64].mxu0  ;;  %v6483_v41 = vpop.f32.mrb[128].mxu1 }
 0x228   : > { %7986 = vst [vmem:[#allocation49_spill] sm:$0xff] %v6483_v41  ;;  %v6486_v46 = vadd.f32 %v2258_v12, %v5992_v13  ;;  %v2260_v62 = vpop.f32.mrb[65].mxu0  ;;  %2522 = vmatmul.mubr.f32.gmra.mrb[170].mxu0 %v654_v32  ;;  %4818 = vmatmul.mubr.msk.f32.gmra.mrb[234].mxu1 %vm942_vm0, %v446_v33  ;;  %v1875_v14 = vpop.f32.mrb[129].mxu1  ;;  %v664_v33 = vld [vmem:[%s5521_s17 + $0xda8] sm:$0xff] }
 0x229   : > { %2526 = vmatprep.mubr.f32.mxu0 %v660_v55  ;;  %4820 = vmatprep.mubr.msk.f32.mxu1 %vm942_vm0, %v451_v59  ;;  %v466_v55 = vld [vmem:[%s5521_s17 + $0x778] sm:$0xff]  ;;  %v471_v62 = vld [vmem:[%s5521_s17 + $0x7a0] sm:$0xff] }
 0x22a   : > { %v670_v59 = vld [vmem:[%s5521_s17 + $0xdd8] sm:$0xff] }
 0x22b   : > { %v2263_v41 = vpop.f32.mrb[66].mxu0  ;;  %v6494_v3 = vpop.f32.mrb[130].mxu1 }
 0x22c   : > { %7987 = vst [vmem:[#allocation50_spill] sm:$0xff] %v6494_v3  ;;  %v6497_v13 = vadd.f32 %v2263_v41, %v5998_v19  ;;  %v2265_v12 = vpop.f32.mrb[67].mxu0  ;;  %2527 = vmatmul.mubr.f32.gmra.mrb[172].mxu0 %v659_v17  ;;  %4821 = vmatmul.mubr.msk.f32.gmra.mrb[236].mxu1 %vm942_vm0, %v456_v22  ;;  %v1880_v32 = vpop.f32.mrb[131].mxu1  ;;  %v476_v22 = vld [vmem:[%s5521_s17 + $0x7c8] sm:$0xff] }
 0x22d   : > { %2531 = vmatprep.mubr.f32.mxu0 %v665_v24  ;;  %4823 = vmatprep.mubr.msk.f32.mxu1 %vm942_vm0, %v461_v57  ;;  %v669_v57 = vld [vmem:[%s5521_s17 + $0xdd0] sm:$0xff]  ;;  %v675_v24 = vld [vmem:[%s5521_s17 + $0xe00] sm:$0xff] }
 0x22e   : > { %v481_v12 = vld [vmem:[%s5521_s17 + $0x7f0] sm:$0xff] }
 0x22f   : > { %v2268_v14 = vpop.f32.mrb[68].mxu0  ;;  %v6505_v3 = vpop.f32.mrb[132].mxu1 }
 0x230   : > { %7988 = vst [vmem:[#allocation51_spill] sm:$0xff] %v6505_v3  ;;  %v6508_v19 = vadd.f32 %v2268_v14, %v6004_v25  ;;  %v2270_v41 = vpop.f32.mrb[69].mxu0  ;;  %2532 = vmatmul.mubr.f32.gmra.mrb[174].mxu0 %v664_v33  ;;  %4824 = vmatmul.mubr.msk.f32.gmra.mrb[238].mxu1 %vm942_vm0, %v466_v55  ;;  %v1885_v17 = vpop.f32.mrb[133].mxu1  ;;  %v680_v14 = vld [vmem:[%s5521_s17 + $0xe28] sm:$0xff] }
 0x231   : > { %2536 = vmatprep.mubr.f32.mxu0 %v670_v59  ;;  %4826 = vmatprep.mubr.msk.f32.mxu1 %vm942_vm0, %v471_v62  ;;  %v674_v59 = vld [vmem:[%s5521_s17 + $0xdf8] sm:$0xff]  ;;  %v491_v41 = vld [vmem:[%s5521_s17 + $0x840] sm:$0xff] }
 0x232   : > { %v486_v62 = vld [vmem:[%s5521_s17 + $0x818] sm:$0xff] }
 0x233   : > { %v2273_v32 = vpop.f32.mrb[70].mxu0  ;;  %v6516_v3 = vpop.f32.mrb[134].mxu1 }
 0x234   : > { %7989 = vst [vmem:[#allocation52_spill] sm:$0xff] %v6516_v3  ;;  %v6519_v25 = vadd.f32 %v2273_v32, %v6010_v31  ;;  %v2275_v33 = vpop.f32.mrb[71].mxu0  ;;  %2537 = vmatmul.mubr.f32.gmra.mrb[176].mxu0 %v669_v57  ;;  %4827 = vmatmul.mubr.msk.f32.gmra.mrb[240].mxu1 %vm942_vm0, %v476_v22  ;;  %v1890_v55 = vpop.f32.mrb[135].mxu1  ;;  %v685_v32 = vld [vmem:[%s5521_s17 + $0xe50] sm:$0xff] }
 0x235   : > { %2541 = vmatprep.mubr.f32.mxu0 %v675_v24  ;;  %4829 = vmatprep.mubr.msk.f32.mxu1 %vm942_vm0, %v481_v12  ;;  %v679_v24 = vld [vmem:[%s5521_s17 + $0xe20] sm:$0xff]  ;;  %v496_v12 = vld [vmem:[%s5521_s17 + $0x868] sm:$0xff]  ;;  %v501_v33 = vld [vmem:[%s5521_s17 + $0x890] sm:$0xff] }
 0x237   : > { %v2278_v17 = vpop.f32.mrb[72].mxu0  ;;  %v6527_v3 = vpop.f32.mrb[136].mxu1 }
 0x238   : > { %7990 = vst [vmem:[#allocation53_spill] sm:$0xff] %v6527_v3  ;;  %v6530_v31 = vadd.f32 %v2278_v17, %v6016_v37  ;;  %v2280_v57 = vpop.f32.mrb[73].mxu0  ;;  %2542 = vmatmul.mubr.f32.gmra.mrb[178].mxu0 %v674_v59  ;;  %4830 = vmatmul.mubr.msk.f32.gmra.mrb[242].mxu1 %vm942_vm0, %v486_v62  ;;  %v1895_v22 = vpop.f32.mrb[137].mxu1  ;;  %v690_v17 = vld [vmem:[%s5521_s17 + $0xe78] sm:$0xff] }
 0x239   : > { %2546 = vmatprep.mubr.f32.mxu0 %v680_v14  ;;  %4832 = vmatprep.mubr.msk.f32.mxu1 %vm942_vm0, %v491_v41  ;;  %v684_v14 = vld [vmem:[%s5521_s17 + $0xe48] sm:$0xff]  ;;  %v506_v41 = vld [vmem:[%s5521_s17 + $0x8b8] sm:$0xff]  ;;  %v511_v57 = vld [vmem:[%s5521_s17 + $0x8e0] sm:$0xff] }
 0x23b   : > { %v2283_v55 = vpop.f32.mrb[74].mxu0  ;;  %v6538_v3 = vpop.f32.mrb[138].mxu1 }
 0x23c   : > { %7991 = vst [vmem:[#allocation54_spill] sm:$0xff] %v6538_v3  ;;  %v6541_v37 = vadd.f32 %v2283_v55, %v6022_v43  ;;  %v2285_v59 = vpop.f32.mrb[75].mxu0  ;;  %2547 = vmatmul.mubr.f32.gmra.mrb[180].mxu0 %v679_v24  ;;  %4833 = vmatmul.mubr.msk.f32.gmra.mrb[244].mxu1 %vm942_vm0, %v496_v12  ;;  %v1900_v62 = vpop.f32.mrb[139].mxu1  ;;  %v695_v55 = vld [vmem:[%s5521_s17 + $0xea0] sm:$0xff] }
 0x23d   : > { %2551 = vmatprep.mubr.f32.mxu0 %v685_v32  ;;  %4835 = vmatprep.mubr.msk.f32.mxu1 %vm942_vm0, %v501_v33  ;;  %v689_v32 = vld [vmem:[%s5521_s17 + $0xe70] sm:$0xff]  ;;  %v516_v33 = vld [vmem:[%s5521_s17 + $0x908] sm:$0xff] }
 0x23e   : > { %v521_v59 = vld [vmem:[%s5521_s17 + $0x930] sm:$0xff] }
 0x23f   : > { %v2288_v22 = vpop.f32.mrb[76].mxu0  ;;  %v6549_v3 = vpop.f32.mrb[140].mxu1 }
 0x240   : > { %7992 = vst [vmem:[#allocation55_spill] sm:$0xff] %v6549_v3  ;;  %v6552_v43 = vadd.f32 %v2288_v22, %v6028_v49  ;;  %v2290_v24 = vpop.f32.mrb[77].mxu0  ;;  %2552 = vmatmul.mubr.f32.gmra.mrb[182].mxu0 %v684_v14  ;;  %4836 = vmatmul.mubr.msk.f32.gmra.mrb[246].mxu1 %vm942_vm0, %v506_v41  ;;  %v1905_v12 = vpop.f32.mrb[141].mxu1  ;;  %v700_v22 = vld [vmem:[%s5521_s17 + $0xec8] sm:$0xff] }
 0x241   : > { %2556 = vmatprep.mubr.f32.mxu0 %v690_v17  ;;  %4838 = vmatprep.mubr.msk.f32.mxu1 %vm942_vm0, %v511_v57  ;;  %v694_v17 = vld [vmem:[%s5521_s17 + $0xe98] sm:$0xff]  ;;  %v531_v24 = vld [vmem:[%s5521_s17 + $0x980] sm:$0xff] }
 0x242   : > { %v526_v57 = vld [vmem:[%s5521_s17 + $0x958] sm:$0xff] }
 0x243   : > { %v2293_v62 = vpop.f32.mrb[78].mxu0  ;;  %v6560_v3 = vpop.f32.mrb[142].mxu1 }
 0x244   : > { %7993 = vst [vmem:[#allocation56_spill] sm:$0xff] %v6560_v3  ;;  %v6563_v49 = vadd.f32 %v2293_v62, %v6034_v54  ;;  %v2295_v14 = vpop.f32.mrb[79].mxu0  ;;  %2557 = vmatmul.mubr.f32.gmra.mrb[184].mxu0 %v689_v32  ;;  %4839 = vmatmul.mubr.msk.f32.gmra.mrb[248].mxu1 %vm942_vm0, %v516_v33  ;;  %v1910_v41 = vpop.f32.mrb[143].mxu1  ;;  %v705_v62 = vld [vmem:[%s5521_s17 + $0xef0] sm:$0xff] }
 0x245   : > { %2561 = vmatprep.mubr.f32.mxu0 %v695_v55  ;;  %4841 = vmatprep.mubr.msk.f32.mxu1 %vm942_vm0, %v521_v59  ;;  %v699_v55 = vld [vmem:[%s5521_s17 + $0xec0] sm:$0xff]  ;;  %v536_v59 = vld [vmem:[%s5521_s17 + $0x9a8] sm:$0xff]  ;;  %v541_v14 = vld [vmem:[%s5521_s17 + $0x9d0] sm:$0xff] }
 0x247   : > { %v2298_v12 = vpop.f32.mrb[80].mxu0  ;;  %v6571_v3 = vpop.f32.mrb[144].mxu1 }
 0x248   : > { %7994 = vst [vmem:[#allocation57_spill] sm:$0xff] %v6571_v3  ;;  %v6574_v54 = vadd.f32 %v2298_v12, %v6040_v60  ;;  %v2300_v32 = vpop.f32.mrb[81].mxu0  ;;  %2562 = vmatmul.mubr.f32.gmra.mrb[186].mxu0 %v694_v17  ;;  %4842 = vmatmul.mubr.msk.f32.gmra.mrb[250].mxu1 %vm942_vm0, %v526_v57  ;;  %v1915_v33 = vpop.f32.mrb[145].mxu1  ;;  %v710_v12 = vld [vmem:[%s5521_s17 + $0xf18] sm:$0xff] }
 0x249   : > { %2566 = vmatprep.mubr.f32.mxu0 %v700_v22  ;;  %4844 = vmatprep.mubr.msk.f32.mxu1 %vm942_vm0, %v531_v24  ;;  %v704_v22 = vld [vmem:[%s5521_s17 + $0xee8] sm:$0xff]  ;;  %v546_v24 = vld [vmem:[%s5521_s17 + $0x9f8] sm:$0xff]  ;;  %v551_v32 = vld [vmem:[%s5521_s17 + $0xa20] sm:$0xff] }
 0x24b   : > { %v2303_v41 = vpop.f32.mrb[82].mxu0  ;;  %v6582_v3 = vpop.f32.mrb[146].mxu1 }
 0x24c   : > { %7995 = vst [vmem:[#allocation58_spill] sm:$0xff] %v6582_v3  ;;  %v6585_v60 = vadd.f32 %v2303_v41, %v6046_v2  ;;  %v2305_v17 = vpop.f32.mrb[83].mxu0  ;;  %2567 = vmatmul.mubr.f32.gmra.mrb[188].mxu0 %v699_v55  ;;  %4845 = vmatmul.mubr.msk.f32.gmra.mrb[252].mxu1 %vm942_vm0, %v536_v59  ;;  %v1920_v57 = vpop.f32.mrb[147].mxu1  ;;  %v715_v41 = vld [vmem:[%s5521_s17 + $0xf40] sm:$0xff] }
 0x24d   : > { %2571 = vmatprep.mubr.f32.mxu0 %v705_v62  ;;  %4847 = vmatprep.mubr.msk.f32.mxu1 %vm942_vm0, %v541_v14  ;;  %v709_v62 = vld [vmem:[%s5521_s17 + $0xf10] sm:$0xff]  ;;  %v556_v14 = vld [vmem:[%s5521_s17 + $0xa48] sm:$0xff] }
 0x24e   : > { %v561_v17 = vld [vmem:[%s5521_s17 + $0xa70] sm:$0xff] }
 0x24f   : > { %v2308_v33 = vpop.f32.mrb[84].mxu0  ;;  %v6593_v3 = vpop.f32.mrb[148].mxu1 }
 0x250   : > { %7996 = vst [vmem:[#allocation59_spill] sm:$0xff] %v6593_v3  ;;  %v6596_v2 = vadd.f32 %v2308_v33, %v6052_v9  ;;  %v2310_v55 = vpop.f32.mrb[85].mxu0  ;;  %2572 = vmatmul.mubr.f32.gmra.mrb[190].mxu0 %v704_v22  ;;  %4848 = vmatmul.mubr.msk.f32.gmra.mrb[254].mxu1 %vm942_vm0, %v546_v24  ;;  %v1925_v59 = vpop.f32.mrb[149].mxu1  ;;  %v720_v33 = vld [vmem:[%s5521_s17 + $0xf68] sm:$0xff] }
 0x251   : > { %2576 = vmatprep.mubr.f32.mxu0 %v710_v12  ;;  %4850 = vmatprep.mubr.msk.f32.mxu1 %vm942_vm0, %v551_v32  ;;  %v714_v12 = vld [vmem:[%s5521_s17 + $0xf38] sm:$0xff]  ;;  %v571_v55 = vld [vmem:[%s5521_s17 + $0xac0] sm:$0xff] }
 0x252   : > { %v566_v32 = vld [vmem:[%s5521_s17 + $0xa98] sm:$0xff] }
 0x253   : > { %v2313_v57 = vpop.f32.mrb[86].mxu0  ;;  %v6604_v3 = vpop.f32.mrb[150].mxu1 }
 0x254   : > { %7997 = vst [vmem:[#allocation60_spill] sm:$0xff] %v6604_v3  ;;  %v6607_v9 = vadd.f32 %v2313_v57, %v6058_v16  ;;  %v2315_v22 = vpop.f32.mrb[87].mxu0  ;;  %2577 = vmatmul.mubr.f32.gmra.mrb[192].mxu0 %v709_v62  ;;  %4851 = vmatmul.mubr.msk.f32.gmra.mrb[0].mxu1 %vm942_vm0, %v556_v14  ;;  %v1930_v24 = vpop.f32.mrb[151].mxu1  ;;  %v725_v57 = vld [vmem:[%s5521_s17 + $0xf90] sm:$0xff] }
 0x255   : > { %2581 = vmatprep.mubr.f32.mxu0 %v715_v41  ;;  %4853 = vmatprep.mubr.msk.f32.mxu1 %vm942_vm0, %v561_v17  ;;  %v719_v41 = vld [vmem:[%s5521_s17 + $0xf60] sm:$0xff]  ;;  %v576_v17 = vld [vmem:[%s5521_s17 + $0xae8] sm:$0xff]  ;;  %v581_v22 = vld [vmem:[%s5521_s17 + $0xb10] sm:$0xff] }
 0x257   : > { %v2318_v59 = vpop.f32.mrb[88].mxu0  ;;  %v6615_v3 = vpop.f32.mrb[152].mxu1 }
 0x258   : > { %7998 = vst [vmem:[#allocation61_spill] sm:$0xff] %v6615_v3  ;;  %v6618_v16 = vadd.f32 %v2318_v59, %v6064_v23  ;;  %v2320_v62 = vpop.f32.mrb[89].mxu0  ;;  %2582 = vmatmul.mubr.f32.gmra.mrb[194].mxu0 %v714_v12  ;;  %4854 = vmatmul.mubr.msk.f32.gmra.mrb[2].mxu1 %vm942_vm0, %v566_v32  ;;  %v1935_v14 = vpop.f32.mrb[153].mxu1  ;;  %v730_v59 = vld [vmem:[%s5521_s17 + $0xfb8] sm:$0xff] }
 0x259   : > { %2586 = vmatprep.mubr.f32.mxu0 %v720_v33  ;;  %4856 = vmatprep.mubr.msk.f32.mxu1 %vm942_vm0, %v571_v55  ;;  %v724_v33 = vld [vmem:[%s5521_s17 + $0xf88] sm:$0xff]  ;;  %v586_v55 = vld [vmem:[%s5521_s17 + $0xb38] sm:$0xff]  ;;  %v591_v62 = vld [vmem:[%s5521_s17 + $0xb60] sm:$0xff] }
 0x25b   : > { %v2323_v24 = vpop.f32.mrb[90].mxu0  ;;  %v6626_v3 = vpop.f32.mrb[154].mxu1 }
 0x25c   : > { %7999 = vst [vmem:[#allocation62_spill] sm:$0xff] %v6626_v3  ;;  %v6629_v23 = vadd.f32 %v2323_v24, %v6070_v30  ;;  %v2325_v12 = vpop.f32.mrb[91].mxu0  ;;  %2587 = vmatmul.mubr.f32.gmra.mrb[196].mxu0 %v719_v41  ;;  %4857 = vmatmul.mubr.msk.f32.gmra.mrb[4].mxu1 %vm942_vm0, %v576_v17  ;;  %v1940_v32 = vpop.f32.mrb[155].mxu1  ;;  %v735_v24 = vld [vmem:[%s5521_s17 + $0xfe0] sm:$0xff] }
 0x25d   : > { %2591 = vmatprep.mubr.f32.mxu0 %v725_v57  ;;  %4859 = vmatprep.mubr.msk.f32.mxu1 %vm942_vm0, %v581_v22  ;;  %v729_v57 = vld [vmem:[%s5521_s17 + $0xfb0] sm:$0xff]  ;;  %v596_v22 = vld [vmem:[%s5521_s17 + $0xb88] sm:$0xff] }
 0x25e   : > { %v601_v12 = vld [vmem:[%s5521_s17 + $0xbb0] sm:$0xff] }
 0x25f   : > { %v2328_v14 = vpop.f32.mrb[92].mxu0  ;;  %v6637_v3 = vpop.f32.mrb[156].mxu1 }
 0x260   : > { %8000 = vst [vmem:[#allocation63_spill] sm:$0xff] %v6637_v3  ;;  %v6640_v30 = vadd.f32 %v2328_v14, %v6076_v38  ;;  %v2330_v41 = vpop.f32.mrb[93].mxu0  ;;  %2592 = vmatmul.mubr.f32.gmra.mrb[198].mxu0 %v724_v33  ;;  %4860 = vmatmul.mubr.msk.f32.gmra.mrb[6].mxu1 %vm942_vm0, %v586_v55  ;;  %v1945_v17 = vpop.f32.mrb[157].mxu1  ;;  %v740_v14 = vld [vmem:[%s5521_s17 + $0x1008] sm:$0xff] }
 0x261   : > { %2596 = vmatprep.mubr.f32.mxu0 %v730_v59  ;;  %4862 = vmatprep.mubr.msk.f32.mxu1 %vm942_vm0, %v591_v62  ;;  %v734_v59 = vld [vmem:[%s5521_s17 + $0xfd8] sm:$0xff]  ;;  %v611_v41 = vld [vmem:[%s5521_s17 + $0xc00] sm:$0xff] }
 0x262   : > { %v606_v62 = vld [vmem:[%s5521_s17 + $0xbd8] sm:$0xff] }
 0x263   : > { %v2333_v32 = vpop.f32.mrb[94].mxu0  ;;  %v6648_v3 = vpop.f32.mrb[158].mxu1 }
 0x264   : > { %8001 = vst [vmem:[#allocation64_spill] sm:$0xff] %v6648_v3  ;;  %v6651_v38 = vadd.f32 %v2333_v32, %v6082_v45  ;;  %v2335_v33 = vpop.f32.mrb[95].mxu0  ;;  %2597 = vmatmul.mubr.f32.gmra.mrb[200].mxu0 %v729_v57  ;;  %4863 = vmatmul.mubr.msk.f32.gmra.mrb[8].mxu1 %vm942_vm0, %v596_v22  ;;  %v1950_v55 = vpop.f32.mrb[159].mxu1  ;;  %v745_v32 = vld [vmem:[%s5521_s17 + $0x1030] sm:$0xff] }
 0x265   : > { %2601 = vmatprep.mubr.f32.mxu0 %v735_v24  ;;  %4865 = vmatprep.mubr.msk.f32.mxu1 %vm942_vm0, %v601_v12  ;;  %v739_v24 = vld [vmem:[%s5521_s17 + $0x1000] sm:$0xff]  ;;  %v616_v12 = vld [vmem:[%s5521_s17 + $0xc28] sm:$0xff]  ;;  %v621_v33 = vld [vmem:[%s5521_s17 + $0xc50] sm:$0xff] }
 0x267   : > { %v2338_v17 = vpop.f32.mrb[96].mxu0  ;;  %v6659_v3 = vpop.f32.mrb[160].mxu1 }
 0x268   : > { %8002 = vst [vmem:[#allocation65_spill] sm:$0xff] %v6659_v3  ;;  %v6662_v45 = vadd.f32 %v2338_v17, %v6088_v51  ;;  %v2340_v57 = vpop.f32.mrb[97].mxu0  ;;  %2602 = vmatmul.mubr.f32.gmra.mrb[202].mxu0 %v734_v59  ;;  %4866 = vmatmul.mubr.msk.f32.gmra.mrb[10].mxu1 %vm942_vm0, %v606_v62  ;;  %v1955_v22 = vpop.f32.mrb[161].mxu1  ;;  %v750_v17 = vld [vmem:[%s5521_s17 + $0x1058] sm:$0xff] }
 0x269   : > { %2606 = vmatprep.mubr.f32.mxu0 %v740_v14  ;;  %4868 = vmatprep.mubr.msk.f32.mxu1 %vm942_vm0, %v611_v41  ;;  %v744_v14 = vld [vmem:[%s5521_s17 + $0x1028] sm:$0xff]  ;;  %v626_v41 = vld [vmem:[%s5521_s17 + $0xc78] sm:$0xff]  ;;  %v631_v57 = vld [vmem:[%s5521_s17 + $0xca0] sm:$0xff] }
 0x26b   : > { %v2343_v55 = vpop.f32.mrb[98].mxu0  ;;  %v6670_v3 = vpop.f32.mrb[162].mxu1 }
 0x26c   : > { %8003 = vst [vmem:[#allocation66_spill] sm:$0xff] %v6670_v3  ;;  %v6673_v51 = vadd.f32 %v2343_v55, %v6094_v58  ;;  %v2345_v59 = vpop.f32.mrb[99].mxu0  ;;  %2607 = vmatmul.mubr.f32.gmra.mrb[204].mxu0 %v739_v24  ;;  %4869 = vmatmul.mubr.msk.f32.gmra.mrb[12].mxu1 %vm942_vm0, %v616_v12  ;;  %v1960_v62 = vpop.f32.mrb[163].mxu1  ;;  %v755_v55 = vld [vmem:[%s5521_s17 + $0x1080] sm:$0xff] }
 0x26d   : > { %2611 = vmatprep.mubr.f32.mxu0 %v745_v32  ;;  %4871 = vmatprep.mubr.msk.f32.mxu1 %vm942_vm0, %v621_v33  ;;  %v749_v32 = vld [vmem:[%s5521_s17 + $0x1050] sm:$0xff]  ;;  %v636_v33 = vld [vmem:[%s5521_s17 + $0xcc8] sm:$0xff] }
 0x26e   : > { %v641_v59 = vld [vmem:[%s5521_s17 + $0xcf0] sm:$0xff] }
 0x26f   : > { %v2348_v22 = vpop.f32.mrb[100].mxu0  ;;  %v6681_v3 = vpop.f32.mrb[164].mxu1 }
 0x270   : > { %8004 = vst [vmem:[#allocation67_spill] sm:$0xff] %v6681_v3  ;;  %v6684_v58 = vadd.f32 %v2348_v22, %v6100_v1  ;;  %v2350_v24 = vpop.f32.mrb[101].mxu0  ;;  %2612 = vmatmul.mubr.f32.gmra.mrb[206].mxu0 %v744_v14  ;;  %4872 = vmatmul.mubr.msk.f32.gmra.mrb[14].mxu1 %vm942_vm0, %v626_v41  ;;  %v1965_v12 = vpop.f32.mrb[165].mxu1  ;;  %v760_v22 = vld [vmem:[%s5521_s17 + $0x10a8] sm:$0xff] }
 0x271   : > { %2616 = vmatprep.mubr.f32.mxu0 %v750_v17  ;;  %4874 = vmatprep.mubr.msk.f32.mxu1 %vm942_vm0, %v631_v57  ;;  %v754_v17 = vld [vmem:[%s5521_s17 + $0x1078] sm:$0xff]  ;;  %v651_v24 = vld [vmem:[%s5521_s17 + $0xd40] sm:$0xff] }
 0x272   : > { %v646_v57 = vld [vmem:[%s5521_s17 + $0xd18] sm:$0xff] }
 0x273   : > { %v2353_v62 = vpop.f32.mrb[102].mxu0  ;;  %v6692_v3 = vpop.f32.mrb[166].mxu1 }
 0x274   : > { %8005 = vst [vmem:[#allocation68_spill] sm:$0xff] %v6692_v3  ;;  %v6695_v1 = vadd.f32 %v2353_v62, %v6106_v10  ;;  %v2355_v14 = vpop.f32.mrb[103].mxu0  ;;  %2617 = vmatmul.mubr.f32.gmra.mrb[208].mxu0 %v749_v32  ;;  %4875 = vmatmul.mubr.msk.f32.gmra.mrb[16].mxu1 %vm942_vm0, %v636_v33  ;;  %v1970_v41 = vpop.f32.mrb[167].mxu1  ;;  %v765_v62 = vld [vmem:[%s5521_s17 + $0x10d0] sm:$0xff] }
 0x275   : > { %2621 = vmatprep.mubr.f32.mxu0 %v755_v55  ;;  %4877 = vmatprep.mubr.msk.f32.mxu1 %vm942_vm0, %v641_v59  ;;  %v759_v55 = vld [vmem:[%s5521_s17 + $0x10a0] sm:$0xff]  ;;  %v656_v59 = vld [vmem:[%s5521_s17 + $0xd68] sm:$0xff]  ;;  %v661_v14 = vld [vmem:[%s5521_s17 + $0xd90] sm:$0xff] }
 0x277   : > { %v2358_v12 = vpop.f32.mrb[104].mxu0  ;;  %v6703_v3 = vpop.f32.mrb[168].mxu1 }
 0x278   : > { %8006 = vst [vmem:[#allocation69_spill] sm:$0xff] %v6703_v3  ;;  %v6706_v10 = vadd.f32 %v2358_v12, %v6112_v18  ;;  %v2360_v32 = vpop.f32.mrb[105].mxu0  ;;  %2622 = vmatmul.mubr.f32.gmra.mrb[210].mxu0 %v754_v17  ;;  %4878 = vmatmul.mubr.msk.f32.gmra.mrb[18].mxu1 %vm942_vm0, %v646_v57  ;;  %v1975_v33 = vpop.f32.mrb[169].mxu1  ;;  %v770_v12 = vld [vmem:[%s5521_s17 + $0x10f8] sm:$0xff] }
 0x279   : > { %2626 = vmatprep.mubr.f32.mxu0 %v760_v22  ;;  %4880 = vmatprep.mubr.msk.f32.mxu1 %vm942_vm0, %v651_v24  ;;  %v764_v22 = vld [vmem:[%s5521_s17 + $0x10c8] sm:$0xff]  ;;  %v666_v24 = vld [vmem:[%s5521_s17 + $0xdb8] sm:$0xff]  ;;  %v671_v32 = vld [vmem:[%s5521_s17 + $0xde0] sm:$0xff] }
 0x27b   : > { %v2363_v41 = vpop.f32.mrb[106].mxu0  ;;  %v6714_v3 = vpop.f32.mrb[170].mxu1 }
 0x27c   : > { %8007 = vst [vmem:[#allocation70_spill] sm:$0xff] %v6714_v3  ;;  %v6717_v18 = vadd.f32 %v2363_v41, %v6118_v27  ;;  %v2365_v17 = vpop.f32.mrb[107].mxu0  ;;  %2627 = vmatmul.mubr.f32.gmra.mrb[212].mxu0 %v759_v55  ;;  %4881 = vmatmul.mubr.msk.f32.gmra.mrb[20].mxu1 %vm942_vm0, %v656_v59  ;;  %v1980_v57 = vpop.f32.mrb[171].mxu1  ;;  %v775_v41 = vld [vmem:[%s5521_s17 + $0x1120] sm:$0xff] }
 0x27d   : > { %2631 = vmatprep.mubr.f32.mxu0 %v765_v62  ;;  %4883 = vmatprep.mubr.msk.f32.mxu1 %vm942_vm0, %v661_v14  ;;  %v769_v62 = vld [vmem:[%s5521_s17 + $0x10f0] sm:$0xff]  ;;  %v676_v14 = vld [vmem:[%s5521_s17 + $0xe08] sm:$0xff] }
 0x27e   : > { %v681_v17 = vld [vmem:[%s5521_s17 + $0xe30] sm:$0xff] }
 0x27f   : > { %v2368_v33 = vpop.f32.mrb[108].mxu0  ;;  %v6725_v3 = vpop.f32.mrb[172].mxu1 }
 0x280   : > { %8008 = vst [vmem:[#allocation71_spill] sm:$0xff] %v6725_v3  ;;  %v6728_v27 = vadd.f32 %v2368_v33, %v6124_v35  ;;  %v2370_v55 = vpop.f32.mrb[109].mxu0  ;;  %2632 = vmatmul.mubr.f32.gmra.mrb[214].mxu0 %v764_v22  ;;  %4884 = vmatmul.mubr.msk.f32.gmra.mrb[22].mxu1 %vm942_vm0, %v666_v24  ;;  %v1985_v59 = vpop.f32.mrb[173].mxu1  ;;  %v780_v33 = vld [vmem:[%s5521_s17 + $0x1148] sm:$0xff] }
 0x281   : > { %2636 = vmatprep.mubr.f32.mxu0 %v770_v12  ;;  %4886 = vmatprep.mubr.msk.f32.mxu1 %vm942_vm0, %v671_v32  ;;  %v774_v12 = vld [vmem:[%s5521_s17 + $0x1118] sm:$0xff]  ;;  %v691_v55 = vld [vmem:[%s5521_s17 + $0xe80] sm:$0xff] }
 0x282   : > { %v686_v32 = vld [vmem:[%s5521_s17 + $0xe58] sm:$0xff] }
 0x283   : > { %v2373_v57 = vpop.f32.mrb[110].mxu0  ;;  %v6736_v3 = vpop.f32.mrb[174].mxu1 }
 0x284   : > { %8009 = vst [vmem:[#allocation72_spill] sm:$0xff] %v6736_v3  ;;  %v6739_v35 = vadd.f32 %v2373_v57, %v6130_v44  ;;  %v2375_v22 = vpop.f32.mrb[111].mxu0  ;;  %2637 = vmatmul.mubr.f32.gmra.mrb[216].mxu0 %v769_v62  ;;  %4887 = vmatmul.mubr.msk.f32.gmra.mrb[24].mxu1 %vm942_vm0, %v676_v14  ;;  %v1990_v24 = vpop.f32.mrb[175].mxu1  ;;  %v785_v57 = vld [vmem:[%s5521_s17 + $0x1170] sm:$0xff] }
 0x285   : > { %2641 = vmatprep.mubr.f32.mxu0 %v775_v41  ;;  %4889 = vmatprep.mubr.msk.f32.mxu1 %vm942_vm0, %v681_v17  ;;  %v779_v41 = vld [vmem:[%s5521_s17 + $0x1140] sm:$0xff]  ;;  %v696_v17 = vld [vmem:[%s5521_s17 + $0xea8] sm:$0xff]  ;;  %v701_v22 = vld [vmem:[%s5521_s17 + $0xed0] sm:$0xff] }
 0x287   : > { %v2378_v59 = vpop.f32.mrb[112].mxu0  ;;  %v6747_v3 = vpop.f32.mrb[176].mxu1 }
 0x288   : > { %8010 = vst [vmem:[#allocation73_spill] sm:$0xff] %v6747_v3  ;;  %v6750_v44 = vadd.f32 %v2378_v59, %v6136_v52  ;;  %v2380_v62 = vpop.f32.mrb[113].mxu0  ;;  %2642 = vmatmul.mubr.f32.gmra.mrb[218].mxu0 %v774_v12  ;;  %4890 = vmatmul.mubr.msk.f32.gmra.mrb[26].mxu1 %vm942_vm0, %v686_v32  ;;  %v1995_v14 = vpop.f32.mrb[177].mxu1  ;;  %v790_v59 = vld [vmem:[%s5521_s17 + $0x1198] sm:$0xff] }
 0x289   : > { %2646 = vmatprep.mubr.f32.mxu0 %v780_v33  ;;  %4892 = vmatprep.mubr.msk.f32.mxu1 %vm942_vm0, %v691_v55  ;;  %v784_v33 = vld [vmem:[%s5521_s17 + $0x1168] sm:$0xff]  ;;  %v706_v55 = vld [vmem:[%s5521_s17 + $0xef8] sm:$0xff]  ;;  %v711_v62 = vld [vmem:[%s5521_s17 + $0xf20] sm:$0xff] }
 0x28b   : > { %v2383_v24 = vpop.f32.mrb[114].mxu0  ;;  %v6758_v3 = vpop.f32.mrb[178].mxu1 }
 0x28c   : > { %8011 = vst [vmem:[#allocation74_spill] sm:$0xff] %v6758_v3  ;;  %v6761_v52 = vadd.f32 %v2383_v24, %v6142_v61  ;;  %v2385_v12 = vpop.f32.mrb[115].mxu0  ;;  %2647 = vmatmul.mubr.f32.gmra.mrb[220].mxu0 %v779_v41  ;;  %4893 = vmatmul.mubr.msk.f32.gmra.mrb[28].mxu1 %vm942_vm0, %v696_v17  ;;  %v2000_v32 = vpop.f32.mrb[179].mxu1  ;;  %v795_v24 = vld [vmem:[%s5521_s17 + $0x11c0] sm:$0xff] }
 0x28d   : > { %2651 = vmatprep.mubr.f32.mxu0 %v785_v57  ;;  %4895 = vmatprep.mubr.msk.f32.mxu1 %vm942_vm0, %v701_v22  ;;  %v789_v57 = vld [vmem:[%s5521_s17 + $0x1190] sm:$0xff]  ;;  %v716_v22 = vld [vmem:[%s5521_s17 + $0xf48] sm:$0xff] }
 0x28e   : > { %v721_v12 = vld [vmem:[%s5521_s17 + $0xf70] sm:$0xff] }
 0x28f   : > { %v2388_v14 = vpop.f32.mrb[116].mxu0  ;;  %v6769_v3 = vpop.f32.mrb[180].mxu1 }
 0x290   : > { %8012 = vst [vmem:[#allocation75_spill] sm:$0xff] %v6769_v3  ;;  %v6772_v61 = vadd.f32 %v2388_v14, %v6148_v6  ;;  %v2390_v41 = vpop.f32.mrb[117].mxu0  ;;  %2652 = vmatmul.mubr.f32.gmra.mrb[222].mxu0 %v784_v33  ;;  %4896 = vmatmul.mubr.msk.f32.gmra.mrb[30].mxu1 %vm942_vm0, %v706_v55  ;;  %v2005_v17 = vpop.f32.mrb[181].mxu1  ;;  %v800_v14 = vld [vmem:[%s5521_s17 + $0x11e8] sm:$0xff] }
 0x291   : > { %2656 = vmatprep.mubr.f32.mxu0 %v790_v59  ;;  %4898 = vmatprep.mubr.msk.f32.mxu1 %vm942_vm0, %v711_v62  ;;  %v794_v59 = vld [vmem:[%s5521_s17 + $0x11b8] sm:$0xff]  ;;  %v731_v41 = vld [vmem:[%s5521_s17 + $0xfc0] sm:$0xff] }
 0x292   : > { %v726_v62 = vld [vmem:[%s5521_s17 + $0xf98] sm:$0xff] }
 0x293   : > { %v2393_v32 = vpop.f32.mrb[118].mxu0  ;;  %v6780_v3 = vpop.f32.mrb[182].mxu1 }
 0x294   : > { %8013 = vst [vmem:[#allocation76_spill] sm:$0xff] %v6780_v3  ;;  %v6783_v6 = vadd.f32 %v2393_v32, %v6154_v15  ;;  %v2395_v33 = vpop.f32.mrb[119].mxu0  ;;  %2657 = vmatmul.mubr.f32.gmra.mrb[224].mxu0 %v789_v57  ;;  %4899 = vmatmul.mubr.msk.f32.gmra.mrb[32].mxu1 %vm942_vm0, %v716_v22  ;;  %v2010_v55 = vpop.f32.mrb[183].mxu1  ;;  %v805_v32 = vld [vmem:[%s5521_s17 + $0x1210] sm:$0xff] }
 0x295   : > { %2661 = vmatprep.mubr.f32.mxu0 %v795_v24  ;;  %4901 = vmatprep.mubr.msk.f32.mxu1 %vm942_vm0, %v721_v12  ;;  %v799_v24 = vld [vmem:[%s5521_s17 + $0x11e0] sm:$0xff]  ;;  %v736_v12 = vld [vmem:[%s5521_s17 + $0xfe8] sm:$0xff]  ;;  %v741_v33 = vld [vmem:[%s5521_s17 + $0x1010] sm:$0xff] }
 0x297   : > { %v2398_v17 = vpop.f32.mrb[120].mxu0  ;;  %v6791_v3 = vpop.f32.mrb[184].mxu1 }
 0x298   : > { %8014 = vst [vmem:[#allocation77_spill] sm:$0xff] %v6791_v3  ;;  %v6794_v15 = vadd.f32 %v2398_v17, %v6160_v26  ;;  %v2400_v57 = vpop.f32.mrb[121].mxu0  ;;  %2662 = vmatmul.mubr.f32.gmra.mrb[226].mxu0 %v794_v59  ;;  %4902 = vmatmul.mubr.msk.f32.gmra.mrb[34].mxu1 %vm942_vm0, %v726_v62  ;;  %v2015_v22 = vpop.f32.mrb[185].mxu1  ;;  %v810_v17 = vld [vmem:[%s5521_s17 + $0x1238] sm:$0xff] }
 0x299   : > { %2666 = vmatprep.mubr.f32.mxu0 %v800_v14  ;;  %4904 = vmatprep.mubr.msk.f32.mxu1 %vm942_vm0, %v731_v41  ;;  %v804_v14 = vld [vmem:[%s5521_s17 + $0x1208] sm:$0xff]  ;;  %v746_v41 = vld [vmem:[%s5521_s17 + $0x1038] sm:$0xff]  ;;  %v751_v57 = vld [vmem:[%s5521_s17 + $0x1060] sm:$0xff] }
 0x29b   : > { %v2403_v55 = vpop.f32.mrb[122].mxu0  ;;  %v6802_v3 = vpop.f32.mrb[186].mxu1 }
 0x29c   : > { %8015 = vst [vmem:[#allocation78_spill] sm:$0xff] %v6802_v3  ;;  %v6805_v26 = vadd.f32 %v2403_v55, %v6166_v36  ;;  %v2405_v59 = vpop.f32.mrb[123].mxu0  ;;  %2667 = vmatmul.mubr.f32.gmra.mrb[228].mxu0 %v799_v24  ;;  %4905 = vmatmul.mubr.msk.f32.gmra.mrb[36].mxu1 %vm942_vm0, %v736_v12  ;;  %v2020_v62 = vpop.f32.mrb[187].mxu1  ;;  %v815_v55 = vld [vmem:[%s5521_s17 + $0x1260] sm:$0xff] }
 0x29d   : > { %2671 = vmatprep.mubr.f32.mxu0 %v805_v32  ;;  %4907 = vmatprep.mubr.msk.f32.mxu1 %vm942_vm0, %v741_v33  ;;  %v809_v32 = vld [vmem:[%s5521_s17 + $0x1230] sm:$0xff]  ;;  %v756_v33 = vld [vmem:[%s5521_s17 + $0x1088] sm:$0xff] }
 0x29e   : > { %v761_v59 = vld [vmem:[%s5521_s17 + $0x10b0] sm:$0xff] }
 0x29f   : > { %v2408_v22 = vpop.f32.mrb[124].mxu0  ;;  %v6813_v3 = vpop.f32.mrb[188].mxu1 }
 0x2a0   : > { %8016 = vst [vmem:[#allocation79_spill] sm:$0xff] %v6813_v3  ;;  %v6816_v36 = vadd.f32 %v2408_v22, %v6172_v47  ;;  %v2410_v24 = vpop.f32.mrb[125].mxu0  ;;  %2672 = vmatmul.mubr.f32.gmra.mrb[230].mxu0 %v804_v14  ;;  %4908 = vmatmul.mubr.msk.f32.gmra.mrb[38].mxu1 %vm942_vm0, %v746_v41  ;;  %v2025_v12 = vpop.f32.mrb[189].mxu1  ;;  %v766_v22 = vld [vmem:[%s5521_s17 + $0x10d8] sm:$0xff] }
 0x2a1   : > { %2676 = vmatprep.mubr.f32.mxu0 %v810_v17  ;;  %4910 = vmatprep.mubr.msk.f32.mxu1 %vm942_vm0, %v751_v57  ;;  %v814_v57 = vld [vmem:[%s5521_s17 + $0x1258] sm:$0xff]  ;;  %v820_v24 = vld [vmem:[%s5521_s17 + $0x1288] sm:$0xff]  ;;  %v771_v12 = vld [vmem:[%s5521_s17 + $0x1100] sm:$0xff] }
 0x2a2   : > { %8017 = vst [vmem:[#allocation80_spill] sm:$0xff] %v6816_v36  ;;  %v786_v36 = vld [vmem:[%s5521_s17 + $0x1178] sm:$0xff] }
 0x2a3   : > { %v2413_v62 = vpop.f32.mrb[126].mxu0  ;;  %v6824_v47 = vpop.f32.mrb[190].mxu1 }
 0x2a4   : > { %8018 = vst [vmem:[#allocation81_spill] sm:$0xff] %v6824_v47  ;;  %v6827_v14 = vadd.f32 %v2413_v62, %v6178_v56  ;;  %v2415_v41 = vpop.f32.mrb[127].mxu0  ;;  %2677 = vmatmul.mubr.f32.gmra.mrb[232].mxu0 %v809_v32  ;;  %4911 = vmatmul.mubr.msk.f32.gmra.mrb[40].mxu1 %vm942_vm0, %v756_v33  ;;  %v2030_v17 = vpop.f32.mrb[191].mxu1  ;;  %v6839_v56 = vld [vmem:[%s7936_s2] ss:$0 sm:$0xff] }
 0x2a5   : > { %2681 = vmatprep.mubr.f32.mxu0 %v815_v55  ;;  %4913 = vmatprep.mubr.msk.f32.mxu1 %vm942_vm0, %v761_v59  ;;  %v6849_v62 = vld [vmem:[%s7937_s3] ss:$0 sm:$0xff] }
 0x2a6   : > { %v819_v17 = vld [vmem:[%s5521_s17 + $0x1280] sm:$0xff] }
 0x2a7   : > { %v2418_v3 = vpop.f32.mrb[128].mxu0  ;;  %v4756_v47 = vpop.f32.mrb[192].mxu1 }
 0x2a8   : > { %v6842_v32 = vadd.f32 %v2418_v3, %v6186_v5  ;;  %v2809_v33 = vadd.f32 %v4756_v47, %v6192_v20  ;;  %v2420_v55 = vpop.f32.mrb[129].mxu0  ;;  %2682 = vmatmul.mubr.f32.gmra.mrb[234].mxu0 %v814_v57  ;;  %v2803_v59 = vpop.f32.mrb[193].mxu1  ;;  %4914 = vmatmul.mubr.msk.f32.gmra.mrb[42].mxu1 %vm942_vm0, %v766_v22  ;;  %v776_v5 = vld [vmem:[%s5521_s17 + $0x1128] sm:$0xff]  ;;  %v825_v3 = vld [vmem:[%s5521_s17 + $0x12b0] sm:$0xff] }
 0x2a9   : > { %v2804_v41 = vadd.f32 %v2803_v59, %v6184_v4  ;;  %2686 = vmatprep.mubr.f32.mxu0 %v820_v24  ;;  %4916 = vmatprep.mubr.msk.f32.mxu1 %vm942_vm0, %v771_v12  ;;  %v781_v47 = vld [vmem:[%s5521_s17 + $0x1150] sm:$0xff] }
 0x2aa   : > { %8019 = vst [vmem:[#allocation82_spill] sm:$0xff] %v6842_v32  ;;  %v3450_v20 = vmul.f32 %v6839_v56, %v2809_v33 }
 0x2ab   : > { %v3449_v57 = vmul.f32 %v6839_v56, %v2804_v41  ;;  %v2423_v22 = vpop.f32.mrb[130].mxu0  ;;  %v4759_v55 = vpop.f32.mrb[194].mxu1 }
 0x2ac   : > { %v3585_v32 = vadd.f32 %v6849_v62, %v3450_v20  ;;  %v6861_v4 = vadd.f32 %v2423_v22, %v6194_v21  ;;  %v2819_v24 = vadd.f32 %v4759_v55, %v6208_v50  ;;  %v2425_v12 = vpop.f32.mrb[131].mxu0  ;;  %2687 = vmatmul.mubr.f32.gmra.mrb[236].mxu0 %v819_v17  ;;  %v2813_v33 = vpop.f32.mrb[195].mxu1  ;;  %4917 = vmatmul.mubr.msk.f32.gmra.mrb[44].mxu1 %vm942_vm0, %v776_v5  ;;  %v824_v20 = vld [vmem:[%s5521_s17 + $0x12a8] sm:$0xff]  ;;  %v791_v50 = vld [vmem:[%s5521_s17 + $0x11a0] sm:$0xff] }
 0x2ad   : > { %v3584_v59 = vadd.f32 %v6849_v62, %v3449_v57  ;;  %v2814_v41 = vadd.f32 %v2813_v33, %v6200_v34  ;;  %2691 = vmatprep.mubr.f32.mxu0 %v825_v3  ;;  %4919 = vmatprep.mubr.msk.f32.mxu1 %vm942_vm0, %v781_v47 }
 0x2ae   : > { %8020 = vst [vmem:[#allocation83_spill] sm:$0xff] %v6861_v4  ;;  %v3713_v21 = vmax.f32 %v3585_v32, 0.0  ;;  %v3452_v22 = vmul.f32 %v6839_v56, %v2819_v24  ;;  %v830_v4 = vld [vmem:[%s5521_s17 + $0x12d8] sm:$0xff] }
 0x2af   : > { %v3712_v55 = vmax.f32 %v3584_v59, 0.0  ;;  %v3451_v17 = vmul.f32 %v6839_v56, %v2814_v41  ;;  %v2428_v12 = vpop.f32.mrb[132].mxu0  ;;  %v4762_v5 = vpop.f32.mrb[196].mxu1  ;;  %v796_v59 = vld [vmem:[%s5521_s17 + $0x11c8] sm:$0xff] }
 0x2b0   : > { %3842 = vst.msk [vmem:[%s6874_s14 + $0x8] sm:$0xff] %vm3840_vm1, %v3713_v21  ;;  %v3587_v34 = vadd.f32 %v6849_v62, %v3452_v22  ;;  %v6880_v32 = vadd.f32 %v2428_v12, %v6202_v39  ;;  %v2829_v3 = vadd.f32 %v4762_v5, %v6224_v28  ;;  %v2430_v47 = vpop.f32.mrb[133].mxu0  ;;  %2692 = vmatmul.mubr.f32.gmra.mrb[238].mxu0 %v824_v20  ;;  %v2823_v57 = vpop.f32.mrb[197].mxu1  ;;  %v829_v39 = vld [vmem:[%s5521_s17 + $0x12d0] sm:$0xff]  ;;  %v835_v20 = vld [vmem:[%s5521_s17 + $0x1300] sm:$0xff] }
 0x2b1   : > { %4920 = vmatmul.mubr.msk.f32.gmra.mrb[46].mxu1 %vm942_vm0, %v786_v36  ;;  %3841 = vst.msk [vmem:[%s6874_s14] sm:$0xff] %vm3840_vm1, %v3712_v55  ;;  %v3586_v24 = vadd.f32 %v6849_v62, %v3451_v17  ;;  %v2824_v33 = vadd.f32 %v2823_v57, %v6216_v7  ;;  %2696 = vmatprep.mubr.f32.mxu0 %v830_v4  ;;  %v801_v21 = vld [vmem:[%s5521_s17 + $0x11f0] sm:$0xff]  ;;  %v806_v47 = vld [vmem:[%s5521_s17 + $0x1218] sm:$0xff] }
 0x2b2   : > { %4922 = vmatprep.mubr.msk.f32.mxu1 %vm942_vm0, %v791_v50  ;;  %v3715_v41 = vmax.f32 %v3587_v34, 0.0  ;;  %v3454_v28 = vmul.f32 %v6839_v56, %v2829_v3 }
 0x2b3   : > { %v3714_v22 = vmax.f32 %v3586_v24, 0.0  ;;  %v3453_v36 = vmul.f32 %v6839_v56, %v2824_v33  ;;  %v2433_v55 = vpop.f32.mrb[134].mxu0  ;;  %v4765_v17 = vpop.f32.mrb[198].mxu1  ;;  %v840_v24 = vld [vmem:[%s5521_s17 + $0x1328] sm:$0xff]  ;;  %v811_v33 = vld [vmem:[%s5521_s17 + $0x1240] sm:$0xff] }
 0x2b4   : > { %3844 = vst.msk [vmem:[%s6874_s14 + $0x18] sm:$0xff] %vm3840_vm1, %v3715_v41  ;;  %v3589_v7 = vadd.f32 %v6849_v62, %v3454_v28  ;;  %v6899_v4 = vadd.f32 %v2433_v55, %v6210_v53  ;;  %v2839_v50 = vadd.f32 %v4765_v17, %v6240_v11  ;;  %v2435_v12 = vpop.f32.mrb[135].mxu0  ;;  %2697 = vmatmul.mubr.f32.gmra.mrb[240].mxu0 %v829_v39  ;;  %v2833_v5 = vpop.f32.mrb[199].mxu1  ;;  %v834_v53 = vld [vmem:[%s5521_s17 + $0x12f8] sm:$0xff] }
 0x2b5   : > { %4923 = vmatmul.mubr.msk.f32.gmra.mrb[48].mxu1 %vm942_vm0, %v796_v59  ;;  %3843 = vst.msk [vmem:[%s6874_s14 + $0x10] sm:$0xff] %vm3840_vm1, %v3714_v22  ;;  %v3588_v34 = vadd.f32 %v6849_v62, %v3453_v36  ;;  %v2834_v3 = vadd.f32 %v2833_v5, %v6232_v48  ;;  %2701 = vmatprep.mubr.f32.mxu0 %v835_v20  ;;  %v845_v12 = vld [vmem:[%s5521_s17 + $0x1350] sm:$0xff] }
 0x2b6   : > { %4925 = vmatprep.mubr.msk.f32.mxu1 %vm942_vm0, %v801_v21  ;;  %v3717_v57 = vmax.f32 %v3589_v7, 0.0  ;;  %v3456_v11 = vmul.f32 %v6839_v56, %v2839_v50  ;;  %v816_v7 = vld [vmem:[%s5521_s17 + $0x1268] sm:$0xff]  ;;  %v821_v5 = vld [vmem:[%s5521_s17 + $0x1290] sm:$0xff] }
 0x2b7   : > { %v3716_v39 = vmax.f32 %v3588_v34, 0.0  ;;  %v3455_v59 = vmul.f32 %v6839_v56, %v2834_v3  ;;  %v2438_v41 = vpop.f32.mrb[136].mxu0  ;;  %v4768_v28 = vpop.f32.mrb[200].mxu1 }
 0x2b8   : > { %3846 = vst.msk [vmem:[%s6874_s14 + $0x28] sm:$0xff] %vm3840_vm1, %v3717_v57  ;;  %v3591_v48 = vadd.f32 %v6849_v62, %v3456_v11  ;;  %v6918_v20 = vadd.f32 %v2438_v41, %v6218_v8  ;;  %v2849_v21 = vadd.f32 %v4768_v28, %v6256_v63  ;;  %v2440_v22 = vpop.f32.mrb[137].mxu0  ;;  %2702 = vmatmul.mubr.f32.gmra.mrb[242].mxu0 %v834_v53  ;;  %v2843_v36 = vpop.f32.mrb[201].mxu1  ;;  %v839_v8 = vld [vmem:[%s5521_s17 + $0x1320] sm:$0xff]  ;;  %v826_v41 = vld [vmem:[%s5521_s17 + $0x12b8] sm:$0xff] }
 0x2b9   : > { %4926 = vmatmul.mubr.msk.f32.gmra.mrb[50].mxu1 %vm942_vm0, %v806_v47  ;;  %3845 = vst.msk [vmem:[%s6874_s14 + $0x20] sm:$0xff] %vm3840_vm1, %v3716_v39  ;;  %v3590_v55 = vadd.f32 %v6849_v62, %v3455_v59  ;;  %v2844_v17 = vadd.f32 %v2843_v36, %v6248_v40  ;;  %2706 = vmatprep.mubr.f32.mxu0 %v840_v24 }
 0x2ba   : > { %4928 = vmatprep.mubr.msk.f32.mxu1 %vm942_vm0, %v811_v33  ;;  %v3719_v50 = vmax.f32 %v3591_v48, 0.0  ;;  %v3458_v63 = vmul.f32 %v6839_v56, %v2849_v21  ;;  %v850_v48 = vld [vmem:[%s5521_s17 + $0x1378] sm:$0xff]  ;;  %v831_v21 = vld [vmem:[%s5521_s17 + $0x12e0] sm:$0xff] }
 0x2bb   : > { %v3718_v34 = vmax.f32 %v3590_v55, 0.0  ;;  %v3457_v3 = vmul.f32 %v6839_v56, %v2844_v17  ;;  %v2443_v53 = vpop.f32.mrb[138].mxu0  ;;  %v4771_v47 = vpop.f32.mrb[202].mxu1 }
 0x2bc   : > { %3848 = vst.msk [vmem:[%s6874_s14 + $0x38] sm:$0xff] %vm3840_vm1, %v3719_v50  ;;  %v3593_v40 = vadd.f32 %v6849_v62, %v3458_v63  ;;  %v6937_v57 = vadd.f32 %v2443_v53, %v6226_v29  ;;  %v2859_v11 = vadd.f32 %v4771_v47, %v6273_v0  ;;  %v2445_v24 = vpop.f32.mrb[139].mxu0  ;;  %2707 = vmatmul.mubr.f32.gmra.mrb[244].mxu0 %v839_v8  ;;  %v2853_v33 = vpop.f32.mrb[203].mxu1  ;;  %v844_v29 = vld [vmem:[%s5521_s17 + $0x1348] sm:$0xff]  ;;  %v8021_v8 = vld [vmem:[#allocation3_spill] sm:$0xff]  ;;  %v849_v47 = vld [vmem:[%s5521_s17 + $0x1370] sm:$0xff] }
 0x2bd   : > { %4929 = vmatmul.mubr.msk.f32.gmra.mrb[52].mxu1 %vm942_vm0, %v816_v7  ;;  %3847 = vst.msk [vmem:[%s6874_s14 + $0x30] sm:$0xff] %vm3840_vm1, %v3718_v34  ;;  %v3592_v39 = vadd.f32 %v6849_v62, %v3457_v3  ;;  %v2854_v59 = vadd.f32 %v2853_v33, %v6264_v42  ;;  %2711 = vmatprep.mubr.f32.mxu0 %v845_v12  ;;  %v8022_v50 = vld [vmem:[#allocation11_spill] sm:$0xff]  ;;  %v8023_v3 = vld [vmem:[#allocation9_spill] sm:$0xff] }
 0x2be   : > { %4931 = vmatprep.mubr.msk.f32.mxu1 %vm942_vm0, %v821_v5  ;;  %v3721_v28 = vmax.f32 %v3593_v40, 0.0  ;;  %v3460_v0 = vmul.f32 %v6839_v56, %v2859_v11  ;;  %v836_v40 = vld [vmem:[%s5521_s17 + $0x1308] sm:$0xff]  ;;  %v855_v33 = vld [vmem:[%s5521_s17 + $0x13a0] sm:$0xff] }
 0x2bf   : > { %v3720_v22 = vmax.f32 %v3592_v39, 0.0  ;;  %v3459_v36 = vmul.f32 %v6839_v56, %v2854_v59  ;;  %v2448_v55 = vpop.f32.mrb[140].mxu0  ;;  %v4774_v17 = vpop.f32.mrb[204].mxu1  ;;  %v841_v39 = vld [vmem:[%s5521_s17 + $0x1330] sm:$0xff] }
 0x2c0   : > { %3850 = vst.msk [vmem:[%s6874_s14 + $0x48] sm:$0xff] %vm3840_vm1, %v3721_v28  ;;  %v3595_v42 = vadd.f32 %v6849_v62, %v3460_v0  ;;  %v6956_v7 = vadd.f32 %v2448_v55, %v8021_v8  ;;  %v2869_v63 = vadd.f32 %v4774_v17, %v8022_v50  ;;  %v2450_v12 = vpop.f32.mrb[141].mxu0  ;;  %2712 = vmatmul.mubr.f32.gmra.mrb[246].mxu0 %v844_v29  ;;  %v2863_v5 = vpop.f32.mrb[205].mxu1  ;;  %v8026_v8 = vld [vmem:[#allocation13_spill] sm:$0xff] }
 0x2c1   : > { %4932 = vmatmul.mubr.msk.f32.gmra.mrb[54].mxu1 %vm942_vm0, %v826_v41  ;;  %3849 = vst.msk [vmem:[%s6874_s14 + $0x40] sm:$0xff] %vm3840_vm1, %v3720_v22  ;;  %v3594_v34 = vadd.f32 %v6849_v62, %v3459_v36  ;;  %v2864_v53 = vadd.f32 %v2863_v5, %v8023_v3  ;;  %2716 = vmatprep.mubr.f32.mxu0 %v850_v48  ;;  %v8024_v48 = vld [vmem:[#allocation4_spill] sm:$0xff]  ;;  %v8025_v22 = vld [vmem:[#allocation15_spill] sm:$0xff]  ;;  %v846_v12 = vld [vmem:[%s5521_s17 + $0x1358] sm:$0xff] }
 0x2c2   : > { %4934 = vmatprep.mubr.msk.f32.mxu1 %vm942_vm0, %v831_v21  ;;  %v3723_v11 = vmax.f32 %v3595_v42, 0.0  ;;  %v3462_v24 = vmul.f32 %v6839_v56, %v2869_v63  ;;  %v854_v63 = vld [vmem:[%s5521_s17 + $0x1398] sm:$0xff]  ;;  %v860_v3 = vld [vmem:[%s5521_s17 + $0x13c8] sm:$0xff] }
 0x2c3   : > { %v3722_v59 = vmax.f32 %v3594_v34, 0.0  ;;  %v3461_v29 = vmul.f32 %v6839_v56, %v2864_v53  ;;  %v2453_v41 = vpop.f32.mrb[142].mxu0  ;;  %v4777_v28 = vpop.f32.mrb[206].mxu1  ;;  %v851_v53 = vld [vmem:[%s5521_s17 + $0x1380] sm:$0xff] }
 0x2c4   : > { %3852 = vst.msk [vmem:[%s6874_s14 + $0x58] sm:$0xff] %vm3840_vm1, %v3723_v11  ;;  %v3597_v0 = vadd.f32 %v6849_v62, %v3462_v24  ;;  %v6975_v21 = vadd.f32 %v2453_v41, %v8024_v48  ;;  %v2879_v36 = vadd.f32 %v4777_v28, %v8025_v22  ;;  %v2455_v55 = vpop.f32.mrb[143].mxu0  ;;  %2717 = vmatmul.mubr.f32.gmra.mrb[248].mxu0 %v849_v47  ;;  %v2873_v17 = vpop.f32.mrb[207].mxu1  ;;  %v8029_v22 = vld [vmem:[#allocation17_spill] sm:$0xff] }
 0x2c5   : > { %4935 = vmatmul.mubr.msk.f32.gmra.mrb[56].mxu1 %vm942_vm0, %v836_v40  ;;  %3851 = vst.msk [vmem:[%s6874_s14 + $0x50] sm:$0xff] %vm3840_vm1, %v3722_v59  ;;  %v3596_v42 = vadd.f32 %v6849_v62, %v3461_v29  ;;  %v2874_v50 = vadd.f32 %v2873_v17, %v8026_v8  ;;  %2721 = vmatprep.mubr.f32.mxu0 %v855_v33  ;;  %v8028_v29 = vld [vmem:[#allocation19_spill] sm:$0xff]  ;;  %v856_v17 = vld [vmem:[%s5521_s17 + $0x13a8] sm:$0xff] }
 0x2c6   : > { %4937 = vmatprep.mubr.msk.f32.mxu1 %vm942_vm0, %v841_v39  ;;  %v3725_v5 = vmax.f32 %v3597_v0, 0.0  ;;  %v3464_v34 = vmul.f32 %v6839_v56, %v2879_v36  ;;  %v8027_v39 = vld [vmem:[#allocation5_spill] sm:$0xff]  ;;  %v859_v55 = vld [vmem:[%s5521_s17 + $0x13c0] sm:$0xff] }
 0x2c7   : > { %v3724_v47 = vmax.f32 %v3596_v42, 0.0  ;;  %v3463_v40 = vmul.f32 %v6839_v56, %v2874_v50  ;;  %v2458_v11 = vpop.f32.mrb[144].mxu0  ;;  %v4780_v24 = vpop.f32.mrb[208].mxu1  ;;  %v865_v50 = vld [vmem:[%s5521_s17 + $0x13f0] sm:$0xff] }
 0x2c8   : > { %3854 = vst.msk [vmem:[%s6874_s14 + $0x68] sm:$0xff] %vm3840_vm1, %v3725_v5  ;;  %v3599_v33 = vadd.f32 %v6849_v62, %v3464_v34  ;;  %v6994_v59 = vadd.f32 %v2458_v11, %v8027_v39  ;;  %v2889_v41 = vadd.f32 %v4780_v24, %v8028_v29  ;;  %v2460_v28 = vpop.f32.mrb[145].mxu0  ;;  %2722 = vmatmul.mubr.f32.gmra.mrb[250].mxu0 %v854_v63  ;;  %v2883_v0 = vpop.f32.mrb[209].mxu1  ;;  %v861_v63 = vld [vmem:[%s5521_s17 + $0x13d0] sm:$0xff]  ;;  %v8031_v11 = vld [vmem:[#allocation23_spill] sm:$0xff] }
 0x2c9   : > { %4938 = vmatmul.mubr.msk.f32.gmra.mrb[58].mxu1 %vm942_vm0, %v846_v12  ;;  %3853 = vst.msk [vmem:[%s6874_s14 + $0x60] sm:$0xff] %vm3840_vm1, %v3724_v47  ;;  %v3598_v48 = vadd.f32 %v6849_v62, %v3463_v40  ;;  %v2884_v36 = vadd.f32 %v2883_v0, %v8029_v22  ;;  %2726 = vmatprep.mubr.f32.mxu0 %v860_v3  ;;  %v864_v0 = vld [vmem:[%s5521_s17 + $0x13e8] sm:$0xff] }
 0x2ca   : > { %4940 = vmatprep.mubr.msk.f32.mxu1 %vm942_vm0, %v851_v53  ;;  %v3727_v42 = vmax.f32 %v3599_v33, 0.0  ;;  %v3466_v8 = vmul.f32 %v6839_v56, %v2889_v41  ;;  %v8030_v53 = vld [vmem:[#allocation6_spill] sm:$0xff]  ;;  %v8032_v41 = vld [vmem:[#allocation21_spill] sm:$0xff] }
 0x2cb   : > { %v3726_v5 = vmax.f32 %v3598_v48, 0.0  ;;  %v3465_v12 = vmul.f32 %v6839_v56, %v2884_v36  ;;  %v2463_v34 = vpop.f32.mrb[146].mxu0  ;;  %v4783_v47 = vpop.f32.mrb[210].mxu1  ;;  %v866_v48 = vld [vmem:[%s5521_s17 + $0x13f8] sm:$0xff] }
 0x2cc   : > { %3856 = vst.msk [vmem:[%s6874_s14 + $0x78] sm:$0xff] %vm3840_vm1, %v3727_v42  ;;  %v3601_v3 = vadd.f32 %v6849_v62, %v3466_v8  ;;  %v7013_v40 = vadd.f32 %v2463_v34, %v8030_v53  ;;  %v2899_v24 = vadd.f32 %v4783_v47, %v8031_v11  ;;  %v2465_v33 = vpop.f32.mrb[147].mxu0  ;;  %2727 = vmatmul.mubr.f32.gmra.mrb[252].mxu0 %v859_v55  ;;  %v2893_v39 = vpop.f32.mrb[211].mxu1  ;;  %v8035_v11 = vld [vmem:[#allocation25_spill] sm:$0xff] }
 0x2cd   : > { %4941 = vmatmul.mubr.msk.f32.gmra.mrb[60].mxu1 %vm942_vm0, %v856_v17  ;;  %3855 = vst.msk [vmem:[%s6874_s14 + $0x70] sm:$0xff] %vm3840_vm1, %v3726_v5  ;;  %v3600_v29 = vadd.f32 %v6849_v62, %v3465_v12  ;;  %v2894_v28 = vadd.f32 %v2893_v39, %v8032_v41  ;;  %2731 = vmatprep.mubr.f32.mxu0 %v865_v50  ;;  %v8033_v12 = vld [vmem:[#allocation7_spill] sm:$0xff] }
 0x2ce   : > { %4943 = vmatprep.mubr.msk.f32.mxu1 %vm942_vm0, %v861_v63  ;;  %v3729_v22 = vmax.f32 %v3601_v3, 0.0  ;;  %v3468_v36 = vmul.f32 %v6839_v56, %v2899_v24  ;;  %v8034_v63 = vld [vmem:[#allocation27_spill] sm:$0xff] }
 0x2cf   : > { %v3728_v55 = vmax.f32 %v3600_v29, 0.0  ;;  %v3467_v42 = vmul.f32 %v6839_v56, %v2894_v28  ;;  %v2468_v8 = vpop.f32.mrb[148].mxu0  ;;  %v4786_v17 = vpop.f32.mrb[212].mxu1 }
 0x2d0   : > { %3858 = vst.msk [vmem:[%s6874_s14 + $0x88] sm:$0xff] %vm3840_vm1, %v3729_v22  ;;  %v3603_v5 = vadd.f32 %v6849_v62, %v3468_v36  ;;  %v7030_v50 = vadd.f32 %v2468_v8, %v8033_v12  ;;  %v2909_v34 = vadd.f32 %v4786_v17, %v8034_v63  ;;  %v2470_v47 = vpop.f32.mrb[149].mxu0  ;;  %2732 = vmatmul.mubr.f32.gmra.mrb[254].mxu0 %v864_v0  ;;  %v2903_v3 = vpop.f32.mrb[213].mxu1  ;;  %v8038_v12 = vld [vmem:[#allocation29_spill] sm:$0xff] }
 0x2d1   : > { %4944 = vmatmul.mubr.msk.f32.gmra.mrb[62].mxu1 %vm942_vm0, %v866_v48  ;;  %3857 = vst.msk [vmem:[%s6874_s14 + $0x80] sm:$0xff] %vm3840_vm1, %v3728_v55  ;;  %v3602_v53 = vadd.f32 %v6849_v62, %v3467_v42  ;;  %v2904_v24 = vadd.f32 %v2903_v3, %v8035_v11  ;;  %v8036_v48 = vld [vmem:[#allocation8_spill] sm:$0xff]  ;;  %v8037_v55 = vld [vmem:[#allocation31_spill] sm:$0xff] }
 0x2d2   : > { %v3731_v33 = vmax.f32 %v3603_v5, 0.0  ;;  %v3470_v39 = vmul.f32 %v6839_v56, %v2909_v34 }
 0x2d3   : > { %v3730_v29 = vmax.f32 %v3602_v53, 0.0  ;;  %v3469_v41 = vmul.f32 %v6839_v56, %v2904_v24  ;;  %v2473_v28 = vpop.f32.mrb[150].mxu0  ;;  %v4789_v22 = vpop.f32.mrb[214].mxu1 }
 0x2d4   : > { %3860 = vst.msk [vmem:[%s6874_s14 + $0x98] sm:$0xff] %vm3840_vm1, %v3731_v33  ;;  %v3605_v0 = vadd.f32 %v6849_v62, %v3470_v39  ;;  %v7044_v36 = vadd.f32 %v2473_v28, %v8036_v48  ;;  %v2919_v42 = vadd.f32 %v4789_v22, %v8037_v55  ;;  %v2475_v8 = vpop.f32.mrb[151].mxu0  ;;  %v2913_v17 = vpop.f32.mrb[215].mxu1  ;;  %v8039_v39 = vld [vmem:[#allocation10_spill] sm:$0xff]  ;;  %v8041_v55 = vld [vmem:[#allocation33_spill] sm:$0xff] }
 0x2d5   : > { %3859 = vst.msk [vmem:[%s6874_s14 + $0x90] sm:$0xff] %vm3840_vm1, %v3730_v29  ;;  %v3604_v5 = vadd.f32 %v6849_v62, %v3469_v41  ;;  %v2914_v63 = vadd.f32 %v2913_v17, %v8038_v12  ;;  %v8040_v29 = vld [vmem:[#allocation35_spill] sm:$0xff] }
 0x2d6   : > { %v3733_v34 = vmax.f32 %v3605_v0, 0.0  ;;  %v3472_v47 = vmul.f32 %v6839_v56, %v2919_v42 }
 0x2d7   : > { %v3732_v3 = vmax.f32 %v3604_v5, 0.0  ;;  %v3471_v53 = vmul.f32 %v6839_v56, %v2914_v63  ;;  %v2478_v11 = vpop.f32.mrb[152].mxu0  ;;  %v4792_v24 = vpop.f32.mrb[216].mxu1 }
 0x2d8   : > { %3862 = vst.msk [vmem:[%s6874_s14 + $0xa8] sm:$0xff] %vm3840_vm1, %v3733_v34  ;;  %v3607_v33 = vadd.f32 %v6849_v62, %v3472_v47  ;;  %v7057_v28 = vadd.f32 %v2478_v11, %v8039_v39  ;;  %v2929_v41 = vadd.f32 %v4792_v24, %v8040_v29  ;;  %v2480_v22 = vpop.f32.mrb[153].mxu0  ;;  %v2923_v48 = vpop.f32.mrb[217].mxu1  ;;  %v8042_v11 = vld [vmem:[#allocation12_spill] sm:$0xff] }
 0x2d9   : > { %3861 = vst.msk [vmem:[%s6874_s14 + $0xa0] sm:$0xff] %vm3840_vm1, %v3732_v3  ;;  %v3606_v0 = vadd.f32 %v6849_v62, %v3471_v53  ;;  %v2924_v42 = vadd.f32 %v2923_v48, %v8041_v55  ;;  %v8043_v3 = vld [vmem:[#allocation39_spill] sm:$0xff] }
 0x2da   : > { %v3735_v8 = vmax.f32 %v3607_v33, 0.0  ;;  %v3474_v17 = vmul.f32 %v6839_v56, %v2929_v41  ;;  %v8044_v41 = vld [vmem:[#allocation37_spill] sm:$0xff] }
 0x2db   : > { %v3734_v5 = vmax.f32 %v3606_v0, 0.0  ;;  %v3473_v12 = vmul.f32 %v6839_v56, %v2924_v42  ;;  %v2483_v63 = vpop.f32.mrb[154].mxu0  ;;  %v4795_v34 = vpop.f32.mrb[218].mxu1 }
 0x2dc   : > { %3864 = vst.msk [vmem:[%s6874_s14 + $0xb8] sm:$0xff] %vm3840_vm1, %v3735_v8  ;;  %v3609_v47 = vadd.f32 %v6849_v62, %v3474_v17  ;;  %v7070_v24 = vadd.f32 %v2483_v63, %v8042_v11  ;;  %v2939_v53 = vadd.f32 %v4795_v34, %v8043_v3  ;;  %v2485_v39 = vpop.f32.mrb[155].mxu0  ;;  %v2933_v29 = vpop.f32.mrb[219].mxu1  ;;  %v8045_v34 = vld [vmem:[#allocation14_spill] sm:$0xff] }
 0x2dd   : > { %3863 = vst.msk [vmem:[%s6874_s14 + $0xb0] sm:$0xff] %vm3840_vm1, %v3734_v5  ;;  %v3608_v33 = vadd.f32 %v6849_v62, %v3473_v12  ;;  %v2934_v22 = vadd.f32 %v2933_v29, %v8044_v41  ;;  %v8047_v5 = vld [vmem:[#allocation43_spill] sm:$0xff] }
 0x2de   : > { %v3737_v48 = vmax.f32 %v3609_v47, 0.0  ;;  %v3476_v0 = vmul.f32 %v6839_v56, %v2939_v53  ;;  %v8048_v53 = vld [vmem:[#allocation41_spill] sm:$0xff] }
 0x2df   : > { %v3736_v55 = vmax.f32 %v3608_v33, 0.0  ;;  %v3475_v42 = vmul.f32 %v6839_v56, %v2934_v22  ;;  %v2488_v8 = vpop.f32.mrb[156].mxu0  ;;  %v4798_v17 = vpop.f32.mrb[220].mxu1 }
 0x2e0   : > { %3866 = vst.msk [vmem:[%s6874_s14 + $0xc8] sm:$0xff] %vm3840_vm1, %v3737_v48  ;;  %v3611_v63 = vadd.f32 %v6849_v62, %v3476_v0  ;;  %v7083_v11 = vadd.f32 %v2488_v8, %v8045_v34  ;;  %v2949_v12 = vadd.f32 %v4798_v17, %v8047_v5  ;;  %v2490_v3 = vpop.f32.mrb[157].mxu0  ;;  %v2943_v39 = vpop.f32.mrb[221].mxu1  ;;  %v8049_v34 = vld [vmem:[#allocation16_spill] sm:$0xff] }
 0x2e1   : > { %3865 = vst.msk [vmem:[%s6874_s14 + $0xc0] sm:$0xff] %vm3840_vm1, %v3736_v55  ;;  %v3610_v47 = vadd.f32 %v6849_v62, %v3475_v42  ;;  %v2944_v29 = vadd.f32 %v2943_v39, %v8048_v53  ;;  %v8050_v55 = vld [vmem:[#allocation47_spill] sm:$0xff] }
 0x2e2   : > { %8046 = vst [vmem:[#allocation3_spill] sm:$0xff] %v7083_v11  ;;  %v3739_v33 = vmax.f32 %v3611_v63, 0.0  ;;  %v3478_v41 = vmul.f32 %v6839_v56, %v2949_v12  ;;  %v8051_v12 = vld [vmem:[#allocation45_spill] sm:$0xff] }
 0x2e3   : > { %v3738_v22 = vmax.f32 %v3610_v47, 0.0  ;;  %v3477_v48 = vmul.f32 %v6839_v56, %v2944_v29  ;;  %v2493_v0 = vpop.f32.mrb[158].mxu0  ;;  %v4801_v8 = vpop.f32.mrb[222].mxu1 }
 0x2e4   : > { %3868 = vst.msk [vmem:[%s6874_s14 + $0xd8] sm:$0xff] %vm3840_vm1, %v3739_v33  ;;  %v3613_v17 = vadd.f32 %v6849_v62, %v3478_v41  ;;  %v7096_v5 = vadd.f32 %v2493_v0, %v8049_v34  ;;  %v2959_v42 = vadd.f32 %v4801_v8, %v8050_v55  ;;  %v2495_v3 = vpop.f32.mrb[159].mxu0  ;;  %v2953_v39 = vpop.f32.mrb[223].mxu1  ;;  %v8052_v34 = vld [vmem:[#allocation18_spill] sm:$0xff] }
 0x2e5   : > { %3867 = vst.msk [vmem:[%s6874_s14 + $0xd0] sm:$0xff] %vm3840_vm1, %v3738_v22  ;;  %v3612_v63 = vadd.f32 %v6849_v62, %v3477_v48  ;;  %v2954_v47 = vadd.f32 %v2953_v39, %v8051_v12 }
 0x2e6   : > { %v3741_v53 = vmax.f32 %v3613_v17, 0.0  ;;  %v3480_v29 = vmul.f32 %v6839_v56, %v2959_v42 }
 0x2e7   : > { %v3740_v33 = vmax.f32 %v3612_v63, 0.0  ;;  %v3479_v41 = vmul.f32 %v6839_v56, %v2954_v47  ;;  %v2498_v11 = vpop.f32.mrb[160].mxu0  ;;  %v4804_v0 = vpop.f32.mrb[224].mxu1 }
 0x2e8   : > { %3870 = vst.msk [vmem:[%s6874_s14 + $0xe8] sm:$0xff] %vm3840_vm1, %v3741_v53  ;;  %v3615_v8 = vadd.f32 %v6849_v62, %v3480_v29  ;;  %v7109_v55 = vadd.f32 %v2498_v11, %v8052_v34  ;;  %v2969_v22 = vadd.f32 %v4804_v0, %v6497_v13  ;;  %v2500_v48 = vpop.f32.mrb[161].mxu0  ;;  %v2963_v3 = vpop.f32.mrb[225].mxu1  ;;  %v8053_v29 = vld [vmem:[#allocation20_spill] sm:$0xff] }
 0x2e9   : > { %3869 = vst.msk [vmem:[%s6874_s14 + $0xe0] sm:$0xff] %vm3840_vm1, %v3740_v33  ;;  %v3614_v17 = vadd.f32 %v6849_v62, %v3479_v41  ;;  %v2964_v42 = vadd.f32 %v2963_v3, %v6486_v46 }
 0x2ea   : > { %v3743_v39 = vmax.f32 %v3615_v8, 0.0  ;;  %v3482_v63 = vmul.f32 %v6839_v56, %v2969_v22 }
 0x2eb   : > { %v3742_v12 = vmax.f32 %v3614_v17, 0.0  ;;  %v3481_v47 = vmul.f32 %v6839_v56, %v2964_v42  ;;  %v2503_v53 = vpop.f32.mrb[162].mxu0  ;;  %v4807_v11 = vpop.f32.mrb[226].mxu1 }
 0x2ec   : > { %3872 = vst.msk [vmem:[%s6874_s14 + $0xf8] sm:$0xff] %vm3840_vm1, %v3743_v39  ;;  %v3617_v13 = vadd.f32 %v6849_v62, %v3482_v63  ;;  %v7122_v0 = vadd.f32 %v2503_v53, %v8053_v29  ;;  %v2979_v33 = vadd.f32 %v4807_v11, %v6519_v25  ;;  %v2505_v41 = vpop.f32.mrb[163].mxu0  ;;  %v2973_v46 = vpop.f32.mrb[227].mxu1  ;;  %v8054_v63 = vld [vmem:[#allocation22_spill] sm:$0xff] }
 0x2ed   : > { %3871 = vst.msk [vmem:[%s6874_s14 + $0xf0] sm:$0xff] %vm3840_vm1, %v3742_v12  ;;  %v3616_v8 = vadd.f32 %v6849_v62, %v3481_v47  ;;  %v2974_v34 = vadd.f32 %v2973_v46, %v6508_v19 }
 0x2ee   : > { %v3745_v22 = vmax.f32 %v3617_v13, 0.0  ;;  %v3484_v48 = vmul.f32 %v6839_v56, %v2979_v33 }
 0x2ef   : > { %v3744_v3 = vmax.f32 %v3616_v8, 0.0  ;;  %v3483_v17 = vmul.f32 %v6839_v56, %v2974_v34  ;;  %v2508_v42 = vpop.f32.mrb[164].mxu0  ;;  %v4810_v39 = vpop.f32.mrb[228].mxu1 }
 0x2f0   : > { %3874 = vst.msk [vmem:[%s6874_s14 + $0x108] sm:$0xff] %vm3840_vm1, %v3745_v22  ;;  %v3619_v25 = vadd.f32 %v6849_v62, %v3484_v48  ;;  %v7135_v53 = vadd.f32 %v2508_v42, %v8054_v63  ;;  %v2989_v12 = vadd.f32 %v4810_v39, %v6541_v37  ;;  %v2510_v47 = vpop.f32.mrb[165].mxu0  ;;  %v2983_v19 = vpop.f32.mrb[229].mxu1  ;;  %v8055_v22 = vld [vmem:[#allocation24_spill] sm:$0xff] }
 0x2f1   : > { %3873 = vst.msk [vmem:[%s6874_s14 + $0x100] sm:$0xff] %vm3840_vm1, %v3744_v3  ;;  %v3618_v11 = vadd.f32 %v6849_v62, %v3483_v17  ;;  %v2984_v13 = vadd.f32 %v2983_v19, %v6530_v31 }
 0x2f2   : > { %v3747_v29 = vmax.f32 %v3619_v25, 0.0  ;;  %v3486_v33 = vmul.f32 %v6839_v56, %v2989_v12 }
 0x2f3   : > { %v3746_v41 = vmax.f32 %v3618_v11, 0.0  ;;  %v3485_v46 = vmul.f32 %v6839_v56, %v2984_v13  ;;  %v2513_v8 = vpop.f32.mrb[166].mxu0  ;;  %v4813_v34 = vpop.f32.mrb[230].mxu1  ;;  %v8056_v13 = vld [vmem:[#allocation26_spill] sm:$0xff] }
 0x2f4   : > { %3876 = vst.msk [vmem:[%s6874_s14 + $0x118] sm:$0xff] %vm3840_vm1, %v3747_v29  ;;  %v3621_v37 = vadd.f32 %v6849_v62, %v3486_v33  ;;  %v7148_v48 = vadd.f32 %v2513_v8, %v8055_v22  ;;  %v2999_v3 = vadd.f32 %v4813_v34, %v6563_v49  ;;  %v2515_v17 = vpop.f32.mrb[167].mxu0  ;;  %v2993_v31 = vpop.f32.mrb[231].mxu1 }
 0x2f5   : > { %3875 = vst.msk [vmem:[%s6874_s14 + $0x110] sm:$0xff] %vm3840_vm1, %v3746_v41  ;;  %v3620_v42 = vadd.f32 %v6849_v62, %v3485_v46  ;;  %v2994_v39 = vadd.f32 %v2993_v31, %v6552_v43 }
 0x2f6   : > { %v3749_v25 = vmax.f32 %v3621_v37, 0.0  ;;  %v3488_v63 = vmul.f32 %v6839_v56, %v2999_v3 }
 0x2f7   : > { %v3748_v12 = vmax.f32 %v3620_v42, 0.0  ;;  %v3487_v47 = vmul.f32 %v6839_v56, %v2994_v39  ;;  %v2518_v19 = vpop.f32.mrb[168].mxu0  ;;  %v4816_v11 = vpop.f32.mrb[232].mxu1  ;;  %v8057_v42 = vld [vmem:[#allocation28_spill] sm:$0xff] }
 0x2f8   : > { %3878 = vst.msk [vmem:[%s6874_s14 + $0x128] sm:$0xff] %vm3840_vm1, %v3749_v25  ;;  %v3623_v49 = vadd.f32 %v6849_v62, %v3488_v63  ;;  %v7161_v29 = vadd.f32 %v2518_v19, %v8056_v13  ;;  %v3009_v33 = vadd.f32 %v4816_v11, %v6585_v60  ;;  %v2520_v41 = vpop.f32.mrb[169].mxu0  ;;  %v3003_v43 = vpop.f32.mrb[233].mxu1 }
 0x2f9   : > { %3877 = vst.msk [vmem:[%s6874_s14 + $0x120] sm:$0xff] %vm3840_vm1, %v3748_v12  ;;  %v3622_v46 = vadd.f32 %v6849_v62, %v3487_v47  ;;  %v3004_v8 = vadd.f32 %v3003_v43, %v6574_v54  ;;  %v8058_v43 = vld [vmem:[#allocation30_spill] sm:$0xff] }
 0x2fa   : > { %v3751_v34 = vmax.f32 %v3623_v49, 0.0  ;;  %v3490_v37 = vmul.f32 %v6839_v56, %v3009_v33 }
 0x2fb   : > { %v3750_v22 = vmax.f32 %v3622_v46, 0.0  ;;  %v3489_v3 = vmul.f32 %v6839_v56, %v3004_v8  ;;  %v2523_v17 = vpop.f32.mrb[170].mxu0  ;;  %v4819_v31 = vpop.f32.mrb[234].mxu1 }
 0x2fc   : > { %3880 = vst.msk [vmem:[%s6874_s14 + $0x138] sm:$0xff] %vm3840_vm1, %v3751_v34  ;;  %v3625_v60 = vadd.f32 %v6849_v62, %v3490_v37  ;;  %v7174_v39 = vadd.f32 %v2523_v17, %v8057_v42  ;;  %v3019_v25 = vadd.f32 %v4819_v31, %v6607_v9  ;;  %v2525_v63 = vpop.f32.mrb[171].mxu0  ;;  %v3013_v54 = vpop.f32.mrb[235].mxu1 }
 0x2fd   : > { %3879 = vst.msk [vmem:[%s6874_s14 + $0x130] sm:$0xff] %vm3840_vm1, %v3750_v22  ;;  %v3624_v12 = vadd.f32 %v6849_v62, %v3489_v3  ;;  %v3014_v47 = vadd.f32 %v3013_v54, %v6596_v2  ;;  %v8059_v63 = vld [vmem:[#allocation32_spill] sm:$0xff] }
 0x2fe   : > { %v3753_v19 = vmax.f32 %v3625_v60, 0.0  ;;  %v3492_v11 = vmul.f32 %v6839_v56, %v3019_v25 }
 0x2ff   : > { %v3752_v49 = vmax.f32 %v3624_v12, 0.0  ;;  %v3491_v13 = vmul.f32 %v6839_v56, %v3014_v47  ;;  %v2528_v33 = vpop.f32.mrb[172].mxu0  ;;  %v4822_v41 = vpop.f32.mrb[236].mxu1 }
 0x300   : > { %3882 = vst.msk [vmem:[%s6874_s14 + $0x148] sm:$0xff] %vm3840_vm1, %v3753_v19  ;;  %v3627_v9 = vadd.f32 %v6849_v62, %v3492_v11  ;;  %v7187_v46 = vadd.f32 %v2528_v33, %v8058_v43  ;;  %v3029_v8 = vadd.f32 %v4822_v41, %v6629_v23  ;;  %v2530_v34 = vpop.f32.mrb[173].mxu0  ;;  %v3023_v2 = vpop.f32.mrb[237].mxu1 }
 0x301   : > { %3881 = vst.msk [vmem:[%s6874_s14 + $0x140] sm:$0xff] %vm3840_vm1, %v3752_v49  ;;  %v3626_v37 = vadd.f32 %v6849_v62, %v3491_v13  ;;  %v3024_v22 = vadd.f32 %v3023_v2, %v6618_v16 }
 0x302   : > { %v3755_v3 = vmax.f32 %v3627_v9, 0.0  ;;  %v3494_v17 = vmul.f32 %v6839_v56, %v3029_v8  ;;  %v8060_v8 = vld [vmem:[#allocation34_spill] sm:$0xff] }
 0x303   : > { %v3754_v31 = vmax.f32 %v3626_v37, 0.0  ;;  %v3493_v60 = vmul.f32 %v6839_v56, %v3024_v22  ;;  %v2533_v42 = vpop.f32.mrb[174].mxu0  ;;  %v4825_v25 = vpop.f32.mrb[238].mxu1 }
 0x304   : > { %3884 = vst.msk [vmem:[%s6874_s14 + $0x158] sm:$0xff] %vm3840_vm1, %v3755_v3  ;;  %v3629_v23 = vadd.f32 %v6849_v62, %v3494_v17  ;;  %v7200_v54 = vadd.f32 %v2533_v42, %v8059_v63  ;;  %v3039_v12 = vadd.f32 %v4825_v25, %v6651_v38  ;;  %v2535_v47 = vpop.f32.mrb[175].mxu0  ;;  %v3033_v16 = vpop.f32.mrb[239].mxu1  ;;  %v8061_v63 = vld [vmem:[#allocation36_spill] sm:$0xff] }
 0x305   : > { %3883 = vst.msk [vmem:[%s6874_s14 + $0x150] sm:$0xff] %vm3840_vm1, %v3754_v31  ;;  %v3628_v19 = vadd.f32 %v6849_v62, %v3493_v60  ;;  %v3034_v11 = vadd.f32 %v3033_v16, %v6640_v30 }
 0x306   : > { %v3757_v49 = vmax.f32 %v3629_v23, 0.0  ;;  %v3496_v13 = vmul.f32 %v6839_v56, %v3039_v12 }
 0x307   : > { %v3756_v33 = vmax.f32 %v3628_v19, 0.0  ;;  %v3495_v41 = vmul.f32 %v6839_v56, %v3034_v11  ;;  %v2538_v9 = vpop.f32.mrb[176].mxu0  ;;  %v4828_v43 = vpop.f32.mrb[240].mxu1 }
 0x308   : > { %3886 = vst.msk [vmem:[%s6874_s14 + $0x168] sm:$0xff] %vm3840_vm1, %v3757_v49  ;;  %v3631_v38 = vadd.f32 %v6849_v62, %v3496_v13  ;;  %v7213_v34 = vadd.f32 %v2538_v9, %v8060_v8  ;;  %v3049_v2 = vadd.f32 %v4828_v43, %v6673_v51  ;;  %v2540_v37 = vpop.f32.mrb[177].mxu0  ;;  %v3043_v30 = vpop.f32.mrb[241].mxu1 }
 0x309   : > { %3885 = vst.msk [vmem:[%s6874_s14 + $0x160] sm:$0xff] %vm3840_vm1, %v3756_v33  ;;  %v3630_v22 = vadd.f32 %v6849_v62, %v3495_v41  ;;  %v3044_v3 = vadd.f32 %v3043_v30, %v6662_v45 }
 0x30a   : > { %v3759_v17 = vmax.f32 %v3631_v38, 0.0  ;;  %v3498_v31 = vmul.f32 %v6839_v56, %v3049_v2  ;;  %v8062_v38 = vld [vmem:[#allocation38_spill] sm:$0xff] }
 0x30b   : > { %v3758_v60 = vmax.f32 %v3630_v22, 0.0  ;;  %v3497_v42 = vmul.f32 %v6839_v56, %v3044_v3  ;;  %v2543_v25 = vpop.f32.mrb[178].mxu0  ;;  %v4831_v23 = vpop.f32.mrb[242].mxu1 }
 0x30c   : > { %3888 = vst.msk [vmem:[%s6874_s14 + $0x178] sm:$0xff] %vm3840_vm1, %v3759_v17  ;;  %v3633_v51 = vadd.f32 %v6849_v62, %v3498_v31  ;;  %v7226_v12 = vadd.f32 %v2543_v25, %v8061_v63  ;;  %v3059_v47 = vadd.f32 %v4831_v23, %v6695_v1  ;;  %v2545_v16 = vpop.f32.mrb[179].mxu0  ;;  %v3053_v45 = vpop.f32.mrb[243].mxu1  ;;  %v8063_v23 = vld [vmem:[#allocation40_spill] sm:$0xff] }
 0x30d   : > { %3887 = vst.msk [vmem:[%s6874_s14 + $0x170] sm:$0xff] %vm3840_vm1, %v3758_v60  ;;  %v3632_v19 = vadd.f32 %v6849_v62, %v3497_v42  ;;  %v3054_v11 = vadd.f32 %v3053_v45, %v6684_v58 }
 0x30e   : > { %v3761_v49 = vmax.f32 %v3633_v51, 0.0  ;;  %v3500_v13 = vmul.f32 %v6839_v56, %v3059_v47 }
 0x30f   : > { %v3760_v33 = vmax.f32 %v3632_v19, 0.0  ;;  %v3499_v41 = vmul.f32 %v6839_v56, %v3054_v11  ;;  %v2548_v9 = vpop.f32.mrb[180].mxu0  ;;  %v4834_v43 = vpop.f32.mrb[244].mxu1 }
 0x310   : > { %3890 = vst.msk [vmem:[%s6874_s14 + $0x188] sm:$0xff] %vm3840_vm1, %v3761_v49  ;;  %v3635_v1 = vadd.f32 %v6849_v62, %v3500_v13  ;;  %v7239_v8 = vadd.f32 %v2548_v9, %v8062_v38  ;;  %v3069_v2 = vadd.f32 %v4834_v43, %v6717_v18  ;;  %v2550_v37 = vpop.f32.mrb[181].mxu0  ;;  %v3063_v58 = vpop.f32.mrb[245].mxu1  ;;  %v8064_v9 = vld [vmem:[#allocation42_spill] sm:$0xff] }
 0x311   : > { %3889 = vst.msk [vmem:[%s6874_s14 + $0x180] sm:$0xff] %vm3840_vm1, %v3760_v33  ;;  %v3634_v30 = vadd.f32 %v6849_v62, %v3499_v41  ;;  %v3064_v22 = vadd.f32 %v3063_v58, %v6706_v10 }
 0x312   : > { %v3763_v3 = vmax.f32 %v3635_v1, 0.0  ;;  %v3502_v17 = vmul.f32 %v6839_v56, %v3069_v2 }
 0x313   : > { %v3762_v31 = vmax.f32 %v3634_v30, 0.0  ;;  %v3501_v60 = vmul.f32 %v6839_v56, %v3064_v22  ;;  %v2553_v42 = vpop.f32.mrb[182].mxu0  ;;  %v4837_v25 = vpop.f32.mrb[246].mxu1 }
 0x314   : > { %3892 = vst.msk [vmem:[%s6874_s14 + $0x198] sm:$0xff] %vm3840_vm1, %v3763_v3  ;;  %v3637_v18 = vadd.f32 %v6849_v62, %v3502_v17  ;;  %v7252_v51 = vadd.f32 %v2553_v42, %v8063_v23  ;;  %v3079_v63 = vadd.f32 %v4837_v25, %v6739_v35  ;;  %v2555_v47 = vpop.f32.mrb[183].mxu0  ;;  %v3073_v10 = vpop.f32.mrb[247].mxu1 }
 0x315   : > { %3891 = vst.msk [vmem:[%s6874_s14 + $0x190] sm:$0xff] %vm3840_vm1, %v3762_v31  ;;  %v3636_v16 = vadd.f32 %v6849_v62, %v3501_v60  ;;  %v3074_v45 = vadd.f32 %v3073_v10, %v6728_v27  ;;  %v8065_v60 = vld [vmem:[#allocation44_spill] sm:$0xff]  ;;  %v7293_v47 = vld [vmem:[%s7936_s2] ss:$0 sm:$0xff] }
 0x316   : > { %v3765_v19 = vmax.f32 %v3637_v18, 0.0  ;;  %v3504_v11 = vmul.f32 %v6839_v56, %v3079_v63 }
 0x317   : > { %v3764_v49 = vmax.f32 %v3636_v16, 0.0  ;;  %v3503_v13 = vmul.f32 %v6839_v56, %v3074_v45  ;;  %v2558_v33 = vpop.f32.mrb[184].mxu0  ;;  %v4840_v41 = vpop.f32.mrb[248].mxu1 }
 0x318   : > { %3894 = vst.msk [vmem:[%s6874_s14 + $0x1a8] sm:$0xff] %vm3840_vm1, %v3765_v19  ;;  %v3639_v35 = vadd.f32 %v6849_v62, %v3504_v11  ;;  %v7265_v43 = vadd.f32 %v2558_v33, %v8064_v9  ;;  %v3089_v1 = vadd.f32 %v4840_v41, %v6761_v52  ;;  %v2560_v38 = vpop.f32.mrb[185].mxu0  ;;  %v3083_v27 = vpop.f32.mrb[249].mxu1 }
 0x319   : > { %3893 = vst.msk [vmem:[%s6874_s14 + $0x1a0] sm:$0xff] %vm3840_vm1, %v3764_v49  ;;  %v3638_v2 = vadd.f32 %v6849_v62, %v3503_v13  ;;  %v3084_v37 = vadd.f32 %v3083_v27, %v6750_v44  ;;  %v8066_v49 = vld [vmem:[#allocation46_spill] sm:$0xff] }
 0x31a   : > { %v3767_v58 = vmax.f32 %v3639_v35, 0.0  ;;  %v3506_v30 = vmul.f32 %v6839_v56, %v3089_v1 }
 0x31b   : > { %v3766_v22 = vmax.f32 %v3638_v2, 0.0  ;;  %v3505_v3 = vmul.f32 %v6839_v56, %v3084_v37  ;;  %v2563_v17 = vpop.f32.mrb[186].mxu0  ;;  %v4843_v31 = vpop.f32.mrb[250].mxu1  ;;  %v7286_v56 = vld [vmem:[%s7937_s3] ss:$0 sm:$0xff] }
 0x31c   : > { %3896 = vst.msk [vmem:[%s6874_s14 + $0x1b8] sm:$0xff] %vm3840_vm1, %v3767_v58  ;;  %v3641_v52 = vadd.f32 %v6849_v62, %v3506_v30  ;;  %v7278_v42 = vadd.f32 %v2563_v17, %v8065_v60  ;;  %v3099_v25 = vadd.f32 %v4843_v31, %v6783_v6  ;;  %v2565_v18 = vpop.f32.mrb[187].mxu0  ;;  %v3093_v44 = vpop.f32.mrb[251].mxu1  ;;  %v8067_v30 = vld [vmem:[#allocation48_spill] sm:$0xff] }
 0x31d   : > { %3895 = vst.msk [vmem:[%s6874_s14 + $0x1b0] sm:$0xff] %vm3840_vm1, %v3766_v22  ;;  %v3640_v23 = vadd.f32 %v7286_v56, %v3505_v3  ;;  %v3094_v62 = vadd.f32 %v3093_v44, %v6772_v61 }
 0x31e   : > { %v3769_v63 = vmax.f32 %v3641_v52, 0.0  ;;  %v3508_v6 = vmul.f32 %v7293_v47, %v3099_v25  ;;  %v8068_v52 = vld [vmem:[#allocation80_spill] sm:$0xff] }
 0x31f   : > { %v3768_v10 = vmax.f32 %v3640_v23, 0.0  ;;  %v3507_v16 = vmul.f32 %v7293_v47, %v3094_v62  ;;  %v2568_v45 = vpop.f32.mrb[188].mxu0  ;;  %v4846_v19 = vpop.f32.mrb[252].mxu1 }
 0x320   : > { %3898 = vst.msk [vmem:[%s6874_s14 + $0x1c8] sm:$0xff] %vm3840_vm1, %v3769_v63  ;;  %v3643_v11 = vadd.f32 %v7286_v56, %v3508_v6  ;;  %v7301_v61 = vadd.f32 %v2568_v45, %v8066_v49  ;;  %v3109_v13 = vadd.f32 %v4846_v19, %v6805_v26  ;;  %v2570_v33 = vpop.f32.mrb[189].mxu0  ;;  %v3103_v41 = vpop.f32.mrb[253].mxu1  ;;  %v8069_v6 = vld [vmem:[#allocation49_spill] sm:$0xff] }
 0x321   : > { %3897 = vst.msk [vmem:[%s6874_s14 + $0x1c0] sm:$0xff] %vm3840_vm1, %v3768_v10  ;;  %v3642_v35 = vadd.f32 %v7286_v56, %v3507_v16  ;;  %v3104_v9 = vadd.f32 %v3103_v41, %v6794_v15  ;;  %v8070_v16 = vld [vmem:[#allocation83_spill] sm:$0xff] }
 0x322   : > { %v3771_v1 = vmax.f32 %v3643_v11, 0.0  ;;  %v3510_v38 = vmul.f32 %v7293_v47, %v3109_v13  ;;  %v8071_v13 = vld [vmem:[#allocation82_spill] sm:$0xff] }
 0x323   : > { %v3770_v27 = vmax.f32 %v3642_v35, 0.0  ;;  %v3509_v2 = vmul.f32 %v7293_v47, %v3104_v9  ;;  %v2573_v37 = vpop.f32.mrb[190].mxu0  ;;  %v4849_v58 = vpop.f32.mrb[254].mxu1 }
 0x324   : > { %3900 = vst.msk [vmem:[%s6874_s14 + $0x1d8] sm:$0xff] %vm3840_vm1, %v3771_v1  ;;  %v3645_v26 = vadd.f32 %v7286_v56, %v3510_v38  ;;  %v7314_v22 = vadd.f32 %v2573_v37, %v8067_v30  ;;  %v3119_v3 = vadd.f32 %v4849_v58, %v6827_v14  ;;  %v2575_v17 = vpop.f32.mrb[191].mxu0  ;;  %v3113_v15 = vpop.f32.mrb[255].mxu1  ;;  %v8072_v37 = vld [vmem:[#allocation50_spill] sm:$0xff] }
 0x325   : > { %3899 = vst.msk [vmem:[%s6874_s14 + $0x1d0] sm:$0xff] %vm3840_vm1, %v3770_v27  ;;  %v3644_v31 = vadd.f32 %v7286_v56, %v3509_v2  ;;  %v3114_v60 = vadd.f32 %v3113_v15, %v8068_v52 }
 0x326   : > { %v3773_v25 = vmax.f32 %v3645_v26, 0.0  ;;  %v3512_v18 = vmul.f32 %v7293_v47, %v3119_v3 }
 0x327   : > { %v3772_v44 = vmax.f32 %v3644_v31, 0.0  ;;  %v3511_v23 = vmul.f32 %v7293_v47, %v3114_v60  ;;  %v2578_v62 = vpop.f32.mrb[192].mxu0  ;;  %v4852_v63 = vpop.f32.mrb[0].mxu1 }
 0x328   : > { %3902 = vst.msk [vmem:[%s6874_s14 + $0x1e8] sm:$0xff] %vm3840_vm1, %v3773_v25  ;;  %v3647_v14 = vadd.f32 %v7286_v56, %v3512_v18  ;;  %v7327_v10 = vadd.f32 %v2578_v62, %v8069_v6  ;;  %v3129_v45 = vadd.f32 %v4852_v63, %v8070_v16  ;;  %v2580_v19 = vpop.f32.mrb[193].mxu0  ;;  %v3123_v11 = vpop.f32.mrb[1].mxu1 }
 0x329   : > { %3901 = vst.msk [vmem:[%s6874_s14 + $0x1e0] sm:$0xff] %vm3840_vm1, %v3772_v44  ;;  %v3646_v49 = vadd.f32 %v7286_v56, %v3511_v23  ;;  %v3124_v33 = vadd.f32 %v3123_v11, %v8071_v13  ;;  %v8073_v23 = vld [vmem:[#allocation51_spill] sm:$0xff] }
 0x32a   : > { %v3775_v41 = vmax.f32 %v3647_v14, 0.0  ;;  %v3514_v35 = vmul.f32 %v7293_v47, %v3129_v45 }
 0x32b   : > { %v3774_v9 = vmax.f32 %v3646_v49, 0.0  ;;  %v3513_v1 = vmul.f32 %v7293_v47, %v3124_v33  ;;  %v2583_v38 = vpop.f32.mrb[194].mxu0  ;;  %v4855_v27 = vpop.f32.mrb[2].mxu1 }
 0x32c   : > { %3904 = vst.msk [vmem:[%s6874_s14 + $0x1f8] sm:$0xff] %vm3840_vm1, %v3775_v41  ;;  %v3649_v2 = vadd.f32 %v7286_v56, %v3514_v35  ;;  %v7340_v58 = vadd.f32 %v2583_v38, %v8072_v37  ;;  %v3139_v26 = vadd.f32 %v4855_v27, %v6899_v4  ;;  %v2585_v30 = vpop.f32.mrb[195].mxu0  ;;  %v3133_v3 = vpop.f32.mrb[3].mxu1  ;;  %v8074_v41 = vld [vmem:[#allocation52_spill] sm:$0xff] }
 0x32d   : > { %3903 = vst.msk [vmem:[%s6874_s14 + $0x1f0] sm:$0xff] %vm3840_vm1, %v3774_v9  ;;  %v3648_v17 = vadd.f32 %v7286_v56, %v3513_v1  ;;  %v3134_v15 = vadd.f32 %v3133_v3, %v6880_v32 }
 0x32e   : > { %v3777_v31 = vmax.f32 %v3649_v2, 0.0  ;;  %v3516_v52 = vmul.f32 %v7293_v47, %v3139_v26 }
 0x32f   : > { %v3776_v60 = vmax.f32 %v3648_v17, 0.0  ;;  %v3515_v25 = vmul.f32 %v7293_v47, %v3134_v15  ;;  %v2588_v18 = vpop.f32.mrb[196].mxu0  ;;  %v4858_v44 = vpop.f32.mrb[4].mxu1  ;;  %v8075_v15 = vld [vmem:[#allocation53_spill] sm:$0xff] }
 0x330   : > { %3906 = vst.msk [vmem:[%s6874_s14 + $0x208] sm:$0xff] %vm3840_vm1, %v3777_v31  ;;  %v3651_v4 = vadd.f32 %v7286_v56, %v3516_v52  ;;  %v7353_v62 = vadd.f32 %v2588_v18, %v8073_v23  ;;  %v3149_v63 = vadd.f32 %v4858_v44, %v6937_v57  ;;  %v2590_v14 = vpop.f32.mrb[197].mxu0  ;;  %v3143_v32 = vpop.f32.mrb[5].mxu1 }
 0x331   : > { %3905 = vst.msk [vmem:[%s6874_s14 + $0x200] sm:$0xff] %vm3840_vm1, %v3776_v60  ;;  %v3650_v6 = vadd.f32 %v7286_v56, %v3515_v25  ;;  %v3144_v16 = vadd.f32 %v3143_v32, %v6918_v20 }
 0x332   : > { %v3779_v45 = vmax.f32 %v3651_v4, 0.0  ;;  %v3518_v19 = vmul.f32 %v7293_v47, %v3149_v63 }
 0x333   : > { %v3778_v11 = vmax.f32 %v3650_v6, 0.0  ;;  %v3517_v49 = vmul.f32 %v7293_v47, %v3144_v16  ;;  %v2593_v13 = vpop.f32.mrb[198].mxu0  ;;  %v4861_v33 = vpop.f32.mrb[6].mxu1  ;;  %v8076_v6 = vld [vmem:[#allocation54_spill] sm:$0xff] }
 0x334   : > { %3908 = vst.msk [vmem:[%s6874_s14 + $0x218] sm:$0xff] %vm3840_vm1, %v3779_v45  ;;  %v3653_v57 = vadd.f32 %v7286_v56, %v3518_v19  ;;  %v7366_v35 = vadd.f32 %v2593_v13, %v8074_v41  ;;  %v3159_v9 = vadd.f32 %v4861_v33, %v6975_v21  ;;  %v2595_v1 = vpop.f32.mrb[199].mxu0  ;;  %v3153_v20 = vpop.f32.mrb[7].mxu1 }
 0x335   : > { %3907 = vst.msk [vmem:[%s6874_s14 + $0x210] sm:$0xff] %vm3840_vm1, %v3778_v11  ;;  %v3652_v38 = vadd.f32 %v7286_v56, %v3517_v49  ;;  %v3154_v27 = vadd.f32 %v3153_v20, %v6956_v7  ;;  %v8077_v20 = vld [vmem:[#allocation55_spill] sm:$0xff] }
 0x336   : > { %v3781_v2 = vmax.f32 %v3653_v57, 0.0  ;;  %v3520_v37 = vmul.f32 %v7293_v47, %v3159_v9 }
 0x337   : > { %v3780_v26 = vmax.f32 %v3652_v38, 0.0  ;;  %v3519_v30 = vmul.f32 %v7293_v47, %v3154_v27  ;;  %v2598_v3 = vpop.f32.mrb[200].mxu0  ;;  %v4864_v17 = vpop.f32.mrb[8].mxu1 }
 0x338   : > { %3910 = vst.msk [vmem:[%s6874_s14 + $0x228] sm:$0xff] %vm3840_vm1, %v3781_v2  ;;  %v3655_v21 = vadd.f32 %v7286_v56, %v3520_v37  ;;  %v7379_v31 = vadd.f32 %v2598_v3, %v8075_v15  ;;  %v3169_v52 = vadd.f32 %v4864_v17, %v7013_v40  ;;  %v2600_v60 = vpop.f32.mrb[201].mxu0  ;;  %v3163_v7 = vpop.f32.mrb[9].mxu1 }
 0x339   : > { %3909 = vst.msk [vmem:[%s6874_s14 + $0x220] sm:$0xff] %vm3840_vm1, %v3780_v26  ;;  %v3654_v25 = vadd.f32 %v7286_v56, %v3519_v30  ;;  %v3164_v18 = vadd.f32 %v3163_v7, %v6994_v59  ;;  %v8078_v60 = vld [vmem:[#allocation56_spill] sm:$0xff] }
 0x33a   : > { %v3783_v44 = vmax.f32 %v3655_v21, 0.0  ;;  %v3522_v4 = vmul.f32 %v7293_v47, %v3169_v52 }
 0x33b   : > { %v3782_v23 = vmax.f32 %v3654_v25, 0.0  ;;  %v3521_v63 = vmul.f32 %v7293_v47, %v3164_v18  ;;  %v2603_v14 = vpop.f32.mrb[202].mxu0  ;;  %v4867_v32 = vpop.f32.mrb[10].mxu1 }
 0x33c   : > { %3912 = vst.msk [vmem:[%s6874_s14 + $0x238] sm:$0xff] %vm3840_vm1, %v3783_v44  ;;  %v3657_v40 = vadd.f32 %v7286_v56, %v3522_v4  ;;  %v7392_v16 = vadd.f32 %v2603_v14, %v8076_v6  ;;  %v3179_v45 = vadd.f32 %v4867_v32, %v7044_v36  ;;  %v2605_v19 = vpop.f32.mrb[203].mxu0  ;;  %v3173_v59 = vpop.f32.mrb[11].mxu1  ;;  %v8079_v4 = vld [vmem:[#allocation3_spill] sm:$0xff] }
 0x33d   : > { %3911 = vst.msk [vmem:[%s6874_s14 + $0x230] sm:$0xff] %vm3840_vm1, %v3782_v23  ;;  %v3656_v11 = vadd.f32 %v7286_v56, %v3521_v63  ;;  %v3174_v49 = vadd.f32 %v3173_v59, %v7030_v50  ;;  %v8080_v19 = vld [vmem:[#allocation57_spill] sm:$0xff] }
 0x33e   : > { %v3785_v13 = vmax.f32 %v3657_v40, 0.0  ;;  %v3524_v33 = vmul.f32 %v7293_v47, %v3179_v45 }
 0x33f   : > { %v3784_v57 = vmax.f32 %v3656_v11, 0.0  ;;  %v3523_v41 = vmul.f32 %v7293_v47, %v3174_v49  ;;  %v2608_v9 = vpop.f32.mrb[204].mxu0  ;;  %v4870_v1 = vpop.f32.mrb[12].mxu1 }
 0x340   : > { %3914 = vst.msk [vmem:[%s6874_s14 + $0x248] sm:$0xff] %vm3840_vm1, %v3785_v13  ;;  %v3659_v36 = vadd.f32 %v7286_v56, %v3524_v33  ;;  %v7405_v38 = vadd.f32 %v2608_v9, %v8077_v20  ;;  %v3189_v27 = vadd.f32 %v4870_v1, %v7070_v24  ;;  %v2610_v2 = vpop.f32.mrb[205].mxu0  ;;  %v3183_v50 = vpop.f32.mrb[13].mxu1 }
 0x341   : > { %3913 = vst.msk [vmem:[%s6874_s14 + $0x240] sm:$0xff] %vm3840_vm1, %v3784_v57  ;;  %v3658_v37 = vadd.f32 %v7286_v56, %v3523_v41  ;;  %v3184_v26 = vadd.f32 %v3183_v50, %v7057_v28  ;;  %v8081_v2 = vld [vmem:[#allocation58_spill] sm:$0xff] }
 0x342   : > { %v3787_v30 = vmax.f32 %v3659_v36, 0.0  ;;  %v3526_v3 = vmul.f32 %v7293_v47, %v3189_v27 }
 0x343   : > { %v3786_v17 = vmax.f32 %v3658_v37, 0.0  ;;  %v3525_v21 = vmul.f32 %v7293_v47, %v3184_v26  ;;  %v2613_v15 = vpop.f32.mrb[206].mxu0  ;;  %v4873_v52 = vpop.f32.mrb[14].mxu1 }
 0x344   : > { %3916 = vst.msk [vmem:[%s6874_s14 + $0x258] sm:$0xff] %vm3840_vm1, %v3787_v30  ;;  %v3661_v24 = vadd.f32 %v7286_v56, %v3526_v3  ;;  %v7418_v7 = vadd.f32 %v2613_v15, %v8078_v60  ;;  %v3199_v25 = vadd.f32 %v4873_v52, %v7096_v5  ;;  %v2615_v18 = vpop.f32.mrb[207].mxu0  ;;  %v3193_v28 = vpop.f32.mrb[15].mxu1 }
 0x345   : > { %3915 = vst.msk [vmem:[%s6874_s14 + $0x250] sm:$0xff] %vm3840_vm1, %v3786_v17  ;;  %v3660_v44 = vadd.f32 %v7286_v56, %v3525_v21  ;;  %v3194_v23 = vadd.f32 %v3193_v28, %v8079_v4 }
 0x346   : > { %v3789_v63 = vmax.f32 %v3661_v24, 0.0  ;;  %v3528_v14 = vmul.f32 %v7293_v47, %v3199_v25  ;;  %v8082_v25 = vld [vmem:[#allocation59_spill] sm:$0xff] }
 0x347   : > { %v3788_v32 = vmax.f32 %v3660_v44, 0.0  ;;  %v3527_v40 = vmul.f32 %v7293_v47, %v3194_v23  ;;  %v2618_v6 = vpop.f32.mrb[208].mxu0  ;;  %v4876_v45 = vpop.f32.mrb[16].mxu1 }
 0x348   : > { %3918 = vst.msk [vmem:[%s6874_s14 + $0x268] sm:$0xff] %vm3840_vm1, %v3789_v63  ;;  %v3663_v5 = vadd.f32 %v7286_v56, %v3528_v14  ;;  %v7431_v59 = vadd.f32 %v2618_v6, %v8080_v19  ;;  %v3209_v11 = vadd.f32 %v4876_v45, %v7122_v0  ;;  %v2620_v49 = vpop.f32.mrb[209].mxu0  ;;  %v3203_v13 = vpop.f32.mrb[17].mxu1 }
 0x349   : > { %3917 = vst.msk [vmem:[%s6874_s14 + $0x260] sm:$0xff] %vm3840_vm1, %v3788_v32  ;;  %v3662_v33 = vadd.f32 %v7286_v56, %v3527_v40  ;;  %v3204_v57 = vadd.f32 %v3203_v13, %v7109_v55 }
 0x34a   : > { %v3791_v41 = vmax.f32 %v3663_v5, 0.0  ;;  %v3530_v9 = vmul.f32 %v7293_v47, %v3209_v11  ;;  %v8083_v5 = vld [vmem:[#allocation60_spill] sm:$0xff] }
 0x34b   : > { %v3790_v1 = vmax.f32 %v3662_v33, 0.0  ;;  %v3529_v36 = vmul.f32 %v7293_v47, %v3204_v57  ;;  %v2623_v20 = vpop.f32.mrb[210].mxu0  ;;  %v4879_v27 = vpop.f32.mrb[18].mxu1 }
 0x34c   : > { %3920 = vst.msk [vmem:[%s6874_s14 + $0x278] sm:$0xff] %vm3840_vm1, %v3791_v41  ;;  %v3665_v0 = vadd.f32 %v7286_v56, %v3530_v9  ;;  %v7444_v50 = vadd.f32 %v2623_v20, %v8081_v2  ;;  %v3219_v37 = vadd.f32 %v4879_v27, %v7148_v48  ;;  %v2625_v26 = vpop.f32.mrb[211].mxu0  ;;  %v3213_v55 = vpop.f32.mrb[19].mxu1  ;;  %v8084_v27 = vld [vmem:[#allocation61_spill] sm:$0xff] }
 0x34d   : > { %3919 = vst.msk [vmem:[%s6874_s14 + $0x270] sm:$0xff] %vm3840_vm1, %v3790_v1  ;;  %v3664_v30 = vadd.f32 %v7286_v56, %v3529_v36  ;;  %v3214_v3 = vadd.f32 %v3213_v55, %v7135_v53 }
 0x34e   : > { %v3793_v17 = vmax.f32 %v3665_v0, 0.0  ;;  %v3532_v21 = vmul.f32 %v7293_v47, %v3219_v37 }
 0x34f   : > { %v3792_v15 = vmax.f32 %v3664_v30, 0.0  ;;  %v3531_v52 = vmul.f32 %v7293_v47, %v3214_v3  ;;  %v2628_v24 = vpop.f32.mrb[212].mxu0  ;;  %v4882_v60 = vpop.f32.mrb[20].mxu1 }
 0x350   : > { %3922 = vst.msk [vmem:[%s6874_s14 + $0x288] sm:$0xff] %vm3840_vm1, %v3793_v17  ;;  %v3667_v48 = vadd.f32 %v7286_v56, %v3532_v21  ;;  %v7457_v18 = vadd.f32 %v2628_v24, %v8082_v25  ;;  %v3229_v28 = vadd.f32 %v4882_v60, %v7174_v39  ;;  %v2630_v44 = vpop.f32.mrb[213].mxu0  ;;  %v3223_v53 = vpop.f32.mrb[21].mxu1  ;;  %v8085_v24 = vld [vmem:[#allocation62_spill] sm:$0xff] }
 0x351   : > { %3921 = vst.msk [vmem:[%s6874_s14 + $0x280] sm:$0xff] %vm3840_vm1, %v3792_v15  ;;  %v3666_v4 = vadd.f32 %v7286_v56, %v3531_v52  ;;  %v3224_v23 = vadd.f32 %v3223_v53, %v7161_v29 }
 0x352   : > { %v3795_v63 = vmax.f32 %v3667_v48, 0.0  ;;  %v3534_v14 = vmul.f32 %v7293_v47, %v3229_v28 }
 0x353   : > { %v3794_v32 = vmax.f32 %v3666_v4, 0.0  ;;  %v3533_v40 = vmul.f32 %v7293_v47, %v3224_v23  ;;  %v2633_v6 = vpop.f32.mrb[214].mxu0  ;;  %v4885_v45 = vpop.f32.mrb[22].mxu1 }
 0x354   : > { %3924 = vst.msk [vmem:[%s6874_s14 + $0x298] sm:$0xff] %vm3840_vm1, %v3795_v63  ;;  %v3669_v39 = vadd.f32 %v7286_v56, %v3534_v14  ;;  %v7470_v19 = vadd.f32 %v2633_v6, %v8083_v5  ;;  %v3239_v11 = vadd.f32 %v4885_v45, %v7200_v54  ;;  %v2635_v49 = vpop.f32.mrb[215].mxu0  ;;  %v3233_v29 = vpop.f32.mrb[23].mxu1 }
 0x355   : > { %3923 = vst.msk [vmem:[%s6874_s14 + $0x290] sm:$0xff] %vm3840_vm1, %v3794_v32  ;;  %v3668_v13 = vadd.f32 %v7286_v56, %v3533_v40  ;;  %v3234_v33 = vadd.f32 %v3233_v29, %v7187_v46  ;;  %v8086_v40 = vld [vmem:[#allocation63_spill] sm:$0xff] }
 0x356   : > { %v3797_v57 = vmax.f32 %v3669_v39, 0.0  ;;  %v3536_v41 = vmul.f32 %v7293_v47, %v3239_v11 }
 0x357   : > { %v3796_v9 = vmax.f32 %v3668_v13, 0.0  ;;  %v3535_v1 = vmul.f32 %v7293_v47, %v3234_v33  ;;  %v2638_v36 = vpop.f32.mrb[216].mxu0  ;;  %v4888_v20 = vpop.f32.mrb[24].mxu1 }
 0x358   : > { %3926 = vst.msk [vmem:[%s6874_s14 + $0x2a8] sm:$0xff] %vm3840_vm1, %v3797_v57  ;;  %v3671_v54 = vadd.f32 %v7286_v56, %v3536_v41  ;;  %v7483_v0 = vadd.f32 %v2638_v36, %v8084_v27  ;;  %v3249_v2 = vadd.f32 %v4888_v20, %v7226_v12  ;;  %v2640_v37 = vpop.f32.mrb[217].mxu0  ;;  %v3243_v46 = vpop.f32.mrb[25].mxu1 }
 0x359   : > { %3925 = vst.msk [vmem:[%s6874_s14 + $0x2a0] sm:$0xff] %vm3840_vm1, %v3796_v9  ;;  %v3670_v26 = vadd.f32 %v7286_v56, %v3535_v1  ;;  %v3244_v55 = vadd.f32 %v3243_v46, %v7213_v34  ;;  %v8087_v9 = vld [vmem:[#allocation64_spill] sm:$0xff] }
 0x35a   : > { %v3799_v30 = vmax.f32 %v3671_v54, 0.0  ;;  %v3538_v3 = vmul.f32 %v7293_v47, %v3249_v2 }
 0x35b   : > { %v3798_v17 = vmax.f32 %v3670_v26, 0.0  ;;  %v3537_v21 = vmul.f32 %v7293_v47, %v3244_v55  ;;  %v2643_v15 = vpop.f32.mrb[218].mxu0  ;;  %v4891_v52 = vpop.f32.mrb[26].mxu1 }
 0x35c   : > { %3928 = vst.msk [vmem:[%s6874_s14 + $0x2b8] sm:$0xff] %vm3840_vm1, %v3799_v30  ;;  %v3673_v12 = vadd.f32 %v7286_v56, %v3538_v3  ;;  %v7496_v60 = vadd.f32 %v2643_v15, %v8085_v24  ;;  %v3259_v48 = vadd.f32 %v4891_v52, %v7252_v51  ;;  %v2645_v25 = vpop.f32.mrb[219].mxu0  ;;  %v3253_v34 = vpop.f32.mrb[27].mxu1  ;;  %v8088_v3 = vld [vmem:[#allocation65_spill] sm:$0xff] }
 0x35d   : > { %3927 = vst.msk [vmem:[%s6874_s14 + $0x2b0] sm:$0xff] %vm3840_vm1, %v3798_v17  ;;  %v3672_v28 = vadd.f32 %v7286_v56, %v3537_v21  ;;  %v3254_v44 = vadd.f32 %v3253_v34, %v7239_v8 }
 0x35e   : > { %v3801_v53 = vmax.f32 %v3673_v12, 0.0  ;;  %v3540_v4 = vmul.f32 %v7293_v47, %v3259_v48 }
 0x35f   : > { %v3800_v23 = vmax.f32 %v3672_v28, 0.0  ;;  %v3539_v63 = vmul.f32 %v7293_v47, %v3254_v44  ;;  %v2648_v14 = vpop.f32.mrb[220].mxu0  ;;  %v4894_v32 = vpop.f32.mrb[28].mxu1 }
 0x360   : > { %3930 = vst.msk [vmem:[%s6874_s14 + $0x2c8] sm:$0xff] %vm3840_vm1, %v3801_v53  ;;  %v3675_v51 = vadd.f32 %v7286_v56, %v3540_v4  ;;  %v7509_v6 = vadd.f32 %v2648_v14, %v8086_v40  ;;  %v3269_v45 = vadd.f32 %v4894_v32, %v7278_v42  ;;  %v2650_v39 = vpop.f32.mrb[221].mxu0  ;;  %v3263_v8 = vpop.f32.mrb[29].mxu1  ;;  %v8089_v53 = vld [vmem:[#allocation66_spill] sm:$0xff] }
 0x361   : > { %3929 = vst.msk [vmem:[%s6874_s14 + $0x2c0] sm:$0xff] %vm3840_vm1, %v3800_v23  ;;  %v3674_v5 = vadd.f32 %v7286_v56, %v3539_v63  ;;  %v3264_v11 = vadd.f32 %v3263_v8, %v7265_v43 }
 0x362   : > { %v3803_v49 = vmax.f32 %v3675_v51, 0.0  ;;  %v3542_v29 = vmul.f32 %v7293_v47, %v3269_v45 }
 0x363   : > { %v3802_v13 = vmax.f32 %v3674_v5, 0.0  ;;  %v3541_v33 = vmul.f32 %v7293_v47, %v3264_v11  ;;  %v2653_v57 = vpop.f32.mrb[222].mxu0  ;;  %v4897_v41 = vpop.f32.mrb[30].mxu1  ;;  %v8090_v11 = vld [vmem:[#allocation67_spill] sm:$0xff] }
 0x364   : > { %3932 = vst.msk [vmem:[%s6874_s14 + $0x2d8] sm:$0xff] %vm3840_vm1, %v3803_v49  ;;  %v3677_v42 = vadd.f32 %v7286_v56, %v3542_v29  ;;  %v7522_v1 = vadd.f32 %v2653_v57, %v8087_v9  ;;  %v3279_v36 = vadd.f32 %v4897_v41, %v7314_v22  ;;  %v2655_v20 = vpop.f32.mrb[223].mxu0  ;;  %v3273_v43 = vpop.f32.mrb[31].mxu1 }
 0x365   : > { %3931 = vst.msk [vmem:[%s6874_s14 + $0x2d0] sm:$0xff] %vm3840_vm1, %v3802_v13  ;;  %v3676_v54 = vadd.f32 %v7286_v56, %v3541_v33  ;;  %v3274_v27 = vadd.f32 %v3273_v43, %v7301_v61 }
 0x366   : > { %v3805_v2 = vmax.f32 %v3677_v42, 0.0  ;;  %v3544_v37 = vmul.f32 %v7293_v47, %v3279_v36 }
 0x367   : > { %v3804_v46 = vmax.f32 %v3676_v54, 0.0  ;;  %v3543_v26 = vmul.f32 %v7293_v47, %v3274_v27  ;;  %v2658_v55 = vpop.f32.mrb[224].mxu0  ;;  %v4900_v30 = vpop.f32.mrb[32].mxu1  ;;  %v8091_v54 = vld [vmem:[#allocation68_spill] sm:$0xff] }
 0x368   : > { %3934 = vst.msk [vmem:[%s6874_s14 + $0x2e8] sm:$0xff] %vm3840_vm1, %v3805_v2  ;;  %v3679_v22 = vadd.f32 %v7286_v56, %v3544_v37  ;;  %v7535_v17 = vadd.f32 %v2658_v55, %v8088_v3  ;;  %v3289_v21 = vadd.f32 %v4900_v30, %v7340_v58  ;;  %v2660_v15 = vpop.f32.mrb[225].mxu0  ;;  %v3283_v61 = vpop.f32.mrb[33].mxu1 }
 0x369   : > { %3933 = vst.msk [vmem:[%s6874_s14 + $0x2e0] sm:$0xff] %vm3840_vm1, %v3804_v46  ;;  %v3678_v52 = vadd.f32 %v7286_v56, %v3543_v26  ;;  %v3284_v12 = vadd.f32 %v3283_v61, %v7327_v10  ;;  %v8092_v61 = vld [vmem:[#allocation69_spill] sm:$0xff] }
 0x36a   : > { %v3807_v24 = vmax.f32 %v3679_v22, 0.0  ;;  %v3546_v48 = vmul.f32 %v7293_v47, %v3289_v21 }
 0x36b   : > { %v3806_v25 = vmax.f32 %v3678_v52, 0.0  ;;  %v3545_v34 = vmul.f32 %v7293_v47, %v3284_v12  ;;  %v2663_v28 = vpop.f32.mrb[226].mxu0  ;;  %v4903_v44 = vpop.f32.mrb[34].mxu1 }
 0x36c   : > { %3936 = vst.msk [vmem:[%s6874_s14 + $0x2f8] sm:$0xff] %vm3840_vm1, %v3807_v24  ;;  %v3681_v58 = vadd.f32 %v7286_v56, %v3546_v48  ;;  %v7548_v4 = vadd.f32 %v2663_v28, %v8089_v53  ;;  %v3299_v23 = vadd.f32 %v4903_v44, %v7366_v35  ;;  %v2665_v63 = vpop.f32.mrb[227].mxu0  ;;  %v3293_v10 = vpop.f32.mrb[35].mxu1 }
 0x36d   : > { %3935 = vst.msk [vmem:[%s6874_s14 + $0x2f0] sm:$0xff] %vm3840_vm1, %v3806_v25  ;;  %v3680_v14 = vadd.f32 %v7286_v56, %v3545_v34  ;;  %v3294_v32 = vadd.f32 %v3293_v10, %v7353_v62  ;;  %v8093_v63 = vld [vmem:[#allocation70_spill] sm:$0xff] }
 0x36e   : > { %v3809_v51 = vmax.f32 %v3681_v58, 0.0  ;;  %v3548_v40 = vmul.f32 %v7293_v47, %v3299_v23 }
 0x36f   : > { %v3808_v45 = vmax.f32 %v3680_v14, 0.0  ;;  %v3547_v39 = vmul.f32 %v7293_v47, %v3294_v32  ;;  %v2668_v8 = vpop.f32.mrb[228].mxu0  ;;  %v4906_v5 = vpop.f32.mrb[36].mxu1 }
 0x370   : > { %3938 = vst.msk [vmem:[%s6874_s14 + $0x308] sm:$0xff] %vm3840_vm1, %v3809_v51  ;;  %v3683_v35 = vadd.f32 %v7286_v56, %v3548_v40  ;;  %v7561_v49 = vadd.f32 %v2668_v8, %v8090_v11  ;;  %v3309_v29 = vadd.f32 %v4906_v5, %v7392_v16  ;;  %v2670_v13 = vpop.f32.mrb[229].mxu0  ;;  %v3303_v62 = vpop.f32.mrb[37].mxu1 }
 0x371   : > { %3937 = vst.msk [vmem:[%s6874_s14 + $0x300] sm:$0xff] %vm3840_vm1, %v3808_v45  ;;  %v3682_v33 = vadd.f32 %v7286_v56, %v3547_v39  ;;  %v3304_v57 = vadd.f32 %v3303_v62, %v7379_v31 }
 0x372   : > { %v3811_v41 = vmax.f32 %v3683_v35, 0.0  ;;  %v3550_v42 = vmul.f32 %v7293_v47, %v3309_v29  ;;  %v8094_v29 = vld [vmem:[#allocation71_spill] sm:$0xff] }
 0x373   : > { %v3810_v9 = vmax.f32 %v3682_v33, 0.0  ;;  %v3549_v36 = vmul.f32 %v7293_v47, %v3304_v57  ;;  %v2673_v20 = vpop.f32.mrb[230].mxu0  ;;  %v4909_v43 = vpop.f32.mrb[38].mxu1 }
 0x374   : > { %3940 = vst.msk [vmem:[%s6874_s14 + $0x318] sm:$0xff] %vm3840_vm1, %v3811_v41  ;;  %v3685_v16 = vadd.f32 %v7286_v56, %v3550_v42  ;;  %v7574_v27 = vadd.f32 %v2673_v20, %v8091_v54  ;;  %v3319_v2 = vadd.f32 %v4909_v43, %v7418_v7  ;;  %v2675_v37 = vpop.f32.mrb[231].mxu0  ;;  %v3313_v31 = vpop.f32.mrb[39].mxu1  ;;  %v8095_v54 = vld [vmem:[#allocation72_spill] sm:$0xff] }
 0x375   : > { %3939 = vst.msk [vmem:[%s6874_s14 + $0x310] sm:$0xff] %vm3840_vm1, %v3810_v9  ;;  %v3684_v46 = vadd.f32 %v7286_v56, %v3549_v36  ;;  %v3314_v26 = vadd.f32 %v3313_v31, %v7405_v38 }
 0x376   : > { %v3813_v55 = vmax.f32 %v3685_v16, 0.0  ;;  %v3552_v30 = vmul.f32 %v7293_v47, %v3319_v2 }
 0x377   : > { %v3812_v22 = vmax.f32 %v3684_v46, 0.0  ;;  %v3551_v3 = vmul.f32 %v7293_v47, %v3314_v26  ;;  %v2678_v21 = vpop.f32.mrb[232].mxu0  ;;  %v4912_v15 = vpop.f32.mrb[40].mxu1 }
 0x378   : > { %3942 = vst.msk [vmem:[%s6874_s14 + $0x328] sm:$0xff] %vm3840_vm1, %v3813_v55  ;;  %v3687_v7 = vadd.f32 %v7286_v56, %v3552_v30  ;;  %v7587_v52 = vadd.f32 %v2678_v21, %v8092_v61  ;;  %v3329_v12 = vadd.f32 %v4912_v15, %v7444_v50  ;;  %v2680_v24 = vpop.f32.mrb[233].mxu0  ;;  %v3323_v38 = vpop.f32.mrb[41].mxu1 }
 0x379   : > { %3941 = vst.msk [vmem:[%s6874_s14 + $0x320] sm:$0xff] %vm3840_vm1, %v3812_v22  ;;  %v3686_v48 = vadd.f32 %v7286_v56, %v3551_v3  ;;  %v3324_v25 = vadd.f32 %v3323_v38, %v7431_v59 }
 0x37a   : > { %v3815_v34 = vmax.f32 %v3687_v7, 0.0  ;;  %v3554_v28 = vmul.f32 %v7293_v47, %v3329_v12  ;;  %v8096_v7 = vld [vmem:[#allocation73_spill] sm:$0xff] }
 0x37b   : > { %v3814_v44 = vmax.f32 %v3686_v48, 0.0  ;;  %v3553_v58 = vmul.f32 %v7293_v47, %v3324_v25  ;;  %v2683_v53 = vpop.f32.mrb[234].mxu0  ;;  %v4915_v23 = vpop.f32.mrb[42].mxu1 }
 0x37c   : > { %3944 = vst.msk [vmem:[%s6874_s14 + $0x338] sm:$0xff] %vm3840_vm1, %v3815_v34  ;;  %v3689_v50 = vadd.f32 %v7286_v56, %v3554_v28  ;;  %v7600_v10 = vadd.f32 %v2683_v53, %v8093_v63  ;;  %v3339_v14 = vadd.f32 %v4915_v23, %v7470_v19  ;;  %v2685_v32 = vpop.f32.mrb[235].mxu0  ;;  %v3333_v59 = vpop.f32.mrb[43].mxu1  ;;  %v8097_v23 = vld [vmem:[#allocation74_spill] sm:$0xff] }
 0x37d   : > { %3943 = vst.msk [vmem:[%s6874_s14 + $0x330] sm:$0xff] %vm3840_vm1, %v3814_v44  ;;  %v3688_v51 = vadd.f32 %v7286_v56, %v3553_v58  ;;  %v3334_v40 = vadd.f32 %v3333_v59, %v7457_v18 }
 0x37e   : > { %v3817_v45 = vmax.f32 %v3689_v50, 0.0  ;;  %v3556_v39 = vmul.f32 %v7293_v47, %v3339_v14 }
 0x37f   : > { %v3816_v8 = vmax.f32 %v3688_v51, 0.0  ;;  %v3555_v5 = vmul.f32 %v7293_v47, %v3334_v40  ;;  %v2688_v35 = vpop.f32.mrb[236].mxu0  ;;  %v4918_v11 = vpop.f32.mrb[44].mxu1 }
 0x380   : > { %3946 = vst.msk [vmem:[%s6874_s14 + $0x348] sm:$0xff] %vm3840_vm1, %v3817_v45  ;;  %v3691_v19 = vadd.f32 %v7286_v56, %v3556_v39  ;;  %v7613_v13 = vadd.f32 %v2688_v35, %v8094_v29  ;;  %v3349_v62 = vadd.f32 %v4918_v11, %v7496_v60  ;;  %v2690_v33 = vpop.f32.mrb[237].mxu0  ;;  %v3343_v18 = vpop.f32.mrb[45].mxu1  ;;  %v8098_v35 = vld [vmem:[#allocation75_spill] sm:$0xff] }
 0x381   : > { %3945 = vst.msk [vmem:[%s6874_s14 + $0x340] sm:$0xff] %vm3840_vm1, %v3816_v8  ;;  %v3690_v57 = vadd.f32 %v7286_v56, %v3555_v5  ;;  %v3344_v41 = vadd.f32 %v3343_v18, %v7483_v0 }
 0x382   : > { %v3819_v42 = vmax.f32 %v3691_v19, 0.0  ;;  %v3558_v9 = vmul.f32 %v7293_v47, %v3349_v62 }
 0x383   : > { %v3818_v36 = vmax.f32 %v3690_v57, 0.0  ;;  %v3557_v20 = vmul.f32 %v7293_v47, %v3344_v41  ;;  %v2693_v43 = vpop.f32.mrb[238].mxu0 }
 0x384   : > { %v4921_v16 = vpop.f32.mrb[46].mxu1  ;;  %3948 = vst.msk [vmem:[%s6874_s14 + $0x358] sm:$0xff] %vm3840_vm1, %v3819_v42  ;;  %v3693_v60 = vadd.f32 %v7286_v56, %v3558_v9  ;;  %v2694_v2 = vadd.f32 %v2693_v43, %v8095_v54  ;;  %v2695_v31 = vpop.f32.mrb[239].mxu0 }
 0x385   : > { %v3359_v37 = vadd.f32 %v4921_v16, %v7522_v1  ;;  %v3353_v46 = vpop.f32.mrb[47].mxu1  ;;  %3947 = vst.msk [vmem:[%s6874_s14 + $0x350] sm:$0xff] %vm3840_vm1, %v3818_v36  ;;  %v3692_v0 = vadd.f32 %v7286_v56, %v3557_v20  ;;  %v8099_v20 = vld [vmem:[#allocation76_spill] sm:$0xff] }
 0x386   : > { %v3354_v26 = vadd.f32 %v3353_v46, %v7509_v6  ;;  %v3821_v55 = vmax.f32 %v3693_v60, 0.0 }
 0x387   : > { %v3560_v30 = vmul.f32 %v7293_v47, %v3359_v37  ;;  %v3820_v22 = vmax.f32 %v3692_v0, 0.0  ;;  %v2698_v21 = vpop.f32.mrb[240].mxu0 }
 0x388   : > { %v3559_v3 = vmul.f32 %v7293_v47, %v3354_v26  ;;  %v4924_v15 = vpop.f32.mrb[48].mxu1  ;;  %3950 = vst.msk [vmem:[%s6874_s14 + $0x368] sm:$0xff] %vm3840_vm1, %v3821_v55  ;;  %v7637_v61 = vadd.f32 %v2698_v21, %v8096_v7  ;;  %v2700_v24 = vpop.f32.mrb[241].mxu0 }
 0x389   : > { %v3695_v1 = vadd.f32 %v7286_v56, %v3560_v30  ;;  %v3369_v12 = vadd.f32 %v4924_v15, %v7548_v4  ;;  %v3363_v6 = vpop.f32.mrb[49].mxu1  ;;  %3949 = vst.msk [vmem:[%s6874_s14 + $0x360] sm:$0xff] %vm3840_vm1, %v3820_v22  ;;  %v8100_v22 = vld [vmem:[#allocation77_spill] sm:$0xff] }
 0x38a   : > { %v3694_v38 = vadd.f32 %v7286_v56, %v3559_v3  ;;  %v3364_v48 = vadd.f32 %v3363_v6, %v7535_v17 }
 0x38b   : > { %v3823_v25 = vmax.f32 %v3695_v1, 0.0  ;;  %v3562_v34 = vmul.f32 %v7293_v47, %v3369_v12  ;;  %v2703_v58 = vpop.f32.mrb[242].mxu0 }
 0x38c   : > { %v3822_v28 = vmax.f32 %v3694_v38, 0.0  ;;  %v3561_v44 = vmul.f32 %v7293_v47, %v3364_v48  ;;  %v4927_v53 = vpop.f32.mrb[50].mxu1  ;;  %v2704_v50 = vadd.f32 %v2703_v58, %v8097_v23  ;;  %v2705_v14 = vpop.f32.mrb[243].mxu0 }
 0x38d   : > { %3952 = vst.msk [vmem:[%s6874_s14 + $0x378] sm:$0xff] %vm3840_vm1, %v3823_v25  ;;  %v3697_v4 = vadd.f32 %v7286_v56, %v3562_v34  ;;  %v3379_v63 = vadd.f32 %v4927_v53, %v7574_v27  ;;  %v3373_v32 = vpop.f32.mrb[51].mxu1 }
 0x38e   : > { %3951 = vst.msk [vmem:[%s6874_s14 + $0x370] sm:$0xff] %vm3840_vm1, %v3822_v28  ;;  %v3696_v17 = vadd.f32 %v7286_v56, %v3561_v44  ;;  %v3374_v59 = vadd.f32 %v3373_v32, %v7561_v49  ;;  %v8101_v28 = vld [vmem:[#allocation78_spill] sm:$0xff] }
 0x38f   : > { %v3825_v51 = vmax.f32 %v3697_v4, 0.0  ;;  %v3564_v40 = vmul.f32 %v7293_v47, %v3379_v63  ;;  %v2708_v8 = vpop.f32.mrb[244].mxu0 }
 0x390   : > { %v3824_v45 = vmax.f32 %v3696_v17, 0.0  ;;  %v3563_v39 = vmul.f32 %v7293_v47, %v3374_v59  ;;  %v4930_v5 = vpop.f32.mrb[52].mxu1  ;;  %v2709_v11 = vadd.f32 %v2708_v8, %v8098_v35  ;;  %v2710_v29 = vpop.f32.mrb[245].mxu0 }
 0x391   : > { %3954 = vst.msk [vmem:[%s6874_s14 + $0x388] sm:$0xff] %vm3840_vm1, %v3825_v51  ;;  %v3699_v27 = vadd.f32 %v7286_v56, %v3564_v40  ;;  %v3389_v19 = vadd.f32 %v4930_v5, %v7600_v10  ;;  %v3383_v62 = vpop.f32.mrb[53].mxu1  ;;  %v8102_v40 = vld [vmem:[#allocation79_spill] sm:$0xff] }
 0x392   : > { %3953 = vst.msk [vmem:[%s6874_s14 + $0x380] sm:$0xff] %vm3840_vm1, %v3824_v45  ;;  %v3698_v49 = vadd.f32 %v7286_v56, %v3563_v39  ;;  %v3384_v33 = vadd.f32 %v3383_v62, %v7587_v52 }
 0x393   : > { %v3827_v18 = vmax.f32 %v3699_v27, 0.0  ;;  %v3566_v57 = vmul.f32 %v7293_v47, %v3389_v19  ;;  %v2713_v9 = vpop.f32.mrb[246].mxu0 }
 0x394   : > { %v3826_v41 = vmax.f32 %v3698_v49, 0.0  ;;  %v3565_v42 = vmul.f32 %v7293_v47, %v3384_v33  ;;  %v4933_v36 = vpop.f32.mrb[54].mxu1  ;;  %v2714_v43 = vadd.f32 %v2713_v9, %v8099_v20  ;;  %v2715_v60 = vpop.f32.mrb[247].mxu0 }
 0x395   : > { %3956 = vst.msk [vmem:[%s6874_s14 + $0x398] sm:$0xff] %vm3840_vm1, %v3827_v18  ;;  %v3701_v10 = vadd.f32 %v7286_v56, %v3566_v57  ;;  %v3399_v16 = vadd.f32 %v4933_v36, %v2694_v2  ;;  %v3393_v54 = vpop.f32.mrb[55].mxu1  ;;  %v8103_v57 = vld [vmem:[#allocation81_spill] sm:$0xff] }
 0x396   : > { %3955 = vst.msk [vmem:[%s6874_s14 + $0x390] sm:$0xff] %vm3840_vm1, %v3826_v41  ;;  %v3700_v52 = vadd.f32 %v7286_v56, %v3565_v42  ;;  %v3394_v37 = vadd.f32 %v3393_v54, %v7613_v13  ;;  %v5346_v54 = vld [vmem:[%s7936_s2] ss:$0 sm:$0xff] }
 0x397   : > { %v3829_v31 = vmax.f32 %v3701_v10, 0.0  ;;  %v3568_v46 = vmul.f32 %v7293_v47, %v3399_v16  ;;  %v2718_v55 = vpop.f32.mrb[248].mxu0 }
 0x398   : > { %v3828_v0 = vmax.f32 %v3700_v52, 0.0  ;;  %v3567_v26 = vmul.f32 %v7293_v47, %v3394_v37  ;;  %v4936_v30 = vpop.f32.mrb[56].mxu1  ;;  %v2719_v3 = vadd.f32 %v2718_v55, %v8100_v22  ;;  %v2720_v15 = vpop.f32.mrb[249].mxu0 }
 0x399   : > { %3958 = vst.msk [vmem:[%s6874_s14 + $0x3a8] sm:$0xff] %vm3840_vm1, %v3829_v31  ;;  %v3703_v2 = vadd.f32 %v7286_v56, %v3568_v46  ;;  %v3409_v21 = vadd.f32 %v4936_v30, %v2704_v50  ;;  %v3403_v1 = vpop.f32.mrb[57].mxu1 }
 0x39a   : > { %3957 = vst.msk [vmem:[%s6874_s14 + $0x3a0] sm:$0xff] %vm3840_vm1, %v3828_v0  ;;  %v3702_v13 = vadd.f32 %v7286_v56, %v3567_v26  ;;  %v3404_v7 = vadd.f32 %v3403_v1, %v7637_v61 }
 0x39b   : > { %v3831_v12 = vmax.f32 %v3703_v2, 0.0  ;;  %v3570_v24 = vmul.f32 %v7293_v47, %v3409_v21  ;;  %v2723_v48 = vpop.f32.mrb[250].mxu0 }
 0x39c   : > { %v3830_v6 = vmax.f32 %v3702_v13, 0.0  ;;  %v3569_v38 = vmul.f32 %v7293_v47, %v3404_v7  ;;  %v4939_v25 = vpop.f32.mrb[58].mxu1  ;;  %v2724_v44 = vadd.f32 %v2723_v48, %v8101_v28  ;;  %v2725_v53 = vpop.f32.mrb[251].mxu0 }
 0x39d   : > { %3960 = vst.msk [vmem:[%s6874_s14 + $0x3b8] sm:$0xff] %vm3840_vm1, %v3831_v12  ;;  %v3705_v34 = vadd.f32 %v7286_v56, %v3570_v24  ;;  %v3419_v58 = vadd.f32 %v4939_v25, %v2714_v43  ;;  %v3413_v4 = vpop.f32.mrb[59].mxu1 }
 0x39e   : > { %3959 = vst.msk [vmem:[%s6874_s14 + $0x3b0] sm:$0xff] %vm3840_vm1, %v3830_v6  ;;  %v3704_v61 = vadd.f32 %v7286_v56, %v3569_v38  ;;  %v3414_v23 = vadd.f32 %v3413_v4, %v2709_v11 }
 0x39f   : > { %v3833_v50 = vmax.f32 %v3705_v34, 0.0  ;;  %v3572_v63 = vmul.f32 %v7293_v47, %v3419_v58  ;;  %v2728_v17 = vpop.f32.mrb[252].mxu0 }
 0x3a0   : > { %v3832_v14 = vmax.f32 %v3704_v61, 0.0  ;;  %v3571_v32 = vmul.f32 %v7293_v47, %v3414_v23  ;;  %v4942_v59 = vpop.f32.mrb[60].mxu1  ;;  %v2729_v45 = vadd.f32 %v2728_v17, %v8102_v40  ;;  %v2730_v8 = vpop.f32.mrb[253].mxu0 }
 0x3a1   : > { %3962 = vst.msk [vmem:[%s6874_s14 + $0x3c8] sm:$0xff] %vm3840_vm1, %v3833_v50  ;;  %v3707_v51 = vadd.f32 %v7286_v56, %v3572_v63  ;;  %v3429_v39 = vadd.f32 %v4942_v59, %v2724_v44  ;;  %v3423_v5 = vpop.f32.mrb[61].mxu1 }
 0x3a2   : > { %3961 = vst.msk [vmem:[%s6874_s14 + $0x3c0] sm:$0xff] %vm3840_vm1, %v3832_v14  ;;  %v3706_v27 = vadd.f32 %v7286_v56, %v3571_v32  ;;  %v3424_v35 = vadd.f32 %v3423_v5, %v2719_v3 }
 0x3a3   : > { %v3835_v11 = vmax.f32 %v3707_v51, 0.0  ;;  %v3574_v19 = vmul.f32 %v7293_v47, %v3429_v39  ;;  %v2733_v49 = vpop.f32.mrb[254].mxu0 }
 0x3a4   : > { %v3834_v29 = vmax.f32 %v3706_v27, 0.0  ;;  %v3573_v62 = vmul.f32 %v7293_v47, %v3424_v35  ;;  %v4945_v33 = vpop.f32.mrb[62].mxu1  ;;  %v2734_v41 = vadd.f32 %v2733_v49, %v8103_v57  ;;  %v2735_v42 = vpop.f32.mrb[255].mxu0 }
 0x3a5   : > { %3964 = vst.msk [vmem:[%s6874_s14 + $0x3d8] sm:$0xff] %vm3840_vm1, %v3835_v11  ;;  %v3709_v18 = vadd.f32 %v7286_v56, %v3574_v19  ;;  %v3433_v9 = vpop.f32.mrb[63].mxu1 }
 0x3a6   : > { %3963 = vst.msk [vmem:[%s6874_s14 + $0x3d0] sm:$0xff] %vm3840_vm1, %v3834_v29  ;;  %v3708_v36 = vadd.f32 %v7286_v56, %v3573_v62  ;;  %v3434_v10 = vadd.f32 %v3433_v9, %v2729_v45  ;;  %v3439_v43 = vadd.f32 %v4945_v33, %v2734_v41  ;;  %v5347_v56 = vld [vmem:[%s7937_s3] ss:$0 sm:$0xff] }
 0x3a7   : > { %v3837_v20 = vmax.f32 %v3709_v18, 0.0 }
 0x3a8   : > { %v3836_v16 = vmax.f32 %v3708_v36, 0.0  ;;  %v3575_v60 = vmul.f32 %v7293_v47, %v3434_v10  ;;  %v3576_v52 = vmul.f32 %v5346_v54, %v3439_v43  ;;  %3975 = sbr.rel (!%p5487_p4) target bundleno = 1015 (0x3f7), region = 40 }
 0x3a9   : > { %3966 = vst.msk [vmem:[%s6874_s14 + $0x3e8] sm:$0xff] %vm3840_vm1, %v3837_v20 }
 0x3aa   : > { %3965 = vst.msk [vmem:[%s6874_s14 + $0x3e0] sm:$0xff] %vm3840_vm1, %v3836_v16  ;;  %v3710_v37 = vadd.f32 %v5347_v56, %v3575_v60  ;;  %v3711_v31 = vadd.f32 %v5347_v56, %v3576_v52 }
 0x3ac   : > { %v3838_v46 = vmax.f32 %v3710_v37, 0.0  ;;  %v3839_v0 = vmax.f32 %v3711_v31, 0.0 }
 0x3ae   : > { %3967 = vst.msk [vmem:[%s6874_s14 + $0x3f0] sm:$0xff] %vm3840_vm1, %v3838_v46  ;;  %3968 = vst.msk [vmem:[%s6874_s14 + $0x3f8] sm:$0xff] %vm3840_vm1, %v3839_v0 }
 0x3af   : > { %s8113_s29 = smov (!%p3978_p8, %s3977_s29), 128 }
 0x3b0   : > { %s4575_s9 = sshll.u32 %s8113_s29, 7 }
 0x3b1   : > { %p4578_p9 = scmp.eq.s32.totalorder %s4575_s9, 0 }
 0x3b2   : > { %s7741_s10 = sshrl.u32 (!%p4578_p9), %s8113_s29, 6 }
 0x3b3   : > { %3986 = sbr.rel (%p4578_p9) target bundleno = 1015 (0x3f7), region = 44  ;;  %p4579_p10 = scmp.le.s32.totalorder (!%p4578_p9), %s7741_s10, 0 }
 0x3ba   : > { %4392 = sbr.rel (%p4579_p10) target bundleno = 994 (0x3e2), region = 120  ;;  %s8104_s18 = smov (!%p4579_p10), %s7735_s8 }
 0x3bb   : > { %s8105_s23 = smov (!%p4579_p10), %s6874_s14  ;;  %s7750_s30 = smov (!%p4579_p10), 0  }
 0x3bc   : > { %s7752_s11 = smov (!%p4579_p10), 0  }
 0x3c1 LB: >> { %v4174_v47 = vld [vmem:[%s5410_s23] sm:$0xff]  ;;  %v4176_v26 = vld [vmem:[%s5410_s23 + $0x8] sm:$0xff]  ;;  %v4178_v55 = vld [vmem:[%s5410_s23 + $0x10] sm:$0xff]  ;;  %s4302_s12 = sadd.s32 1, %s5414_s30  ;;  %s4168_s11 = sadd.s32 1, %s5418_s11   ;;  %s5418_s11 = sphi %s7752_s11, %s4168_s11   ;;  %s5414_s30 = sphi %s7750_s30, %s8108_s30   ;;  %s5410_s23 = sphi %s8105_s23, %s8107_s23   ;;  %s5406_s18 = sphi %s8104_s18, %s8106_s18  }
 0x3c2   : >> { %4175 = vst [vmem:[%s5406_s18] sm:$0xff] %v4174_v47  ;;  %4177 = vst [vmem:[%s5406_s18 + $0x8] sm:$0xff] %v4176_v26  ;;  %v4180_v30 = vld [vmem:[%s5410_s23 + $0x18] sm:$0xff]  ;;  %v4182_v2 = vld [vmem:[%s5410_s23 + $0x20] sm:$0xff]  ;;  %p4303_p11 = scmp.ge.s32.totalorder %s4302_s12, %s7741_s10  ;;  %p4167_p12 = scmp.ge.s32.totalorder %s4168_s11, %s7741_s10 }
 0x3c3   : >> { %4179 = vst [vmem:[%s5406_s18 + $0x10] sm:$0xff] %v4178_v55  ;;  %v4184_v22 = vld [vmem:[%s5410_s23 + $0x28] sm:$0xff]  ;;  %4181 = vst [vmem:[%s5406_s18 + $0x18] sm:$0xff] %v4180_v30  ;;  %v4186_v3 = vld [vmem:[%s5410_s23 + $0x30] sm:$0xff] }
 0x3c4   : >> { %4183 = vst [vmem:[%s5406_s18 + $0x20] sm:$0xff] %v4182_v2  ;;  %4185 = vst [vmem:[%s5406_s18 + $0x28] sm:$0xff] %v4184_v22  ;;  %v4188_v21 = vld [vmem:[%s5410_s23 + $0x38] sm:$0xff]  ;;  %v4190_v15 = vld [vmem:[%s5410_s23 + $0x40] sm:$0xff]  ;;  %s8115_s12 = smov (%p4303_p11, %s4302_s12), 0 }
 0x3c5   : >> { %4187 = vst [vmem:[%s5406_s18 + $0x30] sm:$0xff] %v4186_v3  ;;  %4189 = vst [vmem:[%s5406_s18 + $0x38] sm:$0xff] %v4188_v21  ;;  %v4192_v1 = vld [vmem:[%s5410_s23 + $0x48] sm:$0xff]  ;;  %v4194_v13 = vld [vmem:[%s5410_s23 + $0x50] sm:$0xff]  ;;  %s4580_s15 = sshll.u32 %s8115_s12, 9  ;;  %s8108_s30 = smov %s8115_s12 }
 0x3c6   : >> { %4191 = vst [vmem:[%s5406_s18 + $0x40] sm:$0xff] %v4190_v15  ;;  %v4196_v7 = vld [vmem:[%s5410_s23 + $0x58] sm:$0xff]  ;;  %4193 = vst [vmem:[%s5406_s18 + $0x48] sm:$0xff] %v4192_v1  ;;  %v4198_v12 = vld [vmem:[%s5410_s23 + $0x60] sm:$0xff]  ;;  %s7808_s13 = scalar_lea.vmem %s6874_s14, %s4580_s15 [#allocation2]   ;;  %s7811_s17 = scalar_lea.vmem %s7735_s8, %s4580_s15  }
 0x3c7   : >> { %4195 = vst [vmem:[%s5406_s18 + $0x50] sm:$0xff] %v4194_v13  ;;  %4197 = vst [vmem:[%s5406_s18 + $0x58] sm:$0xff] %v4196_v7  ;;  %v4200_v24 = vld [vmem:[%s5410_s23 + $0x68] sm:$0xff]  ;;  %v4202_v6 = vld [vmem:[%s5410_s23 + $0x70] sm:$0xff] }
 0x3c8   : >> { %4199 = vst [vmem:[%s5406_s18 + $0x60] sm:$0xff] %v4198_v12  ;;  %4201 = vst [vmem:[%s5406_s18 + $0x68] sm:$0xff] %v4200_v24  ;;  %v4204_v38 = vld [vmem:[%s5410_s23 + $0x78] sm:$0xff]  ;;  %v4206_v48 = vld [vmem:[%s5410_s23 + $0x80] sm:$0xff] }
 0x3c9   : >> { %4203 = vst [vmem:[%s5406_s18 + $0x70] sm:$0xff] %v4202_v6  ;;  %v4208_v25 = vld [vmem:[%s5410_s23 + $0x88] sm:$0xff]  ;;  %4205 = vst [vmem:[%s5406_s18 + $0x78] sm:$0xff] %v4204_v38  ;;  %v4210_v34 = vld [vmem:[%s5410_s23 + $0x90] sm:$0xff] }
 0x3ca   : >> { %4207 = vst [vmem:[%s5406_s18 + $0x80] sm:$0xff] %v4206_v48  ;;  %4209 = vst [vmem:[%s5406_s18 + $0x88] sm:$0xff] %v4208_v25  ;;  %v4212_v28 = vld [vmem:[%s5410_s23 + $0x98] sm:$0xff]  ;;  %v4214_v44 = vld [vmem:[%s5410_s23 + $0xa0] sm:$0xff] }
 0x3cb   : >> { %4211 = vst [vmem:[%s5406_s18 + $0x90] sm:$0xff] %v4210_v34  ;;  %4213 = vst [vmem:[%s5406_s18 + $0x98] sm:$0xff] %v4212_v28  ;;  %v4216_v58 = vld [vmem:[%s5410_s23 + $0xa8] sm:$0xff]  ;;  %v4218_v53 = vld [vmem:[%s5410_s23 + $0xb0] sm:$0xff] }
 0x3cc   : >> { %4215 = vst [vmem:[%s5406_s18 + $0xa0] sm:$0xff] %v4214_v44  ;;  %v4220_v4 = vld [vmem:[%s5410_s23 + $0xb8] sm:$0xff]  ;;  %4217 = vst [vmem:[%s5406_s18 + $0xa8] sm:$0xff] %v4216_v58  ;;  %v4222_v61 = vld [vmem:[%s5410_s23 + $0xc0] sm:$0xff] }
 0x3cd   : >> { %4219 = vst [vmem:[%s5406_s18 + $0xb0] sm:$0xff] %v4218_v53  ;;  %4221 = vst [vmem:[%s5406_s18 + $0xb8] sm:$0xff] %v4220_v4  ;;  %v4224_v23 = vld [vmem:[%s5410_s23 + $0xc8] sm:$0xff]  ;;  %v4226_v50 = vld [vmem:[%s5410_s23 + $0xd0] sm:$0xff] }
 0x3ce   : >> { %4223 = vst [vmem:[%s5406_s18 + $0xc0] sm:$0xff] %v4222_v61  ;;  %4225 = vst [vmem:[%s5406_s18 + $0xc8] sm:$0xff] %v4224_v23  ;;  %v4228_v63 = vld [vmem:[%s5410_s23 + $0xd8] sm:$0xff]  ;;  %v4230_v14 = vld [vmem:[%s5410_s23 + $0xe0] sm:$0xff] }
 0x3cf   : >> { %4227 = vst [vmem:[%s5406_s18 + $0xd0] sm:$0xff] %v4226_v50  ;;  %v4232_v32 = vld [vmem:[%s5410_s23 + $0xe8] sm:$0xff]  ;;  %4229 = vst [vmem:[%s5406_s18 + $0xd8] sm:$0xff] %v4228_v63  ;;  %v4234_v17 = vld [vmem:[%s5410_s23 + $0xf0] sm:$0xff] }
 0x3d0   : >> { %4231 = vst [vmem:[%s5406_s18 + $0xe0] sm:$0xff] %v4230_v14  ;;  %4233 = vst [vmem:[%s5406_s18 + $0xe8] sm:$0xff] %v4232_v32  ;;  %v4236_v59 = vld [vmem:[%s5410_s23 + $0xf8] sm:$0xff]  ;;  %v4238_v51 = vld [vmem:[%s5410_s23 + $0x100] sm:$0xff] }
 0x3d1   : >> { %4235 = vst [vmem:[%s5406_s18 + $0xf0] sm:$0xff] %v4234_v17  ;;  %4237 = vst [vmem:[%s5406_s18 + $0xf8] sm:$0xff] %v4236_v59  ;;  %v4240_v40 = vld [vmem:[%s5410_s23 + $0x108] sm:$0xff]  ;;  %v4242_v45 = vld [vmem:[%s5410_s23 + $0x110] sm:$0xff] }
 0x3d2   : >> { %4239 = vst [vmem:[%s5406_s18 + $0x100] sm:$0xff] %v4238_v51  ;;  %v4244_v39 = vld [vmem:[%s5410_s23 + $0x118] sm:$0xff]  ;;  %4241 = vst [vmem:[%s5406_s18 + $0x108] sm:$0xff] %v4240_v40  ;;  %v4246_v8 = vld [vmem:[%s5410_s23 + $0x120] sm:$0xff] }
 0x3d3   : >> { %4243 = vst [vmem:[%s5406_s18 + $0x110] sm:$0xff] %v4242_v45  ;;  %4245 = vst [vmem:[%s5406_s18 + $0x118] sm:$0xff] %v4244_v39  ;;  %v4248_v5 = vld [vmem:[%s5410_s23 + $0x128] sm:$0xff]  ;;  %v4250_v27 = vld [vmem:[%s5410_s23 + $0x130] sm:$0xff] }
 0x3d4   : >> { %4247 = vst [vmem:[%s5406_s18 + $0x120] sm:$0xff] %v4246_v8  ;;  %4249 = vst [vmem:[%s5406_s18 + $0x128] sm:$0xff] %v4248_v5  ;;  %v4252_v35 = vld [vmem:[%s5410_s23 + $0x138] sm:$0xff]  ;;  %v4254_v11 = vld [vmem:[%s5410_s23 + $0x140] sm:$0xff] }
 0x3d5   : >> { %4251 = vst [vmem:[%s5406_s18 + $0x130] sm:$0xff] %v4250_v27  ;;  %v4256_v19 = vld [vmem:[%s5410_s23 + $0x148] sm:$0xff]  ;;  %4253 = vst [vmem:[%s5406_s18 + $0x138] sm:$0xff] %v4252_v35  ;;  %v4258_v29 = vld [vmem:[%s5410_s23 + $0x150] sm:$0xff] }
 0x3d6   : >> { %4255 = vst [vmem:[%s5406_s18 + $0x140] sm:$0xff] %v4254_v11  ;;  %4257 = vst [vmem:[%s5406_s18 + $0x148] sm:$0xff] %v4256_v19  ;;  %v4260_v62 = vld [vmem:[%s5410_s23 + $0x158] sm:$0xff]  ;;  %v4262_v49 = vld [vmem:[%s5410_s23 + $0x160] sm:$0xff] }
 0x3d7   : >> { %4259 = vst [vmem:[%s5406_s18 + $0x150] sm:$0xff] %v4258_v29  ;;  %4261 = vst [vmem:[%s5406_s18 + $0x158] sm:$0xff] %v4260_v62  ;;  %v4264_v33 = vld [vmem:[%s5410_s23 + $0x168] sm:$0xff]  ;;  %v4266_v18 = vld [vmem:[%s5410_s23 + $0x170] sm:$0xff] }
 0x3d8   : >> { %4263 = vst [vmem:[%s5406_s18 + $0x160] sm:$0xff] %v4262_v49  ;;  %v4268_v57 = vld [vmem:[%s5410_s23 + $0x178] sm:$0xff]  ;;  %4265 = vst [vmem:[%s5406_s18 + $0x168] sm:$0xff] %v4264_v33  ;;  %v4270_v41 = vld [vmem:[%s5410_s23 + $0x180] sm:$0xff] }
 0x3d9   : >> { %4267 = vst [vmem:[%s5406_s18 + $0x170] sm:$0xff] %v4266_v18  ;;  %4269 = vst [vmem:[%s5406_s18 + $0x178] sm:$0xff] %v4268_v57  ;;  %v4272_v42 = vld [vmem:[%s5410_s23 + $0x188] sm:$0xff]  ;;  %v4274_v9 = vld [vmem:[%s5410_s23 + $0x190] sm:$0xff] }
 0x3da   : >> { %4271 = vst [vmem:[%s5406_s18 + $0x180] sm:$0xff] %v4270_v41  ;;  %4273 = vst [vmem:[%s5406_s18 + $0x188] sm:$0xff] %v4272_v42  ;;  %v4276_v36 = vld [vmem:[%s5410_s23 + $0x198] sm:$0xff]  ;;  %v4278_v10 = vld [vmem:[%s5410_s23 + $0x1a0] sm:$0xff] }
 0x3db   : >> { %4275 = vst [vmem:[%s5406_s18 + $0x190] sm:$0xff] %v4274_v9  ;;  %v4280_v20 = vld [vmem:[%s5410_s23 + $0x1a8] sm:$0xff]  ;;  %4277 = vst [vmem:[%s5406_s18 + $0x198] sm:$0xff] %v4276_v36  ;;  %v4282_v43 = vld [vmem:[%s5410_s23 + $0x1b0] sm:$0xff]  ;;  %4170 = sbr.rel (!%p4167_p12) target bundleno = 961 (0x3c1), region = 126 }
 0x3dc   : >> { %4279 = vst [vmem:[%s5406_s18 + $0x1a0] sm:$0xff] %v4278_v10  ;;  %4281 = vst [vmem:[%s5406_s18 + $0x1a8] sm:$0xff] %v4280_v20  ;;  %v4284_v16 = vld [vmem:[%s5410_s23 + $0x1b8] sm:$0xff]  ;;  %v4286_v60 = vld [vmem:[%s5410_s23 + $0x1c0] sm:$0xff] }
 0x3dd   : >> { %4283 = vst [vmem:[%s5406_s18 + $0x1b0] sm:$0xff] %v4282_v43  ;;  %4285 = vst [vmem:[%s5406_s18 + $0x1b8] sm:$0xff] %v4284_v16  ;;  %v4288_v54 = vld [vmem:[%s5410_s23 + $0x1c8] sm:$0xff]  ;;  %v4290_v52 = vld [vmem:[%s5410_s23 + $0x1d0] sm:$0xff] }
 0x3de   : >> { %4287 = vst [vmem:[%s5406_s18 + $0x1c0] sm:$0xff] %v4286_v60  ;;  %v4292_v56 = vld [vmem:[%s5410_s23 + $0x1d8] sm:$0xff]  ;;  %4289 = vst [vmem:[%s5406_s18 + $0x1c8] sm:$0xff] %v4288_v54  ;;  %v4294_v37 = vld [vmem:[%s5410_s23 + $0x1e0] sm:$0xff] }
 0x3df   : >> { %4291 = vst [vmem:[%s5406_s18 + $0x1d0] sm:$0xff] %v4290_v52  ;;  %4293 = vst [vmem:[%s5406_s18 + $0x1d8] sm:$0xff] %v4292_v56  ;;  %v4296_v31 = vld [vmem:[%s5410_s23 + $0x1e8] sm:$0xff]  ;;  %v4298_v46 = vld [vmem:[%s5410_s23 + $0x1f0] sm:$0xff] }
 0x3e0   : >> { %4295 = vst [vmem:[%s5406_s18 + $0x1e0] sm:$0xff] %v4294_v37  ;;  %4297 = vst [vmem:[%s5406_s18 + $0x1e8] sm:$0xff] %v4296_v31  ;;  %v4300_v0 = vld [vmem:[%s5410_s23 + $0x1f8] sm:$0xff]  ;;  %s8107_s23 = smov %s7808_s13 }
 0x3e1   : >> { %4299 = vst [vmem:[%s5406_s18 + $0x1f0] sm:$0xff] %v4298_v46  ;;  %4301 = vst [vmem:[%s5406_s18 + $0x1f8] sm:$0xff] %v4300_v0  ;;  %s8106_s18 = smov %s7811_s17 }
 0x3e2 PF: > { %s7916_s20 = sand.u32 63, %s8113_s29   ;;  %s4591_s21 = sshll.u32 %s7741_s10, 9 }
 0x3e3   : > { %s4313_s24 = scalar_lea.vmem %s6874_s14, %s4591_s21 [#allocation2]   ;;  %s4315_s25 = scalar_lea.vmem %s7735_s8, %s4591_s21  }
 0x3e4   : > { %p4585_p13 = scmp.le.s32.totalorder %s7916_s20, 0 }
 0x3e5   : > { %s5420_s26 = smov (!%p4585_p13), %s4315_s25   ;;  %s5424_s27 = smov (!%p4585_p13), %s4313_s24  }
 0x3e6   : > { %4406 = sbr.rel (%p4585_p13) target bundleno = 1015 (0x3f7), region = 131  ;;  %s5428_s28 = smov (!%p4585_p13), 0  }
 0x3e7   : > { %s5432_s5 = smov (!%p4585_p13), 0  }
 0x3ed LB: >> { %v4325_v47 = vld [vmem:[%s5426_s27] sm:$0xff]  ;;  %s4327_s29 = sadd.s32 1, %s5430_s28  ;;  %s4319_s5 = sadd.s32 1, %s5434_s5   ;;  %s5434_s5 = sphi %s5432_s5, %s4319_s5   ;;  %s5430_s28 = sphi %s5428_s28, %s5429_s28   ;;  %s5426_s27 = sphi %s5424_s27, %s4332_s27   ;;  %s5422_s26 = sphi %s5420_s26, %s4333_s26  }
 0x3ee   : >> { %4326 = vst [vmem:[%s5422_s26] sm:$0xff] %v4325_v47  ;;  %p4328_p0 = scmp.ge.s32.totalorder %s4327_s29, %s7916_s20  ;;  %p4318_p1 = scmp.ge.s32.totalorder %s4319_s5, %s7916_s20 }
 0x3f0   : >> { %s8117_s29 = smov (%p4328_p0, %s4327_s29), 0  ;;  %4321 = sbr.rel (!%p4318_p1) target bundleno = 1005 (0x3ed), region = 137 }
 0x3f1   : >> { %s4586_s14 = sshll.u32 %s8117_s29, 3  ;;  %s5429_s28 = smov %s8117_s29  }
 0x3f2   : >> { %s4332_s27 = scalar_lea.vmem %s4313_s24, %s4586_s14 [#allocation2]   ;;  %s4333_s26 = scalar_lea.vmem %s4315_s25, %s4586_s14  }
 0x3f7 PF: > { %p11_p2 = scmp.ge.s32.totalorder %s5477_s19, 4   ;;  %s8109_s15 = smov %s5398_s16 }
 0x3f8   : > { %s8110_s16 = smov %s5485_s22  ;;  %s8111_s17 = smov %s5477_s19 }
 0x3f9   :  { %13 = sbr.rel (!%p11_p2) target bundleno = 2 (0x2), region = 148 }

// kernel: critic_forward.7
= control target key start
LH: loop header
LB: loop body
LE: loop exit
PB: predicated region body
PF: predicated region fallthrough
CT: control target
= control target key end

     0   :  { %v2227_v0 = vmov 0.0|0.0   ;;  %vm571_vm0 = vcmask 1043456   ;;  %vm450_vm1 = vcmask 31744   ;;  %vm1769_vm2 = vcmask 392192   ;;  %s3899_s1 = inlined_call_operand.vmem [shape: f32[900,48], index: 1, kind: input, shape index: {}]   ;;  %s3900_s0 = inlined_call_operand.vmem [shape: f32[320,900], index: 0, kind: input, shape index: {}]   ;;  %s3901_s2 = inlined_call_operand.vmem [shape: f32[1,48], index: 2, kind: input, shape index: {}]   ;;  %s3902_s3 = inlined_call_operand.vmem [shape: f32[1,48], index: 3, kind: input, shape index: {}]   ;;  %s3903_s4 = inlined_call_operand.vmem [shape: f32[320,48], index: 4, kind: output, shape index: {}]  }
   0x1   :  { %1857 = vmatprep.subr.bf16.mxu1 %v2227_v0  ;;  %1953 = vmatprep.subr.bf16.mxu0 %v2227_v0  ;;  %v337_v1 = vld [vmem:[%s3899_s1] sm:$0xff]  ;;  %v338_v2 = vld [vmem:[%s3899_s1 + $0x8] sm:$0xff]  ;;  %v339_v6 = vld [vmem:[%s3899_s1 + $0x10] sm:$0xff] }
   0x2   :  { %v401_v3 = vld [vmem:[%s3899_s1 + $0x200] sm:$0xff]  ;;  %v1858_v4 = vpack.c.bf16 %v338_v2, %v337_v1  ;;  %v402_v5 = vld [vmem:[%s3899_s1 + $0x208] sm:$0xff]  ;;  %v340_v7 = vld [vmem:[%s3899_s1 + $0x18] sm:$0xff] }
   0x3   :  { %v1954_v8 = vpack.c.bf16 %v402_v5, %v401_v3  ;;  %v403_v9 = vld [vmem:[%s3899_s1 + $0x210] sm:$0xff]  ;;  %v404_v10 = vld [vmem:[%s3899_s1 + $0x218] sm:$0xff]  ;;  %v1861_v11 = vpack.c.bf16 %v340_v7, %v339_v6  ;;  %v341_v13 = vld [vmem:[%s3899_s1 + $0x20] sm:$0xff] }
   0x4   :  { %1859 = vmatpush1.bf16.msra.mxu1 %v1858_v4  ;;  %v1957_v12 = vpack.c.bf16 %v404_v10, %v403_v9  ;;  %v342_v14 = vld [vmem:[%s3899_s1 + $0x28] sm:$0xff]  ;;  %v405_v15 = vld [vmem:[%s3899_s1 + $0x220] sm:$0xff]  ;;  %v343_v19 = vld [vmem:[%s3899_s1 + $0x30] sm:$0xff] }
   0x5   :  { %1955 = vmatpush1.bf16.msra.mxu0 %v1954_v8  ;;  %1860 = vmatprep.subr.bf16.mxu1 %v2227_v0  ;;  %v406_v16 = vld [vmem:[%s3899_s1 + $0x228] sm:$0xff]  ;;  %v1864_v17 = vpack.c.bf16 %v342_v14, %v341_v13  ;;  %v344_v20 = vld [vmem:[%s3899_s1 + $0x38] sm:$0xff]  ;;  %v407_v21 = vld [vmem:[%s3899_s1 + $0x230] sm:$0xff] }
   0x6   :  { %1956 = vmatprep.subr.bf16.mxu0 %v2227_v0  ;;  %v1960_v18 = vpack.c.bf16 %v406_v16, %v405_v15  ;;  %v408_v22 = vld [vmem:[%s3899_s1 + $0x238] sm:$0xff]  ;;  %v1867_v23 = vpack.c.bf16 %v344_v20, %v343_v19  ;;  %v345_v25 = vld [vmem:[%s3899_s1 + $0x40] sm:$0xff]  ;;  %v346_v26 = vld [vmem:[%s3899_s1 + $0x48] sm:$0xff] }
   0x7   :  { %v1963_v24 = vpack.c.bf16 %v408_v22, %v407_v21  ;;  %v409_v27 = vld [vmem:[%s3899_s1 + $0x240] sm:$0xff]  ;;  %v410_v28 = vld [vmem:[%s3899_s1 + $0x248] sm:$0xff]  ;;  %v1870_v29 = vpack.c.bf16 %v346_v26, %v345_v25  ;;  %v347_v31 = vld [vmem:[%s3899_s1 + $0x50] sm:$0xff] }
   0x8   :  { %1862 = vmatpush1.bf16.msra.mxu1 %v1861_v11  ;;  %v1966_v30 = vpack.c.bf16 %v410_v28, %v409_v27  ;;  %v348_v32 = vld [vmem:[%s3899_s1 + $0x58] sm:$0xff]  ;;  %v411_v33 = vld [vmem:[%s3899_s1 + $0x250] sm:$0xff]  ;;  %v349_v37 = vld [vmem:[%s3899_s1 + $0x60] sm:$0xff] }
   0x9   :  { %1958 = vmatpush1.bf16.msra.mxu0 %v1957_v12  ;;  %1863 = vmatprep.subr.bf16.mxu1 %v2227_v0  ;;  %v412_v34 = vld [vmem:[%s3899_s1 + $0x258] sm:$0xff]  ;;  %v1873_v35 = vpack.c.bf16 %v348_v32, %v347_v31  ;;  %v350_v38 = vld [vmem:[%s3899_s1 + $0x68] sm:$0xff]  ;;  %v413_v39 = vld [vmem:[%s3899_s1 + $0x260] sm:$0xff] }
   0xa   :  { %1959 = vmatprep.subr.bf16.mxu0 %v2227_v0  ;;  %v1969_v36 = vpack.c.bf16 %v412_v34, %v411_v33  ;;  %v414_v40 = vld [vmem:[%s3899_s1 + $0x268] sm:$0xff]  ;;  %v1876_v43 = vpack.c.bf16 %v350_v38, %v349_v37  ;;  %v351_v45 = vld [vmem:[%s3899_s1 + $0x70] sm:$0xff]  ;;  %v352_v46 = vld [vmem:[%s3899_s1 + $0x78] sm:$0xff] }
   0xb   :  { %v18_v41 = vld [vmem:[%s3900_s0 + $0x8] sm:$0xff]  ;;  %v1972_v44 = vpack.c.bf16 %v414_v40, %v413_v39  ;;  %v415_v47 = vld [vmem:[%s3899_s1 + $0x270] sm:$0xff]  ;;  %v416_v48 = vld [vmem:[%s3899_s1 + $0x278] sm:$0xff]  ;;  %v1879_v49 = vpack.c.bf16 %v352_v46, %v351_v45 }
   0xc   :  { %1865 = vmatpush1.bf16.msra.mxu1 %v1864_v17  ;;  %v22_v42 = vld [vmem:[%s3900_s0 + $0x28] sm:$0xff]  ;;  %639 = vmatprep.mubr.f32.mxu1 %v18_v41  ;;  %v1975_v50 = vpack.c.bf16 %v416_v48, %v415_v47  ;;  %v353_v51 = vld [vmem:[%s3899_s1 + $0x80] sm:$0xff]  ;;  %v355_v57 = vld [vmem:[%s3899_s1 + $0x90] sm:$0xff] }
   0xd   :  { %1961 = vmatpush1.bf16.msra.mxu0 %v1960_v18  ;;  %1866 = vmatprep.subr.bf16.mxu1 %v2227_v0  ;;  %v354_v52 = vld [vmem:[%s3899_s1 + $0x88] sm:$0xff]  ;;  %v417_v53 = vld [vmem:[%s3899_s1 + $0x280] sm:$0xff]  ;;  %v356_v58 = vld [vmem:[%s3899_s1 + $0x98] sm:$0xff] }
   0xe   :  { %1962 = vmatprep.subr.bf16.mxu0 %v2227_v0  ;;  %1169 = vmatprep.mubr.f32.mxu0 %v22_v42  ;;  %v418_v54 = vld [vmem:[%s3899_s1 + $0x288] sm:$0xff]  ;;  %v1882_v55 = vpack.c.bf16 %v354_v52, %v353_v51  ;;  %v419_v59 = vld [vmem:[%s3899_s1 + $0x290] sm:$0xff]  ;;  %v420_v60 = vld [vmem:[%s3899_s1 + $0x298] sm:$0xff]  ;;  %v1885_v61 = vpack.c.bf16 %v356_v58, %v355_v57 }
   0xf   :  { %v1978_v56 = vpack.c.bf16 %v418_v54, %v417_v53  ;;  %v1981_v62 = vpack.c.bf16 %v420_v60, %v419_v59  ;;  %v357_v63 = vld [vmem:[%s3899_s1 + $0xa0] sm:$0xff]  ;;  %v358_v1 = vld [vmem:[%s3899_s1 + $0xa8] sm:$0xff]  ;;  %v359_v6 = vld [vmem:[%s3899_s1 + $0xb0] sm:$0xff] }
  0x10   :  { %1868 = vmatpush1.bf16.msra.mxu1 %v1867_v23  ;;  %v421_v2 = vld [vmem:[%s3899_s1 + $0x2a0] sm:$0xff]  ;;  %v422_v3 = vld [vmem:[%s3899_s1 + $0x2a8] sm:$0xff]  ;;  %v1888_v4 = vpack.c.bf16 %v358_v1, %v357_v63  ;;  %v360_v7 = vld [vmem:[%s3899_s1 + $0xb8] sm:$0xff] }
  0x11   :  { %1964 = vmatpush1.bf16.msra.mxu0 %v1963_v24  ;;  %1869 = vmatprep.subr.bf16.mxu1 %v2227_v0  ;;  %v1984_v5 = vpack.c.bf16 %v422_v3, %v421_v2  ;;  %v423_v8 = vld [vmem:[%s3899_s1 + $0x2b0] sm:$0xff]  ;;  %v424_v9 = vld [vmem:[%s3899_s1 + $0x2b8] sm:$0xff]  ;;  %v1891_v10 = vpack.c.bf16 %v360_v7, %v359_v6  ;;  %v361_v12 = vld [vmem:[%s3899_s1 + $0xc0] sm:$0xff] }
  0x12   :  { %1965 = vmatprep.subr.bf16.mxu0 %v2227_v0  ;;  %v1987_v11 = vpack.c.bf16 %v424_v9, %v423_v8  ;;  %v362_v13 = vld [vmem:[%s3899_s1 + $0xc8] sm:$0xff]  ;;  %v425_v14 = vld [vmem:[%s3899_s1 + $0x2c0] sm:$0xff]  ;;  %v363_v18 = vld [vmem:[%s3899_s1 + $0xd0] sm:$0xff] }
  0x13   :  { %v426_v15 = vld [vmem:[%s3899_s1 + $0x2c8] sm:$0xff]  ;;  %v1894_v16 = vpack.c.bf16 %v362_v13, %v361_v12  ;;  %v364_v19 = vld [vmem:[%s3899_s1 + $0xd8] sm:$0xff]  ;;  %v427_v20 = vld [vmem:[%s3899_s1 + $0x2d0] sm:$0xff] }
  0x14   :  { %1871 = vmatpush1.bf16.msra.mxu1 %v1870_v29  ;;  %v1990_v17 = vpack.c.bf16 %v426_v15, %v425_v14  ;;  %v428_v21 = vld [vmem:[%s3899_s1 + $0x2d8] sm:$0xff]  ;;  %v1897_v22 = vpack.c.bf16 %v364_v19, %v363_v18  ;;  %v365_v24 = vld [vmem:[%s3899_s1 + $0xe0] sm:$0xff]  ;;  %v366_v25 = vld [vmem:[%s3899_s1 + $0xe8] sm:$0xff] }
  0x15   :  { %1967 = vmatpush1.bf16.msra.mxu0 %v1966_v30  ;;  %1872 = vmatprep.subr.bf16.mxu1 %v2227_v0  ;;  %v1993_v23 = vpack.c.bf16 %v428_v21, %v427_v20  ;;  %v429_v26 = vld [vmem:[%s3899_s1 + $0x2e0] sm:$0xff]  ;;  %v430_v27 = vld [vmem:[%s3899_s1 + $0x2e8] sm:$0xff]  ;;  %v1900_v28 = vpack.c.bf16 %v366_v25, %v365_v24  ;;  %v367_v30 = vld [vmem:[%s3899_s1 + $0xf0] sm:$0xff] }
  0x16   :  { %1968 = vmatprep.subr.bf16.mxu0 %v2227_v0  ;;  %v1996_v29 = vpack.c.bf16 %v430_v27, %v429_v26  ;;  %v368_v31 = vld [vmem:[%s3899_s1 + $0xf8] sm:$0xff]  ;;  %v431_v32 = vld [vmem:[%s3899_s1 + $0x2f0] sm:$0xff]  ;;  %v370_v37 = vld [vmem:[%s3899_s1 + $0x108] sm:$0xff] }
  0x17   :  { %v432_v33 = vld [vmem:[%s3899_s1 + $0x2f8] sm:$0xff]  ;;  %v1903_v34 = vpack.c.bf16 %v368_v31, %v367_v30  ;;  %v433_v38 = vld [vmem:[%s3899_s1 + $0x300] sm:$0xff]  ;;  %v434_v39 = vld [vmem:[%s3899_s1 + $0x308] sm:$0xff] }
  0x18   :  { %1874 = vmatpush1.bf16.msra.mxu1 %v1873_v35  ;;  %v1999_v35 = vpack.c.bf16 %v432_v33, %v431_v32  ;;  %v17_v40 = vld [vmem:[%s3900_s0] sm:$0xff]  ;;  %v371_v45 = vld [vmem:[%s3899_s1 + $0x110] sm:$0xff]  ;;  %v372_v46 = vld [vmem:[%s3899_s1 + $0x118] sm:$0xff] }
  0x19   :  { %1970 = vmatpush1.bf16.msra.mxu0 %v1969_v36  ;;  %1875 = vmatprep.subr.bf16.mxu1 %v2227_v0  ;;  %v369_v36 = vld [vmem:[%s3899_s1 + $0x100] sm:$0xff]  ;;  %v30_v47 = vld [vmem:[%s3900_s0 + $0x68] sm:$0xff]  ;;  %v435_v48 = vld [vmem:[%s3899_s1 + $0x310] sm:$0xff]  ;;  %v1909_v53 = vpack.c.bf16 %v372_v46, %v371_v45 }
  0x1a   :  { %1971 = vmatprep.subr.bf16.mxu0 %v2227_v0  ;;  %v1906_v41 = vpack.c.bf16 %v370_v37, %v369_v36  ;;  %v21_v42 = vld [vmem:[%s3900_s0 + $0x20] sm:$0xff]  ;;  %v34_v52 = vld [vmem:[%s3900_s0 + $0x88] sm:$0xff]  ;;  %v375_v2 = vld [vmem:[%s3899_s1 + $0x130] sm:$0xff] }
  0x1b   :  { %v29_v51 = vld [vmem:[%s3900_s0 + $0x60] sm:$0xff]  ;;  %v38_v54 = vld [vmem:[%s3900_s0 + $0xa8] sm:$0xff]  ;;  %v376_v3 = vld [vmem:[%s3899_s1 + $0x138] sm:$0xff] }
  0x1c   :  { %1877 = vmatpush1.bf16.msra.mxu1 %v1876_v43  ;;  %v2002_v43 = vpack.c.bf16 %v434_v39, %v433_v38  ;;  %v374_v57 = vld [vmem:[%s3899_s1 + $0x128] sm:$0xff]  ;;  %v437_v58 = vld [vmem:[%s3899_s1 + $0x320] sm:$0xff]  ;;  %v440_v6 = vld [vmem:[%s3899_s1 + $0x338] sm:$0xff] }
  0x1d   :  { %1973 = vmatpush1.bf16.msra.mxu0 %v1972_v44  ;;  %1878 = vmatprep.subr.bf16.mxu1 %v2227_v0  ;;  %v26_v44 = vld [vmem:[%s3900_s0 + $0x48] sm:$0xff]  ;;  %v33_v60 = vld [vmem:[%s3900_s0 + $0x80] sm:$0xff]  ;;  %v443_v25 = vld [vmem:[%s3899_s1 + $0x350] sm:$0xff] }
  0x1e   :  { %1974 = vmatprep.subr.bf16.mxu0 %v2227_v0  ;;  %v438_v59 = vld [vmem:[%s3899_s1 + $0x328] sm:$0xff]  ;;  %v41_v7 = vld [vmem:[%s3900_s0 + $0xc0] sm:$0xff]  ;;  %v444_v26 = vld [vmem:[%s3899_s1 + $0x358] sm:$0xff] }
  0x1f   :  { %v46_v1 = vld [vmem:[%s3900_s0 + $0xe8] sm:$0xff]  ;;  %v45_v8 = vld [vmem:[%s3900_s0 + $0xe0] sm:$0xff]  ;;  %v447_v45 = vld [vmem:[%s3899_s1 + $0x370] sm:$0xff] }
  0x20   :  { %1880 = vmatpush1.bf16.msra.mxu1 %v1879_v49  ;;  %v436_v49 = vld [vmem:[%s3899_s1 + $0x318] sm:$0xff]  ;;  %v50_v9 = vld [vmem:[%s3900_s0 + $0x108] sm:$0xff]  ;;  %v377_v12 = vld [vmem:[%s3899_s1 + $0x140] sm:$0xff] }
  0x21   :  { %1976 = vmatpush1.bf16.msra.mxu0 %v1975_v50  ;;  %1881 = vmatprep.subr.bf16.mxu1 %v2227_v0  ;;  %v25_v50 = vld [vmem:[%s3900_s0 + $0x40] sm:$0xff]  ;;  %v378_v13 = vld [vmem:[%s3899_s1 + $0x148] sm:$0xff]  ;;  %v448_v46 = vld [vmem:[%s3899_s1 + $0x378] sm:$0xff] }
  0x22   :  { %1977 = vmatprep.subr.bf16.mxu0 %v2227_v0  ;;  %v441_v15 = vld [vmem:[%s3899_s1 + $0x340] sm:$0xff]  ;;  %v58_v19 = vld [vmem:[%s3900_s0 + $0x148] sm:$0xff]  ;;  %v1918_v20 = vpack.c.bf16 %v378_v13, %v377_v12  ;;  %v391_v13 = vld [vmem:[%s3899_s1 + $0x1b0] sm:$0xff] }
  0x23   :  { %v53_v18 = vld [vmem:[%s3900_s0 + $0x120] sm:$0xff]  ;;  %v62_v21 = vld [vmem:[%s3900_s0 + $0x168] sm:$0xff] }
  0x24   :  { %1883 = vmatpush1.bf16.msra.mxu1 %v1882_v55  ;;  %v2005_v55 = vpack.c.bf16 %v436_v49, %v435_v48  ;;  %v57_v27 = vld [vmem:[%s3900_s0 + $0x140] sm:$0xff]  ;;  %v70_v31 = vld [vmem:[%s3900_s0 + $0x1a8] sm:$0xff] }
  0x25   :  { %1979 = vmatpush1.bf16.msra.mxu0 %v1978_v56  ;;  %1884 = vmatprep.subr.bf16.mxu1 %v2227_v0  ;;  %v373_v56 = vld [vmem:[%s3899_s1 + $0x120] sm:$0xff]  ;;  %v382_v33 = vld [vmem:[%s3899_s1 + $0x168] sm:$0xff] }
  0x26   :  { %1980 = vmatprep.subr.bf16.mxu0 %v2227_v0  ;;  %v1912_v63 = vpack.c.bf16 %v374_v57, %v373_v56  ;;  %v381_v32 = vld [vmem:[%s3899_s1 + $0x160] sm:$0xff]  ;;  %v446_v36 = vld [vmem:[%s3899_s1 + $0x368] sm:$0xff] }
  0x27   :  { %v65_v37 = vld [vmem:[%s3900_s0 + $0x180] sm:$0xff]  ;;  %v74_v39 = vld [vmem:[%s3900_s0 + $0x1c8] sm:$0xff] }
  0x28   :  { %1886 = vmatpush1.bf16.msra.mxu1 %v1885_v61  ;;  %v37_v61 = vld [vmem:[%s3900_s0 + $0xa0] sm:$0xff]  ;;  %v82_v49 = vld [vmem:[%s3900_s0 + $0x208] sm:$0xff] }
  0x29   :  { %1982 = vmatpush1.bf16.msra.mxu0 %v1981_v62  ;;  %1887 = vmatprep.subr.bf16.mxu1 %v2227_v0  ;;  %v42_v62 = vld [vmem:[%s3900_s0 + $0xc8] sm:$0xff]  ;;  %v69_v38 = vld [vmem:[%s3900_s0 + $0x1a0] sm:$0xff] }
  0x2a   :  { %1983 = vmatprep.subr.bf16.mxu0 %v2227_v0  ;;  %v77_v48 = vld [vmem:[%s3900_s0 + $0x1e0] sm:$0xff]  ;;  %v90_v57 = vld [vmem:[%s3900_s0 + $0x248] sm:$0xff] }
  0x2b   :  { %v85_v56 = vld [vmem:[%s3900_s0 + $0x220] sm:$0xff]  ;;  %v110_v12 = vld [vmem:[%s3900_s0 + $0x2e8] sm:$0xff] }
  0x2c   :  { %1889 = vmatpush1.bf16.msra.mxu1 %v1888_v4  ;;  %v2008_v4 = vpack.c.bf16 %v438_v59, %v437_v58  ;;  %v94_v59 = vld [vmem:[%s3900_s0 + $0x268] sm:$0xff] }
  0x2d   :  { %1985 = vmatpush1.bf16.msra.mxu0 %v1984_v5  ;;  %1890 = vmatprep.subr.bf16.mxu1 %v2227_v0  ;;  %v439_v5 = vld [vmem:[%s3899_s1 + $0x330] sm:$0xff] }
  0x2e   :  { %1986 = vmatprep.subr.bf16.mxu0 %v2227_v0  ;;  %v2011_v14 = vpack.c.bf16 %v440_v6, %v439_v5  ;;  %v102_v5 = vld [vmem:[%s3900_s0 + $0x2a8] sm:$0xff]  ;;  %v389_v6 = vld [vmem:[%s3899_s1 + $0x1a0] sm:$0xff] }
  0x30   :  { %1892 = vmatpush1.bf16.msra.mxu1 %v1891_v10  ;;  %v1915_v10 = vpack.c.bf16 %v376_v3, %v375_v2  ;;  %v93_v2 = vld [vmem:[%s3900_s0 + $0x260] sm:$0xff]  ;;  %v98_v3 = vld [vmem:[%s3900_s0 + $0x288] sm:$0xff] }
  0x31   :  { %1988 = vmatpush1.bf16.msra.mxu0 %v1987_v11  ;;  %1893 = vmatprep.subr.bf16.mxu1 %v2227_v0  ;;  %v54_v11 = vld [vmem:[%s3900_s0 + $0x128] sm:$0xff] }
  0x32   :  { %1989 = vmatprep.subr.bf16.mxu0 %v2227_v0 }
  0x34   :  { %1895 = vmatpush1.bf16.msra.mxu1 %v1894_v16  ;;  %v442_v16 = vld [vmem:[%s3899_s1 + $0x348] sm:$0xff] }
  0x35   :  { %1991 = vmatpush1.bf16.msra.mxu0 %v1990_v17  ;;  %1896 = vmatprep.subr.bf16.mxu1 %v2227_v0  ;;  %v49_v17 = vld [vmem:[%s3900_s0 + $0x100] sm:$0xff]  ;;  %v2014_v24 = vpack.c.bf16 %v442_v16, %v441_v15 }
  0x36   :  { %1992 = vmatprep.subr.bf16.mxu0 %v2227_v0  ;;  %v105_v15 = vld [vmem:[%s3900_s0 + $0x2c0] sm:$0xff] }
  0x37   :  { %v109_v16 = vld [vmem:[%s3900_s0 + $0x2e0] sm:$0xff] }
  0x38   :  { %1898 = vmatpush1.bf16.msra.mxu1 %v1897_v22  ;;  %v379_v22 = vld [vmem:[%s3899_s1 + $0x150] sm:$0xff] }
  0x39   :  { %1994 = vmatpush1.bf16.msra.mxu0 %v1993_v23  ;;  %1899 = vmatprep.subr.bf16.mxu1 %v2227_v0  ;;  %v380_v23 = vld [vmem:[%s3899_s1 + $0x158] sm:$0xff] }
  0x3a   :  { %1995 = vmatprep.subr.bf16.mxu0 %v2227_v0  ;;  %v1921_v30 = vpack.c.bf16 %v380_v23, %v379_v22  ;;  %v113_v22 = vld [vmem:[%s3900_s0 + $0x300] sm:$0xff] }
  0x3b   :  { %v117_v23 = vld [vmem:[%s3900_s0 + $0x320] sm:$0xff] }
  0x3c   :  { %1901 = vmatpush1.bf16.msra.mxu1 %v1900_v28  ;;  %v61_v28 = vld [vmem:[%s3900_s0 + $0x160] sm:$0xff] }
  0x3d   :  { %1997 = vmatpush1.bf16.msra.mxu0 %v1996_v29  ;;  %1902 = vmatprep.subr.bf16.mxu1 %v2227_v0  ;;  %v66_v29 = vld [vmem:[%s3900_s0 + $0x188] sm:$0xff] }
  0x3e   :  { %1998 = vmatprep.subr.bf16.mxu0 %v2227_v0 }
  0x40   :  { %1904 = vmatpush1.bf16.msra.mxu1 %v1903_v34  ;;  %v2017_v34 = vpack.c.bf16 %v444_v26, %v443_v25  ;;  %v126_v26 = vld [vmem:[%s3900_s0 + $0x368] sm:$0xff] }
  0x41   :  { %2000 = vmatpush1.bf16.msra.mxu0 %v1999_v35  ;;  %1905 = vmatprep.subr.bf16.mxu1 %v2227_v0  ;;  %v445_v35 = vld [vmem:[%s3899_s1 + $0x360] sm:$0xff] }
  0x42   :  { %2001 = vmatprep.subr.bf16.mxu0 %v2227_v0 }
  0x43   :  { %640 = vmatmul.mubr.f32.vlgmr.msra.gmra.mrb[0].mxu1 %v17_v40  ;;  %v1924_v40 = vpack.c.bf16 %v382_v33, %v381_v32  ;;  %v134_v33 = vld [vmem:[%s3900_s0 + $0x3a8] sm:$0xff] }
  0x44   :  { %1170 = vmatmul.mubr.f32.vlgmr.msra.gmra.mrb[0].mxu0 %v21_v42  ;;  %1907 = vmatpush1.bf16.msra.mxu1 %v1906_v41  ;;  %v78_v41 = vld [vmem:[%s3900_s0 + $0x1e8] sm:$0xff]  ;;  %v383_v42 = vld [vmem:[%s3899_s1 + $0x170] sm:$0xff] }
  0x45   :  { %2003 = vmatpush1.bf16.msra.mxu0 %v2002_v43  ;;  %644 = vmatprep.mubr.f32.mxu1 %v26_v44  ;;  %v384_v43 = vld [vmem:[%s3899_s1 + $0x178] sm:$0xff]  ;;  %v2020_v44 = vpack.c.bf16 %v446_v36, %v445_v35  ;;  %v398_v35 = vld [vmem:[%s3899_s1 + $0x1e8] sm:$0xff]  ;;  %v129_v36 = vld [vmem:[%s3900_s0 + $0x380] sm:$0xff] }
  0x46   :  { %1174 = vmatprep.mubr.f32.mxu0 %v30_v47  ;;  %1908 = vmatprep.subr.bf16.mxu1 %v2227_v0  ;;  %v73_v47 = vld [vmem:[%s3900_s0 + $0x1c0] sm:$0xff] }
  0x47   :  { %645 = vmatmul.mubr.f32.gmra.mrb[2].mxu1 %v25_v50  ;;  %2004 = vmatprep.subr.bf16.mxu0 %v2227_v0  ;;  %v1927_v50 = vpack.c.bf16 %v384_v43, %v383_v42  ;;  %v400_v42 = vld [vmem:[%s3899_s1 + $0x1f8] sm:$0xff]  ;;  %v137_v43 = vld [vmem:[%s3900_s0 + $0x3c0] sm:$0xff] }
  0x48   :  { %1175 = vmatmul.mubr.f32.gmra.mrb[2].mxu0 %v29_v51  ;;  %649 = vmatprep.mubr.f32.mxu1 %v34_v52  ;;  %v86_v51 = vld [vmem:[%s3900_s0 + $0x228] sm:$0xff]  ;;  %v385_v52 = vld [vmem:[%s3899_s1 + $0x180] sm:$0xff] }
  0x49   :  { %1179 = vmatprep.mubr.f32.mxu0 %v38_v54  ;;  %1910 = vmatpush1.bf16.msra.mxu1 %v1909_v53  ;;  %v386_v53 = vld [vmem:[%s3899_s1 + $0x188] sm:$0xff]  ;;  %v2023_v54 = vpack.c.bf16 %v448_v46, %v447_v45 }
  0x4a   :  { %2006 = vmatpush1.bf16.msra.mxu0 %v2005_v55  ;;  %1911 = vmatprep.subr.bf16.mxu1 %v2227_v0  ;;  %v81_v55 = vld [vmem:[%s3900_s0 + $0x200] sm:$0xff]  ;;  %v1930_v58 = vpack.c.bf16 %v386_v53, %v385_v52  ;;  %v146_v45 = vld [vmem:[%s3900_s0 + $0x408] sm:$0xff] }
  0x4b   :  { %650 = vmatmul.mubr.f32.gmra.mrb[4].mxu1 %v33_v60  ;;  %2007 = vmatprep.subr.bf16.mxu0 %v2227_v0  ;;  %v387_v60 = vld [vmem:[%s3899_s1 + $0x190] sm:$0xff]  ;;  %v157_v52 = vld [vmem:[%s3900_s0 + $0x460] sm:$0xff]  ;;  %v162_v53 = vld [vmem:[%s3900_s0 + $0x488] sm:$0xff] }
  0x4c   :  { %1180 = vmatmul.mubr.f32.gmra.mrb[4].mxu0 %v37_v61  ;;  %654 = vmatprep.mubr.f32.mxu1 %v42_v62  ;;  %v388_v61 = vld [vmem:[%s3899_s1 + $0x198] sm:$0xff]  ;;  %v2228_v62 = vmov 0.0  }
  0x4d   :  { %1184 = vmatprep.mubr.f32.mxu0 %v46_v1  ;;  %1913 = vmatpush1.bf16.msra.mxu1 %v1912_v63  ;;  %v449_v63 = vld [vmem:[%s3899_s1 + $0x380] sm:$0xf] }
  0x4e   :  { %1914 = vmatprep.subr.bf16.mxu1 %v2227_v0  ;;  %2009 = vmatpush1.bf16.msra.mxu0 %v2008_v4  ;;  %v89_v1 = vld [vmem:[%s3900_s0 + $0x240] sm:$0xff]  ;;  %v1933_v4 = vpack.c.bf16 %v388_v61, %v387_v60  ;;  %v178_v61 = vld [vmem:[%s3900_s0 + $0x508] sm:$0xff] }
  0x4f   :  { %655 = vmatmul.mubr.f32.gmra.mrb[6].mxu1 %v41_v7  ;;  %2010 = vmatprep.subr.bf16.mxu0 %v2227_v0  ;;  %v390_v7 = vld [vmem:[%s3899_s1 + $0x1a8] sm:$0xff]  ;;  %v173_v60 = vld [vmem:[%s3900_s0 + $0x4e0] sm:$0xff] }
  0x50   :  { %1185 = vmatmul.mubr.f32.gmra.mrb[6].mxu0 %v45_v8  ;;  %659 = vmatprep.mubr.f32.mxu1 %v50_v9  ;;  %v97_v8 = vld [vmem:[%s3900_s0 + $0x280] sm:$0xff] }
  0x51   :  { %1189 = vmatprep.mubr.f32.mxu0 %v54_v11  ;;  %1916 = vmatpush1.bf16.msra.mxu1 %v1915_v10  ;;  %v101_v9 = vld [vmem:[%s3900_s0 + $0x2a0] sm:$0xff]  ;;  %v106_v10 = vld [vmem:[%s3900_s0 + $0x2c8] sm:$0xff]  ;;  %v1936_v11 = vpack.c.bf16 %v390_v7, %v389_v6 }
  0x52   :  { %1917 = vmatprep.subr.bf16.mxu1 %v2227_v0  ;;  %2012 = vmatpush1.bf16.msra.mxu0 %v2011_v14  ;;  %v392_v14 = vld [vmem:[%s3899_s1 + $0x1b8] sm:$0xff]  ;;  %v194_v6 = vld [vmem:[%s3900_s0 + $0x588] sm:$0xff] }
  0x53   :  { %660 = vmatmul.mubr.f32.gmra.mrb[8].mxu1 %v49_v17  ;;  %2013 = vmatprep.subr.bf16.mxu0 %v2227_v0  ;;  %v114_v17 = vld [vmem:[%s3900_s0 + $0x308] sm:$0xff] }
  0x54   :  { %1190 = vmatmul.mubr.f32.gmra.mrb[8].mxu0 %v53_v18  ;;  %664 = vmatprep.mubr.f32.mxu1 %v58_v19  ;;  %v1939_v18 = vpack.c.bf16 %v392_v14, %v391_v13  ;;  %v118_v19 = vld [vmem:[%s3900_s0 + $0x328] sm:$0xff]  ;;  %v205_v13 = vld [vmem:[%s3900_s0 + $0x5e0] sm:$0xff] }
  0x55   :  { %1194 = vmatprep.mubr.f32.mxu0 %v62_v21  ;;  %1919 = vmatpush1.bf16.msra.mxu1 %v1918_v20  ;;  %v393_v20 = vld [vmem:[%s3899_s1 + $0x1c0] sm:$0xff]  ;;  %v394_v21 = vld [vmem:[%s3899_s1 + $0x1c8] sm:$0xff] }
  0x56   :  { %1920 = vmatprep.subr.bf16.mxu1 %v2227_v0  ;;  %2015 = vmatpush1.bf16.msra.mxu0 %v2014_v24  ;;  %v122_v24 = vld [vmem:[%s3900_s0 + $0x348] sm:$0xff]  ;;  %v1942_v25 = vpack.c.bf16 %v394_v21, %v393_v20  ;;  %v217_v20 = vld [vmem:[%s3900_s0 + $0x640] sm:$0xff] }
  0x57   :  { %665 = vmatmul.mubr.f32.gmra.mrb[10].mxu1 %v57_v27  ;;  %2016 = vmatprep.subr.bf16.mxu0 %v2227_v0  ;;  %v395_v27 = vld [vmem:[%s3899_s1 + $0x1d0] sm:$0xff]  ;;  %v198_v7 = vld [vmem:[%s3900_s0 + $0x5a8] sm:$0xff]  ;;  %v221_v21 = vld [vmem:[%s3900_s0 + $0x660] sm:$0xff] }
  0x58   :  { %1195 = vmatmul.mubr.f32.gmra.mrb[10].mxu0 %v61_v28  ;;  %669 = vmatprep.mubr.f32.mxu1 %v66_v29  ;;  %v396_v28 = vld [vmem:[%s3899_s1 + $0x1d8] sm:$0xff]  ;;  %v121_v29 = vld [vmem:[%s3900_s0 + $0x340] sm:$0xff]  ;;  %v210_v14 = vld [vmem:[%s3900_s0 + $0x608] sm:$0xff] }
  0x59   :  { %1199 = vmatprep.mubr.f32.mxu0 %v70_v31  ;;  %1922 = vmatpush1.bf16.msra.mxu1 %v1921_v30  ;;  %v125_v30 = vld [vmem:[%s3900_s0 + $0x360] sm:$0xff]  ;;  %v130_v31 = vld [vmem:[%s3900_s0 + $0x388] sm:$0xff]  ;;  %v1945_v32 = vpack.c.bf16 %v396_v28, %v395_v27 }
  0x5a   :  { %1923 = vmatprep.subr.bf16.mxu1 %v2227_v0  ;;  %2018 = vmatpush1.bf16.msra.mxu0 %v2017_v34  ;;  %v397_v34 = vld [vmem:[%s3899_s1 + $0x1e0] sm:$0xff]  ;;  %v238_v27 = vld [vmem:[%s3900_s0 + $0x6e8] sm:$0xff] }
  0x5b   :  { %670 = vmatmul.mubr.f32.gmra.mrb[12].mxu1 %v65_v37  ;;  %2019 = vmatprep.subr.bf16.mxu0 %v2227_v0  ;;  %v133_v37 = vld [vmem:[%s3900_s0 + $0x3a0] sm:$0xff] }
  0x5c   :  { %1200 = vmatmul.mubr.f32.gmra.mrb[12].mxu0 %v69_v38  ;;  %674 = vmatprep.mubr.f32.mxu1 %v74_v39  ;;  %v138_v38 = vld [vmem:[%s3900_s0 + $0x3c8] sm:$0xff]  ;;  %v1948_v39 = vpack.c.bf16 %v398_v35, %v397_v34  ;;  %v233_v28 = vld [vmem:[%s3900_s0 + $0x6c0] sm:$0xff] }
  0x5d   :  { %1204 = vmatprep.mubr.f32.mxu0 %v78_v41  ;;  %1925 = vmatpush1.bf16.msra.mxu1 %v1924_v40  ;;  %v142_v40 = vld [vmem:[%s3900_s0 + $0x3e8] sm:$0xff]  ;;  %v399_v41 = vld [vmem:[%s3899_s1 + $0x1f0] sm:$0xff] }
  0x5e   :  { %1926 = vmatprep.subr.bf16.mxu1 %v2227_v0  ;;  %2021 = vmatpush1.bf16.msra.mxu0 %v2020_v44  ;;  %v141_v44 = vld [vmem:[%s3900_s0 + $0x3e0] sm:$0xff]  ;;  %v1951_v46 = vpack.c.bf16 %v400_v42, %v399_v41  ;;  %v250_v34 = vld [vmem:[%s3900_s0 + $0x748] sm:$0xff] }
  0x5f   :  { %675 = vmatmul.mubr.f32.gmra.mrb[14].mxu1 %v73_v47  ;;  %2022 = vmatprep.subr.bf16.mxu0 %v2227_v0  ;;  %v150_v47 = vld [vmem:[%s3900_s0 + $0x428] sm:$0xff]  ;;  %v261_v41 = vld [vmem:[%s3900_s0 + $0x7a0] sm:$0xff] }
  0x60   :  { %1205 = vmatmul.mubr.f32.gmra.mrb[14].mxu0 %v77_v48  ;;  %679 = vmatprep.mubr.f32.mxu1 %v82_v49  ;;  %v145_v48 = vld [vmem:[%s3900_s0 + $0x400] sm:$0xff]  ;;  %v254_v35 = vld [vmem:[%s3900_s0 + $0x768] sm:$0xff] }
  0x61   :  { %1209 = vmatprep.mubr.f32.mxu0 %v86_v51  ;;  %1928 = vmatpush1.bf16.msra.mxu1 %v1927_v50  ;;  %v149_v49 = vld [vmem:[%s3900_s0 + $0x420] sm:$0xff]  ;;  %v154_v50 = vld [vmem:[%s3900_s0 + $0x448] sm:$0xff] }
  0x62   :  { %1929 = vmatprep.subr.bf16.mxu1 %v2227_v0  ;;  %2024 = vmatpush1.bf16.msra.mxu0 %v2023_v54  ;;  %v153_v51 = vld [vmem:[%s3900_s0 + $0x440] sm:$0xff]  ;;  %v166_v54 = vld [vmem:[%s3900_s0 + $0x4a8] sm:$0xff] }
  0x63   :  { %680 = vmatmul.mubr.f32.gmra.mrb[16].mxu1 %v81_v55  ;;  %1402 = vmatprep.subr.mxu0 %v2228_v62  ;;  %v161_v55 = vld [vmem:[%s3900_s0 + $0x480] sm:$0xff]  ;;  %v182_v62 = vld [vmem:[%s3900_s0 + $0x528] sm:$0xff] }
  0x64   :  { %1210 = vmatmul.mubr.f32.gmra.mrb[16].mxu0 %v85_v56  ;;  %684 = vmatprep.mubr.f32.mxu1 %v90_v57  ;;  %v165_v56 = vld [vmem:[%s3900_s0 + $0x4a0] sm:$0xff]  ;;  %v170_v57 = vld [vmem:[%s3900_s0 + $0x4c8] sm:$0xff] }
  0x65   :  { %1214 = vmatprep.mubr.f32.mxu0 %v94_v59  ;;  %1931 = vmatpush1.bf16.msra.mxu1 %v1930_v58  ;;  %v174_v58 = vld [vmem:[%s3900_s0 + $0x4e8] sm:$0xff]  ;;  %v169_v59 = vld [vmem:[%s3900_s0 + $0x4c0] sm:$0xff] }
  0x66   :  { %1932 = vmatprep.subr.bf16.mxu1 %v2227_v0  ;;  %1814 = vmatpush1.msk.msra.mxu0 %vm571_vm0, %v449_v63  ;;  %v177_v63 = vld [vmem:[%s3900_s0 + $0x500] sm:$0xff]  ;;  %v266_v42 = vld [vmem:[%s3900_s0 + $0x7c8] sm:$0xff] }
  0x67   :  { %685 = vmatmul.mubr.f32.gmra.mrb[18].mxu1 %v89_v1  ;;  %v181_v1 = vld [vmem:[%s3900_s0 + $0x520] sm:$0xff] }
  0x68   :  { %1215 = vmatmul.mubr.f32.gmra.mrb[18].mxu0 %v93_v2  ;;  %689 = vmatprep.mubr.f32.mxu1 %v98_v3  ;;  %v186_v2 = vld [vmem:[%s3900_s0 + $0x548] sm:$0xff] }
  0x69   :  { %1219 = vmatprep.mubr.f32.mxu0 %v102_v5  ;;  %1934 = vmatpush1.bf16.msra.mxu1 %v1933_v4  ;;  %v190_v3 = vld [vmem:[%s3900_s0 + $0x568] sm:$0xff]  ;;  %v185_v4 = vld [vmem:[%s3900_s0 + $0x540] sm:$0xff] }
  0x6a   :  { %1935 = vmatprep.subr.bf16.mxu1 %v2227_v0  ;;  %v189_v5 = vld [vmem:[%s3900_s0 + $0x560] sm:$0xff] }
  0x6b   :  { %690 = vmatmul.mubr.f32.gmra.mrb[20].mxu1 %v97_v8  ;;  %v193_v8 = vld [vmem:[%s3900_s0 + $0x580] sm:$0xff] }
  0x6c   :  { %1220 = vmatmul.mubr.f32.gmra.mrb[20].mxu0 %v101_v9  ;;  %694 = vmatprep.mubr.f32.mxu1 %v106_v10  ;;  %v197_v9 = vld [vmem:[%s3900_s0 + $0x5a0] sm:$0xff]  ;;  %v202_v10 = vld [vmem:[%s3900_s0 + $0x5c8] sm:$0xff] }
  0x6d   :  { %1224 = vmatprep.mubr.f32.mxu0 %v110_v12  ;;  %1937 = vmatpush1.bf16.msra.mxu1 %v1936_v11  ;;  %v206_v11 = vld [vmem:[%s3900_s0 + $0x5e8] sm:$0xff]  ;;  %v201_v12 = vld [vmem:[%s3900_s0 + $0x5c0] sm:$0xff] }
  0x6e   :  { %1938 = vmatprep.subr.bf16.mxu1 %v2227_v0 }
  0x6f   :  { %695 = vmatmul.mubr.f32.gmra.mrb[22].mxu1 %v105_v15  ;;  %v214_v15 = vld [vmem:[%s3900_s0 + $0x628] sm:$0xff] }
  0x70   :  { %1225 = vmatmul.mubr.f32.gmra.mrb[22].mxu0 %v109_v16  ;;  %699 = vmatprep.mubr.f32.mxu1 %v114_v17  ;;  %v209_v16 = vld [vmem:[%s3900_s0 + $0x600] sm:$0xff] }
  0x71   :  { %1229 = vmatprep.mubr.f32.mxu0 %v118_v19  ;;  %1940 = vmatpush1.bf16.msra.mxu1 %v1939_v18  ;;  %v213_v17 = vld [vmem:[%s3900_s0 + $0x620] sm:$0xff]  ;;  %v218_v18 = vld [vmem:[%s3900_s0 + $0x648] sm:$0xff] }
  0x72   :  { %1941 = vmatprep.subr.bf16.mxu1 %v2227_v0  ;;  %v222_v19 = vld [vmem:[%s3900_s0 + $0x668] sm:$0xff] }
  0x73   :  { %700 = vmatmul.mubr.f32.gmra.mrb[24].mxu1 %v113_v22  ;;  %v226_v22 = vld [vmem:[%s3900_s0 + $0x688] sm:$0xff] }
  0x74   :  { %1230 = vmatmul.mubr.f32.gmra.mrb[24].mxu0 %v117_v23  ;;  %704 = vmatprep.mubr.f32.mxu1 %v122_v24  ;;  %v230_v23 = vld [vmem:[%s3900_s0 + $0x6a8] sm:$0xff]  ;;  %v225_v24 = vld [vmem:[%s3900_s0 + $0x680] sm:$0xff] }
  0x75   :  { %1234 = vmatprep.mubr.f32.mxu0 %v126_v26  ;;  %1943 = vmatpush1.bf16.msra.mxu1 %v1942_v25  ;;  %v229_v25 = vld [vmem:[%s3900_s0 + $0x6a0] sm:$0xff]  ;;  %v234_v26 = vld [vmem:[%s3900_s0 + $0x6c8] sm:$0xff] }
  0x76   :  { %1944 = vmatprep.subr.bf16.mxu1 %v2227_v0 }
  0x77   :  { %705 = vmatmul.mubr.f32.gmra.mrb[26].mxu1 %v121_v29  ;;  %v237_v29 = vld [vmem:[%s3900_s0 + $0x6e0] sm:$0xff] }
  0x78   :  { %1235 = vmatmul.mubr.f32.gmra.mrb[26].mxu0 %v125_v30  ;;  %709 = vmatprep.mubr.f32.mxu1 %v130_v31  ;;  %v242_v30 = vld [vmem:[%s3900_s0 + $0x708] sm:$0xff] }
  0x79   :  { %1239 = vmatprep.mubr.f32.mxu0 %v134_v33  ;;  %1946 = vmatpush1.bf16.msra.mxu1 %v1945_v32  ;;  %v246_v31 = vld [vmem:[%s3900_s0 + $0x728] sm:$0xff]  ;;  %v241_v32 = vld [vmem:[%s3900_s0 + $0x700] sm:$0xff] }
  0x7a   :  { %1947 = vmatprep.subr.bf16.mxu1 %v2227_v0  ;;  %v245_v33 = vld [vmem:[%s3900_s0 + $0x720] sm:$0xff] }
  0x7b   :  { %710 = vmatmul.mubr.f32.gmra.mrb[28].mxu1 %v129_v36  ;;  %v249_v36 = vld [vmem:[%s3900_s0 + $0x740] sm:$0xff] }
  0x7c   :  { %1240 = vmatmul.mubr.f32.gmra.mrb[28].mxu0 %v133_v37  ;;  %714 = vmatprep.mubr.f32.mxu1 %v138_v38  ;;  %v253_v37 = vld [vmem:[%s3900_s0 + $0x760] sm:$0xff]  ;;  %v258_v38 = vld [vmem:[%s3900_s0 + $0x788] sm:$0xff] }
  0x7d   :  { %1244 = vmatprep.mubr.f32.mxu0 %v142_v40  ;;  %1949 = vmatpush1.bf16.msra.mxu1 %v1948_v39  ;;  %v262_v39 = vld [vmem:[%s3900_s0 + $0x7a8] sm:$0xff]  ;;  %v257_v40 = vld [vmem:[%s3900_s0 + $0x780] sm:$0xff] }
  0x7e   :  { %1950 = vmatprep.subr.bf16.mxu1 %v2227_v0  ;;  %v158_v0 = vld [vmem:[%s3900_s0 + $0x468] sm:$0xff] }
  0x7f   :  { %715 = vmatmul.mubr.f32.gmra.mrb[30].mxu1 %v137_v43  ;;  %v270_v43 = vld [vmem:[%s3900_s0 + $0x7e8] sm:$0xff] }
  0x80   :  { %1245 = vmatmul.mubr.f32.gmra.mrb[30].mxu0 %v141_v44  ;;  %719 = vmatprep.mubr.f32.mxu1 %v146_v45  ;;  %v265_v44 = vld [vmem:[%s3900_s0 + $0x7c0] sm:$0xff] }
  0x81   :  { %1249 = vmatprep.mubr.f32.mxu0 %v150_v47  ;;  %1952 = vmatpush1.bf16.msra.mxu1 %v1951_v46  ;;  %v269_v45 = vld [vmem:[%s3900_s0 + $0x7e0] sm:$0xff]  ;;  %v274_v46 = vld [vmem:[%s3900_s0 + $0x808] sm:$0xff] }
  0x82   :  { %v278_v47 = vld [vmem:[%s3900_s0 + $0x828] sm:$0xff] }
  0x83   :  { %720 = vmatmul.mubr.f32.gmra.mrb[32].mxu1 %v145_v48  ;;  %v273_v48 = vld [vmem:[%s3900_s0 + $0x800] sm:$0xff] }
  0x84   :  { %1250 = vmatmul.mubr.f32.gmra.mrb[32].mxu0 %v149_v49  ;;  %724 = vmatprep.mubr.f32.mxu1 %v154_v50  ;;  %v277_v49 = vld [vmem:[%s3900_s0 + $0x820] sm:$0xff]  ;;  %v282_v50 = vld [vmem:[%s3900_s0 + $0x848] sm:$0xff] }
  0x85   :  { %1254 = vmatprep.mubr.f32.mxu0 %v158_v0  ;;  %v286_v0 = vld [vmem:[%s3900_s0 + $0x868] sm:$0xff] }
  0x87   :  { %725 = vmatmul.mubr.f32.gmra.mrb[34].mxu1 %v153_v51  ;;  %v281_v51 = vld [vmem:[%s3900_s0 + $0x840] sm:$0xff] }
  0x88   :  { %1255 = vmatmul.mubr.f32.gmra.mrb[34].mxu0 %v157_v52  ;;  %729 = vmatprep.mubr.f32.mxu1 %v162_v53  ;;  %v285_v52 = vld [vmem:[%s3900_s0 + $0x860] sm:$0xff]  ;;  %v290_v53 = vld [vmem:[%s3900_s0 + $0x888] sm:$0xff] }
  0x89   :  { %1259 = vmatprep.mubr.f32.mxu0 %v166_v54  ;;  %v294_v54 = vld [vmem:[%s3900_s0 + $0x8a8] sm:$0xff] }
  0x8b   :  { %730 = vmatmul.mubr.f32.gmra.mrb[36].mxu1 %v161_v55  ;;  %v289_v55 = vld [vmem:[%s3900_s0 + $0x880] sm:$0xff] }
  0x8c   :  { %1260 = vmatmul.mubr.f32.gmra.mrb[36].mxu0 %v165_v56  ;;  %734 = vmatprep.mubr.f32.mxu1 %v170_v57  ;;  %v293_v56 = vld [vmem:[%s3900_s0 + $0x8a0] sm:$0xff]  ;;  %v298_v57 = vld [vmem:[%s3900_s0 + $0x8c8] sm:$0xff] }
  0x8d   :  { %1264 = vmatprep.mubr.f32.mxu0 %v174_v58  ;;  %v302_v58 = vld [vmem:[%s3900_s0 + $0x8e8] sm:$0xff] }
  0x8f   :  { %735 = vmatmul.mubr.f32.gmra.mrb[38].mxu1 %v169_v59  ;;  %v297_v59 = vld [vmem:[%s3900_s0 + $0x8c0] sm:$0xff] }
  0x90   :  { %1265 = vmatmul.mubr.f32.gmra.mrb[38].mxu0 %v173_v60  ;;  %739 = vmatprep.mubr.f32.mxu1 %v178_v61  ;;  %v301_v60 = vld [vmem:[%s3900_s0 + $0x8e0] sm:$0xff]  ;;  %v306_v61 = vld [vmem:[%s3900_s0 + $0x908] sm:$0xff] }
  0x91   :  { %1269 = vmatprep.mubr.f32.mxu0 %v182_v62  ;;  %v310_v62 = vld [vmem:[%s3900_s0 + $0x928] sm:$0xff] }
  0x93   :  { %740 = vmatmul.mubr.f32.gmra.mrb[40].mxu1 %v177_v63  ;;  %v305_v63 = vld [vmem:[%s3900_s0 + $0x900] sm:$0xff] }
  0x94   :  { %1270 = vmatmul.mubr.f32.gmra.mrb[40].mxu0 %v181_v1  ;;  %744 = vmatprep.mubr.f32.mxu1 %v186_v2  ;;  %v309_v1 = vld [vmem:[%s3900_s0 + $0x920] sm:$0xff]  ;;  %v314_v2 = vld [vmem:[%s3900_s0 + $0x948] sm:$0xff] }
  0x95   :  { %1274 = vmatprep.mubr.f32.mxu0 %v190_v3  ;;  %v318_v3 = vld [vmem:[%s3900_s0 + $0x968] sm:$0xff] }
  0x97   :  { %745 = vmatmul.mubr.f32.gmra.mrb[42].mxu1 %v185_v4  ;;  %v313_v4 = vld [vmem:[%s3900_s0 + $0x940] sm:$0xff] }
  0x98   :  { %1275 = vmatmul.mubr.f32.gmra.mrb[42].mxu0 %v189_v5  ;;  %749 = vmatprep.mubr.f32.mxu1 %v194_v6  ;;  %v317_v5 = vld [vmem:[%s3900_s0 + $0x960] sm:$0xff]  ;;  %v322_v6 = vld [vmem:[%s3900_s0 + $0x988] sm:$0xff] }
  0x99   :  { %1279 = vmatprep.mubr.f32.mxu0 %v198_v7  ;;  %v326_v7 = vld [vmem:[%s3900_s0 + $0x9a8] sm:$0xff] }
  0x9b   :  { %750 = vmatmul.mubr.f32.gmra.mrb[44].mxu1 %v193_v8  ;;  %v321_v8 = vld [vmem:[%s3900_s0 + $0x980] sm:$0xff] }
  0x9c   :  { %1280 = vmatmul.mubr.f32.gmra.mrb[44].mxu0 %v197_v9  ;;  %754 = vmatprep.mubr.f32.mxu1 %v202_v10  ;;  %v325_v9 = vld [vmem:[%s3900_s0 + $0x9a0] sm:$0xff]  ;;  %v330_v10 = vld [vmem:[%s3900_s0 + $0x9c8] sm:$0xff] }
  0x9d   :  { %1284 = vmatprep.mubr.f32.mxu0 %v206_v11  ;;  %v334_v11 = vld [vmem:[%s3900_s0 + $0x9e8] sm:$0xff] }
  0x9f   :  { %755 = vmatmul.mubr.f32.gmra.mrb[46].mxu1 %v201_v12  ;;  %v329_v12 = vld [vmem:[%s3900_s0 + $0x9c0] sm:$0xff] }
  0xa0   :  { %1285 = vmatmul.mubr.f32.gmra.mrb[46].mxu0 %v205_v13  ;;  %759 = vmatprep.mubr.f32.mxu1 %v210_v14  ;;  %v333_v13 = vld [vmem:[%s3900_s0 + $0x9e0] sm:$0xff]  ;;  %v20_v14 = vld [vmem:[%s3900_s0 + $0x18] sm:$0xff] }
  0xa1   :  { %1289 = vmatprep.mubr.f32.mxu0 %v214_v15  ;;  %v24_v15 = vld [vmem:[%s3900_s0 + $0x38] sm:$0xff] }
  0xa3   :  { %760 = vmatmul.mubr.f32.gmra.mrb[48].mxu1 %v209_v16  ;;  %v19_v16 = vld [vmem:[%s3900_s0 + $0x10] sm:$0xff] }
  0xa4   :  { %1290 = vmatmul.mubr.f32.gmra.mrb[48].mxu0 %v213_v17  ;;  %764 = vmatprep.mubr.f32.mxu1 %v218_v18  ;;  %v23_v17 = vld [vmem:[%s3900_s0 + $0x30] sm:$0xff]  ;;  %v28_v18 = vld [vmem:[%s3900_s0 + $0x58] sm:$0xff] }
  0xa5   :  { %1294 = vmatprep.mubr.f32.mxu0 %v222_v19  ;;  %v32_v19 = vld [vmem:[%s3900_s0 + $0x78] sm:$0xff] }
  0xa7   :  { %765 = vmatmul.mubr.f32.gmra.mrb[50].mxu1 %v217_v20  ;;  %v27_v20 = vld [vmem:[%s3900_s0 + $0x50] sm:$0xff] }
  0xa8   :  { %1295 = vmatmul.mubr.f32.gmra.mrb[50].mxu0 %v221_v21  ;;  %769 = vmatprep.mubr.f32.mxu1 %v226_v22  ;;  %v31_v21 = vld [vmem:[%s3900_s0 + $0x70] sm:$0xff]  ;;  %v36_v22 = vld [vmem:[%s3900_s0 + $0x98] sm:$0xff] }
  0xa9   :  { %1299 = vmatprep.mubr.f32.mxu0 %v230_v23  ;;  %v40_v23 = vld [vmem:[%s3900_s0 + $0xb8] sm:$0xff] }
  0xab   :  { %770 = vmatmul.mubr.f32.gmra.mrb[52].mxu1 %v225_v24  ;;  %v35_v24 = vld [vmem:[%s3900_s0 + $0x90] sm:$0xff] }
  0xac   :  { %1300 = vmatmul.mubr.f32.gmra.mrb[52].mxu0 %v229_v25  ;;  %774 = vmatprep.mubr.f32.mxu1 %v234_v26  ;;  %v39_v25 = vld [vmem:[%s3900_s0 + $0xb0] sm:$0xff]  ;;  %v44_v26 = vld [vmem:[%s3900_s0 + $0xd8] sm:$0xff] }
  0xad   :  { %1304 = vmatprep.mubr.f32.mxu0 %v238_v27  ;;  %v48_v27 = vld [vmem:[%s3900_s0 + $0xf8] sm:$0xff] }
  0xaf   :  { %775 = vmatmul.mubr.f32.gmra.mrb[54].mxu1 %v233_v28  ;;  %v43_v28 = vld [vmem:[%s3900_s0 + $0xd0] sm:$0xff] }
  0xb0   :  { %1305 = vmatmul.mubr.f32.gmra.mrb[54].mxu0 %v237_v29  ;;  %779 = vmatprep.mubr.f32.mxu1 %v242_v30  ;;  %v47_v29 = vld [vmem:[%s3900_s0 + $0xf0] sm:$0xff]  ;;  %v52_v30 = vld [vmem:[%s3900_s0 + $0x118] sm:$0xff] }
  0xb1   :  { %1309 = vmatprep.mubr.f32.mxu0 %v246_v31  ;;  %v56_v31 = vld [vmem:[%s3900_s0 + $0x138] sm:$0xff] }
  0xb3   :  { %780 = vmatmul.mubr.f32.gmra.mrb[56].mxu1 %v241_v32  ;;  %v51_v32 = vld [vmem:[%s3900_s0 + $0x110] sm:$0xff] }
  0xb4   :  { %1310 = vmatmul.mubr.f32.gmra.mrb[56].mxu0 %v245_v33  ;;  %784 = vmatprep.mubr.f32.mxu1 %v250_v34  ;;  %v55_v33 = vld [vmem:[%s3900_s0 + $0x130] sm:$0xff]  ;;  %v60_v34 = vld [vmem:[%s3900_s0 + $0x158] sm:$0xff] }
  0xb5   :  { %1314 = vmatprep.mubr.f32.mxu0 %v254_v35  ;;  %v64_v35 = vld [vmem:[%s3900_s0 + $0x178] sm:$0xff] }
  0xb7   :  { %785 = vmatmul.mubr.f32.gmra.mrb[58].mxu1 %v249_v36  ;;  %v59_v36 = vld [vmem:[%s3900_s0 + $0x150] sm:$0xff] }
  0xb8   :  { %1315 = vmatmul.mubr.f32.gmra.mrb[58].mxu0 %v253_v37  ;;  %789 = vmatprep.mubr.f32.mxu1 %v258_v38  ;;  %v63_v37 = vld [vmem:[%s3900_s0 + $0x170] sm:$0xff]  ;;  %v68_v38 = vld [vmem:[%s3900_s0 + $0x198] sm:$0xff] }
  0xb9   :  { %1319 = vmatprep.mubr.f32.mxu0 %v262_v39  ;;  %v72_v39 = vld [vmem:[%s3900_s0 + $0x1b8] sm:$0xff] }
  0xbb   :  { %790 = vmatmul.mubr.f32.gmra.mrb[60].mxu1 %v257_v40  ;;  %v67_v40 = vld [vmem:[%s3900_s0 + $0x190] sm:$0xff] }
  0xbc   :  { %1320 = vmatmul.mubr.f32.gmra.mrb[60].mxu0 %v261_v41  ;;  %794 = vmatprep.mubr.f32.mxu1 %v266_v42  ;;  %v71_v41 = vld [vmem:[%s3900_s0 + $0x1b0] sm:$0xff]  ;;  %v76_v42 = vld [vmem:[%s3900_s0 + $0x1d8] sm:$0xff] }
  0xbd   :  { %1324 = vmatprep.mubr.f32.mxu0 %v270_v43  ;;  %v80_v43 = vld [vmem:[%s3900_s0 + $0x1f8] sm:$0xff] }
  0xbf   :  { %795 = vmatmul.mubr.f32.gmra.mrb[62].mxu1 %v265_v44  ;;  %v75_v44 = vld [vmem:[%s3900_s0 + $0x1d0] sm:$0xff] }
  0xc0   :  { %1325 = vmatmul.mubr.f32.gmra.mrb[62].mxu0 %v269_v45  ;;  %799 = vmatprep.mubr.f32.mxu1 %v274_v46  ;;  %v79_v45 = vld [vmem:[%s3900_s0 + $0x1f0] sm:$0xff]  ;;  %v84_v46 = vld [vmem:[%s3900_s0 + $0x218] sm:$0xff] }
  0xc1   :  { %1329 = vmatprep.mubr.f32.mxu0 %v278_v47  ;;  %v88_v47 = vld [vmem:[%s3900_s0 + $0x238] sm:$0xff] }
  0xc3   :  { %800 = vmatmul.mubr.f32.gmra.mrb[64].mxu1 %v273_v48  ;;  %v83_v48 = vld [vmem:[%s3900_s0 + $0x210] sm:$0xff] }
  0xc4   :  { %1330 = vmatmul.mubr.f32.gmra.mrb[64].mxu0 %v277_v49  ;;  %804 = vmatprep.mubr.f32.mxu1 %v282_v50  ;;  %v87_v49 = vld [vmem:[%s3900_s0 + $0x230] sm:$0xff]  ;;  %v92_v50 = vld [vmem:[%s3900_s0 + $0x258] sm:$0xff] }
  0xc5   :  { %1334 = vmatprep.mubr.f32.mxu0 %v286_v0  ;;  %v96_v0 = vld [vmem:[%s3900_s0 + $0x278] sm:$0xff] }
  0xc7   :  { %805 = vmatmul.mubr.f32.gmra.mrb[66].mxu1 %v281_v51  ;;  %v91_v51 = vld [vmem:[%s3900_s0 + $0x250] sm:$0xff] }
  0xc8   :  { %1335 = vmatmul.mubr.f32.gmra.mrb[66].mxu0 %v285_v52  ;;  %809 = vmatprep.mubr.f32.mxu1 %v290_v53  ;;  %v95_v52 = vld [vmem:[%s3900_s0 + $0x270] sm:$0xff]  ;;  %v100_v53 = vld [vmem:[%s3900_s0 + $0x298] sm:$0xff] }
  0xc9   :  { %1339 = vmatprep.mubr.f32.mxu0 %v294_v54  ;;  %v104_v54 = vld [vmem:[%s3900_s0 + $0x2b8] sm:$0xff] }
  0xcb   :  { %810 = vmatmul.mubr.f32.gmra.mrb[68].mxu1 %v289_v55  ;;  %v99_v55 = vld [vmem:[%s3900_s0 + $0x290] sm:$0xff] }
  0xcc   :  { %1340 = vmatmul.mubr.f32.gmra.mrb[68].mxu0 %v293_v56  ;;  %814 = vmatprep.mubr.f32.mxu1 %v298_v57  ;;  %v103_v56 = vld [vmem:[%s3900_s0 + $0x2b0] sm:$0xff]  ;;  %v108_v57 = vld [vmem:[%s3900_s0 + $0x2d8] sm:$0xff] }
  0xcd   :  { %1344 = vmatprep.mubr.f32.mxu0 %v302_v58  ;;  %v112_v58 = vld [vmem:[%s3900_s0 + $0x2f8] sm:$0xff] }
  0xcf   :  { %815 = vmatmul.mubr.f32.gmra.mrb[70].mxu1 %v297_v59  ;;  %v107_v59 = vld [vmem:[%s3900_s0 + $0x2d0] sm:$0xff] }
  0xd0   :  { %1345 = vmatmul.mubr.f32.gmra.mrb[70].mxu0 %v301_v60  ;;  %819 = vmatprep.mubr.f32.mxu1 %v306_v61  ;;  %v111_v60 = vld [vmem:[%s3900_s0 + $0x2f0] sm:$0xff]  ;;  %v116_v61 = vld [vmem:[%s3900_s0 + $0x318] sm:$0xff] }
  0xd1   :  { %1349 = vmatprep.mubr.f32.mxu0 %v310_v62  ;;  %v120_v62 = vld [vmem:[%s3900_s0 + $0x338] sm:$0xff] }
  0xd3   :  { %820 = vmatmul.mubr.f32.gmra.mrb[72].mxu1 %v305_v63  ;;  %v115_v63 = vld [vmem:[%s3900_s0 + $0x310] sm:$0xff] }
  0xd4   :  { %1350 = vmatmul.mubr.f32.gmra.mrb[72].mxu0 %v309_v1  ;;  %824 = vmatprep.mubr.f32.mxu1 %v314_v2  ;;  %v119_v1 = vld [vmem:[%s3900_s0 + $0x330] sm:$0xff]  ;;  %v124_v2 = vld [vmem:[%s3900_s0 + $0x358] sm:$0xff] }
  0xd5   :  { %1354 = vmatprep.mubr.f32.mxu0 %v318_v3  ;;  %v128_v3 = vld [vmem:[%s3900_s0 + $0x378] sm:$0xff] }
  0xd7   :  { %825 = vmatmul.mubr.f32.gmra.mrb[74].mxu1 %v313_v4  ;;  %v123_v4 = vld [vmem:[%s3900_s0 + $0x350] sm:$0xff] }
  0xd8   :  { %1355 = vmatmul.mubr.f32.gmra.mrb[74].mxu0 %v317_v5  ;;  %829 = vmatprep.mubr.f32.mxu1 %v322_v6  ;;  %v127_v5 = vld [vmem:[%s3900_s0 + $0x370] sm:$0xff]  ;;  %v132_v6 = vld [vmem:[%s3900_s0 + $0x398] sm:$0xff] }
  0xd9   :  { %1359 = vmatprep.mubr.f32.mxu0 %v326_v7  ;;  %v136_v7 = vld [vmem:[%s3900_s0 + $0x3b8] sm:$0xff] }
  0xdb   :  { %830 = vmatmul.mubr.f32.gmra.mrb[76].mxu1 %v321_v8  ;;  %v131_v8 = vld [vmem:[%s3900_s0 + $0x390] sm:$0xff] }
  0xdc   :  { %1360 = vmatmul.mubr.f32.gmra.mrb[76].mxu0 %v325_v9  ;;  %834 = vmatprep.mubr.f32.mxu1 %v330_v10  ;;  %v135_v9 = vld [vmem:[%s3900_s0 + $0x3b0] sm:$0xff]  ;;  %v140_v10 = vld [vmem:[%s3900_s0 + $0x3d8] sm:$0xff] }
  0xdd   :  { %1364 = vmatprep.mubr.f32.mxu0 %v334_v11  ;;  %v144_v11 = vld [vmem:[%s3900_s0 + $0x3f8] sm:$0xff] }
  0xdf   :  { %835 = vmatmul.mubr.f32.gmra.mrb[78].mxu1 %v329_v12  ;;  %v139_v12 = vld [vmem:[%s3900_s0 + $0x3d0] sm:$0xff] }
  0xe0   :  { %1365 = vmatmul.mubr.f32.gmra.mrb[78].mxu0 %v333_v13  ;;  %904 = vmatprep.mubr.f32.mxu1 %v20_v14  ;;  %v143_v13 = vld [vmem:[%s3900_s0 + $0x3f0] sm:$0xff]  ;;  %v148_v14 = vld [vmem:[%s3900_s0 + $0x418] sm:$0xff] }
  0xe1   :  { %1815 = vmatprep.mubr.msk.f32.mxu0 %vm450_vm1, %v24_v15  ;;  %v152_v15 = vld [vmem:[%s3900_s0 + $0x438] sm:$0xff] }
  0xe3   :  { %905 = vmatmul.mubr.f32.vlgmr.msra.gmra.mrb[0].mxu1 %v19_v16  ;;  %v147_v16 = vld [vmem:[%s3900_s0 + $0x410] sm:$0xff] }
  0xe4   :  { %1435 = vmatmul.mubr.f32.vlgmr.msra.gmra.mrb[0].mxu0 %v23_v17  ;;  %909 = vmatprep.mubr.f32.mxu1 %v28_v18  ;;  %v151_v17 = vld [vmem:[%s3900_s0 + $0x430] sm:$0xff]  ;;  %v156_v18 = vld [vmem:[%s3900_s0 + $0x458] sm:$0xff] }
  0xe5   :  { %1816 = vmatprep.mubr.msk.f32.mxu0 %vm450_vm1, %v32_v19  ;;  %v160_v19 = vld [vmem:[%s3900_s0 + $0x478] sm:$0xff] }
  0xe7   :  { %910 = vmatmul.mubr.f32.gmra.mrb[2].mxu1 %v27_v20  ;;  %v155_v20 = vld [vmem:[%s3900_s0 + $0x450] sm:$0xff] }
  0xe8   :  { %1440 = vmatmul.mubr.f32.gmra.mrb[2].mxu0 %v31_v21  ;;  %914 = vmatprep.mubr.f32.mxu1 %v36_v22  ;;  %v159_v21 = vld [vmem:[%s3900_s0 + $0x470] sm:$0xff]  ;;  %v164_v22 = vld [vmem:[%s3900_s0 + $0x498] sm:$0xff] }
  0xe9   :  { %1817 = vmatprep.mubr.msk.f32.mxu0 %vm450_vm1, %v40_v23  ;;  %v168_v23 = vld [vmem:[%s3900_s0 + $0x4b8] sm:$0xff] }
  0xeb   :  { %915 = vmatmul.mubr.f32.gmra.mrb[4].mxu1 %v35_v24  ;;  %v163_v24 = vld [vmem:[%s3900_s0 + $0x490] sm:$0xff] }
  0xec   :  { %1445 = vmatmul.mubr.f32.gmra.mrb[4].mxu0 %v39_v25  ;;  %919 = vmatprep.mubr.f32.mxu1 %v44_v26  ;;  %v167_v25 = vld [vmem:[%s3900_s0 + $0x4b0] sm:$0xff]  ;;  %v172_v26 = vld [vmem:[%s3900_s0 + $0x4d8] sm:$0xff] }
  0xed   :  { %1818 = vmatprep.mubr.msk.f32.mxu0 %vm450_vm1, %v48_v27  ;;  %v176_v27 = vld [vmem:[%s3900_s0 + $0x4f8] sm:$0xff] }
  0xef   :  { %920 = vmatmul.mubr.f32.gmra.mrb[6].mxu1 %v43_v28  ;;  %v171_v28 = vld [vmem:[%s3900_s0 + $0x4d0] sm:$0xff] }
  0xf0   :  { %1450 = vmatmul.mubr.f32.gmra.mrb[6].mxu0 %v47_v29  ;;  %924 = vmatprep.mubr.f32.mxu1 %v52_v30  ;;  %v175_v29 = vld [vmem:[%s3900_s0 + $0x4f0] sm:$0xff]  ;;  %v180_v30 = vld [vmem:[%s3900_s0 + $0x518] sm:$0xff] }
  0xf1   :  { %1819 = vmatprep.mubr.msk.f32.mxu0 %vm450_vm1, %v56_v31  ;;  %v184_v31 = vld [vmem:[%s3900_s0 + $0x538] sm:$0xff] }
  0xf3   :  { %925 = vmatmul.mubr.f32.gmra.mrb[8].mxu1 %v51_v32  ;;  %v179_v32 = vld [vmem:[%s3900_s0 + $0x510] sm:$0xff] }
  0xf4   :  { %1455 = vmatmul.mubr.f32.gmra.mrb[8].mxu0 %v55_v33  ;;  %929 = vmatprep.mubr.f32.mxu1 %v60_v34  ;;  %v183_v33 = vld [vmem:[%s3900_s0 + $0x530] sm:$0xff]  ;;  %v188_v34 = vld [vmem:[%s3900_s0 + $0x558] sm:$0xff] }
  0xf5   :  { %1820 = vmatprep.mubr.msk.f32.mxu0 %vm450_vm1, %v64_v35  ;;  %v192_v35 = vld [vmem:[%s3900_s0 + $0x578] sm:$0xff] }
  0xf7   :  { %930 = vmatmul.mubr.f32.gmra.mrb[10].mxu1 %v59_v36  ;;  %v187_v36 = vld [vmem:[%s3900_s0 + $0x550] sm:$0xff] }
  0xf8   :  { %1460 = vmatmul.mubr.f32.gmra.mrb[10].mxu0 %v63_v37  ;;  %934 = vmatprep.mubr.f32.mxu1 %v68_v38  ;;  %v191_v37 = vld [vmem:[%s3900_s0 + $0x570] sm:$0xff]  ;;  %v196_v38 = vld [vmem:[%s3900_s0 + $0x598] sm:$0xff] }
  0xf9   :  { %1821 = vmatprep.mubr.msk.f32.mxu0 %vm450_vm1, %v72_v39  ;;  %v200_v39 = vld [vmem:[%s3900_s0 + $0x5b8] sm:$0xff] }
  0xfb   :  { %935 = vmatmul.mubr.f32.gmra.mrb[12].mxu1 %v67_v40  ;;  %v195_v40 = vld [vmem:[%s3900_s0 + $0x590] sm:$0xff] }
  0xfc   :  { %1465 = vmatmul.mubr.f32.gmra.mrb[12].mxu0 %v71_v41  ;;  %939 = vmatprep.mubr.f32.mxu1 %v76_v42  ;;  %v199_v41 = vld [vmem:[%s3900_s0 + $0x5b0] sm:$0xff]  ;;  %v204_v42 = vld [vmem:[%s3900_s0 + $0x5d8] sm:$0xff] }
  0xfd   :  { %1822 = vmatprep.mubr.msk.f32.mxu0 %vm450_vm1, %v80_v43  ;;  %v208_v43 = vld [vmem:[%s3900_s0 + $0x5f8] sm:$0xff] }
  0xff   :  { %940 = vmatmul.mubr.f32.gmra.mrb[14].mxu1 %v75_v44  ;;  %v203_v44 = vld [vmem:[%s3900_s0 + $0x5d0] sm:$0xff] }
 0x100   :  { %1470 = vmatmul.mubr.f32.gmra.mrb[14].mxu0 %v79_v45  ;;  %944 = vmatprep.mubr.f32.mxu1 %v84_v46  ;;  %v207_v45 = vld [vmem:[%s3900_s0 + $0x5f0] sm:$0xff]  ;;  %v212_v46 = vld [vmem:[%s3900_s0 + $0x618] sm:$0xff] }
 0x101   :  { %1823 = vmatprep.mubr.msk.f32.mxu0 %vm450_vm1, %v88_v47  ;;  %v216_v47 = vld [vmem:[%s3900_s0 + $0x638] sm:$0xff] }
 0x103   :  { %945 = vmatmul.mubr.f32.gmra.mrb[16].mxu1 %v83_v48  ;;  %v211_v48 = vld [vmem:[%s3900_s0 + $0x610] sm:$0xff] }
 0x104   :  { %1475 = vmatmul.mubr.f32.gmra.mrb[16].mxu0 %v87_v49  ;;  %949 = vmatprep.mubr.f32.mxu1 %v92_v50  ;;  %v215_v49 = vld [vmem:[%s3900_s0 + $0x630] sm:$0xff]  ;;  %v220_v50 = vld [vmem:[%s3900_s0 + $0x658] sm:$0xff] }
 0x105   :  { %1824 = vmatprep.mubr.msk.f32.mxu0 %vm450_vm1, %v96_v0  ;;  %v224_v0 = vld [vmem:[%s3900_s0 + $0x678] sm:$0xff] }
 0x107   :  { %950 = vmatmul.mubr.f32.gmra.mrb[18].mxu1 %v91_v51  ;;  %v219_v51 = vld [vmem:[%s3900_s0 + $0x650] sm:$0xff] }
 0x108   :  { %1480 = vmatmul.mubr.f32.gmra.mrb[18].mxu0 %v95_v52  ;;  %954 = vmatprep.mubr.f32.mxu1 %v100_v53  ;;  %v223_v52 = vld [vmem:[%s3900_s0 + $0x670] sm:$0xff]  ;;  %v228_v53 = vld [vmem:[%s3900_s0 + $0x698] sm:$0xff] }
 0x109   :  { %1825 = vmatprep.mubr.msk.f32.mxu0 %vm450_vm1, %v104_v54  ;;  %v232_v54 = vld [vmem:[%s3900_s0 + $0x6b8] sm:$0xff] }
 0x10b   :  { %955 = vmatmul.mubr.f32.gmra.mrb[20].mxu1 %v99_v55  ;;  %v227_v55 = vld [vmem:[%s3900_s0 + $0x690] sm:$0xff] }
 0x10c   :  { %1485 = vmatmul.mubr.f32.gmra.mrb[20].mxu0 %v103_v56  ;;  %959 = vmatprep.mubr.f32.mxu1 %v108_v57  ;;  %v231_v56 = vld [vmem:[%s3900_s0 + $0x6b0] sm:$0xff]  ;;  %v236_v57 = vld [vmem:[%s3900_s0 + $0x6d8] sm:$0xff] }
 0x10d   :  { %1826 = vmatprep.mubr.msk.f32.mxu0 %vm450_vm1, %v112_v58  ;;  %v240_v58 = vld [vmem:[%s3900_s0 + $0x6f8] sm:$0xff] }
 0x10f   :  { %960 = vmatmul.mubr.f32.gmra.mrb[22].mxu1 %v107_v59  ;;  %v235_v59 = vld [vmem:[%s3900_s0 + $0x6d0] sm:$0xff] }
 0x110   :  { %1490 = vmatmul.mubr.f32.gmra.mrb[22].mxu0 %v111_v60  ;;  %964 = vmatprep.mubr.f32.mxu1 %v116_v61  ;;  %v239_v60 = vld [vmem:[%s3900_s0 + $0x6f0] sm:$0xff]  ;;  %v244_v61 = vld [vmem:[%s3900_s0 + $0x718] sm:$0xff] }
 0x111   :  { %1827 = vmatprep.mubr.msk.f32.mxu0 %vm450_vm1, %v120_v62  ;;  %v248_v62 = vld [vmem:[%s3900_s0 + $0x738] sm:$0xff] }
 0x113   :  { %965 = vmatmul.mubr.f32.gmra.mrb[24].mxu1 %v115_v63  ;;  %v243_v63 = vld [vmem:[%s3900_s0 + $0x710] sm:$0xff] }
 0x114   :  { %1495 = vmatmul.mubr.f32.gmra.mrb[24].mxu0 %v119_v1  ;;  %969 = vmatprep.mubr.f32.mxu1 %v124_v2  ;;  %v247_v1 = vld [vmem:[%s3900_s0 + $0x730] sm:$0xff]  ;;  %v252_v2 = vld [vmem:[%s3900_s0 + $0x758] sm:$0xff] }
 0x115   :  { %1828 = vmatprep.mubr.msk.f32.mxu0 %vm450_vm1, %v128_v3  ;;  %v256_v3 = vld [vmem:[%s3900_s0 + $0x778] sm:$0xff] }
 0x117   :  { %970 = vmatmul.mubr.f32.gmra.mrb[26].mxu1 %v123_v4  ;;  %v251_v4 = vld [vmem:[%s3900_s0 + $0x750] sm:$0xff] }
 0x118   :  { %1500 = vmatmul.mubr.f32.gmra.mrb[26].mxu0 %v127_v5  ;;  %974 = vmatprep.mubr.f32.mxu1 %v132_v6  ;;  %v255_v5 = vld [vmem:[%s3900_s0 + $0x770] sm:$0xff]  ;;  %v260_v6 = vld [vmem:[%s3900_s0 + $0x798] sm:$0xff] }
 0x119   :  { %1829 = vmatprep.mubr.msk.f32.mxu0 %vm450_vm1, %v136_v7  ;;  %v264_v7 = vld [vmem:[%s3900_s0 + $0x7b8] sm:$0xff] }
 0x11b   :  { %975 = vmatmul.mubr.f32.gmra.mrb[28].mxu1 %v131_v8  ;;  %v259_v8 = vld [vmem:[%s3900_s0 + $0x790] sm:$0xff] }
 0x11c   :  { %1505 = vmatmul.mubr.f32.gmra.mrb[28].mxu0 %v135_v9  ;;  %979 = vmatprep.mubr.f32.mxu1 %v140_v10  ;;  %v263_v9 = vld [vmem:[%s3900_s0 + $0x7b0] sm:$0xff]  ;;  %v268_v10 = vld [vmem:[%s3900_s0 + $0x7d8] sm:$0xff] }
 0x11d   :  { %1830 = vmatprep.mubr.msk.f32.mxu0 %vm450_vm1, %v144_v11  ;;  %v272_v11 = vld [vmem:[%s3900_s0 + $0x7f8] sm:$0xff] }
 0x11f   :  { %980 = vmatmul.mubr.f32.gmra.mrb[30].mxu1 %v139_v12  ;;  %v267_v12 = vld [vmem:[%s3900_s0 + $0x7d0] sm:$0xff] }
 0x120   :  { %1510 = vmatmul.mubr.f32.gmra.mrb[30].mxu0 %v143_v13  ;;  %984 = vmatprep.mubr.f32.mxu1 %v148_v14  ;;  %v271_v13 = vld [vmem:[%s3900_s0 + $0x7f0] sm:$0xff]  ;;  %v276_v14 = vld [vmem:[%s3900_s0 + $0x818] sm:$0xff] }
 0x121   :  { %1831 = vmatprep.mubr.msk.f32.mxu0 %vm450_vm1, %v152_v15  ;;  %v280_v15 = vld [vmem:[%s3900_s0 + $0x838] sm:$0xff] }
 0x123   :  { %985 = vmatmul.mubr.f32.gmra.mrb[32].mxu1 %v147_v16  ;;  %v275_v16 = vld [vmem:[%s3900_s0 + $0x810] sm:$0xff] }
 0x124   :  { %1515 = vmatmul.mubr.f32.gmra.mrb[32].mxu0 %v151_v17  ;;  %989 = vmatprep.mubr.f32.mxu1 %v156_v18  ;;  %v279_v17 = vld [vmem:[%s3900_s0 + $0x830] sm:$0xff]  ;;  %v284_v18 = vld [vmem:[%s3900_s0 + $0x858] sm:$0xff] }
 0x125   :  { %1832 = vmatprep.mubr.msk.f32.mxu0 %vm450_vm1, %v160_v19  ;;  %v288_v19 = vld [vmem:[%s3900_s0 + $0x878] sm:$0xff] }
 0x127   :  { %990 = vmatmul.mubr.f32.gmra.mrb[34].mxu1 %v155_v20  ;;  %v283_v20 = vld [vmem:[%s3900_s0 + $0x850] sm:$0xff] }
 0x128   :  { %1520 = vmatmul.mubr.f32.gmra.mrb[34].mxu0 %v159_v21  ;;  %994 = vmatprep.mubr.f32.mxu1 %v164_v22  ;;  %v287_v21 = vld [vmem:[%s3900_s0 + $0x870] sm:$0xff]  ;;  %v292_v22 = vld [vmem:[%s3900_s0 + $0x898] sm:$0xff] }
 0x129   :  { %1833 = vmatprep.mubr.msk.f32.mxu0 %vm450_vm1, %v168_v23  ;;  %v296_v23 = vld [vmem:[%s3900_s0 + $0x8b8] sm:$0xff] }
 0x12b   :  { %995 = vmatmul.mubr.f32.gmra.mrb[36].mxu1 %v163_v24  ;;  %v291_v24 = vld [vmem:[%s3900_s0 + $0x890] sm:$0xff] }
 0x12c   :  { %1525 = vmatmul.mubr.f32.gmra.mrb[36].mxu0 %v167_v25  ;;  %999 = vmatprep.mubr.f32.mxu1 %v172_v26  ;;  %v295_v25 = vld [vmem:[%s3900_s0 + $0x8b0] sm:$0xff]  ;;  %v300_v26 = vld [vmem:[%s3900_s0 + $0x8d8] sm:$0xff] }
 0x12d   :  { %1834 = vmatprep.mubr.msk.f32.mxu0 %vm450_vm1, %v176_v27  ;;  %v304_v27 = vld [vmem:[%s3900_s0 + $0x8f8] sm:$0xff] }
 0x12f   :  { %1000 = vmatmul.mubr.f32.gmra.mrb[38].mxu1 %v171_v28  ;;  %v299_v28 = vld [vmem:[%s3900_s0 + $0x8d0] sm:$0xff] }
 0x130   :  { %1530 = vmatmul.mubr.f32.gmra.mrb[38].mxu0 %v175_v29  ;;  %1004 = vmatprep.mubr.f32.mxu1 %v180_v30  ;;  %v303_v29 = vld [vmem:[%s3900_s0 + $0x8f0] sm:$0xff]  ;;  %v308_v30 = vld [vmem:[%s3900_s0 + $0x918] sm:$0xff] }
 0x131   :  { %1835 = vmatprep.mubr.msk.f32.mxu0 %vm450_vm1, %v184_v31  ;;  %v312_v31 = vld [vmem:[%s3900_s0 + $0x938] sm:$0xff] }
 0x133   :  { %1005 = vmatmul.mubr.f32.gmra.mrb[40].mxu1 %v179_v32  ;;  %v307_v32 = vld [vmem:[%s3900_s0 + $0x910] sm:$0xff] }
 0x134   :  { %1535 = vmatmul.mubr.f32.gmra.mrb[40].mxu0 %v183_v33  ;;  %1009 = vmatprep.mubr.f32.mxu1 %v188_v34  ;;  %v311_v33 = vld [vmem:[%s3900_s0 + $0x930] sm:$0xff]  ;;  %v316_v34 = vld [vmem:[%s3900_s0 + $0x958] sm:$0xff] }
 0x135   :  { %1836 = vmatprep.mubr.msk.f32.mxu0 %vm450_vm1, %v192_v35  ;;  %v320_v35 = vld [vmem:[%s3900_s0 + $0x978] sm:$0xff] }
 0x137   :  { %1010 = vmatmul.mubr.f32.gmra.mrb[42].mxu1 %v187_v36  ;;  %v315_v36 = vld [vmem:[%s3900_s0 + $0x950] sm:$0xff] }
 0x138   :  { %1540 = vmatmul.mubr.f32.gmra.mrb[42].mxu0 %v191_v37  ;;  %1014 = vmatprep.mubr.f32.mxu1 %v196_v38  ;;  %v319_v37 = vld [vmem:[%s3900_s0 + $0x970] sm:$0xff]  ;;  %v324_v38 = vld [vmem:[%s3900_s0 + $0x998] sm:$0xff] }
 0x139   :  { %1837 = vmatprep.mubr.msk.f32.mxu0 %vm450_vm1, %v200_v39  ;;  %v328_v39 = vld [vmem:[%s3900_s0 + $0x9b8] sm:$0xff] }
 0x13b   :  { %1015 = vmatmul.mubr.f32.gmra.mrb[44].mxu1 %v195_v40  ;;  %v323_v40 = vld [vmem:[%s3900_s0 + $0x990] sm:$0xff] }
 0x13c   :  { %1545 = vmatmul.mubr.f32.gmra.mrb[44].mxu0 %v199_v41  ;;  %1019 = vmatprep.mubr.f32.mxu1 %v204_v42  ;;  %v327_v41 = vld [vmem:[%s3900_s0 + $0x9b0] sm:$0xff]  ;;  %v332_v42 = vld [vmem:[%s3900_s0 + $0x9d8] sm:$0xff] }
 0x13d   :  { %1838 = vmatprep.mubr.msk.f32.mxu0 %vm450_vm1, %v208_v43  ;;  %v336_v43 = vld [vmem:[%s3900_s0 + $0x9f8] sm:$0xff] }
 0x13f   :  { %1020 = vmatmul.mubr.f32.gmra.mrb[46].mxu1 %v203_v44  ;;  %v331_v44 = vld [vmem:[%s3900_s0 + $0x9d0] sm:$0xff] }
 0x140   :  { %1550 = vmatmul.mubr.f32.gmra.mrb[46].mxu0 %v207_v45  ;;  %1024 = vmatprep.mubr.f32.mxu1 %v212_v46  ;;  %v335_v45 = vld [vmem:[%s3900_s0 + $0x9f0] sm:$0xff] }
 0x141   :  { %1839 = vmatprep.mubr.msk.f32.mxu0 %vm450_vm1, %v216_v47 }
 0x143   :  { %1025 = vmatmul.mubr.f32.gmra.mrb[48].mxu1 %v211_v48  ;;  %v3652_v48 = vld [vmem:[%s3901_s2] ss:$0 sm:$0xff] }
 0x144   :  { %1555 = vmatmul.mubr.f32.gmra.mrb[48].mxu0 %v215_v49  ;;  %1029 = vmatprep.mubr.f32.mxu1 %v220_v50 }
 0x145   :  { %1840 = vmatprep.mubr.msk.f32.mxu0 %vm450_vm1, %v224_v0 }
 0x147   :  { %1030 = vmatmul.mubr.f32.gmra.mrb[50].mxu1 %v219_v51  ;;  %v3657_v51 = vld [vmem:[%s3902_s3] ss:$0 sm:$0xff] }
 0x148   :  { %1560 = vmatmul.mubr.f32.gmra.mrb[50].mxu0 %v223_v52  ;;  %1034 = vmatprep.mubr.f32.mxu1 %v228_v53 }
 0x149   :  { %1841 = vmatprep.mubr.msk.f32.mxu0 %vm450_vm1, %v232_v54 }
 0x14b   :  { %1035 = vmatmul.mubr.f32.gmra.mrb[52].mxu1 %v227_v55 }
 0x14c   :  { %1565 = vmatmul.mubr.f32.gmra.mrb[52].mxu0 %v231_v56  ;;  %1039 = vmatprep.mubr.f32.mxu1 %v236_v57 }
 0x14d   :  { %1842 = vmatprep.mubr.msk.f32.mxu0 %vm450_vm1, %v240_v58 }
 0x14f   :  { %1040 = vmatmul.mubr.f32.gmra.mrb[54].mxu1 %v235_v59 }
 0x150   :  { %1570 = vmatmul.mubr.f32.gmra.mrb[54].mxu0 %v239_v60  ;;  %1044 = vmatprep.mubr.f32.mxu1 %v244_v61 }
 0x151   :  { %1843 = vmatprep.mubr.msk.f32.mxu0 %vm450_vm1, %v248_v62 }
 0x153   :  { %1045 = vmatmul.mubr.f32.gmra.mrb[56].mxu1 %v243_v63 }
 0x154   :  { %1575 = vmatmul.mubr.f32.gmra.mrb[56].mxu0 %v247_v1  ;;  %1049 = vmatprep.mubr.f32.mxu1 %v252_v2 }
 0x155   :  { %1844 = vmatprep.mubr.msk.f32.mxu0 %vm450_vm1, %v256_v3 }
 0x157   :  { %1050 = vmatmul.mubr.f32.gmra.mrb[58].mxu1 %v251_v4 }
 0x158   :  { %1580 = vmatmul.mubr.f32.gmra.mrb[58].mxu0 %v255_v5  ;;  %1054 = vmatprep.mubr.f32.mxu1 %v260_v6 }
 0x159   :  { %1845 = vmatprep.mubr.msk.f32.mxu0 %vm450_vm1, %v264_v7 }
 0x15b   :  { %1055 = vmatmul.mubr.f32.gmra.mrb[60].mxu1 %v259_v8 }
 0x15c   :  { %1585 = vmatmul.mubr.f32.gmra.mrb[60].mxu0 %v263_v9  ;;  %1059 = vmatprep.mubr.f32.mxu1 %v268_v10 }
 0x15d   :  { %1846 = vmatprep.mubr.msk.f32.mxu0 %vm450_vm1, %v272_v11 }
 0x15f   :  { %1060 = vmatmul.mubr.f32.gmra.mrb[62].mxu1 %v267_v12 }
 0x160   :  { %1590 = vmatmul.mubr.f32.gmra.mrb[62].mxu0 %v271_v13  ;;  %1064 = vmatprep.mubr.f32.mxu1 %v276_v14 }
 0x161   :  { %1847 = vmatprep.mubr.msk.f32.mxu0 %vm450_vm1, %v280_v15 }
 0x163   :  { %1065 = vmatmul.mubr.f32.gmra.mrb[64].mxu1 %v275_v16 }
 0x164   :  { %1595 = vmatmul.mubr.f32.gmra.mrb[64].mxu0 %v279_v17  ;;  %1069 = vmatprep.mubr.f32.mxu1 %v284_v18 }
 0x165   :  { %1848 = vmatprep.mubr.msk.f32.mxu0 %vm450_vm1, %v288_v19 }
 0x167   :  { %1070 = vmatmul.mubr.f32.gmra.mrb[66].mxu1 %v283_v20 }
 0x168   :  { %1600 = vmatmul.mubr.f32.gmra.mrb[66].mxu0 %v287_v21  ;;  %1074 = vmatprep.mubr.f32.mxu1 %v292_v22 }
 0x169   :  { %1849 = vmatprep.mubr.msk.f32.mxu0 %vm450_vm1, %v296_v23 }
 0x16b   :  { %1075 = vmatmul.mubr.f32.gmra.mrb[68].mxu1 %v291_v24 }
 0x16c   :  { %1605 = vmatmul.mubr.f32.gmra.mrb[68].mxu0 %v295_v25  ;;  %1079 = vmatprep.mubr.f32.mxu1 %v300_v26 }
 0x16d   :  { %1850 = vmatprep.mubr.msk.f32.mxu0 %vm450_vm1, %v304_v27 }
 0x16f   :  { %1080 = vmatmul.mubr.f32.gmra.mrb[70].mxu1 %v299_v28 }
 0x170   :  { %1610 = vmatmul.mubr.f32.gmra.mrb[70].mxu0 %v303_v29  ;;  %1084 = vmatprep.mubr.f32.mxu1 %v308_v30 }
 0x171   :  { %1851 = vmatprep.mubr.msk.f32.mxu0 %vm450_vm1, %v312_v31 }
 0x173   :  { %1085 = vmatmul.mubr.f32.gmra.mrb[72].mxu1 %v307_v32 }
 0x174   :  { %1615 = vmatmul.mubr.f32.gmra.mrb[72].mxu0 %v311_v33  ;;  %1089 = vmatprep.mubr.f32.mxu1 %v316_v34 }
 0x175   :  { %1852 = vmatprep.mubr.msk.f32.mxu0 %vm450_vm1, %v320_v35 }
 0x177   :  { %1090 = vmatmul.mubr.f32.gmra.mrb[74].mxu1 %v315_v36 }
 0x178   :  { %1620 = vmatmul.mubr.f32.gmra.mrb[74].mxu0 %v319_v37  ;;  %1094 = vmatprep.mubr.f32.mxu1 %v324_v38 }
 0x179   :  { %1853 = vmatprep.mubr.msk.f32.mxu0 %vm450_vm1, %v328_v39 }
 0x17b   :  { %1095 = vmatmul.mubr.f32.gmra.mrb[76].mxu1 %v323_v40 }
 0x17c   :  { %1625 = vmatmul.mubr.f32.gmra.mrb[76].mxu0 %v327_v41  ;;  %1099 = vmatprep.mubr.f32.mxu1 %v332_v42 }
 0x17d   :  { %1854 = vmatprep.mubr.msk.f32.mxu0 %vm450_vm1, %v336_v43 }
 0x17f   :  { %1100 = vmatmul.mubr.f32.gmra.mrb[78].mxu1 %v331_v44 }
 0x180   :  { %1630 = vmatmul.mubr.f32.gmra.mrb[78].mxu0 %v335_v45 }
 0x1b6   :  { %v906_v46 = vpop.f32.mrb[0].mxu1 }
 0x1b7   :  { %v1436_v47 = vpop.f32.mrb[0].mxu0  ;;  %v908_v49 = vpop.f32.mrb[1].mxu1 }
 0x1b8   :  { %v2025_v50 = vadd.f32 %v1436_v47, %v906_v46  ;;  %v1438_v0 = vpop.f32.mrb[1].mxu0 }
 0x1ba   :  { %v1642_v52 = vmul.f32 %v2025_v50, %v3652_v48  ;;  %v911_v53 = vpop.f32.mrb[2].mxu1 }
 0x1bb   :  { %v1441_v54 = vpop.f32.mrb[2].mxu0  ;;  %v913_v55 = vpop.f32.mrb[3].mxu1 }
 0x1bc   :  { %v1689_v56 = vadd.f32 %v3657_v51, %v1642_v52  ;;  %v2026_v57 = vadd.f32 %v1441_v54, %v911_v53  ;;  %v1443_v58 = vpop.f32.mrb[3].mxu0 }
 0x1be   :  { %v1729_v59 = vmax.f32 %v1689_v56, 0.0  ;;  %v1643_v60 = vmul.f32 %v2026_v57, %v3652_v48  ;;  %v916_v61 = vpop.f32.mrb[4].mxu1 }
 0x1bf   :  { %v1446_v62 = vpop.f32.mrb[4].mxu0  ;;  %v918_v63 = vpop.f32.mrb[5].mxu1 }
 0x1c0   :  { %1770 = vst.msk [vmem:[%s3903_s4] sm:$0xff] %vm1769_vm2, %v1729_v59  ;;  %v1690_v1 = vadd.f32 %v3657_v51, %v1643_v60  ;;  %v2027_v2 = vadd.f32 %v1446_v62, %v916_v61  ;;  %v1448_v3 = vpop.f32.mrb[5].mxu0 }
 0x1c2   :  { %v1730_v4 = vmax.f32 %v1690_v1, 0.0  ;;  %v1644_v5 = vmul.f32 %v2027_v2, %v3652_v48  ;;  %v921_v6 = vpop.f32.mrb[6].mxu1 }
 0x1c3   :  { %v1451_v7 = vpop.f32.mrb[6].mxu0  ;;  %v923_v8 = vpop.f32.mrb[7].mxu1 }
 0x1c4   :  { %1771 = vst.msk [vmem:[%s3903_s4 + $0x8] sm:$0xff] %vm1769_vm2, %v1730_v4  ;;  %v1691_v9 = vadd.f32 %v3657_v51, %v1644_v5  ;;  %v2028_v10 = vadd.f32 %v1451_v7, %v921_v6  ;;  %v1453_v11 = vpop.f32.mrb[7].mxu0 }
 0x1c6   :  { %v1731_v12 = vmax.f32 %v1691_v9, 0.0  ;;  %v1645_v13 = vmul.f32 %v2028_v10, %v3652_v48  ;;  %v926_v14 = vpop.f32.mrb[8].mxu1 }
 0x1c7   :  { %v1456_v15 = vpop.f32.mrb[8].mxu0  ;;  %v928_v16 = vpop.f32.mrb[9].mxu1 }
 0x1c8   :  { %1772 = vst.msk [vmem:[%s3903_s4 + $0x10] sm:$0xff] %vm1769_vm2, %v1731_v12  ;;  %v1692_v17 = vadd.f32 %v3657_v51, %v1645_v13  ;;  %v2029_v18 = vadd.f32 %v1456_v15, %v926_v14  ;;  %v1458_v19 = vpop.f32.mrb[9].mxu0 }
 0x1ca   :  { %v1732_v20 = vmax.f32 %v1692_v17, 0.0  ;;  %v1646_v21 = vmul.f32 %v2029_v18, %v3652_v48  ;;  %v931_v22 = vpop.f32.mrb[10].mxu1 }
 0x1cb   :  { %v1461_v23 = vpop.f32.mrb[10].mxu0  ;;  %v933_v24 = vpop.f32.mrb[11].mxu1 }
 0x1cc   :  { %1773 = vst.msk [vmem:[%s3903_s4 + $0x18] sm:$0xff] %vm1769_vm2, %v1732_v20  ;;  %v1693_v25 = vadd.f32 %v3657_v51, %v1646_v21  ;;  %v2030_v26 = vadd.f32 %v1461_v23, %v931_v22  ;;  %v1463_v27 = vpop.f32.mrb[11].mxu0 }
 0x1ce   :  { %v1733_v28 = vmax.f32 %v1693_v25, 0.0  ;;  %v1647_v29 = vmul.f32 %v2030_v26, %v3652_v48  ;;  %v936_v30 = vpop.f32.mrb[12].mxu1 }
 0x1cf   :  { %v1466_v31 = vpop.f32.mrb[12].mxu0  ;;  %v938_v32 = vpop.f32.mrb[13].mxu1 }
 0x1d0   :  { %1774 = vst.msk [vmem:[%s3903_s4 + $0x20] sm:$0xff] %vm1769_vm2, %v1733_v28  ;;  %v1694_v33 = vadd.f32 %v3657_v51, %v1647_v29  ;;  %v2031_v34 = vadd.f32 %v1466_v31, %v936_v30  ;;  %v1468_v35 = vpop.f32.mrb[13].mxu0 }
 0x1d2   :  { %v1734_v36 = vmax.f32 %v1694_v33, 0.0  ;;  %v1648_v37 = vmul.f32 %v2031_v34, %v3652_v48  ;;  %v941_v38 = vpop.f32.mrb[14].mxu1 }
 0x1d3   :  { %v1471_v39 = vpop.f32.mrb[14].mxu0  ;;  %v943_v40 = vpop.f32.mrb[15].mxu1 }
 0x1d4   :  { %1775 = vst.msk [vmem:[%s3903_s4 + $0x28] sm:$0xff] %vm1769_vm2, %v1734_v36  ;;  %v1695_v41 = vadd.f32 %v3657_v51, %v1648_v37  ;;  %v2032_v42 = vadd.f32 %v1471_v39, %v941_v38  ;;  %v1473_v43 = vpop.f32.mrb[15].mxu0 }
 0x1d6   :  { %v1735_v44 = vmax.f32 %v1695_v41, 0.0  ;;  %v1649_v45 = vmul.f32 %v2032_v42, %v3652_v48  ;;  %v946_v46 = vpop.f32.mrb[16].mxu1 }
 0x1d7   :  { %v1476_v47 = vpop.f32.mrb[16].mxu0  ;;  %v948_v49 = vpop.f32.mrb[17].mxu1 }
 0x1d8   :  { %1776 = vst.msk [vmem:[%s3903_s4 + $0x30] sm:$0xff] %vm1769_vm2, %v1735_v44  ;;  %v1696_v50 = vadd.f32 %v3657_v51, %v1649_v45  ;;  %v2033_v0 = vadd.f32 %v1476_v47, %v946_v46  ;;  %v1478_v52 = vpop.f32.mrb[17].mxu0 }
 0x1da   :  { %v1736_v53 = vmax.f32 %v1696_v50, 0.0  ;;  %v1650_v54 = vmul.f32 %v2033_v0, %v3652_v48  ;;  %v951_v55 = vpop.f32.mrb[18].mxu1 }
 0x1db   :  { %v1481_v56 = vpop.f32.mrb[18].mxu0  ;;  %v953_v57 = vpop.f32.mrb[19].mxu1 }
 0x1dc   :  { %1777 = vst.msk [vmem:[%s3903_s4 + $0x38] sm:$0xff] %vm1769_vm2, %v1736_v53  ;;  %v1697_v58 = vadd.f32 %v3657_v51, %v1650_v54  ;;  %v2034_v59 = vadd.f32 %v1481_v56, %v951_v55  ;;  %v1483_v60 = vpop.f32.mrb[19].mxu0 }
 0x1de   :  { %v1737_v61 = vmax.f32 %v1697_v58, 0.0  ;;  %v1651_v62 = vmul.f32 %v2034_v59, %v3652_v48  ;;  %v956_v63 = vpop.f32.mrb[20].mxu1 }
 0x1df   :  { %v1486_v1 = vpop.f32.mrb[20].mxu0  ;;  %v958_v2 = vpop.f32.mrb[21].mxu1 }
 0x1e0   :  { %1778 = vst.msk [vmem:[%s3903_s4 + $0x40] sm:$0xff] %vm1769_vm2, %v1737_v61  ;;  %v1698_v3 = vadd.f32 %v3657_v51, %v1651_v62  ;;  %v2035_v4 = vadd.f32 %v1486_v1, %v956_v63  ;;  %v1488_v5 = vpop.f32.mrb[21].mxu0 }
 0x1e2   :  { %v1738_v6 = vmax.f32 %v1698_v3, 0.0  ;;  %v1652_v7 = vmul.f32 %v2035_v4, %v3652_v48  ;;  %v961_v8 = vpop.f32.mrb[22].mxu1 }
 0x1e3   :  { %v1491_v9 = vpop.f32.mrb[22].mxu0  ;;  %v963_v10 = vpop.f32.mrb[23].mxu1 }
 0x1e4   :  { %1779 = vst.msk [vmem:[%s3903_s4 + $0x48] sm:$0xff] %vm1769_vm2, %v1738_v6  ;;  %v1699_v11 = vadd.f32 %v3657_v51, %v1652_v7  ;;  %v2036_v12 = vadd.f32 %v1491_v9, %v961_v8  ;;  %v1493_v13 = vpop.f32.mrb[23].mxu0 }
 0x1e6   :  { %v1739_v14 = vmax.f32 %v1699_v11, 0.0  ;;  %v1653_v15 = vmul.f32 %v2036_v12, %v3652_v48  ;;  %v966_v16 = vpop.f32.mrb[24].mxu1 }
 0x1e7   :  { %v1496_v17 = vpop.f32.mrb[24].mxu0  ;;  %v968_v18 = vpop.f32.mrb[25].mxu1 }
 0x1e8   :  { %1780 = vst.msk [vmem:[%s3903_s4 + $0x50] sm:$0xff] %vm1769_vm2, %v1739_v14  ;;  %v1700_v19 = vadd.f32 %v3657_v51, %v1653_v15  ;;  %v2037_v20 = vadd.f32 %v1496_v17, %v966_v16  ;;  %v1498_v21 = vpop.f32.mrb[25].mxu0 }
 0x1ea   :  { %v1740_v22 = vmax.f32 %v1700_v19, 0.0  ;;  %v1654_v23 = vmul.f32 %v2037_v20, %v3652_v48  ;;  %v971_v24 = vpop.f32.mrb[26].mxu1 }
 0x1eb   :  { %v1501_v25 = vpop.f32.mrb[26].mxu0  ;;  %v973_v26 = vpop.f32.mrb[27].mxu1 }
 0x1ec   :  { %1781 = vst.msk [vmem:[%s3903_s4 + $0x58] sm:$0xff] %vm1769_vm2, %v1740_v22  ;;  %v1701_v27 = vadd.f32 %v3657_v51, %v1654_v23  ;;  %v2038_v28 = vadd.f32 %v1501_v25, %v971_v24  ;;  %v1503_v29 = vpop.f32.mrb[27].mxu0 }
 0x1ee   :  { %v1741_v30 = vmax.f32 %v1701_v27, 0.0  ;;  %v1655_v31 = vmul.f32 %v2038_v28, %v3652_v48  ;;  %v976_v32 = vpop.f32.mrb[28].mxu1 }
 0x1ef   :  { %v1506_v33 = vpop.f32.mrb[28].mxu0  ;;  %v978_v34 = vpop.f32.mrb[29].mxu1 }
 0x1f0   :  { %1782 = vst.msk [vmem:[%s3903_s4 + $0x60] sm:$0xff] %vm1769_vm2, %v1741_v30  ;;  %v1702_v35 = vadd.f32 %v3657_v51, %v1655_v31  ;;  %v2039_v36 = vadd.f32 %v1506_v33, %v976_v32  ;;  %v1508_v37 = vpop.f32.mrb[29].mxu0 }
 0x1f2   :  { %v1742_v38 = vmax.f32 %v1702_v35, 0.0  ;;  %v1656_v39 = vmul.f32 %v2039_v36, %v3652_v48  ;;  %v981_v40 = vpop.f32.mrb[30].mxu1 }
 0x1f3   :  { %v1511_v41 = vpop.f32.mrb[30].mxu0  ;;  %v983_v42 = vpop.f32.mrb[31].mxu1 }
 0x1f4   :  { %1783 = vst.msk [vmem:[%s3903_s4 + $0x68] sm:$0xff] %vm1769_vm2, %v1742_v38  ;;  %v1703_v43 = vadd.f32 %v3657_v51, %v1656_v39  ;;  %v2040_v44 = vadd.f32 %v1511_v41, %v981_v40  ;;  %v1513_v45 = vpop.f32.mrb[31].mxu0 }
 0x1f6   :  { %v1743_v46 = vmax.f32 %v1703_v43, 0.0  ;;  %v1657_v47 = vmul.f32 %v2040_v44, %v3652_v48  ;;  %v986_v49 = vpop.f32.mrb[32].mxu1 }
 0x1f7   :  { %v1516_v50 = vpop.f32.mrb[32].mxu0  ;;  %v988_v0 = vpop.f32.mrb[33].mxu1 }
 0x1f8   :  { %1784 = vst.msk [vmem:[%s3903_s4 + $0x70] sm:$0xff] %vm1769_vm2, %v1743_v46  ;;  %v1704_v52 = vadd.f32 %v3657_v51, %v1657_v47  ;;  %v2041_v53 = vadd.f32 %v1516_v50, %v986_v49  ;;  %v1518_v54 = vpop.f32.mrb[33].mxu0 }
 0x1fa   :  { %v1744_v55 = vmax.f32 %v1704_v52, 0.0  ;;  %v1658_v56 = vmul.f32 %v2041_v53, %v3652_v48  ;;  %v991_v57 = vpop.f32.mrb[34].mxu1 }
 0x1fb   :  { %v1521_v58 = vpop.f32.mrb[34].mxu0  ;;  %v993_v59 = vpop.f32.mrb[35].mxu1 }
 0x1fc   :  { %1785 = vst.msk [vmem:[%s3903_s4 + $0x78] sm:$0xff] %vm1769_vm2, %v1744_v55  ;;  %v1705_v60 = vadd.f32 %v3657_v51, %v1658_v56  ;;  %v2042_v61 = vadd.f32 %v1521_v58, %v991_v57  ;;  %v1523_v62 = vpop.f32.mrb[35].mxu0 }
 0x1fe   :  { %v1745_v63 = vmax.f32 %v1705_v60, 0.0  ;;  %v1659_v1 = vmul.f32 %v2042_v61, %v3652_v48  ;;  %v996_v2 = vpop.f32.mrb[36].mxu1 }
 0x1ff   :  { %v1526_v3 = vpop.f32.mrb[36].mxu0  ;;  %v998_v4 = vpop.f32.mrb[37].mxu1 }
 0x200   :  { %1786 = vst.msk [vmem:[%s3903_s4 + $0x80] sm:$0xff] %vm1769_vm2, %v1745_v63  ;;  %v1706_v5 = vadd.f32 %v3657_v51, %v1659_v1  ;;  %v2043_v6 = vadd.f32 %v1526_v3, %v996_v2  ;;  %v1528_v7 = vpop.f32.mrb[37].mxu0 }
 0x202   :  { %v1746_v8 = vmax.f32 %v1706_v5, 0.0  ;;  %v1660_v9 = vmul.f32 %v2043_v6, %v3652_v48  ;;  %v1001_v10 = vpop.f32.mrb[38].mxu1 }
 0x203   :  { %v1531_v11 = vpop.f32.mrb[38].mxu0  ;;  %v1003_v12 = vpop.f32.mrb[39].mxu1 }
 0x204   :  { %1787 = vst.msk [vmem:[%s3903_s4 + $0x88] sm:$0xff] %vm1769_vm2, %v1746_v8  ;;  %v1707_v13 = vadd.f32 %v3657_v51, %v1660_v9  ;;  %v2044_v14 = vadd.f32 %v1531_v11, %v1001_v10  ;;  %v1533_v15 = vpop.f32.mrb[39].mxu0 }
 0x206   :  { %v1747_v16 = vmax.f32 %v1707_v13, 0.0  ;;  %v1661_v17 = vmul.f32 %v2044_v14, %v3652_v48  ;;  %v1006_v18 = vpop.f32.mrb[40].mxu1 }
 0x207   :  { %v1536_v19 = vpop.f32.mrb[40].mxu0  ;;  %v1008_v20 = vpop.f32.mrb[41].mxu1 }
 0x208   :  { %1788 = vst.msk [vmem:[%s3903_s4 + $0x90] sm:$0xff] %vm1769_vm2, %v1747_v16  ;;  %v1708_v21 = vadd.f32 %v3657_v51, %v1661_v17  ;;  %v2045_v22 = vadd.f32 %v1536_v19, %v1006_v18  ;;  %v1538_v23 = vpop.f32.mrb[41].mxu0 }
 0x20a   :  { %v1748_v24 = vmax.f32 %v1708_v21, 0.0  ;;  %v1662_v25 = vmul.f32 %v2045_v22, %v3652_v48  ;;  %v1011_v26 = vpop.f32.mrb[42].mxu1 }
 0x20b   :  { %v1541_v27 = vpop.f32.mrb[42].mxu0  ;;  %v1013_v28 = vpop.f32.mrb[43].mxu1 }
 0x20c   :  { %1789 = vst.msk [vmem:[%s3903_s4 + $0x98] sm:$0xff] %vm1769_vm2, %v1748_v24  ;;  %v1709_v29 = vadd.f32 %v3657_v51, %v1662_v25  ;;  %v2046_v30 = vadd.f32 %v1541_v27, %v1011_v26  ;;  %v1543_v31 = vpop.f32.mrb[43].mxu0 }
 0x20e   :  { %v1749_v32 = vmax.f32 %v1709_v29, 0.0  ;;  %v1663_v33 = vmul.f32 %v2046_v30, %v3652_v48  ;;  %v1016_v34 = vpop.f32.mrb[44].mxu1 }
 0x20f   :  { %v1546_v35 = vpop.f32.mrb[44].mxu0  ;;  %v1018_v36 = vpop.f32.mrb[45].mxu1 }
 0x210   :  { %1790 = vst.msk [vmem:[%s3903_s4 + $0xa0] sm:$0xff] %vm1769_vm2, %v1749_v32  ;;  %v1710_v37 = vadd.f32 %v3657_v51, %v1663_v33  ;;  %v2047_v38 = vadd.f32 %v1546_v35, %v1016_v34  ;;  %v1548_v39 = vpop.f32.mrb[45].mxu0 }
 0x212   :  { %v1750_v40 = vmax.f32 %v1710_v37, 0.0  ;;  %v1664_v41 = vmul.f32 %v2047_v38, %v3652_v48  ;;  %v1021_v42 = vpop.f32.mrb[46].mxu1 }
 0x213   :  { %v1551_v43 = vpop.f32.mrb[46].mxu0  ;;  %v1023_v44 = vpop.f32.mrb[47].mxu1 }
 0x214   :  { %1791 = vst.msk [vmem:[%s3903_s4 + $0xa8] sm:$0xff] %vm1769_vm2, %v1750_v40  ;;  %v1711_v45 = vadd.f32 %v3657_v51, %v1664_v41  ;;  %v2048_v46 = vadd.f32 %v1551_v43, %v1021_v42  ;;  %v1553_v47 = vpop.f32.mrb[47].mxu0 }
 0x216   :  { %v1751_v49 = vmax.f32 %v1711_v45, 0.0  ;;  %v1665_v50 = vmul.f32 %v2048_v46, %v3652_v48  ;;  %v1026_v0 = vpop.f32.mrb[48].mxu1 }
 0x217   :  { %v1556_v52 = vpop.f32.mrb[48].mxu0  ;;  %v1028_v53 = vpop.f32.mrb[49].mxu1 }
 0x218   :  { %1792 = vst.msk [vmem:[%s3903_s4 + $0xb0] sm:$0xff] %vm1769_vm2, %v1751_v49  ;;  %v1712_v54 = vadd.f32 %v3657_v51, %v1665_v50  ;;  %v2049_v55 = vadd.f32 %v1556_v52, %v1026_v0  ;;  %v1558_v56 = vpop.f32.mrb[49].mxu0 }
 0x21a   :  { %v1752_v57 = vmax.f32 %v1712_v54, 0.0  ;;  %v1666_v58 = vmul.f32 %v2049_v55, %v3652_v48  ;;  %v1031_v59 = vpop.f32.mrb[50].mxu1 }
 0x21b   :  { %v1561_v60 = vpop.f32.mrb[50].mxu0  ;;  %v1033_v61 = vpop.f32.mrb[51].mxu1 }
 0x21c   :  { %1793 = vst.msk [vmem:[%s3903_s4 + $0xb8] sm:$0xff] %vm1769_vm2, %v1752_v57  ;;  %v1713_v62 = vadd.f32 %v3657_v51, %v1666_v58  ;;  %v2050_v63 = vadd.f32 %v1561_v60, %v1031_v59  ;;  %v1563_v1 = vpop.f32.mrb[51].mxu0 }
 0x21e   :  { %v1753_v2 = vmax.f32 %v1713_v62, 0.0  ;;  %v1667_v3 = vmul.f32 %v2050_v63, %v3652_v48  ;;  %v1036_v4 = vpop.f32.mrb[52].mxu1 }
 0x21f   :  { %v1566_v5 = vpop.f32.mrb[52].mxu0  ;;  %v1038_v6 = vpop.f32.mrb[53].mxu1 }
 0x220   :  { %1794 = vst.msk [vmem:[%s3903_s4 + $0xc0] sm:$0xff] %vm1769_vm2, %v1753_v2  ;;  %v1714_v7 = vadd.f32 %v3657_v51, %v1667_v3  ;;  %v2051_v8 = vadd.f32 %v1566_v5, %v1036_v4  ;;  %v1568_v9 = vpop.f32.mrb[53].mxu0 }
 0x222   :  { %v1754_v10 = vmax.f32 %v1714_v7, 0.0  ;;  %v1668_v11 = vmul.f32 %v2051_v8, %v3652_v48  ;;  %v1041_v12 = vpop.f32.mrb[54].mxu1 }
 0x223   :  { %v1571_v13 = vpop.f32.mrb[54].mxu0  ;;  %v1043_v14 = vpop.f32.mrb[55].mxu1 }
 0x224   :  { %1795 = vst.msk [vmem:[%s3903_s4 + $0xc8] sm:$0xff] %vm1769_vm2, %v1754_v10  ;;  %v1715_v15 = vadd.f32 %v3657_v51, %v1668_v11  ;;  %v2052_v16 = vadd.f32 %v1571_v13, %v1041_v12  ;;  %v1573_v17 = vpop.f32.mrb[55].mxu0 }
 0x226   :  { %v1755_v18 = vmax.f32 %v1715_v15, 0.0  ;;  %v1669_v19 = vmul.f32 %v2052_v16, %v3652_v48  ;;  %v1046_v20 = vpop.f32.mrb[56].mxu1 }
 0x227   :  { %v1576_v21 = vpop.f32.mrb[56].mxu0  ;;  %v1048_v22 = vpop.f32.mrb[57].mxu1 }
 0x228   :  { %1796 = vst.msk [vmem:[%s3903_s4 + $0xd0] sm:$0xff] %vm1769_vm2, %v1755_v18  ;;  %v1716_v23 = vadd.f32 %v3657_v51, %v1669_v19  ;;  %v2053_v24 = vadd.f32 %v1576_v21, %v1046_v20  ;;  %v1578_v25 = vpop.f32.mrb[57].mxu0 }
 0x22a   :  { %v1756_v26 = vmax.f32 %v1716_v23, 0.0  ;;  %v1670_v27 = vmul.f32 %v2053_v24, %v3652_v48  ;;  %v1051_v28 = vpop.f32.mrb[58].mxu1 }
 0x22b   :  { %v1581_v29 = vpop.f32.mrb[58].mxu0  ;;  %v1053_v30 = vpop.f32.mrb[59].mxu1 }
 0x22c   :  { %1797 = vst.msk [vmem:[%s3903_s4 + $0xd8] sm:$0xff] %vm1769_vm2, %v1756_v26  ;;  %v1717_v31 = vadd.f32 %v3657_v51, %v1670_v27  ;;  %v2054_v32 = vadd.f32 %v1581_v29, %v1051_v28  ;;  %v1583_v33 = vpop.f32.mrb[59].mxu0 }
 0x22e   :  { %v1757_v34 = vmax.f32 %v1717_v31, 0.0  ;;  %v1671_v35 = vmul.f32 %v2054_v32, %v3652_v48  ;;  %v1056_v36 = vpop.f32.mrb[60].mxu1 }
 0x22f   :  { %v1586_v37 = vpop.f32.mrb[60].mxu0  ;;  %v1058_v38 = vpop.f32.mrb[61].mxu1 }
 0x230   :  { %1798 = vst.msk [vmem:[%s3903_s4 + $0xe0] sm:$0xff] %vm1769_vm2, %v1757_v34  ;;  %v1718_v39 = vadd.f32 %v3657_v51, %v1671_v35  ;;  %v2055_v40 = vadd.f32 %v1586_v37, %v1056_v36  ;;  %v1588_v41 = vpop.f32.mrb[61].mxu0 }
 0x232   :  { %v1758_v42 = vmax.f32 %v1718_v39, 0.0  ;;  %v1672_v43 = vmul.f32 %v2055_v40, %v3652_v48  ;;  %v1061_v44 = vpop.f32.mrb[62].mxu1 }
 0x233   :  { %v1591_v45 = vpop.f32.mrb[62].mxu0  ;;  %v1063_v46 = vpop.f32.mrb[63].mxu1 }
 0x234   :  { %1799 = vst.msk [vmem:[%s3903_s4 + $0xe8] sm:$0xff] %vm1769_vm2, %v1758_v42  ;;  %v1719_v47 = vadd.f32 %v3657_v51, %v1672_v43  ;;  %v2056_v49 = vadd.f32 %v1591_v45, %v1061_v44  ;;  %v1593_v50 = vpop.f32.mrb[63].mxu0 }
 0x236   :  { %v1759_v0 = vmax.f32 %v1719_v47, 0.0  ;;  %v1673_v52 = vmul.f32 %v2056_v49, %v3652_v48  ;;  %v1066_v53 = vpop.f32.mrb[64].mxu1 }
 0x237   :  { %v1596_v54 = vpop.f32.mrb[64].mxu0  ;;  %v1068_v55 = vpop.f32.mrb[65].mxu1 }
 0x238   :  { %1800 = vst.msk [vmem:[%s3903_s4 + $0xf0] sm:$0xff] %vm1769_vm2, %v1759_v0  ;;  %v1720_v56 = vadd.f32 %v3657_v51, %v1673_v52  ;;  %v2057_v57 = vadd.f32 %v1596_v54, %v1066_v53  ;;  %v1598_v58 = vpop.f32.mrb[65].mxu0 }
 0x23a   :  { %v1760_v59 = vmax.f32 %v1720_v56, 0.0  ;;  %v1674_v60 = vmul.f32 %v2057_v57, %v3652_v48  ;;  %v1071_v61 = vpop.f32.mrb[66].mxu1 }
 0x23b   :  { %v1601_v62 = vpop.f32.mrb[66].mxu0  ;;  %v1073_v63 = vpop.f32.mrb[67].mxu1 }
 0x23c   :  { %1801 = vst.msk [vmem:[%s3903_s4 + $0xf8] sm:$0xff] %vm1769_vm2, %v1760_v59  ;;  %v1721_v1 = vadd.f32 %v3657_v51, %v1674_v60  ;;  %v2058_v2 = vadd.f32 %v1601_v62, %v1071_v61  ;;  %v1603_v3 = vpop.f32.mrb[67].mxu0 }
 0x23e   :  { %v1761_v4 = vmax.f32 %v1721_v1, 0.0  ;;  %v1675_v5 = vmul.f32 %v2058_v2, %v3652_v48  ;;  %v1076_v6 = vpop.f32.mrb[68].mxu1 }
 0x23f   :  { %v1606_v7 = vpop.f32.mrb[68].mxu0  ;;  %v1078_v8 = vpop.f32.mrb[69].mxu1 }
 0x240   :  { %1802 = vst.msk [vmem:[%s3903_s4 + $0x100] sm:$0xff] %vm1769_vm2, %v1761_v4  ;;  %v1722_v9 = vadd.f32 %v3657_v51, %v1675_v5  ;;  %v2059_v10 = vadd.f32 %v1606_v7, %v1076_v6  ;;  %v1608_v11 = vpop.f32.mrb[69].mxu0 }
 0x242   :  { %v1762_v12 = vmax.f32 %v1722_v9, 0.0  ;;  %v1676_v13 = vmul.f32 %v2059_v10, %v3652_v48  ;;  %v1081_v14 = vpop.f32.mrb[70].mxu1 }
 0x243   :  { %v1611_v15 = vpop.f32.mrb[70].mxu0  ;;  %v1083_v16 = vpop.f32.mrb[71].mxu1 }
 0x244   :  { %1803 = vst.msk [vmem:[%s3903_s4 + $0x108] sm:$0xff] %vm1769_vm2, %v1762_v12  ;;  %v1723_v17 = vadd.f32 %v3657_v51, %v1676_v13  ;;  %v2060_v18 = vadd.f32 %v1611_v15, %v1081_v14  ;;  %v1613_v19 = vpop.f32.mrb[71].mxu0 }
 0x246   :  { %v1763_v20 = vmax.f32 %v1723_v17, 0.0  ;;  %v1677_v21 = vmul.f32 %v2060_v18, %v3652_v48  ;;  %v1086_v22 = vpop.f32.mrb[72].mxu1 }
 0x247   :  { %v1616_v23 = vpop.f32.mrb[72].mxu0  ;;  %v1088_v24 = vpop.f32.mrb[73].mxu1 }
 0x248   :  { %1804 = vst.msk [vmem:[%s3903_s4 + $0x110] sm:$0xff] %vm1769_vm2, %v1763_v20  ;;  %v1724_v25 = vadd.f32 %v3657_v51, %v1677_v21  ;;  %v2061_v26 = vadd.f32 %v1616_v23, %v1086_v22  ;;  %v1618_v27 = vpop.f32.mrb[73].mxu0 }
 0x24a   :  { %v1764_v28 = vmax.f32 %v1724_v25, 0.0  ;;  %v1678_v29 = vmul.f32 %v2061_v26, %v3652_v48  ;;  %v1091_v30 = vpop.f32.mrb[74].mxu1 }
 0x24b   :  { %v1621_v31 = vpop.f32.mrb[74].mxu0  ;;  %v1093_v32 = vpop.f32.mrb[75].mxu1 }
 0x24c   :  { %1805 = vst.msk [vmem:[%s3903_s4 + $0x118] sm:$0xff] %vm1769_vm2, %v1764_v28  ;;  %v1725_v33 = vadd.f32 %v3657_v51, %v1678_v29  ;;  %v2062_v34 = vadd.f32 %v1621_v31, %v1091_v30  ;;  %v1623_v35 = vpop.f32.mrb[75].mxu0 }
 0x24e   :  { %v1765_v36 = vmax.f32 %v1725_v33, 0.0  ;;  %v1679_v37 = vmul.f32 %v2062_v34, %v3652_v48  ;;  %v1096_v38 = vpop.f32.mrb[76].mxu1 }
 0x24f   :  { %v1626_v39 = vpop.f32.mrb[76].mxu0  ;;  %v1098_v40 = vpop.f32.mrb[77].mxu1 }
 0x250   :  { %1806 = vst.msk [vmem:[%s3903_s4 + $0x120] sm:$0xff] %vm1769_vm2, %v1765_v36  ;;  %v1726_v41 = vadd.f32 %v3657_v51, %v1679_v37  ;;  %v2063_v42 = vadd.f32 %v1626_v39, %v1096_v38  ;;  %v1628_v43 = vpop.f32.mrb[77].mxu0 }
 0x252   :  { %v1766_v44 = vmax.f32 %v1726_v41, 0.0  ;;  %v1680_v45 = vmul.f32 %v2063_v42, %v3652_v48  ;;  %v1101_v46 = vpop.f32.mrb[78].mxu1 }
 0x253   :  { %v1631_v47 = vpop.f32.mrb[78].mxu0  ;;  %v1103_v49 = vpop.f32.mrb[79].mxu1 }
 0x254   :  { %1807 = vst.msk [vmem:[%s3903_s4 + $0x128] sm:$0xff] %vm1769_vm2, %v1766_v44  ;;  %v1727_v50 = vadd.f32 %v3657_v51, %v1680_v45  ;;  %v2064_v0 = vadd.f32 %v1631_v47, %v1101_v46  ;;  %v1633_v52 = vpop.f32.mrb[79].mxu0 }
 0x256   :  { %v1767_v53 = vmax.f32 %v1727_v50, 0.0  ;;  %v1681_v54 = vmul.f32 %v2064_v0, %v3652_v48 }
 0x258   :  { %1808 = vst.msk [vmem:[%s3903_s4 + $0x130] sm:$0xff] %vm1769_vm2, %v1767_v53  ;;  %v1728_v55 = vadd.f32 %v3657_v51, %v1681_v54 }
 0x25a   :  { %v1768_v56 = vmax.f32 %v1728_v55, 0.0 }
 0x25c   :  { %1809 = vst.msk [vmem:[%s3903_s4 + $0x138] sm:$0xff] %vm1769_vm2, %v1768_v56 }

// kernel: critic_forward.8
= control target key start
LH: loop header
LB: loop body
LE: loop exit
PB: predicated region body
PF: predicated region fallthrough
CT: control target
= control target key end

     0   :  { %v719_v0 = vmov 0.0|0.0   ;;  %vm143_vm0 = vcmask 392192   ;;  %vm576_vm1 = vcmask 523264   ;;  %s1286_s1 = inlined_call_operand.vmem [shape: f32[432,64], index: 1, kind: input, shape index: {}]   ;;  %s1287_s0 = inlined_call_operand.vmem [shape: f32[144,432], index: 0, kind: input, shape index: {}]   ;;  %s1288_s2 = inlined_call_operand.vmem [shape: f32[1,64], index: 2, kind: input, shape index: {}]   ;;  %s1289_s3 = inlined_call_operand.vmem [shape: f32[1,64], index: 3, kind: input, shape index: {}]   ;;  %s1290_s4 = inlined_call_operand.vmem [shape: f32[144,64], index: 4, kind: output, shape index: {}]  }
   0x1   :  { %619 = vmatprep.subr.bf16.mxu1 %v719_v0  ;;  %v89_v1 = vld [vmem:[%s1286_s1] sm:$0xff]  ;;  %v90_v2 = vld [vmem:[%s1286_s1 + $0x8] sm:$0xff]  ;;  %v91_v3 = vld [vmem:[%s1286_s1 + $0x10] sm:$0xff]  ;;  %667 = vmatprep.subr.bf16.mxu0 %v719_v0 }
   0x2   :  { %v620_v4 = vpack.c.bf16 %v90_v2, %v89_v1  ;;  %v92_v5 = vld [vmem:[%s1286_s1 + $0x18] sm:$0xff]  ;;  %v121_v7 = vld [vmem:[%s1286_s1 + $0x100] sm:$0xff]  ;;  %v122_v8 = vld [vmem:[%s1286_s1 + $0x108] sm:$0xff] }
   0x3   :  { %v623_v6 = vpack.c.bf16 %v92_v5, %v91_v3  ;;  %v93_v9 = vld [vmem:[%s1286_s1 + $0x20] sm:$0xff]  ;;  %v94_v10 = vld [vmem:[%s1286_s1 + $0x28] sm:$0xff]  ;;  %v668_v11 = vpack.c.bf16 %v122_v8, %v121_v7  ;;  %v123_v12 = vld [vmem:[%s1286_s1 + $0x110] sm:$0xff] }
   0x4   :  { %621 = vmatpush1.bf16.msra.mxu1 %v620_v4  ;;  %v124_v13 = vld [vmem:[%s1286_s1 + $0x118] sm:$0xff]  ;;  %v626_v15 = vpack.c.bf16 %v94_v10, %v93_v9  ;;  %v125_v16 = vld [vmem:[%s1286_s1 + $0x120] sm:$0xff]  ;;  %v126_v17 = vld [vmem:[%s1286_s1 + $0x128] sm:$0xff] }
   0x5   :  { %622 = vmatprep.subr.bf16.mxu1 %v719_v0  ;;  %669 = vmatpush1.bf16.msra.mxu0 %v668_v11  ;;  %v671_v14 = vpack.c.bf16 %v124_v13, %v123_v12  ;;  %v95_v18 = vld [vmem:[%s1286_s1 + $0x30] sm:$0xff]  ;;  %v96_v19 = vld [vmem:[%s1286_s1 + $0x38] sm:$0xff]  ;;  %v674_v20 = vpack.c.bf16 %v126_v17, %v125_v16  ;;  %v97_v24 = vld [vmem:[%s1286_s1 + $0x40] sm:$0xff] }
   0x6   :  { %670 = vmatprep.subr.bf16.mxu0 %v719_v0  ;;  %v629_v21 = vpack.c.bf16 %v96_v19, %v95_v18  ;;  %v127_v22 = vld [vmem:[%s1286_s1 + $0x130] sm:$0xff]  ;;  %v128_v23 = vld [vmem:[%s1286_s1 + $0x138] sm:$0xff]  ;;  %v98_v25 = vld [vmem:[%s1286_s1 + $0x48] sm:$0xff] }
   0x7   :  { %v677_v26 = vpack.c.bf16 %v128_v23, %v127_v22  ;;  %v632_v27 = vpack.c.bf16 %v98_v25, %v97_v24  ;;  %v129_v28 = vld [vmem:[%s1286_s1 + $0x140] sm:$0xff]  ;;  %v130_v29 = vld [vmem:[%s1286_s1 + $0x148] sm:$0xff]  ;;  %v99_v30 = vld [vmem:[%s1286_s1 + $0x50] sm:$0xff] }
   0x8   :  { %624 = vmatpush1.bf16.msra.mxu1 %v623_v6  ;;  %v100_v31 = vld [vmem:[%s1286_s1 + $0x58] sm:$0xff]  ;;  %v680_v32 = vpack.c.bf16 %v130_v29, %v129_v28  ;;  %v18_v34 = vld [vmem:[%s1287_s0 + $0x8] sm:$0xff]  ;;  %v131_v36 = vld [vmem:[%s1286_s1 + $0x150] sm:$0xff] }
   0x9   :  { %625 = vmatprep.subr.bf16.mxu1 %v719_v0  ;;  %672 = vmatpush1.bf16.msra.mxu0 %v671_v14  ;;  %v20_v33 = vld [vmem:[%s1287_s0 + $0x18] sm:$0xff]  ;;  %v635_v35 = vpack.c.bf16 %v100_v31, %v99_v30  ;;  %v101_v38 = vld [vmem:[%s1286_s1 + $0x60] sm:$0xff]  ;;  %v102_v39 = vld [vmem:[%s1286_s1 + $0x68] sm:$0xff] }
   0xa   :  { %673 = vmatprep.subr.bf16.mxu0 %v719_v0  ;;  %v132_v37 = vld [vmem:[%s1286_s1 + $0x158] sm:$0xff]  ;;  %599 = vmatprep.mubr.msk.f32.mxu0 %vm143_vm0, %v20_v33  ;;  %v638_v41 = vpack.c.bf16 %v102_v39, %v101_v38  ;;  %v133_v42 = vld [vmem:[%s1286_s1 + $0x160] sm:$0xff]  ;;  %v134_v43 = vld [vmem:[%s1286_s1 + $0x168] sm:$0xff] }
   0xb   :  { %262 = vmatprep.mubr.f32.mxu1 %v18_v34  ;;  %v683_v40 = vpack.c.bf16 %v132_v37, %v131_v36  ;;  %v103_v44 = vld [vmem:[%s1286_s1 + $0x70] sm:$0xff]  ;;  %v104_v45 = vld [vmem:[%s1286_s1 + $0x78] sm:$0xff]  ;;  %v686_v46 = vpack.c.bf16 %v134_v43, %v133_v42  ;;  %v105_v50 = vld [vmem:[%s1286_s1 + $0x80] sm:$0xff] }
   0xc   :  { %627 = vmatpush1.bf16.msra.mxu1 %v626_v15  ;;  %v641_v47 = vpack.c.bf16 %v104_v45, %v103_v44  ;;  %v135_v48 = vld [vmem:[%s1286_s1 + $0x170] sm:$0xff]  ;;  %v136_v49 = vld [vmem:[%s1286_s1 + $0x178] sm:$0xff]  ;;  %v106_v51 = vld [vmem:[%s1286_s1 + $0x88] sm:$0xff] }
   0xd   :  { %628 = vmatprep.subr.bf16.mxu1 %v719_v0  ;;  %675 = vmatpush1.bf16.msra.mxu0 %v674_v20  ;;  %v689_v52 = vpack.c.bf16 %v136_v49, %v135_v48  ;;  %v644_v53 = vpack.c.bf16 %v106_v51, %v105_v50  ;;  %v137_v54 = vld [vmem:[%s1286_s1 + $0x180] sm:$0xff]  ;;  %v138_v55 = vld [vmem:[%s1286_s1 + $0x188] sm:$0xff]  ;;  %v107_v56 = vld [vmem:[%s1286_s1 + $0x90] sm:$0xff] }
   0xe   :  { %676 = vmatprep.subr.bf16.mxu0 %v719_v0  ;;  %v108_v57 = vld [vmem:[%s1286_s1 + $0x98] sm:$0xff]  ;;  %v692_v58 = vpack.c.bf16 %v138_v55, %v137_v54  ;;  %v139_v60 = vld [vmem:[%s1286_s1 + $0x190] sm:$0xff]  ;;  %v109_v62 = vld [vmem:[%s1286_s1 + $0xa0] sm:$0xff] }
   0xf   :  { %v647_v59 = vpack.c.bf16 %v108_v57, %v107_v56  ;;  %v140_v61 = vld [vmem:[%s1286_s1 + $0x198] sm:$0xff]  ;;  %v110_v63 = vld [vmem:[%s1286_s1 + $0xa8] sm:$0xff]  ;;  %v141_v3 = vld [vmem:[%s1286_s1 + $0x1a0] sm:$0xff] }
  0x10   :  { %630 = vmatpush1.bf16.msra.mxu1 %v629_v21  ;;  %v695_v1 = vpack.c.bf16 %v140_v61, %v139_v60  ;;  %v650_v2 = vpack.c.bf16 %v110_v63, %v109_v62  ;;  %v142_v4 = vld [vmem:[%s1286_s1 + $0x1a8] sm:$0xff]  ;;  %v111_v5 = vld [vmem:[%s1286_s1 + $0xb0] sm:$0xff]  ;;  %v112_v6 = vld [vmem:[%s1286_s1 + $0xb8] sm:$0xff] }
  0x11   :  { %631 = vmatprep.subr.bf16.mxu1 %v719_v0  ;;  %678 = vmatpush1.bf16.msra.mxu0 %v677_v26  ;;  %v698_v7 = vpack.c.bf16 %v142_v4, %v141_v3  ;;  %v653_v8 = vpack.c.bf16 %v112_v6, %v111_v5  ;;  %v113_v9 = vld [vmem:[%s1286_s1 + $0xc0] sm:$0xff]  ;;  %v114_v10 = vld [vmem:[%s1286_s1 + $0xc8] sm:$0xff]  ;;  %v19_v11 = vld [vmem:[%s1287_s0 + $0x10] sm:$0xff] }
  0x12   :  { %679 = vmatprep.subr.bf16.mxu0 %v719_v0  ;;  %v656_v12 = vpack.c.bf16 %v114_v10, %v113_v9  ;;  %v24_v13 = vld [vmem:[%s1287_s0 + $0x38] sm:$0xff]  ;;  %v115_v14 = vld [vmem:[%s1286_s1 + $0xd0] sm:$0xff]  ;;  %v117_v19 = vld [vmem:[%s1286_s1 + $0xe0] sm:$0xff] }
  0x13   :  { %v116_v15 = vld [vmem:[%s1286_s1 + $0xd8] sm:$0xff]  ;;  %v23_v16 = vld [vmem:[%s1287_s0 + $0x30] sm:$0xff]  ;;  %v118_v20 = vld [vmem:[%s1286_s1 + $0xe8] sm:$0xff] }
  0x14   :  { %633 = vmatpush1.bf16.msra.mxu1 %v632_v27  ;;  %v659_v17 = vpack.c.bf16 %v116_v15, %v115_v14  ;;  %v28_v18 = vld [vmem:[%s1287_s0 + $0x58] sm:$0xff]  ;;  %v27_v21 = vld [vmem:[%s1287_s0 + $0x50] sm:$0xff]  ;;  %v662_v22 = vpack.c.bf16 %v118_v20, %v117_v19  ;;  %v17_v30 = vld [vmem:[%s1287_s0] sm:$0xff] }
  0x15   :  { %634 = vmatprep.subr.bf16.mxu1 %v719_v0  ;;  %681 = vmatpush1.bf16.msra.mxu0 %v680_v32  ;;  %v32_v23 = vld [vmem:[%s1287_s0 + $0x78] sm:$0xff]  ;;  %v119_v24 = vld [vmem:[%s1286_s1 + $0xf0] sm:$0xff]  ;;  %v21_v33 = vld [vmem:[%s1287_s0 + $0x20] sm:$0xff] }
  0x16   :  { %682 = vmatprep.subr.bf16.mxu0 %v719_v0  ;;  %v120_v25 = vld [vmem:[%s1286_s1 + $0xf8] sm:$0xff]  ;;  %v31_v26 = vld [vmem:[%s1287_s0 + $0x70] sm:$0xff]  ;;  %v25_v37 = vld [vmem:[%s1287_s0 + $0x40] sm:$0xff] }
  0x17   :  { %v665_v27 = vpack.c.bf16 %v120_v25, %v119_v24  ;;  %v36_v28 = vld [vmem:[%s1287_s0 + $0x98] sm:$0xff]  ;;  %v35_v29 = vld [vmem:[%s1287_s0 + $0x90] sm:$0xff]  ;;  %v30_v39 = vld [vmem:[%s1287_s0 + $0x68] sm:$0xff] }
  0x18   :  { %636 = vmatpush1.bf16.msra.mxu1 %v635_v35  ;;  %v40_v31 = vld [vmem:[%s1287_s0 + $0xb8] sm:$0xff]  ;;  %v39_v32 = vld [vmem:[%s1287_s0 + $0xb0] sm:$0xff]  ;;  %v26_v35 = vld [vmem:[%s1287_s0 + $0x48] sm:$0xff] }
  0x19   :  { %637 = vmatprep.subr.bf16.mxu1 %v719_v0  ;;  %684 = vmatpush1.bf16.msra.mxu0 %v683_v40  ;;  %v44_v34 = vld [vmem:[%s1287_s0 + $0xd8] sm:$0xff]  ;;  %v43_v36 = vld [vmem:[%s1287_s0 + $0xd0] sm:$0xff]  ;;  %v34_v43 = vld [vmem:[%s1287_s0 + $0x88] sm:$0xff] }
  0x1a   :  { %685 = vmatprep.subr.bf16.mxu0 %v719_v0  ;;  %v48_v38 = vld [vmem:[%s1287_s0 + $0xf8] sm:$0xff]  ;;  %v47_v40 = vld [vmem:[%s1287_s0 + $0xf0] sm:$0xff]  ;;  %v33_v45 = vld [vmem:[%s1287_s0 + $0x80] sm:$0xff] }
  0x1b   :  { %v52_v42 = vld [vmem:[%s1287_s0 + $0x118] sm:$0xff]  ;;  %v51_v44 = vld [vmem:[%s1287_s0 + $0x110] sm:$0xff]  ;;  %v37_v49 = vld [vmem:[%s1287_s0 + $0xa0] sm:$0xff] }
  0x1c   :  { %639 = vmatpush1.bf16.msra.mxu1 %v638_v41  ;;  %v29_v41 = vld [vmem:[%s1287_s0 + $0x60] sm:$0xff]  ;;  %v55_v48 = vld [vmem:[%s1287_s0 + $0x130] sm:$0xff]  ;;  %v60_v50 = vld [vmem:[%s1287_s0 + $0x158] sm:$0xff] }
  0x1d   :  { %640 = vmatprep.subr.bf16.mxu1 %v719_v0  ;;  %687 = vmatpush1.bf16.msra.mxu0 %v686_v46  ;;  %v56_v46 = vld [vmem:[%s1287_s0 + $0x138] sm:$0xff]  ;;  %v42_v51 = vld [vmem:[%s1287_s0 + $0xc8] sm:$0xff]  ;;  %v63_v56 = vld [vmem:[%s1287_s0 + $0x170] sm:$0xff] }
  0x1e   :  { %688 = vmatprep.subr.bf16.mxu0 %v719_v0  ;;  %v64_v54 = vld [vmem:[%s1287_s0 + $0x178] sm:$0xff]  ;;  %v46_v55 = vld [vmem:[%s1287_s0 + $0xe8] sm:$0xff]  ;;  %v45_v57 = vld [vmem:[%s1287_s0 + $0xe0] sm:$0xff] }
  0x1f   :  { %v67_v60 = vld [vmem:[%s1287_s0 + $0x190] sm:$0xff]  ;;  %v49_v61 = vld [vmem:[%s1287_s0 + $0x100] sm:$0xff]  ;;  %v72_v62 = vld [vmem:[%s1287_s0 + $0x1b8] sm:$0xff] }
  0x20   :  { %642 = vmatpush1.bf16.msra.mxu1 %v641_v47  ;;  %v38_v47 = vld [vmem:[%s1287_s0 + $0xa8] sm:$0xff]  ;;  %v76_v3 = vld [vmem:[%s1287_s0 + $0x1d8] sm:$0xff]  ;;  %v75_v5 = vld [vmem:[%s1287_s0 + $0x1d0] sm:$0xff] }
  0x21   :  { %643 = vmatprep.subr.bf16.mxu1 %v719_v0  ;;  %690 = vmatpush1.bf16.msra.mxu0 %v689_v52  ;;  %v59_v52 = vld [vmem:[%s1287_s0 + $0x150] sm:$0xff]  ;;  %v54_v63 = vld [vmem:[%s1287_s0 + $0x128] sm:$0xff]  ;;  %v57_v6 = vld [vmem:[%s1287_s0 + $0x140] sm:$0xff] }
  0x22   :  { %691 = vmatprep.subr.bf16.mxu0 %v719_v0  ;;  %v58_v4 = vld [vmem:[%s1287_s0 + $0x148] sm:$0xff]  ;;  %v79_v9 = vld [vmem:[%s1287_s0 + $0x1f0] sm:$0xff]  ;;  %v61_v10 = vld [vmem:[%s1287_s0 + $0x160] sm:$0xff] }
  0x23   :  { %v65_v14 = vld [vmem:[%s1287_s0 + $0x180] sm:$0xff]  ;;  %v88_v15 = vld [vmem:[%s1287_s0 + $0x238] sm:$0xff]  ;;  %v74_v19 = vld [vmem:[%s1287_s0 + $0x1c8] sm:$0xff] }
  0x24   :  { %645 = vmatpush1.bf16.msra.mxu1 %v644_v53  ;;  %v41_v53 = vld [vmem:[%s1287_s0 + $0xc0] sm:$0xff]  ;;  %v86_v25 = vld [vmem:[%s1287_s0 + $0x228] sm:$0xff] }
  0x25   :  { %646 = vmatprep.subr.bf16.mxu1 %v719_v0  ;;  %693 = vmatpush1.bf16.msra.mxu0 %v692_v58  ;;  %v68_v58 = vld [vmem:[%s1287_s0 + $0x198] sm:$0xff]  ;;  %v73_v20 = vld [vmem:[%s1287_s0 + $0x1c0] sm:$0xff] }
  0x26   :  { %694 = vmatprep.subr.bf16.mxu0 %v719_v0  ;;  %v81_v24 = vld [vmem:[%s1287_s0 + $0x200] sm:$0xff] }
  0x28   :  { %648 = vmatpush1.bf16.msra.mxu1 %v647_v59  ;;  %v50_v59 = vld [vmem:[%s1287_s0 + $0x108] sm:$0xff] }
  0x29   :  { %649 = vmatprep.subr.bf16.mxu1 %v719_v0  ;;  %696 = vmatpush1.bf16.msra.mxu0 %v695_v1  ;;  %v71_v1 = vld [vmem:[%s1287_s0 + $0x1b0] sm:$0xff] }
  0x2a   :  { %697 = vmatprep.subr.bf16.mxu0 %v719_v0 }
  0x2c   :  { %651 = vmatpush1.bf16.msra.mxu1 %v650_v2  ;;  %v53_v2 = vld [vmem:[%s1287_s0 + $0x120] sm:$0xff] }
  0x2d   :  { %652 = vmatprep.subr.bf16.mxu1 %v719_v0  ;;  %699 = vmatpush1.bf16.msra.mxu0 %v698_v7  ;;  %v80_v7 = vld [vmem:[%s1287_s0 + $0x1f8] sm:$0xff] }
  0x30   :  { %654 = vmatpush1.bf16.msra.mxu1 %v653_v8  ;;  %418 = vmatmul.mubr.f32.vlgmr.msra.gmra.mrb[0].mxu0 %v19_v11  ;;  %v62_v8 = vld [vmem:[%s1287_s0 + $0x168] sm:$0xff]  ;;  %v84_v11 = vld [vmem:[%s1287_s0 + $0x218] sm:$0xff] }
  0x31   :  { %655 = vmatprep.subr.bf16.mxu1 %v719_v0  ;;  %600 = vmatprep.mubr.msk.f32.mxu0 %vm143_vm0, %v24_v13  ;;  %v83_v13 = vld [vmem:[%s1287_s0 + $0x210] sm:$0xff] }
  0x34   :  { %657 = vmatpush1.bf16.msra.mxu1 %v656_v12  ;;  %423 = vmatmul.mubr.f32.gmra.mrb[2].mxu0 %v23_v16  ;;  %v66_v12 = vld [vmem:[%s1287_s0 + $0x188] sm:$0xff] }
  0x35   :  { %658 = vmatprep.subr.bf16.mxu1 %v719_v0  ;;  %601 = vmatprep.mubr.msk.f32.mxu0 %vm143_vm0, %v28_v18  ;;  %v70_v16 = vld [vmem:[%s1287_s0 + $0x1a8] sm:$0xff]  ;;  %v69_v18 = vld [vmem:[%s1287_s0 + $0x1a0] sm:$0xff] }
  0x38   :  { %660 = vmatpush1.bf16.msra.mxu1 %v659_v17  ;;  %428 = vmatmul.mubr.f32.gmra.mrb[4].mxu0 %v27_v21  ;;  %v87_v17 = vld [vmem:[%s1287_s0 + $0x230] sm:$0xff]  ;;  %v78_v21 = vld [vmem:[%s1287_s0 + $0x1e8] sm:$0xff] }
  0x39   :  { %661 = vmatprep.subr.bf16.mxu1 %v719_v0  ;;  %602 = vmatprep.mubr.msk.f32.mxu0 %vm143_vm0, %v32_v23  ;;  %v82_v23 = vld [vmem:[%s1287_s0 + $0x208] sm:$0xff] }
  0x3c   :  { %663 = vmatpush1.bf16.msra.mxu1 %v662_v22  ;;  %433 = vmatmul.mubr.f32.gmra.mrb[6].mxu0 %v31_v26  ;;  %v77_v22 = vld [vmem:[%s1287_s0 + $0x1e0] sm:$0xff] }
  0x3d   :  { %664 = vmatprep.subr.bf16.mxu1 %v719_v0  ;;  %603 = vmatprep.mubr.msk.f32.mxu0 %vm143_vm0, %v36_v28  ;;  %v22_v0 = vld [vmem:[%s1287_s0 + $0x28] sm:$0xff]  ;;  %v85_v26 = vld [vmem:[%s1287_s0 + $0x220] sm:$0xff] }
  0x40   :  { %666 = vmatpush1.bf16.msra.mxu1 %v665_v27  ;;  %438 = vmatmul.mubr.f32.gmra.mrb[8].mxu0 %v35_v29 }
  0x41   :  { %604 = vmatprep.mubr.msk.f32.mxu0 %vm143_vm0, %v40_v31 }
  0x43   :  { %263 = vmatmul.mubr.f32.vlgmr.msra.gmra.mrb[0].mxu1 %v17_v30 }
  0x44   :  { %267 = vmatprep.mubr.f32.mxu1 %v22_v0  ;;  %443 = vmatmul.mubr.f32.gmra.mrb[10].mxu0 %v39_v32 }
  0x45   :  { %605 = vmatprep.mubr.msk.f32.mxu0 %vm143_vm0, %v44_v34 }
  0x47   :  { %268 = vmatmul.mubr.f32.gmra.mrb[2].mxu1 %v21_v33 }
  0x48   :  { %272 = vmatprep.mubr.f32.mxu1 %v26_v35  ;;  %448 = vmatmul.mubr.f32.gmra.mrb[12].mxu0 %v43_v36  ;;  %v1171_v36 = vld [vmem:[%s1288_s2] ss:$0 sm:$0xff] }
  0x49   :  { %606 = vmatprep.mubr.msk.f32.mxu0 %vm143_vm0, %v48_v38 }
  0x4b   :  { %273 = vmatmul.mubr.f32.gmra.mrb[4].mxu1 %v25_v37 }
  0x4c   :  { %277 = vmatprep.mubr.f32.mxu1 %v30_v39  ;;  %453 = vmatmul.mubr.f32.gmra.mrb[14].mxu0 %v47_v40  ;;  %v1176_v40 = vld [vmem:[%s1289_s3] ss:$0 sm:$0xff] }
  0x4d   :  { %607 = vmatprep.mubr.msk.f32.mxu0 %vm143_vm0, %v52_v42 }
  0x4f   :  { %278 = vmatmul.mubr.f32.gmra.mrb[6].mxu1 %v29_v41 }
  0x50   :  { %282 = vmatprep.mubr.f32.mxu1 %v34_v43  ;;  %458 = vmatmul.mubr.f32.gmra.mrb[16].mxu0 %v51_v44 }
  0x51   :  { %608 = vmatprep.mubr.msk.f32.mxu0 %vm143_vm0, %v56_v46 }
  0x53   :  { %283 = vmatmul.mubr.f32.gmra.mrb[8].mxu1 %v33_v45 }
  0x54   :  { %287 = vmatprep.mubr.f32.mxu1 %v38_v47  ;;  %463 = vmatmul.mubr.f32.gmra.mrb[18].mxu0 %v55_v48 }
  0x55   :  { %609 = vmatprep.mubr.msk.f32.mxu0 %vm143_vm0, %v60_v50 }
  0x57   :  { %288 = vmatmul.mubr.f32.gmra.mrb[10].mxu1 %v37_v49 }
  0x58   :  { %292 = vmatprep.mubr.f32.mxu1 %v42_v51  ;;  %468 = vmatmul.mubr.f32.gmra.mrb[20].mxu0 %v59_v52 }
  0x59   :  { %610 = vmatprep.mubr.msk.f32.mxu0 %vm143_vm0, %v64_v54 }
  0x5b   :  { %293 = vmatmul.mubr.f32.gmra.mrb[12].mxu1 %v41_v53 }
  0x5c   :  { %297 = vmatprep.mubr.f32.mxu1 %v46_v55  ;;  %473 = vmatmul.mubr.f32.gmra.mrb[22].mxu0 %v63_v56 }
  0x5d   :  { %611 = vmatprep.mubr.msk.f32.mxu0 %vm143_vm0, %v68_v58 }
  0x5f   :  { %298 = vmatmul.mubr.f32.gmra.mrb[14].mxu1 %v45_v57 }
  0x60   :  { %302 = vmatprep.mubr.f32.mxu1 %v50_v59  ;;  %478 = vmatmul.mubr.f32.gmra.mrb[24].mxu0 %v67_v60 }
  0x61   :  { %612 = vmatprep.mubr.msk.f32.mxu0 %vm143_vm0, %v72_v62 }
  0x63   :  { %303 = vmatmul.mubr.f32.gmra.mrb[16].mxu1 %v49_v61 }
  0x64   :  { %307 = vmatprep.mubr.f32.mxu1 %v54_v63  ;;  %483 = vmatmul.mubr.f32.gmra.mrb[26].mxu0 %v71_v1 }
  0x65   :  { %613 = vmatprep.mubr.msk.f32.mxu0 %vm143_vm0, %v76_v3 }
  0x67   :  { %308 = vmatmul.mubr.f32.gmra.mrb[18].mxu1 %v53_v2 }
  0x68   :  { %312 = vmatprep.mubr.f32.mxu1 %v58_v4  ;;  %488 = vmatmul.mubr.f32.gmra.mrb[28].mxu0 %v75_v5 }
  0x69   :  { %614 = vmatprep.mubr.msk.f32.mxu0 %vm143_vm0, %v80_v7 }
  0x6b   :  { %313 = vmatmul.mubr.f32.gmra.mrb[20].mxu1 %v57_v6 }
  0x6c   :  { %317 = vmatprep.mubr.f32.mxu1 %v62_v8  ;;  %493 = vmatmul.mubr.f32.gmra.mrb[30].mxu0 %v79_v9 }
  0x6d   :  { %615 = vmatprep.mubr.msk.f32.mxu0 %vm143_vm0, %v84_v11 }
  0x6f   :  { %318 = vmatmul.mubr.f32.gmra.mrb[22].mxu1 %v61_v10 }
  0x70   :  { %322 = vmatprep.mubr.f32.mxu1 %v66_v12  ;;  %498 = vmatmul.mubr.f32.gmra.mrb[32].mxu0 %v83_v13 }
  0x71   :  { %616 = vmatprep.mubr.msk.f32.mxu0 %vm143_vm0, %v88_v15 }
  0x73   :  { %323 = vmatmul.mubr.f32.gmra.mrb[24].mxu1 %v65_v14 }
  0x74   :  { %327 = vmatprep.mubr.f32.mxu1 %v70_v16  ;;  %503 = vmatmul.mubr.f32.gmra.mrb[34].mxu0 %v87_v17 }
  0x77   :  { %328 = vmatmul.mubr.f32.gmra.mrb[26].mxu1 %v69_v18 }
  0x78   :  { %332 = vmatprep.mubr.f32.mxu1 %v74_v19 }
  0x7b   :  { %333 = vmatmul.mubr.f32.gmra.mrb[28].mxu1 %v73_v20 }
  0x7c   :  { %337 = vmatprep.mubr.f32.mxu1 %v78_v21 }
  0x7f   :  { %338 = vmatmul.mubr.f32.gmra.mrb[30].mxu1 %v77_v22 }
  0x80   :  { %342 = vmatprep.mubr.f32.mxu1 %v82_v23 }
  0x83   :  { %343 = vmatmul.mubr.f32.gmra.mrb[32].mxu1 %v81_v24 }
  0x84   :  { %347 = vmatprep.mubr.f32.mxu1 %v86_v25 }
  0x87   :  { %348 = vmatmul.mubr.f32.gmra.mrb[34].mxu1 %v85_v26 }
 0x103   :  { %v419_v27 = vpop.f32.mrb[0].mxu0 }
 0x104   :  { %v421_v28 = vpop.f32.mrb[1].mxu0 }
 0x107   :  { %v424_v29 = vpop.f32.mrb[2].mxu0 }
 0x108   :  { %v426_v30 = vpop.f32.mrb[3].mxu0 }
 0x10b   :  { %v429_v31 = vpop.f32.mrb[4].mxu0 }
 0x10c   :  { %v431_v0 = vpop.f32.mrb[5].mxu0 }
 0x10f   :  { %v434_v32 = vpop.f32.mrb[6].mxu0 }
 0x110   :  { %v436_v33 = vpop.f32.mrb[7].mxu0 }
 0x113   :  { %v439_v34 = vpop.f32.mrb[8].mxu0 }
 0x114   :  { %v441_v37 = vpop.f32.mrb[9].mxu0 }
 0x116   :  { %v264_v35 = vpop.f32.mrb[0].mxu1 }
 0x117   :  { %v420_v38 = vadd.f32 %v419_v27, %v264_v35  ;;  %v266_v39 = vpop.f32.mrb[1].mxu1  ;;  %v444_v42 = vpop.f32.mrb[10].mxu0 }
 0x118   :  { %v446_v44 = vpop.f32.mrb[11].mxu0 }
 0x119   :  { %v515_v41 = vmul.f32 %v1171_v36, %v420_v38 }
 0x11a   :  { %v269_v43 = vpop.f32.mrb[2].mxu1 }
 0x11b   :  { %v540_v45 = vadd.f32 %v1176_v40, %v515_v41  ;;  %v425_v46 = vadd.f32 %v424_v29, %v269_v43  ;;  %v271_v47 = vpop.f32.mrb[3].mxu1  ;;  %v449_v50 = vpop.f32.mrb[12].mxu0 }
 0x11c   :  { %v451_v52 = vpop.f32.mrb[13].mxu0 }
 0x11d   :  { %v558_v48 = vmax.f32 %v540_v45, 0.0  ;;  %v516_v49 = vmul.f32 %v1171_v36, %v425_v46 }
 0x11e   :  { %v274_v51 = vpop.f32.mrb[4].mxu1 }
 0x11f   :  { %577 = vst.msk [vmem:[%s1290_s4] sm:$0xff] %vm576_vm1, %v558_v48  ;;  %v541_v53 = vadd.f32 %v1176_v40, %v516_v49  ;;  %v430_v54 = vadd.f32 %v429_v31, %v274_v51  ;;  %v276_v55 = vpop.f32.mrb[5].mxu1  ;;  %v454_v58 = vpop.f32.mrb[14].mxu0 }
 0x120   :  { %v456_v60 = vpop.f32.mrb[15].mxu0 }
 0x121   :  { %v559_v56 = vmax.f32 %v541_v53, 0.0  ;;  %v517_v57 = vmul.f32 %v1171_v36, %v430_v54 }
 0x122   :  { %v279_v59 = vpop.f32.mrb[6].mxu1 }
 0x123   :  { %578 = vst.msk [vmem:[%s1290_s4 + $0x8] sm:$0xff] %vm576_vm1, %v559_v56  ;;  %v542_v61 = vadd.f32 %v1176_v40, %v517_v57  ;;  %v435_v62 = vadd.f32 %v434_v32, %v279_v59  ;;  %v281_v63 = vpop.f32.mrb[7].mxu1  ;;  %v459_v3 = vpop.f32.mrb[16].mxu0 }
 0x124   :  { %v461_v5 = vpop.f32.mrb[17].mxu0 }
 0x125   :  { %v560_v1 = vmax.f32 %v542_v61, 0.0  ;;  %v518_v2 = vmul.f32 %v1171_v36, %v435_v62 }
 0x126   :  { %v284_v4 = vpop.f32.mrb[8].mxu1 }
 0x127   :  { %579 = vst.msk [vmem:[%s1290_s4 + $0x10] sm:$0xff] %vm576_vm1, %v560_v1  ;;  %v543_v6 = vadd.f32 %v1176_v40, %v518_v2  ;;  %v440_v7 = vadd.f32 %v439_v34, %v284_v4  ;;  %v286_v8 = vpop.f32.mrb[9].mxu1  ;;  %v464_v11 = vpop.f32.mrb[18].mxu0 }
 0x128   :  { %v466_v13 = vpop.f32.mrb[19].mxu0 }
 0x129   :  { %v561_v9 = vmax.f32 %v543_v6, 0.0  ;;  %v519_v10 = vmul.f32 %v1171_v36, %v440_v7 }
 0x12a   :  { %v289_v12 = vpop.f32.mrb[10].mxu1 }
 0x12b   :  { %580 = vst.msk [vmem:[%s1290_s4 + $0x18] sm:$0xff] %vm576_vm1, %v561_v9  ;;  %v544_v14 = vadd.f32 %v1176_v40, %v519_v10  ;;  %v445_v15 = vadd.f32 %v444_v42, %v289_v12  ;;  %v291_v16 = vpop.f32.mrb[11].mxu1  ;;  %v469_v19 = vpop.f32.mrb[20].mxu0 }
 0x12c   :  { %v471_v21 = vpop.f32.mrb[21].mxu0 }
 0x12d   :  { %v562_v17 = vmax.f32 %v544_v14, 0.0  ;;  %v520_v18 = vmul.f32 %v1171_v36, %v445_v15 }
 0x12e   :  { %v294_v20 = vpop.f32.mrb[12].mxu1 }
 0x12f   :  { %581 = vst.msk [vmem:[%s1290_s4 + $0x20] sm:$0xff] %vm576_vm1, %v562_v17  ;;  %v545_v22 = vadd.f32 %v1176_v40, %v520_v18  ;;  %v450_v23 = vadd.f32 %v449_v50, %v294_v20  ;;  %v296_v24 = vpop.f32.mrb[13].mxu1  ;;  %v474_v27 = vpop.f32.mrb[22].mxu0 }
 0x130   :  { %v476_v29 = vpop.f32.mrb[23].mxu0 }
 0x131   :  { %v563_v25 = vmax.f32 %v545_v22, 0.0  ;;  %v521_v26 = vmul.f32 %v1171_v36, %v450_v23 }
 0x132   :  { %v299_v28 = vpop.f32.mrb[14].mxu1 }
 0x133   :  { %582 = vst.msk [vmem:[%s1290_s4 + $0x28] sm:$0xff] %vm576_vm1, %v563_v25  ;;  %v546_v30 = vadd.f32 %v1176_v40, %v521_v26  ;;  %v455_v31 = vadd.f32 %v454_v58, %v299_v28  ;;  %v301_v0 = vpop.f32.mrb[15].mxu1  ;;  %v479_v34 = vpop.f32.mrb[24].mxu0 }
 0x134   :  { %v481_v37 = vpop.f32.mrb[25].mxu0 }
 0x135   :  { %v564_v32 = vmax.f32 %v546_v30, 0.0  ;;  %v522_v33 = vmul.f32 %v1171_v36, %v455_v31 }
 0x136   :  { %v304_v35 = vpop.f32.mrb[16].mxu1 }
 0x137   :  { %583 = vst.msk [vmem:[%s1290_s4 + $0x30] sm:$0xff] %vm576_vm1, %v564_v32  ;;  %v547_v38 = vadd.f32 %v1176_v40, %v522_v33  ;;  %v460_v39 = vadd.f32 %v459_v3, %v304_v35  ;;  %v306_v41 = vpop.f32.mrb[17].mxu1  ;;  %v484_v44 = vpop.f32.mrb[26].mxu0 }
 0x138   :  { %v486_v46 = vpop.f32.mrb[27].mxu0 }
 0x139   :  { %v565_v42 = vmax.f32 %v547_v38, 0.0  ;;  %v523_v43 = vmul.f32 %v1171_v36, %v460_v39 }
 0x13a   :  { %v309_v45 = vpop.f32.mrb[18].mxu1 }
 0x13b   :  { %584 = vst.msk [vmem:[%s1290_s4 + $0x38] sm:$0xff] %vm576_vm1, %v565_v42  ;;  %v548_v47 = vadd.f32 %v1176_v40, %v523_v43  ;;  %v465_v48 = vadd.f32 %v464_v11, %v309_v45  ;;  %v311_v49 = vpop.f32.mrb[19].mxu1  ;;  %v489_v52 = vpop.f32.mrb[28].mxu0 }
 0x13c   :  { %v491_v54 = vpop.f32.mrb[29].mxu0 }
 0x13d   :  { %v566_v50 = vmax.f32 %v548_v47, 0.0  ;;  %v524_v51 = vmul.f32 %v1171_v36, %v465_v48 }
 0x13e   :  { %v314_v53 = vpop.f32.mrb[20].mxu1 }
 0x13f   :  { %585 = vst.msk [vmem:[%s1290_s4 + $0x40] sm:$0xff] %vm576_vm1, %v566_v50  ;;  %v549_v55 = vadd.f32 %v1176_v40, %v524_v51  ;;  %v470_v56 = vadd.f32 %v469_v19, %v314_v53  ;;  %v316_v57 = vpop.f32.mrb[21].mxu1  ;;  %v494_v60 = vpop.f32.mrb[30].mxu0 }
 0x140   :  { %v496_v62 = vpop.f32.mrb[31].mxu0 }
 0x141   :  { %v567_v58 = vmax.f32 %v549_v55, 0.0  ;;  %v525_v59 = vmul.f32 %v1171_v36, %v470_v56 }
 0x142   :  { %v319_v61 = vpop.f32.mrb[22].mxu1 }
 0x143   :  { %586 = vst.msk [vmem:[%s1290_s4 + $0x48] sm:$0xff] %vm576_vm1, %v567_v58  ;;  %v550_v63 = vadd.f32 %v1176_v40, %v525_v59  ;;  %v475_v1 = vadd.f32 %v474_v27, %v319_v61  ;;  %v321_v2 = vpop.f32.mrb[23].mxu1  ;;  %v499_v5 = vpop.f32.mrb[32].mxu0 }
 0x144   :  { %v501_v7 = vpop.f32.mrb[33].mxu0 }
 0x145   :  { %v568_v3 = vmax.f32 %v550_v63, 0.0  ;;  %v526_v4 = vmul.f32 %v1171_v36, %v475_v1 }
 0x146   :  { %v324_v6 = vpop.f32.mrb[24].mxu1 }
 0x147   :  { %587 = vst.msk [vmem:[%s1290_s4 + $0x50] sm:$0xff] %vm576_vm1, %v568_v3  ;;  %v551_v8 = vadd.f32 %v1176_v40, %v526_v4  ;;  %v480_v9 = vadd.f32 %v479_v34, %v324_v6  ;;  %v326_v10 = vpop.f32.mrb[25].mxu1  ;;  %v504_v13 = vpop.f32.mrb[34].mxu0 }
 0x148   :  { %v506_v15 = vpop.f32.mrb[35].mxu0 }
 0x149   :  { %v569_v11 = vmax.f32 %v551_v8, 0.0  ;;  %v527_v12 = vmul.f32 %v1171_v36, %v480_v9 }
 0x14a   :  { %v329_v14 = vpop.f32.mrb[26].mxu1 }
 0x14b   :  { %588 = vst.msk [vmem:[%s1290_s4 + $0x58] sm:$0xff] %vm576_vm1, %v569_v11  ;;  %v552_v16 = vadd.f32 %v1176_v40, %v527_v12  ;;  %v485_v17 = vadd.f32 %v484_v44, %v329_v14  ;;  %v331_v18 = vpop.f32.mrb[27].mxu1 }
 0x14d   :  { %v570_v19 = vmax.f32 %v552_v16, 0.0  ;;  %v528_v20 = vmul.f32 %v1171_v36, %v485_v17 }
 0x14e   :  { %v334_v21 = vpop.f32.mrb[28].mxu1 }
 0x14f   :  { %589 = vst.msk [vmem:[%s1290_s4 + $0x60] sm:$0xff] %vm576_vm1, %v570_v19  ;;  %v553_v22 = vadd.f32 %v1176_v40, %v528_v20  ;;  %v490_v23 = vadd.f32 %v489_v52, %v334_v21  ;;  %v336_v24 = vpop.f32.mrb[29].mxu1 }
 0x151   :  { %v571_v25 = vmax.f32 %v553_v22, 0.0  ;;  %v529_v26 = vmul.f32 %v1171_v36, %v490_v23 }
 0x152   :  { %v339_v27 = vpop.f32.mrb[30].mxu1 }
 0x153   :  { %590 = vst.msk [vmem:[%s1290_s4 + $0x68] sm:$0xff] %vm576_vm1, %v571_v25  ;;  %v554_v28 = vadd.f32 %v1176_v40, %v529_v26  ;;  %v495_v29 = vadd.f32 %v494_v60, %v339_v27  ;;  %v341_v30 = vpop.f32.mrb[31].mxu1 }
 0x155   :  { %v572_v31 = vmax.f32 %v554_v28, 0.0  ;;  %v530_v0 = vmul.f32 %v1171_v36, %v495_v29 }
 0x156   :  { %v344_v32 = vpop.f32.mrb[32].mxu1 }
 0x157   :  { %591 = vst.msk [vmem:[%s1290_s4 + $0x70] sm:$0xff] %vm576_vm1, %v572_v31  ;;  %v555_v33 = vadd.f32 %v1176_v40, %v530_v0  ;;  %v500_v34 = vadd.f32 %v499_v5, %v344_v32  ;;  %v346_v35 = vpop.f32.mrb[33].mxu1 }
 0x159   :  { %v573_v37 = vmax.f32 %v555_v33, 0.0  ;;  %v531_v38 = vmul.f32 %v1171_v36, %v500_v34 }
 0x15a   :  { %v349_v39 = vpop.f32.mrb[34].mxu1 }
 0x15b   :  { %592 = vst.msk [vmem:[%s1290_s4 + $0x78] sm:$0xff] %vm576_vm1, %v573_v37  ;;  %v556_v41 = vadd.f32 %v1176_v40, %v531_v38  ;;  %v505_v42 = vadd.f32 %v504_v13, %v349_v39  ;;  %v351_v43 = vpop.f32.mrb[35].mxu1 }
 0x15d   :  { %v574_v44 = vmax.f32 %v556_v41, 0.0  ;;  %v532_v45 = vmul.f32 %v1171_v36, %v505_v42 }
 0x15f   :  { %593 = vst.msk [vmem:[%s1290_s4 + $0x80] sm:$0xff] %vm576_vm1, %v574_v44  ;;  %v557_v46 = vadd.f32 %v1176_v40, %v532_v45 }
 0x161   :  { %v575_v47 = vmax.f32 %v557_v46, 0.0 }
 0x163   :  { %594 = vst.msk [vmem:[%s1290_s4 + $0x88] sm:$0xff] %vm576_vm1, %v575_v47 }

// kernel: critic_forward.9
= control target key start
LH: loop header
LB: loop body
LE: loop exit
PB: predicated region body
PF: predicated region fallthrough
CT: control target
= control target key end

     0   :  { %s3356_s0 = inlined_call_operand.vmem [shape: f32[8,1152], index: 0, kind: input, shape index: {}]   ;;  %s3357_s1 = inlined_call_operand.vmem [shape: f32[8,2], index: 1, kind: input, shape index: {}]   ;;  %s3358_s2 = inlined_call_operand.vmem [shape: f32[1152,192], index: 2, kind: input, shape index: {}]   ;;  %s3359_s3 = inlined_call_operand.vmem [shape: f32[1,192], index: 3, kind: input, shape index: {}]   ;;  %s3360_s4 = inlined_call_operand.vmem [shape: f32[192,64], index: 4, kind: input, shape index: {}]   ;;  %s3361_s5 = inlined_call_operand.vmem [shape: f32[1,64], index: 5, kind: input, shape index: {}]   ;;  %s3362_s6 = inlined_call_operand.vmem [shape: f32[64,128], index: 6, kind: input, shape index: {}]   ;;  %s3363_s7 = inlined_call_operand.vmem [shape: f32[2,128], index: 7, kind: input, shape index: {}]   ;;  %s3364_s8 = inlined_call_operand.vmem [shape: f32[32,128], index: 8, kind: input, shape index: {}]   ;;  %s3365_s9 = inlined_call_operand.vmem [shape: f32[1,128], index: 9, kind: input, shape index: {}]   ;;  %s3366_s10 = inlined_call_operand.vmem [shape: f32[1,32], index: 10, kind: input, shape index: {}]   ;;  %s3367_s11 = inlined_call_operand.<no memory space> [shape: f32[1,1], index: 11, kind: input, shape index: {}]   ;;  %s3368_s12 = inlined_call_operand.vmem [shape: f32[1,2,32], index: 12, kind: input, shape index: {}, may-alias: {12,13}]   ;;  %s3369_s13 = inlined_call_operand.vmem [shape: f32[1,2,32], index: 13, kind: input, shape index: {}, may-alias: {12,13}]   ;;  %s3370_s14 = inlined_call_operand.vmem [shape: f32[4,2,1], index: 14, kind: output, shape index: {0}]   ;;  %s3371_s15 = inlined_call_operand.hbm [shape: f32[1,2,32], index: 15, kind: output, shape index: {1}]   ;;  %s3372_s16 = inlined_call_operand.hbm [shape: f32[1,2,32], index: 16, kind: output, shape index: {2}]  }
   0x1   :  { %3374 = sst [smem:[#allocation9_spill]] %s3356_s0  ;;  %v22_v0 = vstv %s3367_s11 }
   0x2   :  { %23 = vst [vmem:[#allocation2] sm:$0x1] %v22_v0 }
   0x3   :  { %24 = vsyncpa [#allocation4], 0  ;;  %v128_v1 = vld [vmem:[%s3358_s2 + $0x208] sm:$0xff]  ;;  %v130_v2 = vld [vmem:[%s3358_s2 + $0x218] sm:$0xff]  ;;  %s3375_s17 = sld [smem:[#allocation9_spill]] }
   0x4   :  { %v127_v3 = vld [vmem:[%s3358_s2 + $0x200] sm:$0xff]  ;;  %v1711_v4 = vpack.c.bf16 %v130_v2, %v128_v1  ;;  %v129_v5 = vld [vmem:[%s3358_s2 + $0x210] sm:$0xff]  ;;  %v132_v6 = vld [vmem:[%s3358_s2 + $0x228] sm:$0xff] }
   0x5   :  { %v134_v7 = vld [vmem:[%s3358_s2 + $0x238] sm:$0xff]  ;;  %v1713_v8 = vpack.c.bf16 %v129_v5, %v127_v3  ;;  %v131_v10 = vld [vmem:[%s3358_s2 + $0x220] sm:$0xff]  ;;  %v133_v11 = vld [vmem:[%s3358_s2 + $0x230] sm:$0xff] }
   0x6   :  { %v1715_v9 = vpack.c.bf16 %v134_v7, %v132_v6  ;;  %v136_v12 = vld [vmem:[%s3358_s2 + $0x248] sm:$0xff]  ;;  %1712 = vmatprep.subr.bf16.mxu0 %v1711_v4  ;;  %v138_v13 = vld [vmem:[%s3358_s2 + $0x258] sm:$0xff]  ;;  %v1717_v14 = vpack.c.bf16 %v133_v11, %v131_v10  ;;  %v135_v16 = vld [vmem:[%s3358_s2 + $0x240] sm:$0xff] }
   0x7   :  { %1714 = vmatpush1.bf16.msra.mxu0 %v1713_v8  ;;  %v1719_v15 = vpack.c.bf16 %v138_v13, %v136_v12  ;;  %v137_v17 = vld [vmem:[%s3358_s2 + $0x250] sm:$0xff]  ;;  %v140_v18 = vld [vmem:[%s3358_s2 + $0x268] sm:$0xff]  ;;  %v142_v19 = vld [vmem:[%s3358_s2 + $0x278] sm:$0xff] }
   0x8   :  { %1716 = vmatprep.subr.bf16.mxu0 %v1715_v9  ;;  %v1721_v20 = vpack.c.bf16 %v137_v17, %v135_v16  ;;  %v1723_v21 = vpack.c.bf16 %v142_v19, %v140_v18  ;;  %v139_v22 = vld [vmem:[%s3358_s2 + $0x260] sm:$0xff]  ;;  %v141_v23 = vld [vmem:[%s3358_s2 + $0x270] sm:$0xff]  ;;  %v144_v24 = vld [vmem:[%s3358_s2 + $0x288] sm:$0xff] }
   0x9   :  { %v146_v25 = vld [vmem:[%s3358_s2 + $0x298] sm:$0xff]  ;;  %v1725_v26 = vpack.c.bf16 %v141_v23, %v139_v22  ;;  %v143_v28 = vld [vmem:[%s3358_s2 + $0x280] sm:$0xff]  ;;  %v145_v29 = vld [vmem:[%s3358_s2 + $0x290] sm:$0xff] }
   0xa   :  { %v1727_v27 = vpack.c.bf16 %v146_v25, %v144_v24  ;;  %v148_v30 = vld [vmem:[%s3358_s2 + $0x2a8] sm:$0xff]  ;;  %v150_v31 = vld [vmem:[%s3358_s2 + $0x2b8] sm:$0xff]  ;;  %v1729_v32 = vpack.c.bf16 %v145_v29, %v143_v28  ;;  %v147_v34 = vld [vmem:[%s3358_s2 + $0x2a0] sm:$0xff] }
   0xb   :  { %1718 = vmatpush1.bf16.msra.mxu0 %v1717_v14  ;;  %v1731_v33 = vpack.c.bf16 %v150_v31, %v148_v30  ;;  %v149_v35 = vld [vmem:[%s3358_s2 + $0x2b0] sm:$0xff]  ;;  %v152_v36 = vld [vmem:[%s3358_s2 + $0x2c8] sm:$0xff]  ;;  %v154_v37 = vld [vmem:[%s3358_s2 + $0x2d8] sm:$0xff] }
   0xc   :  { %1720 = vmatprep.subr.bf16.mxu0 %v1719_v15  ;;  %v1733_v38 = vpack.c.bf16 %v149_v35, %v147_v34  ;;  %v1735_v39 = vpack.c.bf16 %v154_v37, %v152_v36  ;;  %v151_v40 = vld [vmem:[%s3358_s2 + $0x2c0] sm:$0xff]  ;;  %v153_v41 = vld [vmem:[%s3358_s2 + $0x2d0] sm:$0xff]  ;;  %v57_v42 = vld [vmem:[%s3375_s17 + $0x18] sm:$0xff] }
   0xd   :  { %v156_v43 = vld [vmem:[%s3358_s2 + $0x2e8] sm:$0xff]  ;;  %v158_v44 = vld [vmem:[%s3358_s2 + $0x2f8] sm:$0xff]  ;;  %498 = vmatprep.mubr.f32.mxu0 %v57_v42  ;;  %v1737_v45 = vpack.c.bf16 %v153_v41, %v151_v40  ;;  %v155_v47 = vld [vmem:[%s3358_s2 + $0x2e0] sm:$0xff] }
   0xe   :  { %v1739_v46 = vpack.c.bf16 %v158_v44, %v156_v43  ;;  %v157_v48 = vld [vmem:[%s3358_s2 + $0x2f0] sm:$0xff]  ;;  %v160_v49 = vld [vmem:[%s3358_s2 + $0x308] sm:$0xff]  ;;  %v162_v50 = vld [vmem:[%s3358_s2 + $0x318] sm:$0xff] }
   0xf   :  { %1722 = vmatpush1.bf16.msra.mxu0 %v1721_v20  ;;  %v1741_v51 = vpack.c.bf16 %v157_v48, %v155_v47  ;;  %v1743_v52 = vpack.c.bf16 %v162_v50, %v160_v49  ;;  %v159_v53 = vld [vmem:[%s3358_s2 + $0x300] sm:$0xff]  ;;  %v161_v54 = vld [vmem:[%s3358_s2 + $0x310] sm:$0xff]  ;;  %v164_v55 = vld [vmem:[%s3358_s2 + $0x328] sm:$0xff] }
  0x10   :  { %1724 = vmatprep.subr.bf16.mxu0 %v1723_v21  ;;  %v166_v56 = vld [vmem:[%s3358_s2 + $0x338] sm:$0xff]  ;;  %v1745_v57 = vpack.c.bf16 %v161_v54, %v159_v53  ;;  %v163_v58 = vld [vmem:[%s3358_s2 + $0x320] sm:$0xff]  ;;  %v165_v60 = vld [vmem:[%s3358_s2 + $0x330] sm:$0xff] }
  0x11   :  { %v1747_v59 = vpack.c.bf16 %v166_v56, %v164_v55  ;;  %v64_v61 = vld [vmem:[%s3358_s2 + $0x8] sm:$0xff]  ;;  %v66_v62 = vld [vmem:[%s3358_s2 + $0x18] sm:$0xff]  ;;  %v63_v2 = vld [vmem:[%s3358_s2] sm:$0xff]  ;;  %v1749_v4 = vpack.c.bf16 %v165_v60, %v163_v58 }
  0x12   :  { %v168_v63 = vld [vmem:[%s3358_s2 + $0x348] sm:$0xff]  ;;  %v170_v0 = vld [vmem:[%s3358_s2 + $0x358] sm:$0xff]  ;;  %v1647_v1 = vpack.c.bf16 %v66_v62, %v64_v61  ;;  %v65_v3 = vld [vmem:[%s3358_s2 + $0x10] sm:$0xff] }
  0x13   :  { %1726 = vmatpush1.bf16.msra.mxu0 %v1725_v26  ;;  %v167_v5 = vld [vmem:[%s3358_s2 + $0x340] sm:$0xff]  ;;  %v1649_v6 = vpack.c.bf16 %v65_v3, %v63_v2  ;;  %v68_v7 = vld [vmem:[%s3358_s2 + $0x28] sm:$0xff]  ;;  %v70_v8 = vld [vmem:[%s3358_s2 + $0x38] sm:$0xff]  ;;  %v1751_v9 = vpack.c.bf16 %v170_v0, %v168_v63 }
  0x14   :  { %1728 = vmatprep.subr.bf16.mxu0 %v1727_v27  ;;  %1648 = vmatprep.subr.bf16.mxu1 %v1647_v1  ;;  %v169_v10 = vld [vmem:[%s3358_s2 + $0x350] sm:$0xff]  ;;  %v1651_v11 = vpack.c.bf16 %v70_v8, %v68_v7  ;;  %v67_v12 = vld [vmem:[%s3358_s2 + $0x20] sm:$0xff]  ;;  %v172_v14 = vld [vmem:[%s3358_s2 + $0x368] sm:$0xff] }
  0x15   :  { %v69_v13 = vld [vmem:[%s3358_s2 + $0x30] sm:$0xff]  ;;  %v174_v15 = vld [vmem:[%s3358_s2 + $0x378] sm:$0xff]  ;;  %1650 = vmatpush1.bf16.msra.mxu1 %v1649_v6  ;;  %v72_v17 = vld [vmem:[%s3358_s2 + $0x48] sm:$0xff]  ;;  %v1753_v19 = vpack.c.bf16 %v169_v10, %v167_v5 }
  0x16   :  { %v1653_v16 = vpack.c.bf16 %v69_v13, %v67_v12  ;;  %1652 = vmatprep.subr.bf16.mxu1 %v1651_v11  ;;  %v74_v18 = vld [vmem:[%s3358_s2 + $0x58] sm:$0xff]  ;;  %v171_v20 = vld [vmem:[%s3358_s2 + $0x360] sm:$0xff]  ;;  %v73_v23 = vld [vmem:[%s3358_s2 + $0x50] sm:$0xff]  ;;  %v1755_v24 = vpack.c.bf16 %v174_v15, %v172_v14 }
  0x17   :  { %1730 = vmatpush1.bf16.msra.mxu0 %v1729_v32  ;;  %v1655_v21 = vpack.c.bf16 %v74_v18, %v72_v17  ;;  %v71_v22 = vld [vmem:[%s3358_s2 + $0x40] sm:$0xff]  ;;  %v173_v25 = vld [vmem:[%s3358_s2 + $0x370] sm:$0xff]  ;;  %v76_v26 = vld [vmem:[%s3358_s2 + $0x68] sm:$0xff] }
  0x18   :  { %1732 = vmatprep.subr.bf16.mxu0 %v1731_v33  ;;  %v78_v27 = vld [vmem:[%s3358_s2 + $0x78] sm:$0xff]  ;;  %v176_v28 = vld [vmem:[%s3358_s2 + $0x388] sm:$0xff]  ;;  %v1657_v30 = vpack.c.bf16 %v73_v23, %v71_v22  ;;  %v75_v32 = vld [vmem:[%s3358_s2 + $0x60] sm:$0xff]  ;;  %v1757_v34 = vpack.c.bf16 %v173_v25, %v171_v20 }
  0x19   :  { %v178_v29 = vld [vmem:[%s3358_s2 + $0x398] sm:$0xff]  ;;  %1654 = vmatpush1.bf16.msra.mxu1 %v1653_v16  ;;  %v1659_v31 = vpack.c.bf16 %v78_v27, %v76_v26  ;;  %v77_v33 = vld [vmem:[%s3358_s2 + $0x70] sm:$0xff]  ;;  %v80_v35 = vld [vmem:[%s3358_s2 + $0x88] sm:$0xff] }
  0x1a   :  { %1656 = vmatprep.subr.bf16.mxu1 %v1655_v21  ;;  %v82_v36 = vld [vmem:[%s3358_s2 + $0x98] sm:$0xff]  ;;  %v1759_v37 = vpack.c.bf16 %v178_v29, %v176_v28  ;;  %v180_v40 = vld [vmem:[%s3358_s2 + $0x3a8] sm:$0xff]  ;;  %v1661_v42 = vpack.c.bf16 %v77_v33, %v75_v32  ;;  %v79_v44 = vld [vmem:[%s3358_s2 + $0x80] sm:$0xff] }
  0x1b   :  { %1734 = vmatpush1.bf16.msra.mxu0 %v1733_v38  ;;  %v175_v38 = vld [vmem:[%s3358_s2 + $0x380] sm:$0xff]  ;;  %v182_v41 = vld [vmem:[%s3358_s2 + $0x3b8] sm:$0xff]  ;;  %v1663_v43 = vpack.c.bf16 %v82_v36, %v80_v35  ;;  %v84_v47 = vld [vmem:[%s3358_s2 + $0xa8] sm:$0xff] }
  0x1c   :  { %1736 = vmatprep.subr.bf16.mxu0 %v1735_v39  ;;  %v177_v39 = vld [vmem:[%s3358_s2 + $0x390] sm:$0xff]  ;;  %v86_v48 = vld [vmem:[%s3358_s2 + $0xb8] sm:$0xff]  ;;  %v1763_v49 = vpack.c.bf16 %v182_v41, %v180_v40  ;;  %v179_v50 = vld [vmem:[%s3358_s2 + $0x3a0] sm:$0xff] }
  0x1d   :  { %1658 = vmatpush1.bf16.msra.mxu1 %v1657_v30  ;;  %v186_v53 = vld [vmem:[%s3358_s2 + $0x3d8] sm:$0xff]  ;;  %v1667_v55 = vpack.c.bf16 %v86_v48, %v84_v47  ;;  %v83_v56 = vld [vmem:[%s3358_s2 + $0xa0] sm:$0xff]  ;;  %v185_v63 = vld [vmem:[%s3358_s2 + $0x3d0] sm:$0xff] }
  0x1e   :  { %1660 = vmatprep.subr.bf16.mxu1 %v1659_v31  ;;  %v90_v60 = vld [vmem:[%s3358_s2 + $0xd8] sm:$0xff]  ;;  %v183_v62 = vld [vmem:[%s3358_s2 + $0x3c0] sm:$0xff]  ;;  %v188_v0 = vld [vmem:[%s3358_s2 + $0x3e8] sm:$0xff] }
  0x1f   :  { %1738 = vmatpush1.bf16.msra.mxu0 %v1737_v45  ;;  %v81_v45 = vld [vmem:[%s3358_s2 + $0x90] sm:$0xff]  ;;  %v190_v1 = vld [vmem:[%s3358_s2 + $0x3f8] sm:$0xff]  ;;  %v1769_v6 = vpack.c.bf16 %v185_v63, %v183_v62  ;;  %v92_v7 = vld [vmem:[%s3358_s2 + $0xe8] sm:$0xff] }
  0x20   :  { %1740 = vmatprep.subr.bf16.mxu0 %v1739_v46  ;;  %v1761_v46 = vpack.c.bf16 %v177_v39, %v175_v38  ;;  %v1665_v54 = vpack.c.bf16 %v81_v45, %v79_v44  ;;  %v89_v5 = vld [vmem:[%s3358_s2 + $0xd0] sm:$0xff]  ;;  %v94_v8 = vld [vmem:[%s3358_s2 + $0xf8] sm:$0xff]  ;;  %v187_v10 = vld [vmem:[%s3358_s2 + $0x3e0] sm:$0xff] }
  0x21   :  { %1662 = vmatpush1.bf16.msra.mxu1 %v1661_v42  ;;  %v189_v11 = vld [vmem:[%s3358_s2 + $0x3f0] sm:$0xff]  ;;  %v192_v12 = vld [vmem:[%s3358_s2 + $0x408] sm:$0xff]  ;;  %v194_v13 = vld [vmem:[%s3358_s2 + $0x418] sm:$0xff]  ;;  %v1675_v15 = vpack.c.bf16 %v94_v8, %v92_v7 }
  0x22   :  { %1664 = vmatprep.subr.bf16.mxu1 %v1663_v43  ;;  %v91_v16 = vld [vmem:[%s3358_s2 + $0xe0] sm:$0xff]  ;;  %v93_v17 = vld [vmem:[%s3358_s2 + $0xf0] sm:$0xff]  ;;  %v1773_v18 = vpack.c.bf16 %v189_v11, %v187_v10  ;;  %v98_v20 = vld [vmem:[%s3358_s2 + $0x118] sm:$0xff]  ;;  %v1775_v21 = vpack.c.bf16 %v194_v13, %v192_v12 }
  0x23   :  { %1742 = vmatpush1.bf16.msra.mxu0 %v1741_v51  ;;  %v181_v51 = vld [vmem:[%s3358_s2 + $0x3b0] sm:$0xff]  ;;  %v191_v22 = vld [vmem:[%s3358_s2 + $0x400] sm:$0xff]  ;;  %v198_v25 = vld [vmem:[%s3358_s2 + $0x438] sm:$0xff]  ;;  %v1677_v26 = vpack.c.bf16 %v93_v17, %v91_v16 }
  0x24   :  { %1744 = vmatprep.subr.bf16.mxu0 %v1743_v52  ;;  %v184_v52 = vld [vmem:[%s3358_s2 + $0x3c8] sm:$0xff]  ;;  %v1765_v58 = vpack.c.bf16 %v181_v51, %v179_v50  ;;  %v193_v23 = vld [vmem:[%s3358_s2 + $0x410] sm:$0xff]  ;;  %v95_v28 = vld [vmem:[%s3358_s2 + $0x100] sm:$0xff] }
  0x25   :  { %v1767_v61 = vpack.c.bf16 %v186_v53, %v184_v52  ;;  %1666 = vmatpush1.bf16.msra.mxu1 %v1665_v54  ;;  %v97_v29 = vld [vmem:[%s3358_s2 + $0x110] sm:$0xff]  ;;  %v1777_v31 = vpack.c.bf16 %v193_v23, %v191_v22  ;;  %v100_v32 = vld [vmem:[%s3358_s2 + $0x128] sm:$0xff]  ;;  %v102_v33 = vld [vmem:[%s3358_s2 + $0x138] sm:$0xff] }
  0x26   :  { %1668 = vmatprep.subr.bf16.mxu1 %v1667_v55  ;;  %v56_v30 = vld [vmem:[%s3375_s17 + $0x10] sm:$0xff]  ;;  %v195_v35 = vld [vmem:[%s3358_s2 + $0x420] sm:$0xff]  ;;  %v200_v38 = vld [vmem:[%s3358_s2 + $0x448] sm:$0xff]  ;;  %v1681_v40 = vpack.c.bf16 %v97_v29, %v95_v28  ;;  %v1683_v41 = vpack.c.bf16 %v102_v33, %v100_v32 }
  0x27   :  { %1746 = vmatpush1.bf16.msra.mxu0 %v1745_v57  ;;  %v85_v57 = vld [vmem:[%s3358_s2 + $0xb0] sm:$0xff]  ;;  %v202_v39 = vld [vmem:[%s3358_s2 + $0x458] sm:$0xff]  ;;  %v99_v42 = vld [vmem:[%s3358_s2 + $0x120] sm:$0xff] }
  0x28   :  { %1748 = vmatprep.subr.bf16.mxu0 %v1747_v59  ;;  %v88_v59 = vld [vmem:[%s3358_s2 + $0xc8] sm:$0xff]  ;;  %v1669_v2 = vpack.c.bf16 %v85_v57, %v83_v56  ;;  %v197_v36 = vld [vmem:[%s3358_s2 + $0x430] sm:$0xff]  ;;  %v1783_v47 = vpack.c.bf16 %v202_v39, %v200_v38  ;;  %v199_v48 = vld [vmem:[%s3358_s2 + $0x440] sm:$0xff] }
  0x29   :  { %v1671_v3 = vpack.c.bf16 %v90_v60, %v88_v59  ;;  %v101_v43 = vld [vmem:[%s3358_s2 + $0x130] sm:$0xff]  ;;  %v1781_v44 = vpack.c.bf16 %v197_v36, %v195_v35  ;;  %v104_v45 = vld [vmem:[%s3358_s2 + $0x148] sm:$0xff]  ;;  %v206_v51 = vld [vmem:[%s3358_s2 + $0x478] sm:$0xff] }
  0x2a   :  { %1670 = vmatpush1.bf16.msra.mxu1 %v1669_v2  ;;  %v204_v50 = vld [vmem:[%s3358_s2 + $0x468] sm:$0xff]  ;;  %v1685_v52 = vpack.c.bf16 %v101_v43, %v99_v42  ;;  %v103_v54 = vld [vmem:[%s3358_s2 + $0x140] sm:$0xff]  ;;  %v105_v55 = vld [vmem:[%s3358_s2 + $0x150] sm:$0xff] }
  0x2b   :  { %1750 = vmatpush1.bf16.msra.mxu0 %v1749_v4  ;;  %v87_v4 = vld [vmem:[%s3358_s2 + $0xc0] sm:$0xff]  ;;  %1672 = vmatprep.subr.bf16.mxu1 %v1671_v3  ;;  %v108_v57 = vld [vmem:[%s3358_s2 + $0x168] sm:$0xff]  ;;  %v1787_v59 = vpack.c.bf16 %v206_v51, %v204_v50  ;;  %v210_v63 = vld [vmem:[%s3358_s2 + $0x498] sm:$0xff] }
  0x2c   :  { %1752 = vmatprep.subr.bf16.mxu0 %v1751_v9  ;;  %v1771_v9 = vpack.c.bf16 %v190_v1, %v188_v0  ;;  %v1673_v14 = vpack.c.bf16 %v89_v5, %v87_v4  ;;  %v203_v60 = vld [vmem:[%s3358_s2 + $0x460] sm:$0xff]  ;;  %v208_v62 = vld [vmem:[%s3358_s2 + $0x488] sm:$0xff]  ;;  %v1689_v0 = vpack.c.bf16 %v105_v55, %v103_v54  ;;  %v109_v3 = vld [vmem:[%s3358_s2 + $0x170] sm:$0xff] }
  0x2d   :  { %v107_v2 = vld [vmem:[%s3358_s2 + $0x160] sm:$0xff]  ;;  %v112_v5 = vld [vmem:[%s3358_s2 + $0x188] sm:$0xff]  ;;  %v1791_v8 = vpack.c.bf16 %v210_v63, %v208_v62  ;;  %v209_v10 = vld [vmem:[%s3358_s2 + $0x490] sm:$0xff] }
  0x2e   :  { %1674 = vmatpush1.bf16.msra.mxu1 %v1673_v14  ;;  %v55_v7 = vld [vmem:[%s3375_s17 + $0x8] sm:$0xff]  ;;  %v214_v12 = vld [vmem:[%s3358_s2 + $0x4b8] sm:$0xff]  ;;  %v1693_v13 = vpack.c.bf16 %v109_v3, %v107_v2  ;;  %v113_v16 = vld [vmem:[%s3358_s2 + $0x190] sm:$0xff] }
  0x2f   :  { %1754 = vmatpush1.bf16.msra.mxu0 %v1753_v19  ;;  %v96_v19 = vld [vmem:[%s3358_s2 + $0x108] sm:$0xff]  ;;  %1676 = vmatprep.subr.bf16.mxu1 %v1675_v15  ;;  %v111_v15 = vld [vmem:[%s3358_s2 + $0x180] sm:$0xff]  ;;  %v213_v22 = vld [vmem:[%s3358_s2 + $0x4b0] sm:$0xff] }
  0x30   :  { %1756 = vmatprep.subr.bf16.mxu0 %v1755_v24  ;;  %v196_v24 = vld [vmem:[%s3358_s2 + $0x428] sm:$0xff]  ;;  %v1679_v27 = vpack.c.bf16 %v98_v20, %v96_v19  ;;  %427 = vmatprep.mubr.f32.mxu1 %v55_v7  ;;  %v118_v19 = vld [vmem:[%s3358_s2 + $0x1b8] sm:$0xff]  ;;  %v117_v28 = vld [vmem:[%s3358_s2 + $0x1b0] sm:$0xff] }
  0x31   :  { %v212_v11 = vld [vmem:[%s3358_s2 + $0x4a8] sm:$0xff]  ;;  %v215_v33 = vld [vmem:[%s3358_s2 + $0x4c0] sm:$0xff]  ;;  %v222_v36 = vld [vmem:[%s3358_s2 + $0x4f8] sm:$0xff] }
  0x32   :  { %1678 = vmatpush1.bf16.msra.mxu1 %v1677_v26  ;;  %v1795_v20 = vpack.c.bf16 %v214_v12, %v212_v11  ;;  %v216_v23 = vld [vmem:[%s3358_s2 + $0x4c8] sm:$0xff]  ;;  %v119_v39 = vld [vmem:[%s3358_s2 + $0x1c0] sm:$0xff]  ;;  %v126_v43 = vld [vmem:[%s3358_s2 + $0x1f8] sm:$0xff] }
  0x33   :  { %1758 = vmatpush1.bf16.msra.mxu0 %v1757_v34  ;;  %v1779_v34 = vpack.c.bf16 %v198_v25, %v196_v24  ;;  %1680 = vmatprep.subr.bf16.mxu1 %v1679_v27  ;;  %v218_v24 = vld [vmem:[%s3358_s2 + $0x4d8] sm:$0xff]  ;;  %v1697_v25 = vpack.c.bf16 %v113_v16, %v111_v15  ;;  %v115_v27 = vld [vmem:[%s3358_s2 + $0x1a0] sm:$0xff]  ;;  %v220_v35 = vld [vmem:[%s3358_s2 + $0x4e8] sm:$0xff] }
  0x34   :  { %1760 = vmatprep.subr.bf16.mxu0 %v1759_v37  ;;  %v59_v37 = vld [vmem:[%s3375_s17 + $0x28] sm:$0xff]  ;;  %v1799_v32 = vpack.c.bf16 %v218_v24, %v216_v23  ;;  %v123_v51 = vld [vmem:[%s3358_s2 + $0x1e0] sm:$0xff]  ;;  %v322_v55 = vld [vmem:[%s3358_s2 + $0x818] sm:$0xff] }
  0x35   :  { %v124_v42 = vld [vmem:[%s3358_s2 + $0x1e8] sm:$0xff]  ;;  %v319_v63 = vld [vmem:[%s3358_s2 + $0x800] sm:$0xff]  ;;  %v326_v3 = vld [vmem:[%s3358_s2 + $0x838] sm:$0xff] }
  0x36   :  { %1682 = vmatpush1.bf16.msra.mxu1 %v1681_v40  ;;  %v121_v40 = vld [vmem:[%s3358_s2 + $0x1d0] sm:$0xff]  ;;  %v1707_v50 = vpack.c.bf16 %v126_v43, %v124_v42  ;;  %v320_v54 = vld [vmem:[%s3358_s2 + $0x808] sm:$0xff]  ;;  %v323_v12 = vld [vmem:[%s3358_s2 + $0x820] sm:$0xff] }
  0x37   :  { %1762 = vmatpush1.bf16.msra.mxu0 %v1761_v46  ;;  %v106_v46 = vld [vmem:[%s3358_s2 + $0x158] sm:$0xff]  ;;  %1684 = vmatprep.subr.bf16.mxu1 %v1683_v41  ;;  %v1903_v62 = vpack.c.bf16 %v322_v55, %v320_v54  ;;  %v324_v2 = vld [vmem:[%s3358_s2 + $0x828] sm:$0xff] }
  0x38   :  { %1764 = vmatprep.subr.bf16.mxu0 %v1763_v49  ;;  %v201_v49 = vld [vmem:[%s3358_s2 + $0x450] sm:$0xff]  ;;  %v1687_v53 = vpack.c.bf16 %v106_v46, %v104_v45  ;;  %v219_v45 = vld [vmem:[%s3358_s2 + $0x4e0] sm:$0xff]  ;;  %v232_v7 = vld [vmem:[%s3358_s2 + $0x548] sm:$0xff]  ;;  %v1907_v11 = vpack.c.bf16 %v326_v3, %v324_v2 }
  0x39   :  { %v1785_v56 = vpack.c.bf16 %v201_v49, %v199_v48  ;;  %v221_v46 = vld [vmem:[%s3358_s2 + $0x4f0] sm:$0xff]  ;;  %v226_v48 = vld [vmem:[%s3358_s2 + $0x518] sm:$0xff]  ;;  %v1705_v49 = vpack.c.bf16 %v121_v40, %v119_v39  ;;  %v328_v15 = vld [vmem:[%s3358_s2 + $0x848] sm:$0xff] }
  0x3a   :  { %1686 = vmatpush1.bf16.msra.mxu1 %v1685_v52  ;;  %v125_v52 = vld [vmem:[%s3358_s2 + $0x1f0] sm:$0xff]  ;;  %v330_v16 = vld [vmem:[%s3358_s2 + $0x858] sm:$0xff] }
  0x3b   :  { %1766 = vmatpush1.bf16.msra.mxu0 %v1765_v58  ;;  %v110_v58 = vld [vmem:[%s3358_s2 + $0x178] sm:$0xff]  ;;  %1688 = vmatprep.subr.bf16.mxu1 %v1687_v53  ;;  %v1805_v53 = vpack.c.bf16 %v221_v46, %v219_v45 }
  0x3c   :  { %1768 = vmatprep.subr.bf16.mxu0 %v1767_v61  ;;  %v205_v61 = vld [vmem:[%s3358_s2 + $0x470] sm:$0xff]  ;;  %v1691_v1 = vpack.c.bf16 %v110_v58, %v108_v57  ;;  %v223_v57 = vld [vmem:[%s3358_s2 + $0x500] sm:$0xff] }
  0x3d   :  { %v1789_v4 = vpack.c.bf16 %v205_v61, %v203_v60  ;;  %v225_v58 = vld [vmem:[%s3358_s2 + $0x510] sm:$0xff]  ;;  %v230_v60 = vld [vmem:[%s3358_s2 + $0x538] sm:$0xff]  ;;  %v1709_v61 = vpack.c.bf16 %v125_v52, %v123_v51 }
  0x3e   :  { %1690 = vmatpush1.bf16.msra.mxu1 %v1689_v0  ;;  %v321_v0 = vld [vmem:[%s3358_s2 + $0x810] sm:$0xff] }
  0x3f   :  { %1770 = vmatpush1.bf16.msra.mxu0 %v1769_v6  ;;  %v114_v6 = vld [vmem:[%s3358_s2 + $0x198] sm:$0xff]  ;;  %1692 = vmatprep.subr.bf16.mxu1 %v1691_v1  ;;  %v1809_v1 = vpack.c.bf16 %v225_v58, %v223_v57 }
  0x40   :  { %1772 = vmatprep.subr.bf16.mxu0 %v1771_v9  ;;  %v207_v9 = vld [vmem:[%s3358_s2 + $0x480] sm:$0xff]  ;;  %v1695_v14 = vpack.c.bf16 %v114_v6, %v112_v5  ;;  %v229_v6 = vld [vmem:[%s3358_s2 + $0x530] sm:$0xff] }
  0x41   :  { %v1793_v17 = vpack.c.bf16 %v209_v10, %v207_v9  ;;  %v227_v5 = vld [vmem:[%s3358_s2 + $0x520] sm:$0xff]  ;;  %v1905_v10 = vpack.c.bf16 %v321_v0, %v319_v63 }
  0x42   :  { %1694 = vmatpush1.bf16.msra.mxu1 %v1693_v13  ;;  %v54_v9 = vld [vmem:[%s3375_s17] sm:$0xff]  ;;  %v325_v13 = vld [vmem:[%s3358_s2 + $0x830] sm:$0xff] }
  0x43   :  { %1774 = vmatpush1.bf16.msra.mxu0 %v1773_v18  ;;  %v116_v18 = vld [vmem:[%s3358_s2 + $0x1a8] sm:$0xff]  ;;  %1696 = vmatprep.subr.bf16.mxu1 %v1695_v14  ;;  %v1813_v14 = vpack.c.bf16 %v229_v6, %v227_v5 }
  0x44   :  { %1776 = vmatprep.subr.bf16.mxu0 %v1775_v21  ;;  %v211_v21 = vld [vmem:[%s3358_s2 + $0x4a0] sm:$0xff]  ;;  %v1699_v26 = vpack.c.bf16 %v118_v19, %v116_v18 }
  0x45   :  { %v1797_v29 = vpack.c.bf16 %v213_v22, %v211_v21 }
  0x46   :  { %499 = vmatmul.mubr.f32.vlgmr.msra.gmra.mrb[0].mxu0 %v56_v30  ;;  %v120_v30 = vld [vmem:[%s3358_s2 + $0x1c8] sm:$0xff]  ;;  %1698 = vmatpush1.bf16.msra.mxu1 %v1697_v25 }
  0x47   :  { %1778 = vmatpush1.bf16.msra.mxu0 %v1777_v31  ;;  %569 = vmatprep.mubr.f32.mxu0 %v59_v37  ;;  %v122_v31 = vld [vmem:[%s3358_s2 + $0x1d8] sm:$0xff]  ;;  %v1701_v37 = vpack.c.bf16 %v117_v28, %v115_v27 }
  0x48   :  { %1780 = vmatprep.subr.bf16.mxu0 %v1779_v34  ;;  %v217_v34 = vld [vmem:[%s3358_s2 + $0x4d0] sm:$0xff]  ;;  %1700 = vmatprep.subr.bf16.mxu1 %v1699_v26  ;;  %v1703_v38 = vpack.c.bf16 %v122_v31, %v120_v30 }
  0x49   :  { %v1801_v41 = vpack.c.bf16 %v217_v34, %v215_v33 }
  0x4a   :  { %1702 = vmatpush1.bf16.msra.mxu1 %v1701_v37 }
  0x4b   :  { %1782 = vmatpush1.bf16.msra.mxu0 %v1781_v44  ;;  %v1803_v44 = vpack.c.bf16 %v222_v36, %v220_v35  ;;  %1704 = vmatprep.subr.bf16.mxu1 %v1703_v38 }
  0x4c   :  { %1784 = vmatprep.subr.bf16.mxu0 %v1783_v47  ;;  %v224_v47 = vld [vmem:[%s3358_s2 + $0x508] sm:$0xff] }
  0x4e   :  { %1706 = vmatpush1.bf16.msra.mxu1 %v1705_v49 }
  0x4f   :  { %1786 = vmatpush1.bf16.msra.mxu0 %v1785_v56  ;;  %v1807_v56 = vpack.c.bf16 %v226_v48, %v224_v47  ;;  %1708 = vmatprep.subr.bf16.mxu1 %v1707_v50 }
  0x50   :  { %1788 = vmatprep.subr.bf16.mxu0 %v1787_v59  ;;  %v228_v59 = vld [vmem:[%s3358_s2 + $0x528] sm:$0xff] }
  0x52   :  { %1710 = vmatpush1.bf16.msra.mxu1 %v1709_v61 }
  0x53   :  { %1790 = vmatpush1.bf16.msra.mxu0 %v1789_v4  ;;  %v1811_v4 = vpack.c.bf16 %v230_v60, %v228_v59  ;;  %1904 = vmatprep.subr.bf16.mxu1 %v1903_v62 }
  0x54   :  { %1792 = vmatprep.subr.bf16.mxu0 %v1791_v8  ;;  %v234_v8 = vld [vmem:[%s3358_s2 + $0x558] sm:$0xff] }
  0x57   :  { %1794 = vmatpush1.bf16.msra.mxu0 %v1793_v17 }
  0x58   :  { %1796 = vmatprep.subr.bf16.mxu0 %v1795_v20 }
  0x5b   :  { %1798 = vmatpush1.bf16.msra.mxu0 %v1797_v29 }
  0x5c   :  { %1800 = vmatprep.subr.bf16.mxu0 %v1799_v32 }
  0x5f   :  { %1802 = vmatpush1.bf16.msra.mxu0 %v1801_v41 }
  0x60   :  { %1804 = vmatprep.subr.bf16.mxu0 %v1803_v44 }
  0x63   :  { %1806 = vmatpush1.bf16.msra.mxu0 %v1805_v53 }
  0x64   :  { %1808 = vmatprep.subr.bf16.mxu0 %v1807_v56 }
  0x67   :  { %1810 = vmatpush1.bf16.msra.mxu0 %v1809_v1 }
  0x68   :  { %25 = vsyncpa [#allocation6], 0  ;;  %1812 = vmatprep.subr.bf16.mxu0 %v1811_v4  ;;  %v1815_v17 = vpack.c.bf16 %v234_v8, %v232_v7  ;;  %v231_v18 = vld [vmem:[%s3358_s2 + $0x540] sm:$0xff]  ;;  %v233_v19 = vld [vmem:[%s3358_s2 + $0x550] sm:$0xff]  ;;  %428 = vmatmul.mubr.f32.vlgmr.msra.gmra.mrb[0].mxu1 %v54_v9  ;;  %v1909_v22 = vpack.c.bf16 %v325_v13, %v323_v12  ;;  %v2105_v23 = vmov 0.0   ;;  %v1911_v24 = vpack.c.bf16 %v330_v16, %v328_v15  ;;  %s2108_s20 = smov 64  }
  0x69   :  { %v236_v20 = vld [vmem:[%s3358_s2 + $0x568] sm:$0xff]  ;;  %v238_v21 = vld [vmem:[%s3358_s2 + $0x578] sm:$0xff]  ;;  %1906 = vmatpush1.bf16.msra.mxu1 %v1905_v10  ;;  %711 = vmatprep.mubr.f32.mxu1 %v2105_v23  ;;  %v327_v25 = vld [vmem:[%s3358_s2 + $0x840] sm:$0xff]  ;;  %v1817_v27 = vpack.c.bf16 %v233_v19, %v231_v18  ;;  %vm751_vm0 = vcmask 523264   ;;  %vm840_vm1 = vcmask 1041408   ;;  %vm2107_vm2 = vmmov 0  }
  0x6a   :  { %1908 = vmatprep.subr.bf16.mxu1 %v1907_v11  ;;  %v329_v26 = vld [vmem:[%s3358_s2 + $0x850] sm:$0xff]  ;;  %v332_v28 = vld [vmem:[%s3358_s2 + $0x868] sm:$0xff]  ;;  %v334_v29 = vld [vmem:[%s3358_s2 + $0x878] sm:$0xff]  ;;  %v1819_v30 = vpack.c.bf16 %v238_v21, %v236_v20  ;;  %vm836_vm3 = vcmask 15360   ;;  %vm1003_vm4 = vcmask 261120   ;;  %s2110_s23 = smov 96  }
  0x6b   :  { %1814 = vmatpush1.bf16.msra.mxu0 %v1813_v14  ;;  %v235_v31 = vld [vmem:[%s3358_s2 + $0x560] sm:$0xff]  ;;  %v237_v32 = vld [vmem:[%s3358_s2 + $0x570] sm:$0xff]  ;;  %v240_v33 = vld [vmem:[%s3358_s2 + $0x588] sm:$0xff]  ;;  %v1913_v35 = vpack.c.bf16 %v329_v26, %v327_v25  ;;  %v1915_v36 = vpack.c.bf16 %v334_v29, %v332_v28  ;;  %vm1119_vm5 = vcmask 254976   ;;  %vm1243_vm6 = vcmask 257026   ;;  %s2111_s26 = smov [#allocation3]  }
  0x6c   :  { %1816 = vmatprep.subr.bf16.mxu0 %v1815_v17  ;;  %v242_v34 = vld [vmem:[%s3358_s2 + $0x598] sm:$0xff]  ;;  %v331_v37 = vld [vmem:[%s3358_s2 + $0x860] sm:$0xff]  ;;  %v333_v38 = vld [vmem:[%s3358_s2 + $0x870] sm:$0xff]  ;;  %v1821_v39 = vpack.c.bf16 %v237_v32, %v235_v31  ;;  %vm1363_vm7 = vcmask 259076   ;;  %vm1483_vm8 = vcmask 261126   ;;  %vm1130_vm9 = vcmask 1024  }
  0x6d   :  { %1910 = vmatpush1.bf16.msra.mxu1 %v1909_v22  ;;  %v336_v40 = vld [vmem:[%s3358_s2 + $0x888] sm:$0xff]  ;;  %v338_v41 = vld [vmem:[%s3358_s2 + $0x898] sm:$0xff]  ;;  %v1823_v42 = vpack.c.bf16 %v242_v34, %v240_v33  ;;  %v239_v43 = vld [vmem:[%s3358_s2 + $0x580] sm:$0xff]  ;;  %v1917_v47 = vpack.c.bf16 %v333_v38, %v331_v37  ;;  %vm1249_vm10 = vcmask 3074   ;;  %vm1369_vm11 = vcmask 5124   ;;  %s1509_s27 = sshll.u32 %s2111_s26, 4  ;;  %s1510_s27 = int_to_ptr.vmem [resolvable:$true] %s1509_s27 }
  0x6e   :  { %1912 = vmatprep.subr.bf16.mxu1 %v1911_v24  ;;  %v241_v44 = vld [vmem:[%s3358_s2 + $0x590] sm:$0xff]  ;;  %v244_v45 = vld [vmem:[%s3358_s2 + $0x5a8] sm:$0xff]  ;;  %v246_v46 = vld [vmem:[%s3358_s2 + $0x5b8] sm:$0xff]  ;;  %v1919_v48 = vpack.c.bf16 %v338_v41, %v336_v40  ;;  %p2062_p1 = scmp.lt.s32.totalorder %s1510_s27, %s1510_s27 }
  0x6f   :  { %1818 = vmatpush1.bf16.msra.mxu0 %v1817_v27  ;;  %v335_v49 = vld [vmem:[%s3358_s2 + $0x880] sm:$0xff]  ;;  %v337_v50 = vld [vmem:[%s3358_s2 + $0x890] sm:$0xff]  ;;  %v1825_v51 = vpack.c.bf16 %v241_v44, %v239_v43  ;;  %v340_v52 = vld [vmem:[%s3358_s2 + $0x8a8] sm:$0xff]  ;;  %v1827_v54 = vpack.c.bf16 %v246_v46, %v244_v45  ;;  %v2106_v43 = vmov 0.0|0.0  }
  0x70   :  { %1820 = vmatprep.subr.bf16.mxu0 %v1819_v30  ;;  %v342_v53 = vld [vmem:[%s3358_s2 + $0x8b8] sm:$0xff]  ;;  %v243_v55 = vld [vmem:[%s3358_s2 + $0x5a0] sm:$0xff]  ;;  %v245_v56 = vld [vmem:[%s3358_s2 + $0x5b0] sm:$0xff]  ;;  %v1921_v59 = vpack.c.bf16 %v337_v50, %v335_v49 }
  0x71   :  { %1914 = vmatpush1.bf16.msra.mxu1 %v1913_v35  ;;  %v248_v57 = vld [vmem:[%s3358_s2 + $0x5c8] sm:$0xff]  ;;  %v250_v58 = vld [vmem:[%s3358_s2 + $0x5d8] sm:$0xff]  ;;  %v1923_v60 = vpack.c.bf16 %v342_v53, %v340_v52  ;;  %v339_v61 = vld [vmem:[%s3358_s2 + $0x8a0] sm:$0xff]  ;;  %v1829_v63 = vpack.c.bf16 %v245_v56, %v243_v55 }
  0x72   :  { %1916 = vmatprep.subr.bf16.mxu1 %v1915_v36  ;;  %v341_v62 = vld [vmem:[%s3358_s2 + $0x8b0] sm:$0xff]  ;;  %v344_v0 = vld [vmem:[%s3358_s2 + $0x8c8] sm:$0xff]  ;;  %v346_v1 = vld [vmem:[%s3358_s2 + $0x8d8] sm:$0xff]  ;;  %v1831_v2 = vpack.c.bf16 %v250_v58, %v248_v57 }
  0x73   :  { %1822 = vmatpush1.bf16.msra.mxu0 %v1821_v39  ;;  %v247_v3 = vld [vmem:[%s3358_s2 + $0x5c0] sm:$0xff]  ;;  %v249_v4 = vld [vmem:[%s3358_s2 + $0x5d0] sm:$0xff]  ;;  %v252_v5 = vld [vmem:[%s3358_s2 + $0x5e8] sm:$0xff]  ;;  %v1925_v7 = vpack.c.bf16 %v341_v62, %v339_v61  ;;  %v1927_v8 = vpack.c.bf16 %v346_v1, %v344_v0 }
  0x74   :  { %1824 = vmatprep.subr.bf16.mxu0 %v1823_v42  ;;  %v254_v6 = vld [vmem:[%s3358_s2 + $0x5f8] sm:$0xff]  ;;  %v343_v9 = vld [vmem:[%s3358_s2 + $0x8c0] sm:$0xff]  ;;  %v345_v10 = vld [vmem:[%s3358_s2 + $0x8d0] sm:$0xff]  ;;  %v1833_v11 = vpack.c.bf16 %v249_v4, %v247_v3 }
  0x75   :  { %1918 = vmatpush1.bf16.msra.mxu1 %v1917_v47  ;;  %v348_v12 = vld [vmem:[%s3358_s2 + $0x8e8] sm:$0xff]  ;;  %v350_v13 = vld [vmem:[%s3358_s2 + $0x8f8] sm:$0xff]  ;;  %v1835_v14 = vpack.c.bf16 %v254_v6, %v252_v5  ;;  %v251_v15 = vld [vmem:[%s3358_s2 + $0x5e0] sm:$0xff]  ;;  %v1929_v19 = vpack.c.bf16 %v345_v10, %v343_v9 }
  0x76   :  { %1920 = vmatprep.subr.bf16.mxu1 %v1919_v48  ;;  %v253_v16 = vld [vmem:[%s3358_s2 + $0x5f0] sm:$0xff]  ;;  %v256_v17 = vld [vmem:[%s3358_s2 + $0x608] sm:$0xff]  ;;  %v258_v18 = vld [vmem:[%s3358_s2 + $0x618] sm:$0xff]  ;;  %v1931_v20 = vpack.c.bf16 %v350_v13, %v348_v12 }
  0x77   :  { %1826 = vmatpush1.bf16.msra.mxu0 %v1825_v51  ;;  %v347_v21 = vld [vmem:[%s3358_s2 + $0x8e0] sm:$0xff]  ;;  %v349_v22 = vld [vmem:[%s3358_s2 + $0x8f0] sm:$0xff]  ;;  %v1837_v24 = vpack.c.bf16 %v253_v16, %v251_v15  ;;  %v1839_v25 = vpack.c.bf16 %v258_v18, %v256_v17  ;;  %v260_v28 = vld [vmem:[%s3358_s2 + $0x628] sm:$0xff] }
  0x78   :  { %1828 = vmatprep.subr.bf16.mxu0 %v1827_v54  ;;  %v255_v26 = vld [vmem:[%s3358_s2 + $0x600] sm:$0xff]  ;;  %v257_v27 = vld [vmem:[%s3358_s2 + $0x610] sm:$0xff]  ;;  %v262_v29 = vld [vmem:[%s3358_s2 + $0x638] sm:$0xff]  ;;  %v1933_v30 = vpack.c.bf16 %v349_v22, %v347_v21 }
  0x79   :  { %1922 = vmatpush1.bf16.msra.mxu1 %v1921_v59  ;;  %v720_v31 = vld [vmem:[%s3360_s4] sm:$0xff]  ;;  %v721_v32 = vld [vmem:[%s3360_s4 + $0x8] sm:$0xff]  ;;  %v1841_v34 = vpack.c.bf16 %v257_v27, %v255_v26  ;;  %v1843_v35 = vpack.c.bf16 %v262_v29, %v260_v28  ;;  %v261_v37 = vld [vmem:[%s3358_s2 + $0x630] sm:$0xff] }
  0x7a   :  { %1924 = vmatprep.subr.bf16.mxu1 %v1923_v60  ;;  %v58_v33 = vld [vmem:[%s3375_s17 + $0x20] sm:$0xff]  ;;  %v61_v38 = vld [vmem:[%s3375_s17 + $0x38] sm:$0xff]  ;;  %v264_v39 = vld [vmem:[%s3358_s2 + $0x648] sm:$0xff]  ;;  %v1936_v42 = vpack.c.bf16 %v721_v32, %v720_v31 }
  0x7b   :  { %1830 = vmatpush1.bf16.msra.mxu0 %v1829_v63  ;;  %v259_v36 = vld [vmem:[%s3358_s2 + $0x620] sm:$0xff]  ;;  %v266_v40 = vld [vmem:[%s3358_s2 + $0x658] sm:$0xff]  ;;  %v722_v44 = vld [vmem:[%s3360_s4 + $0x10] sm:$0xff] }
  0x7c   :  { %1832 = vmatprep.subr.bf16.mxu0 %v1831_v2  ;;  %v62_v41 = vld [vmem:[%s3375_s17 + $0x40] sm:$0xff]  ;;  %v723_v45 = vld [vmem:[%s3360_s4 + $0x18] sm:$0xff]  ;;  %v1845_v46 = vpack.c.bf16 %v261_v37, %v259_v36  ;;  %v1847_v47 = vpack.c.bf16 %v266_v40, %v264_v39  ;;  %v265_v49 = vld [vmem:[%s3358_s2 + $0x650] sm:$0xff] }
  0x7d   :  { %1926 = vmatpush1.bf16.msra.mxu1 %v1925_v7  ;;  %v263_v48 = vld [vmem:[%s3358_s2 + $0x640] sm:$0xff]  ;;  %v268_v50 = vld [vmem:[%s3358_s2 + $0x668] sm:$0xff]  ;;  %v270_v51 = vld [vmem:[%s3358_s2 + $0x678] sm:$0xff]  ;;  %v1939_v52 = vpack.c.bf16 %v723_v45, %v722_v44 }
  0x7e   :  { %1928 = vmatprep.subr.bf16.mxu1 %v1927_v8  ;;  %v1849_v53 = vpack.c.bf16 %v265_v49, %v263_v48  ;;  %v1851_v54 = vpack.c.bf16 %v270_v51, %v268_v50  ;;  %v267_v55 = vld [vmem:[%s3358_s2 + $0x660] sm:$0xff]  ;;  %v269_v56 = vld [vmem:[%s3358_s2 + $0x670] sm:$0xff]  ;;  %v272_v57 = vld [vmem:[%s3358_s2 + $0x688] sm:$0xff] }
  0x7f   :  { %1834 = vmatpush1.bf16.msra.mxu0 %v1833_v11  ;;  %v274_v58 = vld [vmem:[%s3358_s2 + $0x698] sm:$0xff]  ;;  %v1853_v59 = vpack.c.bf16 %v269_v56, %v267_v55  ;;  %v271_v61 = vld [vmem:[%s3358_s2 + $0x680] sm:$0xff]  ;;  %v273_v62 = vld [vmem:[%s3358_s2 + $0x690] sm:$0xff] }
  0x80   :  { %1836 = vmatprep.subr.bf16.mxu0 %v1835_v14  ;;  %v1855_v60 = vpack.c.bf16 %v274_v58, %v272_v57  ;;  %v276_v63 = vld [vmem:[%s3358_s2 + $0x6a8] sm:$0xff]  ;;  %v278_v0 = vld [vmem:[%s3358_s2 + $0x6b8] sm:$0xff]  ;;  %v1857_v1 = vpack.c.bf16 %v273_v62, %v271_v61  ;;  %v275_v3 = vld [vmem:[%s3358_s2 + $0x6a0] sm:$0xff] }
  0x81   :  { %1930 = vmatpush1.bf16.msra.mxu1 %v1929_v19  ;;  %v1859_v2 = vpack.c.bf16 %v278_v0, %v276_v63  ;;  %v277_v4 = vld [vmem:[%s3358_s2 + $0x6b0] sm:$0xff]  ;;  %v280_v5 = vld [vmem:[%s3358_s2 + $0x6c8] sm:$0xff]  ;;  %v282_v6 = vld [vmem:[%s3358_s2 + $0x6d8] sm:$0xff] }
  0x82   :  { %1932 = vmatprep.subr.bf16.mxu1 %v1931_v20  ;;  %v1861_v7 = vpack.c.bf16 %v277_v4, %v275_v3  ;;  %v1863_v8 = vpack.c.bf16 %v282_v6, %v280_v5  ;;  %v279_v9 = vld [vmem:[%s3358_s2 + $0x6c0] sm:$0xff]  ;;  %v281_v10 = vld [vmem:[%s3358_s2 + $0x6d0] sm:$0xff]  ;;  %v284_v11 = vld [vmem:[%s3358_s2 + $0x6e8] sm:$0xff] }
  0x83   :  { %1838 = vmatpush1.bf16.msra.mxu0 %v1837_v24  ;;  %v286_v12 = vld [vmem:[%s3358_s2 + $0x6f8] sm:$0xff]  ;;  %v1865_v13 = vpack.c.bf16 %v281_v10, %v279_v9  ;;  %v283_v15 = vld [vmem:[%s3358_s2 + $0x6e0] sm:$0xff]  ;;  %v285_v16 = vld [vmem:[%s3358_s2 + $0x6f0] sm:$0xff] }
  0x84   :  { %1840 = vmatprep.subr.bf16.mxu0 %v1839_v25  ;;  %v1867_v14 = vpack.c.bf16 %v286_v12, %v284_v11  ;;  %v288_v17 = vld [vmem:[%s3358_s2 + $0x708] sm:$0xff]  ;;  %v290_v18 = vld [vmem:[%s3358_s2 + $0x718] sm:$0xff]  ;;  %v1869_v19 = vpack.c.bf16 %v285_v16, %v283_v15  ;;  %v287_v21 = vld [vmem:[%s3358_s2 + $0x700] sm:$0xff] }
  0x85   :  { %1934 = vmatpush1.bf16.msra.mxu1 %v1933_v30  ;;  %v1871_v20 = vpack.c.bf16 %v290_v18, %v288_v17  ;;  %v289_v22 = vld [vmem:[%s3358_s2 + $0x710] sm:$0xff]  ;;  %v292_v24 = vld [vmem:[%s3358_s2 + $0x728] sm:$0xff]  ;;  %v294_v25 = vld [vmem:[%s3358_s2 + $0x738] sm:$0xff] }
  0x86   :  { %570 = vmatmul.mubr.f32.vlgmr.msra.gmra.mrb[0].mxu0 %v58_v33  ;;  %1935 = vmatprep.subr.bf16.mxu1 %v2106_v43  ;;  %v1873_v26 = vpack.c.bf16 %v289_v22, %v287_v21  ;;  %v1875_v27 = vpack.c.bf16 %v294_v25, %v292_v24  ;;  %v291_v28 = vld [vmem:[%s3358_s2 + $0x720] sm:$0xff]  ;;  %v293_v29 = vld [vmem:[%s3358_s2 + $0x730] sm:$0xff]  ;;  %v296_v30 = vld [vmem:[%s3358_s2 + $0x748] sm:$0xff] }
  0x87   :  { %1842 = vmatpush1.bf16.msra.mxu0 %v1841_v34  ;;  %640 = vmatprep.mubr.f32.mxu0 %v61_v38  ;;  %v298_v31 = vld [vmem:[%s3358_s2 + $0x758] sm:$0xff]  ;;  %v1877_v32 = vpack.c.bf16 %v293_v29, %v291_v28  ;;  %v295_v34 = vld [vmem:[%s3358_s2 + $0x740] sm:$0xff]  ;;  %v300_v36 = vld [vmem:[%s3358_s2 + $0x768] sm:$0xff] }
  0x88   :  { %1844 = vmatprep.subr.bf16.mxu0 %v1843_v35  ;;  %712 = vmatmul.mubr.f32.vlgmr.msra.gmra.mrb[2].mxu1 %v62_v41  ;;  %v1879_v33 = vpack.c.bf16 %v298_v31, %v296_v30  ;;  %v297_v35 = vld [vmem:[%s3358_s2 + $0x750] sm:$0xff]  ;;  %v302_v37 = vld [vmem:[%s3358_s2 + $0x778] sm:$0xff]  ;;  %v299_v40 = vld [vmem:[%s3358_s2 + $0x760] sm:$0xff] }
  0x89   :  { %1937 = vmatpush1.bf16.msra.mxu1 %v1936_v42  ;;  %v1881_v38 = vpack.c.bf16 %v297_v35, %v295_v34  ;;  %v1883_v39 = vpack.c.bf16 %v302_v37, %v300_v36  ;;  %v301_v41 = vld [vmem:[%s3358_s2 + $0x770] sm:$0xff]  ;;  %v304_v42 = vld [vmem:[%s3358_s2 + $0x788] sm:$0xff]  ;;  %v306_v44 = vld [vmem:[%s3358_s2 + $0x798] sm:$0xff] }
  0x8a   :  { %1938 = vmatprep.subr.bf16.mxu1 %v2106_v43  ;;  %v1885_v45 = vpack.c.bf16 %v301_v41, %v299_v40  ;;  %v305_v48 = vld [vmem:[%s3358_s2 + $0x790] sm:$0xff]  ;;  %v308_v49 = vld [vmem:[%s3358_s2 + $0x7a8] sm:$0xff]  ;;  %v310_v50 = vld [vmem:[%s3358_s2 + $0x7b8] sm:$0xff]  ;;  %v353_v40 = vlaneseq }
  0x8b   :  { %1846 = vmatpush1.bf16.msra.mxu0 %v1845_v46  ;;  %v1887_v46 = vpack.c.bf16 %v306_v44, %v304_v42  ;;  %v312_v55 = vld [vmem:[%s3358_s2 + $0x7c8] sm:$0xff]  ;;  %v314_v56 = vld [vmem:[%s3358_s2 + $0x7d8] sm:$0xff]  ;;  %v315_v0 = vld [vmem:[%s3358_s2 + $0x7e0] sm:$0xff] }
  0x8c   :  { %1848 = vmatprep.subr.bf16.mxu0 %v1847_v47  ;;  %v303_v47 = vld [vmem:[%s3358_s2 + $0x780] sm:$0xff]  ;;  %v1895_v58 = vpack.c.bf16 %v314_v56, %v312_v55  ;;  %v316_v61 = vld [vmem:[%s3358_s2 + $0x7e8] sm:$0xff]  ;;  %v318_v62 = vld [vmem:[%s3358_s2 + $0x7f8] sm:$0xff]  ;;  %v354_v41 = vshrl.u32 %v353_v40, 7 }
  0x8d   :  { %1940 = vmatpush1.bf16.msra.mxu1 %v1939_v52  ;;  %v1889_v51 = vpack.c.bf16 %v305_v48, %v303_v47  ;;  %v1891_v52 = vpack.c.bf16 %v310_v50, %v308_v49  ;;  %v724_v3 = vld [vmem:[%s3360_s4 + $0x20] sm:$0xff]  ;;  %v725_v4 = vld [vmem:[%s3360_s4 + $0x28] sm:$0xff]  ;;  %v726_v6 = vld [vmem:[%s3360_s4 + $0x30] sm:$0xff] }
  0x8e   :  { %1941 = vmatprep.subr.bf16.mxu1 %v2106_v43  ;;  %v1942_v5 = vpack.c.bf16 %v725_v4, %v724_v3  ;;  %v728_v10 = vld [vmem:[%s3360_s4 + $0x40] sm:$0xff]  ;;  %v729_v11 = vld [vmem:[%s3360_s4 + $0x48] sm:$0xff]  ;;  %v60_v12 = vld [vmem:[%s3375_s17 + $0x30] sm:$0xff]  ;;  %v355_v42 = vsub.s32 0, %v354_v41 }
  0x8f   :  { %1850 = vmatpush1.bf16.msra.mxu0 %v1849_v53  ;;  %v307_v53 = vld [vmem:[%s3358_s2 + $0x7a0] sm:$0xff]  ;;  %v731_v15 = vld [vmem:[%s3360_s4 + $0x58] sm:$0xff]  ;;  %v733_v18 = vld [vmem:[%s3360_s4 + $0x68] sm:$0xff] }
  0x90   :  { %1852 = vmatprep.subr.bf16.mxu0 %v1851_v54  ;;  %v309_v54 = vld [vmem:[%s3358_s2 + $0x7b0] sm:$0xff]  ;;  %v732_v17 = vld [vmem:[%s3360_s4 + $0x60] sm:$0xff]  ;;  %v735_v21 = vld [vmem:[%s3360_s4 + $0x78] sm:$0xff] }
  0x91   :  { %v1893_v57 = vpack.c.bf16 %v309_v54, %v307_v53  ;;  %1943 = vmatpush1.bf16.msra.mxu1 %v1942_v5  ;;  %v736_v24 = vld [vmem:[%s3360_s4 + $0x80] sm:$0xff]  ;;  %v737_v25 = vld [vmem:[%s3360_s4 + $0x88] sm:$0xff]  ;;  %v739_v28 = vld [vmem:[%s3360_s4 + $0x98] sm:$0xff] }
  0x92   :  { %1944 = vmatprep.subr.bf16.mxu1 %v2106_v43  ;;  %v740_v30 = vld [vmem:[%s3360_s4 + $0xa0] sm:$0xff]  ;;  %v741_v31 = vld [vmem:[%s3360_s4 + $0xa8] sm:$0xff]  ;;  %v743_v34 = vld [vmem:[%s3360_s4 + $0xb8] sm:$0xff] }
  0x93   :  { %1854 = vmatpush1.bf16.msra.mxu0 %v1853_v59  ;;  %v311_v59 = vld [vmem:[%s3358_s2 + $0x7c0] sm:$0xff]  ;;  %v831_v3 = vld [vmem:[%s3362_s6 + $0x28] sm:$0xff]  ;;  %v832_v5 = vld [vmem:[%s3362_s6 + $0x30] sm:$0xff] }
  0x94   :  { %1856 = vmatprep.subr.bf16.mxu0 %v1855_v60  ;;  %v313_v60 = vld [vmem:[%s3358_s2 + $0x7d0] sm:$0xff]  ;;  %v351_v44 = vld [vmem:[%s3359_s3] sm:$0x3] }
  0x95   :  { %v1897_v63 = vpack.c.bf16 %v313_v60, %v311_v59  ;;  %v826_v59 = vld [vmem:[%s3362_s6] sm:$0xff]  ;;  %v827_v60 = vld [vmem:[%s3362_s6 + $0x8] sm:$0xff] }
  0x97   :  { %1858 = vmatpush1.bf16.msra.mxu0 %v1857_v1  ;;  %v1899_v1 = vpack.c.bf16 %v318_v62, %v316_v61  ;;  %v834_v61 = vld [vmem:[%s3357_s1] sm:$0xff]  ;;  %v1972_v62 = vpack.c.bf16 %v827_v60, %v826_v59  ;;  %s2109_s1 = smov 32  }
  0x98   :  { %1860 = vmatprep.subr.bf16.mxu0 %v1859_v2  ;;  %v317_v2 = vld [vmem:[%s3358_s2 + $0x7f0] sm:$0xff] }
  0x9b   :  { %1862 = vmatpush1.bf16.msra.mxu0 %v1861_v7  ;;  %v727_v7 = vld [vmem:[%s3360_s4 + $0x38] sm:$0xff] }
  0x9c   :  { %1864 = vmatprep.subr.bf16.mxu0 %v1863_v8  ;;  %v1901_v8 = vpack.c.bf16 %v317_v2, %v315_v0  ;;  %v1945_v9 = vpack.c.bf16 %v727_v7, %v726_v6  ;;  %v829_v0 = vld [vmem:[%s3362_s6 + $0x18] sm:$0xff]  ;;  %v830_v2 = vld [vmem:[%s3362_s6 + $0x20] sm:$0xff] }
  0x9d   :  { %v1978_v4 = vpack.c.bf16 %v831_v3, %v830_v2  ;;  %v833_v6 = vld [vmem:[%s3362_s6 + $0x38] sm:$0xff] }
  0x9e   :  { %1946 = vmatpush1.bf16.msra.mxu1 %v1945_v9  ;;  %v1981_v7 = vpack.c.bf16 %v833_v6, %v832_v5  ;;  %v997_v9 = vld [vmem:[%s3364_s8] sm:$0xff] }
  0x9f   :  { %1866 = vmatpush1.bf16.msra.mxu0 %v1865_v13  ;;  %v1948_v13 = vpack.c.bf16 %v729_v11, %v728_v10  ;;  %1947 = vmatprep.subr.bf16.mxu1 %v2106_v43  ;;  %v998_v10 = vld [vmem:[%s3364_s8 + $0x8] sm:$0xff] }
  0xa0   :  { %1868 = vmatprep.subr.bf16.mxu0 %v1867_v14  ;;  %v730_v14 = vld [vmem:[%s3360_s4 + $0x50] sm:$0xff] }
  0xa1   :  { %v1951_v16 = vpack.c.bf16 %v731_v15, %v730_v14  ;;  %v3230_v14 = vpack.c.bf16 %v998_v10, %v997_v9 }
  0xa2   :  { %1949 = vmatpush1.bf16.msra.mxu1 %v1948_v13 }
  0xa3   :  { %1870 = vmatpush1.bf16.msra.mxu0 %v1869_v19  ;;  %1950 = vmatprep.subr.bf16.mxu1 %v2106_v43  ;;  %v1954_v19 = vpack.c.bf16 %v733_v18, %v732_v17  ;;  %v1000_v17 = vld [vmem:[%s3364_s8 + $0x18] sm:$0xff] }
  0xa4   :  { %1872 = vmatprep.subr.bf16.mxu0 %v1871_v20  ;;  %v734_v20 = vld [vmem:[%s3360_s4 + $0x70] sm:$0xff] }
  0xa5   :  { %v1957_v22 = vpack.c.bf16 %v735_v21, %v734_v20  ;;  %v1001_v21 = vld [vmem:[%s3368_s12] sm:$0x3] }
  0xa6   :  { %1952 = vmatpush1.bf16.msra.mxu1 %v1951_v16  ;;  %v999_v16 = vld [vmem:[%s3364_s8 + $0x10] sm:$0xff] }
  0xa7   :  { %1874 = vmatpush1.bf16.msra.mxu0 %v1873_v26  ;;  %1953 = vmatprep.subr.bf16.mxu1 %v2106_v43  ;;  %v1960_v26 = vpack.c.bf16 %v737_v25, %v736_v24  ;;  %v3240_v20 = vpack.c.bf16 %v1000_v17, %v999_v16 }
  0xa8   :  { %1876 = vmatprep.subr.bf16.mxu0 %v1875_v27  ;;  %v738_v27 = vld [vmem:[%s3360_s4 + $0x90] sm:$0xff] }
  0xa9   :  { %v1963_v29 = vpack.c.bf16 %v739_v28, %v738_v27 }
  0xaa   :  { %1955 = vmatpush1.bf16.msra.mxu1 %v1954_v19 }
  0xab   :  { %1878 = vmatpush1.bf16.msra.mxu0 %v1877_v32  ;;  %1956 = vmatprep.subr.bf16.mxu1 %v2106_v43  ;;  %v1966_v32 = vpack.c.bf16 %v741_v31, %v740_v30 }
  0xac   :  { %1880 = vmatprep.subr.bf16.mxu0 %v1879_v33  ;;  %v742_v33 = vld [vmem:[%s3360_s4 + $0xb0] sm:$0xff]  ;;  %s2057_s4 = scalar_lea.vmem %s1510_s27, 32 }
  0xad   :  { %v1969_v35 = vpack.c.bf16 %v743_v34, %v742_v33  ;;  %p2058_p0 = scmp.ne.s32.totalorder %s1510_s27, %s2057_s4  ;;  %p2063_p2 = scmp.lt.s32.totalorder %s2057_s4, %s2057_s4 }
  0xae   :  { %1958 = vmatpush1.bf16.msra.mxu1 %v1957_v22 }
  0xaf   :  { %1882 = vmatpush1.bf16.msra.mxu0 %v1881_v38  ;;  %1959 = vmatprep.subr.bf16.mxu1 %v2106_v43  ;;  %p2064_p3 = por %p2063_p2, %p2062_p1 }
  0xb0   :  { %1884 = vmatprep.subr.bf16.mxu0 %v1883_v39 }
  0xb1   :  { %p2065_p4 = pnand %p2064_p3, %p2058_p0 }
  0xb2   :  { %1961 = vmatpush1.bf16.msra.mxu1 %v1960_v26  ;;  %v1538_v26 = vld [vmem:[%s3365_s9] ss:$0 sm:$0xff] }
  0xb3   :  { %1886 = vmatpush1.bf16.msra.mxu0 %v1885_v45  ;;  %1962 = vmatprep.subr.bf16.mxu1 %v2106_v43  ;;  %v359_v45 = vsub.s32 1, %v354_v41 }
  0xb4   :  { %1888 = vmatprep.subr.bf16.mxu0 %v1887_v46  ;;  %v356_v46 = vrot.slane %v351_v44, %v355_v42 }
  0xb5   :  { %v360_v47 = vrot.slane %v351_v44, %v359_v45 }
  0xb6   :  { %1964 = vmatpush1.bf16.msra.mxu1 %v1963_v29 }
  0xb7   :  { %1890 = vmatpush1.bf16.msra.mxu0 %v1889_v51  ;;  %1965 = vmatprep.subr.bf16.mxu1 %v2106_v43 }
  0xb8   :  { %1892 = vmatprep.subr.bf16.mxu0 %v1891_v52 }
  0xba   :  { %1967 = vmatpush1.bf16.msra.mxu1 %v1966_v32  ;;  %v1002_v32 = vld [vmem:[%s3369_s13] sm:$0x3] }
  0xbb   :  { %1894 = vmatpush1.bf16.msra.mxu0 %v1893_v57  ;;  %1968 = vmatprep.subr.bf16.mxu1 %v2106_v43  ;;  %v835_v57 = vld [vmem:[%s3363_s7] sm:$0x3] }
  0xbc   :  { %1896 = vmatprep.subr.bf16.mxu0 %v1895_v58 }
  0xbe   :  { %1970 = vmatpush1.bf16.msra.mxu1 %v1969_v35 }
  0xbf   :  { %1898 = vmatpush1.bf16.msra.mxu0 %v1897_v63  ;;  %1579 = vmatprep.subr.mxu1 %v2105_v23  ;;  %v828_v63 = vld [vmem:[%s3362_s6 + $0x10] sm:$0xff] }
  0xc0   :  { %1900 = vmatprep.subr.bf16.mxu0 %v1899_v1  ;;  %v1975_v1 = vpack.c.bf16 %v829_v0, %v828_v63 }
  0xc3   :  { %1902 = vmatpush1.bf16.msra.mxu0 %v1901_v8  ;;  %v1533_v8 = vld [vmem:[%s3361_s5] ss:$0 sm:$0xff] }
  0xc6   :  { %641 = vmatmul.mubr.f32.vlgmr.msra.gmra.mrb[0].mxu0 %v60_v12 }
 0x13b   :  { %v429_v36 = vpop.f32.mrb[0].mxu1 }
 0x13c   :  { %v431_v37 = vpop.f32.mrb[1].mxu1  ;;  %v430_v48 = vadd.f32 %v429_v36, %v356_v46 }
 0x13d   :  { %v432_v49 = vadd.f32 %v431_v37, %v360_v47 }
 0x15b   :  { %v713_v38 = vpop.f32.mrb[2].mxu1 }
 0x15c   :  { %v715_v39 = vpop.f32.mrb[3].mxu1 }
 0x199   :  { %v642_v50 = vpop.f32.mrb[0].mxu0 }
 0x19a   :  { %v2008_v51 = vadd.f32 %v642_v50, %v430_v48  ;;  %v644_v52 = vpop.f32.mrb[1].mxu0 }
 0x19b   :  { %v2011_v53 = vadd.f32 %v644_v52, %v432_v49 }
 0x19c   :  { %v2009_v54 = vadd.f32 %v2008_v51, %v713_v38 }
 0x19d   :  { %v2012_v55 = vadd.f32 %v2011_v53, %v715_v39 }
 0x19e   :  { %v718_v58 = vmax.f32 %v2009_v54, 0.0 }
 0x19f   :  { %v719_v56 = vmax.f32 %v2012_v55, 0.0 }
 0x1a1   :  { %1534 = vmatprep.mubr.msk.f32.mxu1 %vm751_vm0, %v719_v56 }
 0x1a2   :  { %820 = vmatmul.mubr.f32.vlgmr.msra.gmra.mrb[4].mxu1 %v718_v58 }
 0x1a3   :  { %1580 = vmatpush3.msk.msra.mxu1 %vm840_vm1, %v835_v57  ;;  %1581 = vmatprep.mubr.msk.f32.mxu1 %vm2107_vm2, %v2105_v23 }
 0x1a4   :  { %1971 = vmatprep.subr.bf16.mxu1 %v2106_v43 }
 0x1a6   :  { %1582 = vmatmul.mubr.msk.f32.vlgmr.msra.gmra.mrb[6].mxu1 %vm836_vm3, %v834_v61 }
 0x1a7   :  { %1973 = vmatpush3.bf16.msra.mxu1 %v1972_v62  ;;  %1600 = vmatprep.mubr.msk.f32.mxu1 %vm2107_vm2, %v2105_v23 }
 0x1a8   :  { %1974 = vmatprep.subr.bf16.mxu1 %v2106_v43 }
 0x1ab   :  { %1976 = vmatpush3.bf16.msra.mxu1 %v1975_v1 }
 0x1ac   :  { %1977 = vmatprep.subr.bf16.mxu1 %v2106_v43 }
 0x1af   :  { %1979 = vmatpush3.bf16.msra.mxu1 %v1978_v4 }
 0x1b0   :  { %1980 = vmatprep.subr.bf16.mxu1 %v2106_v43 }
 0x1b3   :  { %1982 = vmatpush3.bf16.msra.mxu1 %v1981_v7 }
 0x1b4   :  { %1983 = vmatprep.subr.bf16.mxu1 %v2106_v43 }
 0x275   :  { %v821_v11 = vpop.f32.mrb[4].mxu1 }
 0x276   :  { %v822_v12 = vadd.f32 %v1533_v8, %v821_v11  ;;  %v823_v13 = vpop.f32.mrb[5].mxu1 }
 0x278   :  { %v825_v15 = vmax.f32 %v822_v12, 0.0 }
 0x279   :  { %v910_v18 = vpop.f32.mrb[6].mxu1 }
 0x27a   :  { %1601 = vmatmul.mubr.msk.f32.vlgmr.msra.gmra.mrb[8].mxu1 %vm751_vm0, %v825_v15  ;;  %v1583_v19 = vpop.f32.mrb[7].mxu1 }
 0x27b   :  { %1985 = vmatpush3.bf16.msra.mxu1 %v3230_v14  ;;  %1611 = vmatprep.mubr.msk.f32.mxu1 %vm2107_vm2, %v2105_v23 }
 0x27c   :  { %1986 = vmatprep.subr.bf16.mxu1 %v2106_v43 }
 0x27f   :  { %1988 = vmatpush3.bf16.msra.mxu1 %v3240_v20 }
 0x280   :  { %1989 = vmatprep.subr.bf16.mxu1 %v2106_v43 }
 0x282   :  { %1612 = vmatmul.mubr.msk.f32.vlgmr.msra.gmra.mrb[10].mxu1 %vm1003_vm4, %v1001_v21 }
 0x283   :  { %1991 = vmatpush3.bf16.msra.mxu1 %v3230_v14  ;;  %1622 = vmatprep.mubr.msk.f32.mxu1 %vm2107_vm2, %v2105_v23 }
 0x284   :  { %1992 = vmatprep.subr.bf16.mxu1 %v2106_v43 }
 0x287   :  { %1994 = vmatpush3.bf16.msra.mxu1 %v3240_v20 }
 0x288   :  { %1995 = vmatprep.subr.bf16.mxu1 %v2106_v43 }
 0x34d   :  { %v983_v22 = vpop.f32.mrb[8].mxu1 }
 0x34e   :  { %v984_v24 = vadd.f32 %v983_v22, %v910_v18  ;;  %v1602_v25 = vpop.f32.mrb[9].mxu1 }
 0x350   :  { %v3260_v27 = vadd.f32 %v1538_v26, %v984_v24 }
 0x355   :  { %v1073_v28 = vpop.f32.mrb[10].mxu1 }
 0x356   :  { %v1077_v29 = vadd.f32 %v1073_v28, %v3260_v27  ;;  %v1613_v30 = vpop.f32.mrb[11].mxu1 }
 0x358   :  { %2025 = vtanh.f32 %v1077_v29  ;;  %v1078_v33 = vsub.f32 0.0, %v1077_v29 }
 0x35a   :  { %v1079_v34 = vmul.f32 1.442695, %v1078_v33 }
 0x35c   :  { %2027 = vpow2.f32 %v1079_v34 }
 0x362   :  { %v2026_v31 = vpop.eup %2025 }
 0x363   :  { %1091 = vrot.lane.b32.xlu0 %v2026_v31, %s2108_s20 }
 0x366   :  { %v2028_v35 = vpop.eup %2027 }
 0x367   :  { %1086 = vrot.lane.b32.xlu0 %v1002_v32, %s2109_s1  ;;  %v1081_v36 = vadd.f32 1.0, %v2028_v35 }
 0x369   :  { %2029 = vrcp.f32 %v1081_v36 }
 0x373   :  { %v2030_v37 = vpop.eup %2029 }
 0x3d5   :  { %v1092_v38 = vpop.permute.xlu0 %1091 }
 0x3d6   :  { %v1094_v39 = vmul.f32 %v2030_v37, %v1092_v38 }
 0x3d8   :  { %1096 = vrot.lane.b32.xlu1 %v1094_v39, %s2109_s1  ;;  %v1540_v39 = vld [vmem:[%s3366_s10] ss:$0 sm:$0xff] }
 0x3d9   :  { %v1087_v40 = vpop.permute.xlu0 %1086 }
 0x3da   :  { %v1089_v41 = vmul.f32 %v2030_v37, %v1087_v40 }
 0x44a   :  { %v1097_v42 = vpop.permute.xlu1 %1096 }
 0x44b   :  { %v1099_v44 = vadd.f32 %v1097_v42, %v1089_v41 }
 0x44d   :  { %2031 = vtanh.f32 %v1099_v44  ;;  %v1219_v61 = vrot.slane %v1099_v44, 6 }
 0x457   :  { %v2032_v45 = vpop.eup %2031 }
 0x458   :  { %1102 = vrot.lane.b32.xlu1 %v2032_v45, %s2108_s20 }
 0x4ca   :  { %v1103_v46 = vpop.permute.xlu1 %1102 }
 0x4cb   :  { %v3270_v47 = vmul.f32 %v2030_v37, %v1103_v46 }
 0x4cd   :  { %1133 = vrot.lane.b32.xlu0 %v3270_v47, %s2109_s1 }
 0x53f   :  { %v1134_v48 = vpop.permute.xlu0 %1133 }
 0x540   :  { %1623 = vmatmul.mubr.msk.f32.vlgmr.msra.gmra.mrb[12].mxu1 %vm1003_vm4, %v1134_v48 }
 0x541   :  { %1997 = vmatpush3.bf16.msra.mxu1 %v3230_v14  ;;  %1633 = vmatprep.mubr.msk.f32.mxu1 %vm2107_vm2, %v2105_v23 }
 0x542   :  { %1998 = vmatprep.subr.bf16.mxu1 %v2106_v43 }
 0x545   :  { %2000 = vmatpush3.bf16.msra.mxu1 %v3240_v20 }
 0x546   :  { %2001 = vmatprep.subr.bf16.mxu1 %v2106_v43 }
 0x613   :  { %v1203_v49 = vpop.f32.mrb[12].mxu1 }
 0x614   :  { %v1208_v50 = vrot.slane %v1203_v49, 6  ;;  %v1624_v51 = vpop.f32.mrb[13].mxu1 }
 0x616   :  { %v1210_v52 = vadd.f32 %v1208_v50, %v3260_v27 }
 0x618   :  { %2033 = vtanh.f32 %v1210_v52  ;;  %v1211_v54 = vsub.f32 0.0, %v1210_v52 }
 0x61a   :  { %v1212_v55 = vmul.f32 1.442695, %v1211_v54 }
 0x61c   :  { %2035 = vpow2.f32 %v1212_v55 }
 0x622   :  { %v2034_v53 = vpop.eup %2033 }
 0x623   :  { %1223 = vrot.lane.b32.xlu1 %v2034_v53, %s2108_s20 }
 0x626   :  { %v2036_v56 = vpop.eup %2035 }
 0x627   :  { %v1214_v57 = vadd.f32 1.0, %v2036_v56 }
 0x629   :  { %2037 = vrcp.f32 %v1214_v57 }
 0x633   :  { %v2038_v58 = vpop.eup %2037 }
 0x634   :  { %v1221_v62 = vmul.f32 %v2038_v58, %v1219_v61 }
 0x695   :  { %v1224_v59 = vpop.permute.xlu1 %1223 }
 0x696   :  { %v1226_v60 = vmul.f32 %v2038_v58, %v1224_v59 }
 0x698   :  { %1228 = vrot.lane.b32.xlu0 %v1226_v60, %s2109_s1  ;;  %v1541_v60 = vld [vmem:[#allocation2] ss:$0 sm:$0xff] }
 0x70a   :  { %v1229_v63 = vpop.permute.xlu0 %1228 }
 0x70b   :  { %v1231_v0 = vadd.f32 %v1229_v63, %v1221_v62 }
 0x70d   :  { %2039 = vtanh.f32 %v1231_v0  ;;  %v1339_v16 = vrot.slane %v1231_v0, 6 }
 0x717   :  { %v2040_v1 = vpop.eup %2039 }
 0x718   :  { %1234 = vrot.lane.b32.xlu1 %v2040_v1, %s2108_s20 }
 0x78a   :  { %v1235_v2 = vpop.permute.xlu1 %1234 }
 0x78b   :  { %v3285_v3 = vmul.f32 %v2038_v58, %v1235_v2 }
 0x78d   :  { %v1252_v4 = vrot.slane %v3285_v3, 2 }
 0x78f   :  { %1253 = vrot.lane.b32.xlu0 %v1252_v4, %s2109_s1 }
 0x801   :  { %v1254_v5 = vpop.permute.xlu0 %1253 }
 0x802   :  { %1634 = vmatmul.mubr.msk.f32.vlgmr.msra.gmra.mrb[14].mxu1 %vm1003_vm4, %v1254_v5 }
 0x803   :  { %2003 = vmatpush3.bf16.msra.mxu1 %v3230_v14  ;;  %1644 = vmatprep.mubr.msk.f32.mxu1 %vm2107_vm2, %v2105_v23 }
 0x804   :  { %2004 = vmatprep.subr.bf16.mxu1 %v2106_v43 }
 0x807   :  { %2006 = vmatpush3.bf16.msra.mxu1 %v3240_v20 }
 0x8d5   :  { %v1323_v6 = vpop.f32.mrb[14].mxu1 }
 0x8d6   :  { %v1328_v7 = vrot.slane %v1323_v6, 4  ;;  %v1635_v8 = vpop.f32.mrb[15].mxu1 }
 0x8d8   :  { %v1330_v9 = vadd.f32 %v1328_v7, %v3260_v27 }
 0x8da   :  { %2041 = vtanh.f32 %v1330_v9  ;;  %v1331_v11 = vsub.f32 0.0, %v1330_v9 }
 0x8dc   :  { %v1332_v12 = vmul.f32 1.442695, %v1331_v11 }
 0x8de   :  { %2043 = vpow2.f32 %v1332_v12 }
 0x8e4   :  { %v2042_v10 = vpop.eup %2041 }
 0x8e5   :  { %1343 = vrot.lane.b32.xlu1 %v2042_v10, %s2108_s20 }
 0x8e8   :  { %v2044_v13 = vpop.eup %2043 }
 0x8e9   :  { %v1334_v14 = vadd.f32 1.0, %v2044_v13 }
 0x8eb   :  { %2045 = vrcp.f32 %v1334_v14 }
 0x8f5   :  { %v2046_v23 = vpop.eup %2045 }
 0x8f6   :  { %v1341_v17 = vmul.f32 %v2046_v23, %v1339_v16 }
 0x957   :  { %v1344_v15 = vpop.permute.xlu1 %1343 }
 0x958   :  { %v1346_v43 = vmul.f32 %v2046_v23, %v1344_v15 }
 0x95a   :  { %1348 = vrot.lane.b32.xlu0 %v1346_v43, %s2109_s1 }
 0x9cc   :  { %v1349_v18 = vpop.permute.xlu0 %1348 }
 0x9cd   :  { %v1351_v19 = vadd.f32 %v1349_v18, %v1341_v17 }
 0x9cf   :  { %2047 = vtanh.f32 %v1351_v19 }
 0x9d9   :  { %v2048_v20 = vpop.eup %2047 }
 0x9da   :  { %1354 = vrot.lane.b32.xlu1 %v2048_v20, %s2108_s20 }
 0xa4c   :  { %v1355_v21 = vpop.permute.xlu1 %1354 }
 0xa4d   :  { %v1357_v22 = vmul.f32 %v2046_v23, %v1355_v21 }
 0xa4f   :  { %v1372_v24 = vrot.slane %v1357_v22, 4 }
 0xa51   :  { %1373 = vrot.lane.b32.xlu0 %v1372_v24, %s2109_s1 }
 0xac3   :  { %v1374_v25 = vpop.permute.xlu0 %1373 }
 0xac4   :  { %1645 = vmatmul.mubr.msk.f32.vlgmr.msra.gmra.mrb[16].mxu1 %vm1003_vm4, %v1374_v25 }
 0xb97   :  { %v1443_v26 = vpop.f32.mrb[16].mxu1 }
 0xb98   :  { %v1448_v28 = vrot.slane %v1443_v26, 2  ;;  %v1646_v29 = vpop.f32.mrb[17].mxu1 }
 0xb9a   :  { %v1450_v30 = vadd.f32 %v1448_v28, %v3260_v27  ;;  %v1459_v27 = vrot.slane %v1351_v19, 6 }
 0xb9c   :  { %2049 = vtanh.f32 %v1450_v30  ;;  %v1451_v32 = vsub.f32 0.0, %v1450_v30 }
 0xb9e   :  { %v1452_v33 = vmul.f32 1.442695, %v1451_v32 }
 0xba0   :  { %2051 = vpow2.f32 %v1452_v33 }
 0xba6   :  { %v2050_v31 = vpop.eup %2049 }
 0xba7   :  { %1463 = vrot.lane.b32.xlu1 %v2050_v31, %s2108_s20 }
 0xbaa   :  { %v2052_v34 = vpop.eup %2051 }
 0xbab   :  { %v1454_v35 = vadd.f32 1.0, %v2052_v34 }
 0xbad   :  { %2053 = vrcp.f32 %v1454_v35 }
 0xbb7   :  { %v2054_v36 = vpop.eup %2053 }
 0xbb8   :  { %v1461_v40 = vmul.f32 %v2054_v36, %v1459_v27 }
 0xc19   :  { %v1464_v37 = vpop.permute.xlu1 %1463 }
 0xc1a   :  { %v1466_v38 = vmul.f32 %v2054_v36, %v1464_v37 }
 0xc1c   :  { %1468 = vrot.lane.b32.xlu0 %v1466_v38, %s2109_s1 }
 0xc20   :  { %1111 = vrot.lane.b32.xlu0 %v1540_v39, %s2110_s23 }
 0xc8e   :  { %v1469_v41 = vpop.permute.xlu0 %1468 }
 0xc8f   :  { %v1471_v42 = vadd.f32 %v1469_v41, %v1461_v40 }
 0xc91   :  { %2055 = vtanh.f32 %v1471_v42 }
 0xc92   :  { %v1112_v44 = vpop.permute.xlu0 %1111 }
 0xc93   :  { %v1238_v45 = vmul.f32 %v3285_v3, %v1112_v44  ;;  %v1114_v48 = vmul.f32 %v1112_v44, %v3270_v47  ;;  %v1358_v49 = vmul.f32 %v1357_v22, %v1112_v44 }
 0xc95   :  { %1240 = vrot.lane.b32.xlu0 %v1238_v45, %s2109_s1 }
 0xc9b   :  { %v2056_v46 = vpop.eup %2055 }
 0xc9c   :  { %1474 = vrot.lane.b32.xlu1 %v2056_v46, %s2108_s20 }
 0xca0   :  { %1116 = vrot.lane.b32.xlu1 %v1114_v48, %s2109_s1 }
 0xca4   :  { %1360 = vrot.lane.b32.xlu1 %v1358_v49, %s2109_s1 }
 0xd07   :  { %v1241_v55 = vpop.permute.xlu0 %1240 }
 0xd08   :  { %v1244_v56 = vsel %vm1243_vm6, %v1241_v55, 0.0 }
 0xd0e   :  { %v1475_v50 = vpop.permute.xlu1 %1474 }
 0xd0f   :  { %v1477_v51 = vmul.f32 %v2054_v36, %v1475_v50 }
 0xd11   :  { %v1478_v52 = vmul.f32 %v1477_v51, %v1112_v44 }
 0xd12   :  { %v1117_v53 = vpop.permute.xlu1 %1116 }
 0xd13   :  { %1480 = vrot.lane.b32.xlu0 %v1478_v52, %s2109_s1  ;;  %v1120_v54 = vsel %vm1119_vm5, %v1117_v53, 0.0 }
 0xd14   :  { %1121 = vadd.xlane.f32.xlu1 %v1120_v54 }
 0xd16   :  { %v1361_v57 = vpop.permute.xlu1 %1360 }
 0xd17   :  { %v1364_v47 = vsel %vm1363_vm7, %v1361_v57, 0.0 }
 0xd32   :  { %1245 = vadd.xlane.f32.xlu0 %v1244_v56 }
 0xd36   :  { %1365 = vadd.xlane.f32.xlu0 %v1364_v47 }
 0xd4c   :  { %1492 = vrot.lane.b32.xlu0 %v1477_v51, %s2109_s1 }
 0xd85   :  { %v1481_v58 = vpop.permute.xlu0 %1480 }
 0xd86   :  { %v1484_v59 = vsel %vm1483_vm8, %v1481_v58, 0.0 }
 0xd87   :  { %1485 = vadd.xlane.f32.xlu1 %v1484_v59 }
 0xd98   :  { %1497 = vrot.lane.b32.xlu1 %v1471_v42, %s2110_s23 }
 0xda1   :  { %v1122_v61 = vpop.xlane.xlu1 %1121 }
 0xda2   :  { %v1129_v62 = vadd.f32 %v1541_v60, %v1122_v61 }
 0xda4   :  { %1131 = vst.msk [vmem:[%s3370_s14] sm:$0x3] %vm1130_vm9, %v1129_v62 }
 0xdbf   :  { %v1246_v63 = vpop.xlane.xlu0 %1245 }
 0xdc0   :  { %v1247_v0 = vadd.f32 %v1541_v60, %v1246_v63 }
 0xdc2   :  { %1543 = vst.msk [vmem:[%s3370_s14] sm:$0xc] %vm1249_vm10, %v1247_v0 }
 0xdc3   :  { %v1366_v1 = vpop.xlane.xlu0 %1365 }
 0xdc4   :  { %v1367_v2 = vadd.f32 %v1541_v60, %v1366_v1 }
 0xdc6   :  { %1545 = vst.msk [vmem:[%s3370_s14] sm:$0x30] %vm1369_vm11, %v1367_v2 }
 0xdc7   :  { %v1493_v3 = vpop.permute.xlu0 %1492 }
 0xdc8   :  { %1495 = vst.msk [vmem:[#allocation3 - $0x6] sm:$0xc0] %vm1483_vm8, %v1493_v3 }
 0xdc9   :  { %2068 = shalt.err (!%p2065_p4)
}
 0xdca   :  { %s2069_s30 = scalar_lea.hbm %s3371_s15, 32 }
 0xdcb   :  { %p2070_p5 = scmp.ne.s32.totalorder %s3371_s15, %s2069_s30  ;;  %p2073_p6 = scmp.lt.u32.totalorder %s2069_s30, %s3371_s15 }
 0xdcd   :  { %p2075_p7 = pnand %p2073_p6, %p2070_p5 }
 0xdcf   :  { %2078 = shalt.err (!%p2075_p7)
}
 0xdd0   :  { %1512 = dma.vmem_to_hbm [thread:$0]  %s1510_s27, 32, %s3371_s15, [#allocation4]   ;;  %vm1489_vm12 = vcmask 7174  }
 0xdd1   :  { %s2112_s19 = smov [#allocation5]  }
 0xdd2   :  { %s1519_s8 = sshll.u32 %s2112_s19, 4  ;;  %s1520_s8 = int_to_ptr.vmem [resolvable:$true] %s1519_s8 }
 0xdd3   :  { %s2079_s21 = scalar_lea.vmem %s1520_s8, 32  ;;  %p2084_p9 = scmp.lt.s32.totalorder %s1520_s8, %s1520_s8 }
 0xdd4   :  { %p2080_p8 = scmp.ne.s32.totalorder %s1520_s8, %s2079_s21  ;;  %p2085_p10 = scmp.lt.s32.totalorder %s2079_s21, %s2079_s21 }
 0xdd6   :  { %p2086_p11 = por %p2085_p10, %p2084_p9 }
 0xdd8   :  { %p2087_p12 = pnand %p2086_p11, %p2080_p8 }
 0xe14   :  { %v1486_v4 = vpop.xlane.xlu1 %1485 }
 0xe15   :  { %v1487_v5 = vadd.f32 %v1541_v60, %v1486_v4 }
 0xe17   :  { %1547 = vst.msk [vmem:[%s3370_s14] sm:$0xc0] %vm1489_vm12, %v1487_v5 }
 0xe18   :  { %v1498_v6 = vpop.permute.xlu1 %1497 }
 0xe19   :  { %1500 = vst.msk [vmem:[#allocation5 - $0x6] sm:$0xc0] %vm1483_vm8, %v1498_v6 }
 0xe1a   :  { %2090 = shalt.err (!%p2087_p12)
}
 0xe1b   :  { %s2091_s1 = scalar_lea.hbm %s3372_s16, 32 }
 0xe1c   :  { %p2092_p13 = scmp.ne.s32.totalorder %s3372_s16, %s2091_s1  ;;  %p2095_p0 = scmp.lt.u32.totalorder %s2091_s1, %s3372_s16 }
 0xe1e   :  { %p2097_p1 = pnand %p2095_p0, %p2092_p13 }
 0xe20   :  { %2100 = shalt.err (!%p2097_p1)
}
 0xe21   :  { %1522 = dma.vmem_to_hbm [thread:$0]  %s1520_s8, 32, %s3372_s16, [#allocation6]  }
 0xe22   :  { %2101 = dma.done.wait [#allocation4], 32  }
 0xe23   :  { %2102 = vsyncadd [#allocation4], 4294967264 }
 0xe24   :  { %2103 = dma.done.wait [#allocation6], 32  }
 0xe25   :  { %2104 = vsyncadd [#allocation6], 4294967264 }
 0xe26   :  { %1531 = vsyncpa [#allocation4], 1 }
 0xe27   :  { %1532 = vsyncpa [#allocation6], 1 }

</bundles_post_ra>
